<compile_context>
chip_gen: v7x
topology: tpu7x:2x2x1
jax: 0.10.0
libtpu: 0.0.40
codegen_flags: <defaults>
</compile_context>

<pallas_src>
import functools
import math

import jax
import jax.numpy as jnp
from jax.experimental import pallas as pl
from jax.experimental.pallas import tpu as pltpu


# ----------------------------------------------------------------------------
# Per-generation configuration (VMEM budget, gate-activation dtype).
# ----------------------------------------------------------------------------
def _vmem_capacity_bytes():
    try:
        return int(pltpu.get_tpu_info().vmem_capacity_bytes)
    except Exception:
        return 64 * 1024 * 1024          # conservative fallback (v7x-sized)


_VMEM_CAP = _vmem_capacity_bytes()
_VMEM_BUDGET = int(_VMEM_CAP * 0.70)     # target for tile sizing (incl. double buffers)
_VMEM_LIMIT = min(int(_VMEM_CAP * 0.85), 110 * 1024 * 1024)
_VMEM = pl.BlockSpec(memory_space=pltpu.MemorySpace.VMEM)


def _gate_act_dtype():
    """bf16 EUP exists on v6e/v7x; keep f32 sigmoid/tanh elsewhere (v5e etc.)."""
    try:
        kind = jax.devices()[0].device_kind.lower()
    except Exception:
        return jnp.float32
    if ("v6" in kind) or ("v7" in kind) or ("7x" in kind):
        return jnp.bfloat16
    return jnp.float32


_ACT_DTYPE = _gate_act_dtype()


# ----------------------------------------------------------------------------
# Tile sizing helpers (VMEM-aware).
# ----------------------------------------------------------------------------
def _lstm_layer_vmem_bytes(tc, B, H, in_dims, n_dir):
    x_blocks = 2 * n_dir * sum(tc * B * d * 2 for d in in_dims)   # bf16, 2 buffers
    wih = n_dir * sum(d * 4 * H * 2 for d in in_dims)             # bf16 resident
    whh = n_dir * H * 4 * H * 2                                    # bf16 resident
    bias = n_dir * 4 * H * 4
    gates_scratch = n_dir * tc * B * 4 * H * 4                     # f32 scratch
    hc_scratch = 2 * n_dir * B * H * 4
    out_blocks = 2 * n_dir * tc * B * H * 2                        # bf16, 2 buffers
    return x_blocks + wih + whh + bias + gates_scratch + hc_scratch + out_blocks


def _pick_time_chunk(T, B, H, in_dims, n_dir, need_mult8, max_chunk=32):
    """Largest divisor of T (<= max_chunk) whose fused-layer footprint fits VMEM."""
    def ok_layout(tc):
        # Batch-major output blocks put Tc on the sublane axis -> need 8|Tc or Tc==T.
        return (not need_mult8) or tc == T or tc % 8 == 0

    for tc in range(min(T, max_chunk), 0, -1):
        if T % tc == 0 and ok_layout(tc) and \
                _lstm_layer_vmem_bytes(tc, B, H, in_dims, n_dir) <= _VMEM_BUDGET:
            return tc
    for tc in range(1, T + 1):            # smallest layout-legal fallback
        if T % tc == 0 and ok_layout(tc):
            return tc
    return T


def _pick_batch_tile(B, T, H, n_src):
    """Attention batch tile: prefer >=2 tiles (keeps both v7x TCs busy), fit VMEM."""
    def bytes_for(tb):
        return 2 * n_src * tb * T * H * 2          # bf16 x blocks, double-buffered

    divs = sorted((d for d in range(8, B, 8) if B % d == 0), reverse=True)
    for tb in divs:
        if bytes_for(tb) <= _VMEM_BUDGET:
            return tb
    return B if not divs else divs[-1]


# ----------------------------------------------------------------------------
# Fused (input-projection + bidirectional recurrence) LSTM layer kernel.
# Grid over time chunks; gates for the chunk are computed into VMEM scratch,
# then the unrolled step loop only does h @ W_hh + gate math.
# ----------------------------------------------------------------------------
def _make_lstm_layer_kernel(n_dir, n_src, Tc, H, out_batch_major, act_dtype):
    n_x = n_dir * n_src
    sig = jax.nn.sigmoid

    def kernel(*refs):
        idx = 0
        x_refs = refs[idx:idx + n_x]; idx += n_x          # per (dir, src): (Tc,B,In_s) bf16
        wih_refs = refs[idx:idx + n_x]; idx += n_x        # per (dir, src): (In_s,4H) bf16
        bias_ref = refs[idx]; idx += 1                    # (n_dir,1,4H) f32
        whh_ref = refs[idx]; idx += 1                     # (n_dir,H,4H) bf16
        out_refs = refs[idx:idx + n_dir]; idx += n_dir    # (Tc,B,H) or (B,Tc,H) bf16
        g_sc = refs[idx]; idx += 1                        # (n_dir,Tc,B,4H) f32 scratch
        h_sc = refs[idx]; idx += 1                        # (n_dir,B,H) f32 scratch
        c_sc = refs[idx]; idx += 1                        # (n_dir,B,H) f32 scratch

        B = h_sc.shape[1]

        @pl.when(pl.program_id(0) == 0)
        def _():
            h_sc[...] = jnp.zeros_like(h_sc)
            c_sc[...] = jnp.zeros_like(c_sc)

        # ---- fused input projection for this chunk (one MXU matmul per dir/src) ----
        for d in range(n_dir):
            acc = None
            for s in range(n_src):
                x = x_refs[d * n_src + s][...]                       # (Tc,B,In_s) bf16
                in_s = x.shape[-1]
                term = jnp.dot(x.reshape(Tc * B, in_s),
                               wih_refs[d * n_src + s][...],
                               preferred_element_type=jnp.float32)   # (Tc*B,4H) f32
                acc = term if acc is None else acc + term
            g_sc[d] = (acc + bias_ref[d]).reshape(Tc, B, 4 * H)

        whh = whh_ref[...]                                # (n_dir,H,4H) bf16, invariant

        # ---- serial recurrence over the chunk (fully unrolled, static indices) ----
        for i in range(Tc):
            rec = jnp.einsum("dbh,dhg->dbg",
                             h_sc[...].astype(jnp.bfloat16), whh,
                             preferred_element_type=jnp.float32)     # (n_dir,B,4H) f32
            for d in range(n_dir):
                t = i if d == 0 else Tc - 1 - i           # bwd walks its chunk reversed

                def gate(k, fn, d=d, t=t):
                    pre = g_sc[d, t, :, k * H:(k + 1) * H] + rec[d, :, k * H:(k + 1) * H]
                    return fn(pre.astype(act_dtype)).astype(jnp.float32)

                i_g = gate(0, sig)
                f_g = gate(1, sig)
                g_g = gate(2, jnp.tanh)
                o_g = gate(3, sig)
                c_new = f_g * c_sc[d] + i_g * g_g
                h_new = o_g * jnp.tanh(c_new.astype(act_dtype)).astype(jnp.float32)
                c_sc[d] = c_new
                h_sc[d] = h_new
                if out_batch_major:
                    out_refs[d][:, t, :] = h_new.astype(out_refs[d].dtype)
                else:
                    out_refs[d][t] = h_new.astype(out_refs[d].dtype)

    return kernel


def lstm_layer(x_sources, w_ih_list, bias, whh, hidden_dim, bidirectional,
               out_batch_major):
    """x_sources: list of n_src arrays (T, B, In_s) bf16, time-major.
    w_ih_list[d][s]: (In_s, 4H) bf16; bias: (n_dir, 1, 4H) f32; whh: (n_dir, H, 4H) bf16.
    Returns n_dir arrays of hidden states, time-major (T,B,H) or batch-major (B,T,H)."""
    T, B, _ = x_sources[0].shape
    H = hidden_dim
    n_dir = 2 if bidirectional else 1
    n_src = len(x_sources)
    in_dims = [x.shape[-1] for x in x_sources]
    Tc = _pick_time_chunk(T, B, H, in_dims, n_dir, need_mult8=out_batch_major)
    nc = T // Tc

    x_inputs, x_specs = [], []
    for d in range(n_dir):
        imap = (lambda c: (c, 0, 0)) if d == 0 else (lambda c: (nc - 1 - c, 0, 0))
        for s in range(n_src):
            x_inputs.append(x_sources[s])
            x_specs.append(pl.BlockSpec((Tc, B, in_dims[s]), imap))
    wih_inputs = [w_ih_list[d][s] for d in range(n_dir) for s in range(n_src)]
    n_x = n_dir * n_src
    in_specs = x_specs + [_VMEM] * (n_x + 2)

    if out_batch_major:
        out_sds = jax.ShapeDtypeStruct((B, T, H), jnp.bfloat16)
        fwd_spec = pl.BlockSpec((B, Tc, H), lambda c: (0, c, 0))
        bwd_spec = pl.BlockSpec((B, Tc, H), lambda c: (0, nc - 1 - c, 0))
    else:
        out_sds = jax.ShapeDtypeStruct((T, B, H), jnp.bfloat16)
        fwd_spec = pl.BlockSpec((Tc, B, H), lambda c: (c, 0, 0))
        bwd_spec = pl.BlockSpec((Tc, B, H), lambda c: (nc - 1 - c, 0, 0))
    out_shape = tuple([out_sds] * n_dir)
    out_specs = tuple([fwd_spec, bwd_spec][:n_dir])

    outs = pl.pallas_call(
        _make_lstm_layer_kernel(n_dir, n_src, Tc, H, out_batch_major, _ACT_DTYPE),
        out_shape=out_shape,
        grid=(nc,),
        in_specs=in_specs,
        out_specs=out_specs,
        scratch_shapes=[
            pltpu.VMEM((n_dir, Tc, B, 4 * H), jnp.float32),   # chunk gates
            pltpu.VMEM((n_dir, B, H), jnp.float32),           # h carry
            pltpu.VMEM((n_dir, B, H), jnp.float32),           # c carry
        ],
        compiler_params=pltpu.CompilerParams(
            dimension_semantics=("arbitrary",),
            vmem_limit_bytes=_VMEM_LIMIT),
    )(*x_inputs, *wih_inputs, bias, whh)
    return list(outs)


# ----------------------------------------------------------------------------
# Self-attention (Linear -> ReLU -> Linear -> softmax over seq -> weighted sum)
# fused with the final fc layer, tiled over batch.  The bidirectional halves
# are consumed directly with row-split weights (== concat along features).
# ----------------------------------------------------------------------------
def _make_attn_fc_kernel(n_src):
    def kernel(*refs):
        x_refs = refs[:n_src]                          # each (Tb, T, H) bf16
        w1_refs = refs[n_src:2 * n_src]                # each (H, 128) bf16 (lane-padded)
        b1_ref = refs[2 * n_src]                       # (1, 128) f32 (lane-padded)
        w2_ref = refs[2 * n_src + 1]                   # (1, 128) f32 (lane-padded)
        b2_ref = refs[2 * n_src + 2]                   # (1, 1) f32
        wfc_refs = refs[2 * n_src + 3:3 * n_src + 3]   # each (H, O) bf16
        bfc_ref = refs[3 * n_src + 3]                  # (1, O) f32
        out_ref = refs[3 * n_src + 4]                  # (Tb, O) f32

        Tb, T, H = x_refs[0].shape
        xs = [x_ref[...].astype(jnp.bfloat16) for x_ref in x_refs]

        # energy = Linear(D, 64) -> ReLU -> Linear(64, 1), D split per direction,
        # 64 zero-padded to 128 lanes; second projection is a VPU dot.
        acc = None
        for x, w1_ref in zip(xs, w1_refs):
            term = jnp.dot(x.reshape(Tb * T, H), w1_ref[...],
                           preferred_element_type=jnp.float32)
            acc = term if acc is None else acc + term
        hproj = jnp.maximum(acc + b1_ref[...], 0.0)                        # (Tb*T,128)
        e = jnp.sum(hproj * w2_ref[...], axis=-1, keepdims=True) + b2_ref[...]
        e = e.reshape(Tb, T)

        # softmax over the sequence axis
        e = e - jnp.max(e, axis=1, keepdims=True)
        p = jnp.exp(e)
        w = p * pl.reciprocal(jnp.sum(p, axis=1, keepdims=True), approx=True)
        wb = w.astype(jnp.bfloat16)[:, None, :]                            # (Tb,1,T)

        # context via batched MXU einsum + final fc, per half, summed
        out = None
        for x, wfc_ref in zip(xs, wfc_refs):
            ctx = jnp.einsum("bqt,bth->bqh", wb, x,
                             preferred_element_type=jnp.float32)[:, 0, :]  # (Tb,H)
            term = jnp.dot(ctx.astype(jnp.bfloat16), wfc_ref[...],
                           preferred_element_type=jnp.float32)
            out = term if out is None else out + term
        out_ref[...] = out + bfc_ref[...]
    return kernel


def attention_fc(x_halves, ap, output_dim):
    """x_halves: list of n_dir arrays (B, T, H) bf16 (feature-concat == LSTM output).
    ap: pre-transposed / pre-cast attention+fc weights from prepare_params."""
    B, T, H = x_halves[0].shape
    n_src = len(x_halves)
    Tb = _pick_batch_tile(B, T, H, n_src)

    x_specs = [pl.BlockSpec((Tb, T, H), lambda b: (b, 0, 0)) for _ in range(n_src)]
    in_specs = x_specs + [_VMEM] * (2 * n_src + 4)

    return pl.pallas_call(
        _make_attn_fc_kernel(n_src),
        out_shape=jax.ShapeDtypeStruct((B, output_dim), jnp.float32),
        grid=(B // Tb,),
        in_specs=in_specs,
        out_specs=pl.BlockSpec((Tb, output_dim), lambda b: (b, 0)),
        compiler_params=pltpu.CompilerParams(
            dimension_semantics=("parallel",),
            vmem_limit_bytes=_VMEM_LIMIT),
    )(*x_halves, *ap["w1"], ap["b1"], ap["w2"], ap["b2"], *ap["wfc"], ap["bfc"])


# ----------------------------------------------------------------------------
# Parameter construction (PyTorch-shaped) and one-time prep (transpose / cast).
# ----------------------------------------------------------------------------
def init_params(key, vocab_size, embedding_dim, hidden_dim, output_dim,
                n_layers, bidirectional):
    keys = iter(jax.random.split(key, 128))
    u = lambda shape, bound: jax.random.uniform(
        next(keys), shape, jnp.float32, -bound, bound)

    params = {"embedding": jax.random.normal(
        next(keys), (vocab_size, embedding_dim), jnp.float32)}

    num_dirs = 2 if bidirectional else 1
    k = 1.0 / math.sqrt(hidden_dim)
    lstm = []
    for layer in range(n_layers):
        in_dim = embedding_dim if layer == 0 else hidden_dim * num_dirs
        dirs = []
        for _ in range(num_dirs):
            dirs.append({
                "w_ih": u((4 * hidden_dim, in_dim), k),
                "w_hh": u((4 * hidden_dim, hidden_dim), k),
                "b_ih": u((4 * hidden_dim,), k),
                "b_hh": u((4 * hidden_dim,), k),
            })
        lstm.append(dirs)
    params["lstm"] = lstm

    attn_in = hidden_dim * num_dirs
    ka = 1.0 / math.sqrt(attn_in)
    params["attn_w1"] = u((64, attn_in), ka)
    params["attn_b1"] = u((64,), ka)
    params["attn_w2"] = u((1, 64), 1.0 / 8.0)
    params["attn_b2"] = u((1,), 1.0 / 8.0)
    params["fc_w"] = u((output_dim, attn_in), ka)
    params["fc_b"] = u((output_dim,), ka)
    return params


def prepare_params(params, hidden_dim, n_layers, bidirectional):
    """One-time weight prep (transpose / split / bf16 cast) outside the forward."""
    H = hidden_dim
    n_dir = 2 if bidirectional else 1
    prepped = {"embedding": params["embedding"].astype(jnp.bfloat16)}

    layers = []
    for layer in range(n_layers):
        dirs = params["lstm"][layer]
        if layer == 0:
            src_dims = [dirs[0]["w_ih"].shape[1]]
        else:
            src_dims = [H] * n_dir
        w_ih = []
        for d in dirs:
            wt = jnp.transpose(d["w_ih"]).astype(jnp.bfloat16)     # (In, 4H)
            per_src, row = [], 0
            for s in src_dims:
                per_src.append(wt[row:row + s])
                row += s
            w_ih.append(per_src)
        bias = jnp.stack([(d["b_ih"] + d["b_hh"]) for d in dirs]
                         ).reshape(n_dir, 1, 4 * H).astype(jnp.float32)
        whh = jnp.stack([jnp.transpose(d["w_hh"]) for d in dirs]
                        ).astype(jnp.bfloat16)                      # (n_dir, H, 4H)
        layers.append({"w_ih": w_ih, "bias": bias, "whh": whh})
    prepped["lstm"] = layers

    # attention + fc (lane-pad the 64-wide energy path to 128; zeros keep math exact)
    w1t = jnp.pad(jnp.transpose(params["attn_w1"]), ((0, 0), (0, 64))
                  ).astype(jnp.bfloat16)                             # (D, 128)
    wfct = jnp.transpose(params["fc_w"]).astype(jnp.bfloat16)        # (D, O)
    prepped["attn"] = {
        "w1": [w1t[s * H:(s + 1) * H] for s in range(n_dir)],
        "b1": jnp.pad(params["attn_b1"], (0, 64)).reshape(1, -1).astype(jnp.float32),
        "w2": jnp.pad(params["attn_w2"].reshape(-1), (0, 64)).reshape(1, -1)
                 .astype(jnp.float32),
        "b2": params["attn_b2"].reshape(1, 1).astype(jnp.float32),
        "wfc": [wfct[s * H:(s + 1) * H] for s in range(n_dir)],
        "bfc": params["fc_b"].reshape(1, -1).astype(jnp.float32),
    }
    return prepped


# ----------------------------------------------------------------------------
# Forward pass (mirrors LSTMModel.forward, inference mode).
# ----------------------------------------------------------------------------
@functools.partial(jax.jit, static_argnames=("hidden_dim", "output_dim",
                                             "n_layers", "bidirectional"))
def lstm_model_forward(prepped, text, hidden_dim, output_dim, n_layers,
                       bidirectional):
    # embedding lookup, gathered directly time-major (transpose ids, not activations)
    # dropout is identity at inference
    emb = jnp.take(prepped["embedding"], jnp.transpose(text), axis=0)  # (T,B,E) bf16
    x_sources = [emb]

    for layer in range(n_layers):
        lp = prepped["lstm"][layer]
        last = layer == n_layers - 1
        # last layer writes batch-major (B,T,H) so attention needs no transpose
        x_sources = lstm_layer(x_sources, lp["w_ih"], lp["bias"], lp["whh"],
                               hidden_dim, bidirectional, out_batch_major=last)
        # inter-layer dropout is identity at inference

    return attention_fc(x_sources, prepped["attn"], output_dim)       # (B, O)


if __name__ == "__main__":
    # Small, module-consistent shapes.
    vocab_size, embedding_dim, hidden_dim, output_dim = 50, 16, 32, 3
    n_layers, bidirectional, dropout = 2, True, 0.0
    batch, seq_len = 2, 8

    key = jax.random.PRNGKey(0)
    key_text, key_params = jax.random.split(key)
    text = jax.random.randint(key_text, (batch, seq_len), 0, vocab_size,
                              dtype=jnp.int32)
    params = init_params(key_params, vocab_size, embedding_dim, hidden_dim,
                         output_dim, n_layers, bidirectional)
    prepped = prepare_params(params, hidden_dim, n_layers, bidirectional)

    out = lstm_model_forward(prepped, text, hidden_dim, output_dim, n_layers,
                             bidirectional)
    out = jax.block_until_ready(out)
    assert out.shape == (batch, output_dim)
    assert bool(jnp.all(jnp.isfinite(out)))
    print("KERNEL_OK")
</pallas_src>

<mosaic_0001>
module attributes {stable_mosaic.version = 11 : i64} {
  func.func @kernel(%arg0: i32, %arg1: memref<2x8x32xbf16, #tpu.memory_space<vmem>>, %arg2: memref<2x8x32xbf16, #tpu.memory_space<vmem>>, %arg3: memref<32x128xbf16, #tpu.memory_space<vmem>>, %arg4: memref<32x128xbf16, #tpu.memory_space<vmem>>, %arg5: memref<1x128xf32, #tpu.memory_space<vmem>>, %arg6: memref<1x128xf32, #tpu.memory_space<vmem>>, %arg7: memref<1x1xf32, #tpu.memory_space<vmem>>, %arg8: memref<32x3xbf16, #tpu.memory_space<vmem>>, %arg9: memref<32x3xbf16, #tpu.memory_space<vmem>>, %arg10: memref<1x3xf32, #tpu.memory_space<vmem>>, %arg11: memref<2x3xf32, #tpu.memory_space<vmem>>) attributes {dimension_semantics = [#tpu.dimension_semantics<parallel>], iteration_bounds = array<i64: 1>, scalar_prefetch = 0 : i64, scratch_operands = 0 : i64, tpu.core_type = #tpu.core_type<tc>, window_params = [{transform_indices = @transform_0, window_bounds = array<i64: 2, 8, 32>}, {transform_indices = @transform_1, window_bounds = array<i64: 2, 8, 32>}, {pipeline_mode = #tpu.pipeline_mode<synchronous>, transform_indices = @transform_2, window_bounds = array<i64: 32, 128>}, {pipeline_mode = #tpu.pipeline_mode<synchronous>, transform_indices = @transform_3, window_bounds = array<i64: 32, 128>}, {pipeline_mode = #tpu.pipeline_mode<synchronous>, transform_indices = @transform_4, window_bounds = array<i64: 1, 128>}, {pipeline_mode = #tpu.pipeline_mode<synchronous>, transform_indices = @transform_5, window_bounds = array<i64: 1, 128>}, {pipeline_mode = #tpu.pipeline_mode<synchronous>, transform_indices = @transform_6, window_bounds = array<i64: 1, 1>}, {pipeline_mode = #tpu.pipeline_mode<synchronous>, transform_indices = @transform_7, window_bounds = array<i64: 32, 3>}, {pipeline_mode = #tpu.pipeline_mode<synchronous>, transform_indices = @transform_8, window_bounds = array<i64: 32, 3>}, {pipeline_mode = #tpu.pipeline_mode<synchronous>, transform_indices = @transform_9, window_bounds = array<i64: 1, 3>}, {transform_indices = @transform_10, window_bounds = array<i64: 2, 3>}]} {
    %c0 = arith.constant 0 : index
    %c0_0 = arith.constant 0 : index
    %c0_1 = arith.constant 0 : index
    %0 = vector.load %arg1[%c0, %c0_0, %c0_1] : memref<2x8x32xbf16, #tpu.memory_space<vmem>>, vector<2x8x32xbf16>
    %c0_2 = arith.constant 0 : index
    %c0_3 = arith.constant 0 : index
    %c0_4 = arith.constant 0 : index
    %1 = vector.load %arg2[%c0_2, %c0_3, %c0_4] : memref<2x8x32xbf16, #tpu.memory_space<vmem>>, vector<2x8x32xbf16>
    %2 = vector.shape_cast %0 : vector<2x8x32xbf16> to vector<16x32xbf16>
    %c0_5 = arith.constant 0 : index
    %c0_6 = arith.constant 0 : index
    %3 = vector.load %arg3[%c0_5, %c0_6] : memref<32x128xbf16, #tpu.memory_space<vmem>>, vector<32x128xbf16>
    %cst = arith.constant dense<0.000000e+00> : vector<16x128xf32>
    %4 = tpu.matmul %2, %3, %cst {dimension_numbers = #tpu.dot_dimension_numbers<[1], [0], [0], [1], [0, 0, 1, 1], [], []>} : vector<16x32xbf16>, vector<32x128xbf16>, vector<16x128xf32> -> vector<16x128xf32>
    %5 = vector.shape_cast %1 : vector<2x8x32xbf16> to vector<16x32xbf16>
    %c0_7 = arith.constant 0 : index
    %c0_8 = arith.constant 0 : index
    %6 = vector.load %arg4[%c0_7, %c0_8] : memref<32x128xbf16, #tpu.memory_space<vmem>>, vector<32x128xbf16>
    %cst_9 = arith.constant dense<0.000000e+00> : vector<16x128xf32>
    %7 = tpu.matmul %5, %6, %cst_9 {dimension_numbers = #tpu.dot_dimension_numbers<[1], [0], [0], [1], [0, 0, 1, 1], [], []>} : vector<16x32xbf16>, vector<32x128xbf16>, vector<16x128xf32> -> vector<16x128xf32>
    %8 = arith.addf %4, %7 : vector<16x128xf32>
    %c0_10 = arith.constant 0 : index
    %c0_11 = arith.constant 0 : index
    %9 = vector.load %arg5[%c0_10, %c0_11] : memref<1x128xf32, #tpu.memory_space<vmem>>, vector<1x128xf32>
    %10 = vector.broadcast %9 : vector<1x128xf32> to vector<16x128xf32>
    %11 = arith.addf %8, %10 : vector<16x128xf32>
    %cst_12 = arith.constant 0.000000e+00 : f32
    %12 = vector.broadcast %cst_12 : f32 to vector<16x128xf32>
    %13 = arith.maximumf %11, %12 : vector<16x128xf32>
    %c0_13 = arith.constant 0 : index
    %c0_14 = arith.constant 0 : index
    %14 = vector.load %arg6[%c0_13, %c0_14] : memref<1x128xf32, #tpu.memory_space<vmem>>, vector<1x128xf32>
    %15 = vector.broadcast %14 : vector<1x128xf32> to vector<16x128xf32>
    %16 = arith.mulf %13, %15 : vector<16x128xf32>
    %cst_15 = arith.constant dense<0.000000e+00> : vector<16xf32>
    %17 = vector.multi_reduction <add>, %16, %cst_15 [1] : vector<16x128xf32> to vector<16xf32>
    %18 = vector.shape_cast %17 : vector<16xf32> to vector<16x1xf32>
    %c0_16 = arith.constant 0 : index
    %c0_17 = arith.constant 0 : index
    %19 = vector.load %arg7[%c0_16, %c0_17] : memref<1x1xf32, #tpu.memory_space<vmem>>, vector<1x1xf32>
    %20 = vector.broadcast %19 : vector<1x1xf32> to vector<16x1xf32>
    %21 = arith.addf %18, %20 : vector<16x1xf32>
    %22 = vector.shape_cast %21 : vector<16x1xf32> to vector<2x8xf32>
    %cst_18 = arith.constant dense<0xFF800000> : vector<2xf32>
    %23 = vector.multi_reduction <maximumf>, %22, %cst_18 [1] : vector<2x8xf32> to vector<2xf32>
    %24 = vector.shape_cast %23 : vector<2xf32> to vector<2x1xf32>
    %25 = vector.broadcast %24 : vector<2x1xf32> to vector<2x8xf32>
    %26 = arith.subf %22, %25 : vector<2x8xf32>
    %27 = math.exp %26 : vector<2x8xf32>
    %cst_19 = arith.constant dense<0.000000e+00> : vector<2xf32>
    %28 = vector.multi_reduction <add>, %27, %cst_19 [1] : vector<2x8xf32> to vector<2xf32>
    %29 = vector.shape_cast %28 : vector<2xf32> to vector<2x1xf32>
    %30 = tpu.reciprocal %29 {approx = true} : vector<2x1xf32> -> vector<2x1xf32>
    %31 = vector.broadcast %30 : vector<2x1xf32> to vector<2x8xf32>
    %32 = arith.mulf %27, %31 : vector<2x8xf32>
    %33 = arith.truncf %32 : vector<2x8xf32> to vector<2x8xbf16>
    %34 = vector.shape_cast %33 : vector<2x8xbf16> to vector<2x1x8xbf16>
    "tpu.trace_start"() <{level = 10 : i32, message = "bqt,bth->bqh"}> : () -> ()
    %cst_20 = arith.constant dense<0.000000e+00> : vector<2x1x32xf32>
    %35 = tpu.matmul %34, %0, %cst_20 {dimension_numbers = #tpu.dot_dimension_numbers<[2], [1], [1], [2], [0, 0, 0, 1, 1, 2], [0], [0]>} : vector<2x1x8xbf16>, vector<2x8x32xbf16>, vector<2x1x32xf32> -> vector<2x1x32xf32>
    "tpu.trace_stop"() : () -> ()
    %36 = vector.shape_cast %35 : vector<2x1x32xf32> to vector<2x32xf32>
    %37 = arith.truncf %36 : vector<2x32xf32> to vector<2x32xbf16>
    %c0_21 = arith.constant 0 : index
    %c0_22 = arith.constant 0 : index
    %38 = vector.load %arg8[%c0_21, %c0_22] : memref<32x3xbf16, #tpu.memory_space<vmem>>, vector<32x3xbf16>
    %cst_23 = arith.constant dense<0.000000e+00> : vector<2x3xf32>
    %39 = tpu.matmul %37, %38, %cst_23 {dimension_numbers = #tpu.dot_dimension_numbers<[1], [0], [0], [1], [0, 0, 1, 1], [], []>} : vector<2x32xbf16>, vector<32x3xbf16>, vector<2x3xf32> -> vector<2x3xf32>
    "tpu.trace_start"() <{level = 10 : i32, message = "bqt,bth->bqh"}> : () -> ()
    %cst_24 = arith.constant dense<0.000000e+00> : vector<2x1x32xf32>
    %40 = tpu.matmul %34, %1, %cst_24 {dimension_numbers = #tpu.dot_dimension_numbers<[2], [1], [1], [2], [0, 0, 0, 1, 1, 2], [0], [0]>} : vector<2x1x8xbf16>, vector<2x8x32xbf16>, vector<2x1x32xf32> -> vector<2x1x32xf32>
    "tpu.trace_stop"() : () -> ()
    %41 = vector.shape_cast %40 : vector<2x1x32xf32> to vector<2x32xf32>
    %42 = arith.truncf %41 : vector<2x32xf32> to vector<2x32xbf16>
    %c0_25 = arith.constant 0 : index
    %c0_26 = arith.constant 0 : index
    %43 = vector.load %arg9[%c0_25, %c0_26] : memref<32x3xbf16, #tpu.memory_space<vmem>>, vector<32x3xbf16>
    %cst_27 = arith.constant dense<0.000000e+00> : vector<2x3xf32>
    %44 = tpu.matmul %42, %43, %cst_27 {dimension_numbers = #tpu.dot_dimension_numbers<[1], [0], [0], [1], [0, 0, 1, 1], [], []>} : vector<2x32xbf16>, vector<32x3xbf16>, vector<2x3xf32> -> vector<2x3xf32>
    %45 = arith.addf %39, %44 : vector<2x3xf32>
    %c0_28 = arith.constant 0 : index
    %c0_29 = arith.constant 0 : index
    %46 = vector.load %arg10[%c0_28, %c0_29] : memref<1x3xf32, #tpu.memory_space<vmem>>, vector<1x3xf32>
    %47 = vector.broadcast %46 : vector<1x3xf32> to vector<2x3xf32>
    %48 = arith.addf %45, %47 : vector<2x3xf32>
    %c0_30 = arith.constant 0 : index
    %c0_31 = arith.constant 0 : index
    %49 = vector.load %arg11[%c0_30, %c0_31] : memref<2x3xf32, #tpu.memory_space<vmem>>, vector<2x3xf32>
    tpu.vector_store %arg11[%c0_30, %c0_31], %48 {strides = array<i32>} : memref<2x3xf32, #tpu.memory_space<vmem>>, vector<2x3xf32>,
    return
  }
  func.func @transform_0(%arg0: i32) -> (i32, i32, i32) {
    %c0_i32 = arith.constant 0 : i32
    %c0_i32_0 = arith.constant 0 : i32
    %c0_i32_1 = arith.constant 0 : i32
    return %arg0, %c0_i32, %c0_i32_0 : i32, i32, i32
  }
  func.func @transform_1(%arg0: i32) -> (i32, i32, i32) {
    %c0_i32 = arith.constant 0 : i32
    %c0_i32_0 = arith.constant 0 : i32
    %c0_i32_1 = arith.constant 0 : i32
    return %arg0, %c0_i32, %c0_i32_0 : i32, i32, i32
  }
  func.func @transform_2(%arg0: i32) -> (i32, i32) {
    %c0_i32 = arith.constant 0 : i32
    %c0_i32_0 = arith.constant 0 : i32
    %c0_i32_1 = arith.constant 0 : i32
    return %c0_i32, %c0_i32_0 : i32, i32
  }
  func.func @transform_3(%arg0: i32) -> (i32, i32) {
    %c0_i32 = arith.constant 0 : i32
    %c0_i32_0 = arith.constant 0 : i32
    %c0_i32_1 = arith.constant 0 : i32
    return %c0_i32, %c0_i32_0 : i32, i32
  }
  func.func @transform_4(%arg0: i32) -> (i32, i32) {
    %c0_i32 = arith.constant 0 : i32
    %c0_i32_0 = arith.constant 0 : i32
    %c0_i32_1 = arith.constant 0 : i32
    return %c0_i32, %c0_i32_0 : i32, i32
  }
  func.func @transform_5(%arg0: i32) -> (i32, i32) {
    %c0_i32 = arith.constant 0 : i32
    %c0_i32_0 = arith.constant 0 : i32
    %c0_i32_1 = arith.constant 0 : i32
    return %c0_i32, %c0_i32_0 : i32, i32
  }
  func.func @transform_6(%arg0: i32) -> (i32, i32) {
    %c0_i32 = arith.constant 0 : i32
    %c0_i32_0 = arith.constant 0 : i32
    %c0_i32_1 = arith.constant 0 : i32
    return %c0_i32, %c0_i32_0 : i32, i32
  }
  func.func @transform_7(%arg0: i32) -> (i32, i32) {
    %c0_i32 = arith.constant 0 : i32
    %c0_i32_0 = arith.constant 0 : i32
    %c0_i32_1 = arith.constant 0 : i32
    return %c0_i32, %c0_i32_0 : i32, i32
  }
  func.func @transform_8(%arg0: i32) -> (i32, i32) {
    %c0_i32 = arith.constant 0 : i32
    %c0_i32_0 = arith.constant 0 : i32
    %c0_i32_1 = arith.constant 0 : i32
    return %c0_i32, %c0_i32_0 : i32, i32
  }
  func.func @transform_9(%arg0: i32) -> (i32, i32) {
    %c0_i32 = arith.constant 0 : i32
    %c0_i32_0 = arith.constant 0 : i32
    %c0_i32_1 = arith.constant 0 : i32
    return %c0_i32, %c0_i32_0 : i32, i32
  }
  func.func @transform_10(%arg0: i32) -> (i32, i32) {
    %c0_i32 = arith.constant 0 : i32
    %c0_i32_0 = arith.constant 0 : i32
    return %arg0, %c0_i32 : i32, i32
  }
}

module attributes {stable_mosaic.version = 11 : i64} {
  func.func @kernel(%arg0: i32, %arg1: memref<8x2x32xbf16, #tpu.memory_space<vmem>>, %arg2: memref<8x2x32xbf16, #tpu.memory_space<vmem>>, %arg3: memref<8x2x32xbf16, #tpu.memory_space<vmem>>, %arg4: memref<8x2x32xbf16, #tpu.memory_space<vmem>>, %arg5: memref<32x128xbf16, #tpu.memory_space<vmem>>, %arg6: memref<32x128xbf16, #tpu.memory_space<vmem>>, %arg7: memref<32x128xbf16, #tpu.memory_space<vmem>>, %arg8: memref<32x128xbf16, #tpu.memory_space<vmem>>, %arg9: memref<2x1x128xf32, #tpu.memory_space<vmem>>, %arg10: memref<2x32x128xbf16, #tpu.memory_space<vmem>>, %arg11: memref<2x8x32xbf16, #tpu.memory_space<vmem>>, %arg12: memref<2x8x32xbf16, #tpu.memory_space<vmem>>, %arg13: memref<2x8x2x128xf32, #tpu.memory_space<vmem>>, %arg14: memref<2x2x32xf32, #tpu.memory_space<vmem>>, %arg15: memref<2x2x32xf32, #tpu.memory_space<vmem>>) attributes {dimension_semantics = [#tpu.dimension_semantics<arbitrary>], iteration_bounds = array<i64: 1>, scalar_prefetch = 0 : i64, scratch_operands = 3 : i64, tpu.core_type = #tpu.core_type<tc>, window_params = [{transform_indices = @transform_0, window_bounds = array<i64: 8, 2, 32>}, {transform_indices = @transform_1, window_bounds = array<i64: 8, 2, 32>}, {transform_indices = @transform_2, window_bounds = array<i64: 8, 2, 32>}, {transform_indices = @transform_3, window_bounds = array<i64: 8, 2, 32>}, {pipeline_mode = #tpu.pipeline_mode<synchronous>, transform_indices = @transform_4, window_bounds = array<i64: 32, 128>}, {pipeline_mode = #tpu.pipeline_mode<synchronous>, transform_indices = @transform_5, window_bounds = array<i64: 32, 128>}, {pipeline_mode = #tpu.pipeline_mode<synchronous>, transform_indices = @transform_6, window_bounds = array<i64: 32, 128>}, {pipeline_mode = #tpu.pipeline_mode<synchronous>, transform_indices = @transform_7, window_bounds = array<i64: 32, 128>}, {pipeline_mode = #tpu.pipeline_mode<synchronous>, transform_indices = @transform_8, window_bounds = array<i64: 2, 1, 128>}, {pipeline_mode = #tpu.pipeline_mode<synchronous>, transform_indices = @transform_9, window_bounds = array<i64: 2, 32, 128>}, {transform_indices = @transform_10, window_bounds = array<i64: 2, 8, 32>}, {transform_indices = @transform_11, window_bounds = array<i64: 2, 8, 32>}]} {
    %c0_i32 = arith.constant 0 : i32
    %0 = arith.cmpi eq, %arg0, %c0_i32 : i32
    %1 = arith.extui %0 : i1 to i32
    %c0_i32_0 = arith.constant 0 : i32
    %2 = arith.cmpi ne, %1, %c0_i32_0 : i32
    scf.if %2 {
      %cst_558 = arith.constant 0.000000e+00 : f32
      %910 = vector.broadcast %cst_558 : f32 to vector<2x2x32xf32>
      %c0_559 = arith.constant 0 : index
      %c0_560 = arith.constant 0 : index
      %c0_561 = arith.constant 0 : index
      %911 = vector.load %arg14[%c0_559, %c0_560, %c0_561] : memref<2x2x32xf32, #tpu.memory_space<vmem>>, vector<2x2x32xf32>
      tpu.vector_store %arg14[%c0_559, %c0_560, %c0_561], %910 {strides = array<i32>} : memref<2x2x32xf32, #tpu.memory_space<vmem>>, vector<2x2x32xf32>,
      %cst_562 = arith.constant 0.000000e+00 : f32
      %912 = vector.broadcast %cst_562 : f32 to vector<2x2x32xf32>
      %c0_563 = arith.constant 0 : index
      %c0_564 = arith.constant 0 : index
      %c0_565 = arith.constant 0 : index
      %913 = vector.load %arg15[%c0_563, %c0_564, %c0_565] : memref<2x2x32xf32, #tpu.memory_space<vmem>>, vector<2x2x32xf32>
      tpu.vector_store %arg15[%c0_563, %c0_564, %c0_565], %912 {strides = array<i32>} : memref<2x2x32xf32, #tpu.memory_space<vmem>>, vector<2x2x32xf32>,
    } else {
    }
    %c0 = arith.constant 0 : index
    %c0_1 = arith.constant 0 : index
    %c0_2 = arith.constant 0 : index
    %3 = vector.load %arg1[%c0, %c0_1, %c0_2] : memref<8x2x32xbf16, #tpu.memory_space<vmem>>, vector<8x2x32xbf16>
    %4 = vector.shape_cast %3 : vector<8x2x32xbf16> to vector<16x32xbf16>
    %c0_3 = arith.constant 0 : index
    %c0_4 = arith.constant 0 : index
    %5 = vector.load %arg5[%c0_3, %c0_4] : memref<32x128xbf16, #tpu.memory_space<vmem>>, vector<32x128xbf16>
    %cst = arith.constant dense<0.000000e+00> : vector<16x128xf32>
    %6 = tpu.matmul %4, %5, %cst {dimension_numbers = #tpu.dot_dimension_numbers<[1], [0], [0], [1], [0, 0, 1, 1], [], []>} : vector<16x32xbf16>, vector<32x128xbf16>, vector<16x128xf32> -> vector<16x128xf32>
    %c0_5 = arith.constant 0 : index
    %c0_6 = arith.constant 0 : index
    %c0_7 = arith.constant 0 : index
    %7 = vector.load %arg2[%c0_5, %c0_6, %c0_7] : memref<8x2x32xbf16, #tpu.memory_space<vmem>>, vector<8x2x32xbf16>
    %8 = vector.shape_cast %7 : vector<8x2x32xbf16> to vector<16x32xbf16>
    %c0_8 = arith.constant 0 : index
    %c0_9 = arith.constant 0 : index
    %9 = vector.load %arg6[%c0_8, %c0_9] : memref<32x128xbf16, #tpu.memory_space<vmem>>, vector<32x128xbf16>
    %cst_10 = arith.constant dense<0.000000e+00> : vector<16x128xf32>
    %10 = tpu.matmul %8, %9, %cst_10 {dimension_numbers = #tpu.dot_dimension_numbers<[1], [0], [0], [1], [0, 0, 1, 1], [], []>} : vector<16x32xbf16>, vector<32x128xbf16>, vector<16x128xf32> -> vector<16x128xf32>
    %11 = arith.addf %6, %10 : vector<16x128xf32>
    %c0_11 = arith.constant 0 : index
    %c0_12 = arith.constant 0 : index
    %c0_13 = arith.constant 0 : index
    %12 = vector.load %arg9[%c0_11, %c0_12, %c0_13] : memref<2x1x128xf32, #tpu.memory_space<vmem>>, vector<1x1x128xf32>
    %13 = vector.shape_cast %12 : vector<1x1x128xf32> to vector<1x128xf32>
    %14 = vector.broadcast %13 : vector<1x128xf32> to vector<16x128xf32>
    %15 = arith.addf %11, %14 : vector<16x128xf32>
    %16 = vector.shape_cast %15 : vector<16x128xf32> to vector<8x2x128xf32>
    %c0_14 = arith.constant 0 : index
    %c0_15 = arith.constant 0 : index
    %c0_16 = arith.constant 0 : index
    %c0_17 = arith.constant 0 : index
    %17 = vector.load %arg13[%c0_14, %c0_15, %c0_16, %c0_17] : memref<2x8x2x128xf32, #tpu.memory_space<vmem>>, vector<1x8x2x128xf32>
    %18 = vector.shape_cast %17 : vector<1x8x2x128xf32> to vector<8x2x128xf32>
    %19 = vector.shape_cast %16 : vector<8x2x128xf32> to vector<1x8x2x128xf32>
    tpu.vector_store %arg13[%c0_14, %c0_15, %c0_16, %c0_17], %19 {strides = array<i32>} : memref<2x8x2x128xf32, #tpu.memory_space<vmem>>, vector<1x8x2x128xf32>,
    %c0_18 = arith.constant 0 : index
    %c0_19 = arith.constant 0 : index
    %c0_20 = arith.constant 0 : index
    %20 = vector.load %arg3[%c0_18, %c0_19, %c0_20] : memref<8x2x32xbf16, #tpu.memory_space<vmem>>, vector<8x2x32xbf16>
    %21 = vector.shape_cast %20 : vector<8x2x32xbf16> to vector<16x32xbf16>
    %c0_21 = arith.constant 0 : index
    %c0_22 = arith.constant 0 : index
    %22 = vector.load %arg7[%c0_21, %c0_22] : memref<32x128xbf16, #tpu.memory_space<vmem>>, vector<32x128xbf16>
    %cst_23 = arith.constant dense<0.000000e+00> : vector<16x128xf32>
    %23 = tpu.matmul %21, %22, %cst_23 {dimension_numbers = #tpu.dot_dimension_numbers<[1], [0], [0], [1], [0, 0, 1, 1], [], []>} : vector<16x32xbf16>, vector<32x128xbf16>, vector<16x128xf32> -> vector<16x128xf32>
    %c0_24 = arith.constant 0 : index
    %c0_25 = arith.constant 0 : index
    %c0_26 = arith.constant 0 : index
    %24 = vector.load %arg4[%c0_24, %c0_25, %c0_26] : memref<8x2x32xbf16, #tpu.memory_space<vmem>>, vector<8x2x32xbf16>
    %25 = vector.shape_cast %24 : vector<8x2x32xbf16> to vector<16x32xbf16>
    %c0_27 = arith.constant 0 : index
    %c0_28 = arith.constant 0 : index
    %26 = vector.load %arg8[%c0_27, %c0_28] : memref<32x128xbf16, #tpu.memory_space<vmem>>, vector<32x128xbf16>
    %cst_29 = arith.constant dense<0.000000e+00> : vector<16x128xf32>
    %27 = tpu.matmul %25, %26, %cst_29 {dimension_numbers = #tpu.dot_dimension_numbers<[1], [0], [0], [1], [0, 0, 1, 1], [], []>} : vector<16x32xbf16>, vector<32x128xbf16>, vector<16x128xf32> -> vector<16x128xf32>
    %28 = arith.addf %23, %27 : vector<16x128xf32>
    %c1 = arith.constant 1 : index
    %c0_30 = arith.constant 0 : index
    %c0_31 = arith.constant 0 : index
    %29 = vector.load %arg9[%c1, %c0_30, %c0_31] : memref<2x1x128xf32, #tpu.memory_space<vmem>>, vector<1x1x128xf32>
    %30 = vector.shape_cast %29 : vector<1x1x128xf32> to vector<1x128xf32>
    %31 = vector.broadcast %30 : vector<1x128xf32> to vector<16x128xf32>
    %32 = arith.addf %28, %31 : vector<16x128xf32>
    %33 = vector.shape_cast %32 : vector<16x128xf32> to vector<8x2x128xf32>
    %c1_32 = arith.constant 1 : index
    %c0_33 = arith.constant 0 : index
    %c0_34 = arith.constant 0 : index
    %c0_35 = arith.constant 0 : index
    %34 = vector.load %arg13[%c1_32, %c0_33, %c0_34, %c0_35] : memref<2x8x2x128xf32, #tpu.memory_space<vmem>>, vector<1x8x2x128xf32>
    %35 = vector.shape_cast %34 : vector<1x8x2x128xf32> to vector<8x2x128xf32>
    %36 = vector.shape_cast %33 : vector<8x2x128xf32> to vector<1x8x2x128xf32>
    tpu.vector_store %arg13[%c1_32, %c0_33, %c0_34, %c0_35], %36 {strides = array<i32>} : memref<2x8x2x128xf32, #tpu.memory_space<vmem>>, vector<1x8x2x128xf32>,
    %c0_36 = arith.constant 0 : index
    %c0_37 = arith.constant 0 : index
    %c0_38 = arith.constant 0 : index
    %37 = vector.load %arg10[%c0_36, %c0_37, %c0_38] : memref<2x32x128xbf16, #tpu.memory_space<vmem>>, vector<2x32x128xbf16>
    %c0_39 = arith.constant 0 : index
    %c0_40 = arith.constant 0 : index
    %c0_41 = arith.constant 0 : index
    %38 = vector.load %arg14[%c0_39, %c0_40, %c0_41] : memref<2x2x32xf32, #tpu.memory_space<vmem>>, vector<2x2x32xf32>
    %39 = arith.truncf %38 : vector<2x2x32xf32> to vector<2x2x32xbf16>
    "tpu.trace_start"() <{level = 10 : i32, message = "dbh,dhg->dbg"}> : () -> ()
    %cst_42 = arith.constant dense<0.000000e+00> : vector<2x2x128xf32>
    %40 = tpu.matmul %39, %37, %cst_42 {dimension_numbers = #tpu.dot_dimension_numbers<[2], [1], [1], [2], [0, 0, 0, 1, 1, 2], [0], [0]>} : vector<2x2x32xbf16>, vector<2x32x128xbf16>, vector<2x2x128xf32> -> vector<2x2x128xf32>
    "tpu.trace_stop"() : () -> ()
    %c0_43 = arith.constant 0 : index
    %c0_44 = arith.constant 0 : index
    %c0_45 = arith.constant 0 : index
    %c0_46 = arith.constant 0 : index
    %41 = vector.load %arg13[%c0_43, %c0_44, %c0_45, %c0_46] : memref<2x8x2x128xf32, #tpu.memory_space<vmem>>, vector<1x1x2x32xf32>
    %42 = vector.shape_cast %41 : vector<1x1x2x32xf32> to vector<2x32xf32>
    %43 = vector.extract_strided_slice %40 {offsets = [0, 0, 0], sizes = [1, 2, 32], strides = [1, 1, 1]} : vector<2x2x128xf32> to vector<1x2x32xf32>
    %44 = vector.shape_cast %43 : vector<1x2x32xf32> to vector<2x32xf32>
    %45 = arith.addf %42, %44 : vector<2x32xf32>
    %46 = arith.negf %45 : vector<2x32xf32>
    %47 = math.exp %46 : vector<2x32xf32>
    %cst_47 = arith.constant 1.000000e+00 : f32
    %48 = vector.broadcast %cst_47 : f32 to vector<2x32xf32>
    %49 = arith.addf %48, %47 : vector<2x32xf32>
    %50 = arith.divf %48, %49 : vector<2x32xf32>
    %c0_48 = arith.constant 0 : index
    %c0_49 = arith.constant 0 : index
    %c0_50 = arith.constant 0 : index
    %c32 = arith.constant 32 : index
    %51 = vector.load %arg13[%c0_48, %c0_49, %c0_50, %c32] : memref<2x8x2x128xf32, #tpu.memory_space<vmem>>, vector<1x1x2x32xf32>
    %52 = vector.shape_cast %51 : vector<1x1x2x32xf32> to vector<2x32xf32>
    %53 = vector.extract_strided_slice %40 {offsets = [0, 0, 32], sizes = [1, 2, 32], strides = [1, 1, 1]} : vector<2x2x128xf32> to vector<1x2x32xf32>
    %54 = vector.shape_cast %53 : vector<1x2x32xf32> to vector<2x32xf32>
    %55 = arith.addf %52, %54 : vector<2x32xf32>
    %56 = arith.negf %55 : vector<2x32xf32>
    %57 = math.exp %56 : vector<2x32xf32>
    %cst_51 = arith.constant 1.000000e+00 : f32
    %58 = vector.broadcast %cst_51 : f32 to vector<2x32xf32>
    %59 = arith.addf %58, %57 : vector<2x32xf32>
    %60 = arith.divf %58, %59 : vector<2x32xf32>
    %c0_52 = arith.constant 0 : index
    %c0_53 = arith.constant 0 : index
    %c0_54 = arith.constant 0 : index
    %c64 = arith.constant 64 : index
    %61 = vector.load %arg13[%c0_52, %c0_53, %c0_54, %c64] : memref<2x8x2x128xf32, #tpu.memory_space<vmem>>, vector<1x1x2x32xf32>
    %62 = vector.shape_cast %61 : vector<1x1x2x32xf32> to vector<2x32xf32>
    %63 = vector.extract_strided_slice %40 {offsets = [0, 0, 64], sizes = [1, 2, 32], strides = [1, 1, 1]} : vector<2x2x128xf32> to vector<1x2x32xf32>
    %64 = vector.shape_cast %63 : vector<1x2x32xf32> to vector<2x32xf32>
    %65 = arith.addf %62, %64 : vector<2x32xf32>
    %66 = math.tanh %65 : vector<2x32xf32>
    %c0_55 = arith.constant 0 : index
    %c0_56 = arith.constant 0 : index
    %c0_57 = arith.constant 0 : index
    %c96 = arith.constant 96 : index
    %67 = vector.load %arg13[%c0_55, %c0_56, %c0_57, %c96] : memref<2x8x2x128xf32, #tpu.memory_space<vmem>>, vector<1x1x2x32xf32>
    %68 = vector.shape_cast %67 : vector<1x1x2x32xf32> to vector<2x32xf32>
    %69 = vector.extract_strided_slice %40 {offsets = [0, 0, 96], sizes = [1, 2, 32], strides = [1, 1, 1]} : vector<2x2x128xf32> to vector<1x2x32xf32>
    %70 = vector.shape_cast %69 : vector<1x2x32xf32> to vector<2x32xf32>
    %71 = arith.addf %68, %70 : vector<2x32xf32>
    %72 = arith.negf %71 : vector<2x32xf32>
    %73 = math.exp %72 : vector<2x32xf32>
    %cst_58 = arith.constant 1.000000e+00 : f32
    %74 = vector.broadcast %cst_58 : f32 to vector<2x32xf32>
    %75 = arith.addf %74, %73 : vector<2x32xf32>
    %76 = arith.divf %74, %75 : vector<2x32xf32>
    %c0_59 = arith.constant 0 : index
    %c0_60 = arith.constant 0 : index
    %c0_61 = arith.constant 0 : index
    %77 = vector.load %arg15[%c0_59, %c0_60, %c0_61] : memref<2x2x32xf32, #tpu.memory_space<vmem>>, vector<1x2x32xf32>
    %78 = vector.shape_cast %77 : vector<1x2x32xf32> to vector<2x32xf32>
    %79 = arith.mulf %60, %78 : vector<2x32xf32>
    %80 = arith.mulf %50, %66 : vector<2x32xf32>
    %81 = arith.addf %79, %80 : vector<2x32xf32>
    %82 = math.tanh %81 : vector<2x32xf32>
    %83 = arith.mulf %76, %82 : vector<2x32xf32>
    %c0_62 = arith.constant 0 : index
    %c0_63 = arith.constant 0 : index
    %c0_64 = arith.constant 0 : index
    %84 = vector.load %arg15[%c0_62, %c0_63, %c0_64] : memref<2x2x32xf32, #tpu.memory_space<vmem>>, vector<1x2x32xf32>
    %85 = vector.shape_cast %84 : vector<1x2x32xf32> to vector<2x32xf32>
    %86 = vector.shape_cast %81 : vector<2x32xf32> to vector<1x2x32xf32>
    tpu.vector_store %arg15[%c0_62, %c0_63, %c0_64], %86 {strides = array<i32>} : memref<2x2x32xf32, #tpu.memory_space<vmem>>, vector<1x2x32xf32>,
    %c0_65 = arith.constant 0 : index
    %c0_66 = arith.constant 0 : index
    %c0_67 = arith.constant 0 : index
    %87 = vector.load %arg14[%c0_65, %c0_66, %c0_67] : memref<2x2x32xf32, #tpu.memory_space<vmem>>, vector<1x2x32xf32>
    %88 = vector.shape_cast %87 : vector<1x2x32xf32> to vector<2x32xf32>
    %89 = vector.shape_cast %83 : vector<2x32xf32> to vector<1x2x32xf32>
    tpu.vector_store %arg14[%c0_65, %c0_66, %c0_67], %89 {strides = array<i32>} : memref<2x2x32xf32, #tpu.memory_space<vmem>>, vector<1x2x32xf32>,
    %90 = arith.truncf %83 : vector<2x32xf32> to vector<2x32xbf16>
    %c0_68 = arith.constant 0 : index
    %c0_69 = arith.constant 0 : index
    %c0_70 = arith.constant 0 : index
    %91 = vector.load %arg11[%c0_68, %c0_69, %c0_70] : memref<2x8x32xbf16, #tpu.memory_space<vmem>>, vector<2x1x32xbf16>
    %92 = vector.shape_cast %91 : vector<2x1x32xbf16> to vector<2x32xbf16>
    %93 = vector.shape_cast %90 : vector<2x32xbf16> to vector<2x1x32xbf16>
    tpu.vector_store %arg11[%c0_68, %c0_69, %c0_70], %93 {strides = array<i32>} : memref<2x8x32xbf16, #tpu.memory_space<vmem>>, vector<2x1x32xbf16>,
    %c1_71 = arith.constant 1 : index
    %c7 = arith.constant 7 : index
    %c0_72 = arith.constant 0 : index
    %c0_73 = arith.constant 0 : index
    %94 = vector.load %arg13[%c1_71, %c7, %c0_72, %c0_73] : memref<2x8x2x128xf32, #tpu.memory_space<vmem>>, vector<1x1x2x32xf32>
    %95 = vector.shape_cast %94 : vector<1x1x2x32xf32> to vector<2x32xf32>
    %96 = vector.extract_strided_slice %40 {offsets = [1, 0, 0], sizes = [1, 2, 32], strides = [1, 1, 1]} : vector<2x2x128xf32> to vector<1x2x32xf32>
    %97 = vector.shape_cast %96 : vector<1x2x32xf32> to vector<2x32xf32>
    %98 = arith.addf %95, %97 : vector<2x32xf32>
    %99 = arith.negf %98 : vector<2x32xf32>
    %100 = math.exp %99 : vector<2x32xf32>
    %cst_74 = arith.constant 1.000000e+00 : f32
    %101 = vector.broadcast %cst_74 : f32 to vector<2x32xf32>
    %102 = arith.addf %101, %100 : vector<2x32xf32>
    %103 = arith.divf %101, %102 : vector<2x32xf32>
    %c1_75 = arith.constant 1 : index
    %c7_76 = arith.constant 7 : index
    %c0_77 = arith.constant 0 : index
    %c32_78 = arith.constant 32 : index
    %104 = vector.load %arg13[%c1_75, %c7_76, %c0_77, %c32_78] : memref<2x8x2x128xf32, #tpu.memory_space<vmem>>, vector<1x1x2x32xf32>
    %105 = vector.shape_cast %104 : vector<1x1x2x32xf32> to vector<2x32xf32>
    %106 = vector.extract_strided_slice %40 {offsets = [1, 0, 32], sizes = [1, 2, 32], strides = [1, 1, 1]} : vector<2x2x128xf32> to vector<1x2x32xf32>
    %107 = vector.shape_cast %106 : vector<1x2x32xf32> to vector<2x32xf32>
    %108 = arith.addf %105, %107 : vector<2x32xf32>
    %109 = arith.negf %108 : vector<2x32xf32>
    %110 = math.exp %109 : vector<2x32xf32>
    %cst_79 = arith.constant 1.000000e+00 : f32
    %111 = vector.broadcast %cst_79 : f32 to vector<2x32xf32>
    %112 = arith.addf %111, %110 : vector<2x32xf32>
    %113 = arith.divf %111, %112 : vector<2x32xf32>
    %c1_80 = arith.constant 1 : index
    %c7_81 = arith.constant 7 : index
    %c0_82 = arith.constant 0 : index
    %c64_83 = arith.constant 64 : index
    %114 = vector.load %arg13[%c1_80, %c7_81, %c0_82, %c64_83] : memref<2x8x2x128xf32, #tpu.memory_space<vmem>>, vector<1x1x2x32xf32>
    %115 = vector.shape_cast %114 : vector<1x1x2x32xf32> to vector<2x32xf32>
    %116 = vector.extract_strided_slice %40 {offsets = [1, 0, 64], sizes = [1, 2, 32], strides = [1, 1, 1]} : vector<2x2x128xf32> to vector<1x2x32xf32>
    %117 = vector.shape_cast %116 : vector<1x2x32xf32> to vector<2x32xf32>
    %118 = arith.addf %115, %117 : vector<2x32xf32>
    %119 = math.tanh %118 : vector<2x32xf32>
    %c1_84 = arith.constant 1 : index
    %c7_85 = arith.constant 7 : index
    %c0_86 = arith.constant 0 : index
    %c96_87 = arith.constant 96 : index
    %120 = vector.load %arg13[%c1_84, %c7_85, %c0_86, %c96_87] : memref<2x8x2x128xf32, #tpu.memory_space<vmem>>, vector<1x1x2x32xf32>
    %121 = vector.shape_cast %120 : vector<1x1x2x32xf32> to vector<2x32xf32>
    %122 = vector.extract_strided_slice %40 {offsets = [1, 0, 96], sizes = [1, 2, 32], strides = [1, 1, 1]} : vector<2x2x128xf32> to vector<1x2x32xf32>
    %123 = vector.shape_cast %122 : vector<1x2x32xf32> to vector<2x32xf32>
    %124 = arith.addf %121, %123 : vector<2x32xf32>
    %125 = arith.negf %124 : vector<2x32xf32>
    %126 = math.exp %125 : vector<2x32xf32>
    %cst_88 = arith.constant 1.000000e+00 : f32
    %127 = vector.broadcast %cst_88 : f32 to vector<2x32xf32>
    %128 = arith.addf %127, %126 : vector<2x32xf32>
    %129 = arith.divf %127, %128 : vector<2x32xf32>
    %c1_89 = arith.constant 1 : index
    %c0_90 = arith.constant 0 : index
    %c0_91 = arith.constant 0 : index
    %130 = vector.load %arg15[%c1_89, %c0_90, %c0_91] : memref<2x2x32xf32, #tpu.memory_space<vmem>>, vector<1x2x32xf32>
    %131 = vector.shape_cast %130 : vector<1x2x32xf32> to vector<2x32xf32>
    %132 = arith.mulf %113, %131 : vector<2x32xf32>
    %133 = arith.mulf %103, %119 : vector<2x32xf32>
    %134 = arith.addf %132, %133 : vector<2x32xf32>
    %135 = math.tanh %134 : vector<2x32xf32>
    %136 = arith.mulf %129, %135 : vector<2x32xf32>
    %c1_92 = arith.constant 1 : index
    %c0_93 = arith.constant 0 : index
    %c0_94 = arith.constant 0 : index
    %137 = vector.load %arg15[%c1_92, %c0_93, %c0_94] : memref<2x2x32xf32, #tpu.memory_space<vmem>>, vector<1x2x32xf32>
    %138 = vector.shape_cast %137 : vector<1x2x32xf32> to vector<2x32xf32>
    %139 = vector.shape_cast %134 : vector<2x32xf32> to vector<1x2x32xf32>
    tpu.vector_store %arg15[%c1_92, %c0_93, %c0_94], %139 {strides = array<i32>} : memref<2x2x32xf32, #tpu.memory_space<vmem>>, vector<1x2x32xf32>,
    %c1_95 = arith.constant 1 : index
    %c0_96 = arith.constant 0 : index
    %c0_97 = arith.constant 0 : index
    %140 = vector.load %arg14[%c1_95, %c0_96, %c0_97] : memref<2x2x32xf32, #tpu.memory_space<vmem>>, vector<1x2x32xf32>
    %141 = vector.shape_cast %140 : vector<1x2x32xf32> to vector<2x32xf32>
    %142 = vector.shape_cast %136 : vector<2x32xf32> to vector<1x2x32xf32>
    tpu.vector_store %arg14[%c1_95, %c0_96, %c0_97], %142 {strides = array<i32>} : memref<2x2x32xf32, #tpu.memory_space<vmem>>, vector<1x2x32xf32>,
    %143 = arith.truncf %136 : vector<2x32xf32> to vector<2x32xbf16>
    %c0_98 = arith.constant 0 : index
    %c7_99 = arith.constant 7 : index
    %c0_100 = arith.constant 0 : index
    %144 = vector.load %arg12[%c0_98, %c7_99, %c0_100] : memref<2x8x32xbf16, #tpu.memory_space<vmem>>, vector<2x1x32xbf16>
    %145 = vector.shape_cast %144 : vector<2x1x32xbf16> to vector<2x32xbf16>
    %146 = vector.shape_cast %143 : vector<2x32xbf16> to vector<2x1x32xbf16>
    tpu.vector_store %arg12[%c0_98, %c7_99, %c0_100], %146 {strides = array<i32>} : memref<2x8x32xbf16, #tpu.memory_space<vmem>>, vector<2x1x32xbf16>,
    %c0_101 = arith.constant 0 : index
    %c0_102 = arith.constant 0 : index
    %c0_103 = arith.constant 0 : index
    %147 = vector.load %arg14[%c0_101, %c0_102, %c0_103] : memref<2x2x32xf32, #tpu.memory_space<vmem>>, vector<2x2x32xf32>
    %148 = arith.truncf %147 : vector<2x2x32xf32> to vector<2x2x32xbf16>
    "tpu.trace_start"() <{level = 10 : i32, message = "dbh,dhg->dbg"}> : () -> ()
    %cst_104 = arith.constant dense<0.000000e+00> : vector<2x2x128xf32>
    %149 = tpu.matmul %148, %37, %cst_104 {dimension_numbers = #tpu.dot_dimension_numbers<[2], [1], [1], [2], [0, 0, 0, 1, 1, 2], [0], [0]>} : vector<2x2x32xbf16>, vector<2x32x128xbf16>, vector<2x2x128xf32> -> vector<2x2x128xf32>
    "tpu.trace_stop"() : () -> ()
    %c0_105 = arith.constant 0 : index
    %c1_106 = arith.constant 1 : index
    %c0_107 = arith.constant 0 : index
    %c0_108 = arith.constant 0 : index
    %150 = vector.load %arg13[%c0_105, %c1_106, %c0_107, %c0_108] : memref<2x8x2x128xf32, #tpu.memory_space<vmem>>, vector<1x1x2x32xf32>
    %151 = vector.shape_cast %150 : vector<1x1x2x32xf32> to vector<2x32xf32>
    %152 = vector.extract_strided_slice %149 {offsets = [0, 0, 0], sizes = [1, 2, 32], strides = [1, 1, 1]} : vector<2x2x128xf32> to vector<1x2x32xf32>
    %153 = vector.shape_cast %152 : vector<1x2x32xf32> to vector<2x32xf32>
    %154 = arith.addf %151, %153 : vector<2x32xf32>
    %155 = arith.negf %154 : vector<2x32xf32>
    %156 = math.exp %155 : vector<2x32xf32>
    %cst_109 = arith.constant 1.000000e+00 : f32
    %157 = vector.broadcast %cst_109 : f32 to vector<2x32xf32>
    %158 = arith.addf %157, %156 : vector<2x32xf32>
    %159 = arith.divf %157, %158 : vector<2x32xf32>
    %c0_110 = arith.constant 0 : index
    %c1_111 = arith.constant 1 : index
    %c0_112 = arith.constant 0 : index
    %c32_113 = arith.constant 32 : index
    %160 = vector.load %arg13[%c0_110, %c1_111, %c0_112, %c32_113] : memref<2x8x2x128xf32, #tpu.memory_space<vmem>>, vector<1x1x2x32xf32>
    %161 = vector.shape_cast %160 : vector<1x1x2x32xf32> to vector<2x32xf32>
    %162 = vector.extract_strided_slice %149 {offsets = [0, 0, 32], sizes = [1, 2, 32], strides = [1, 1, 1]} : vector<2x2x128xf32> to vector<1x2x32xf32>
    %163 = vector.shape_cast %162 : vector<1x2x32xf32> to vector<2x32xf32>
    %164 = arith.addf %161, %163 : vector<2x32xf32>
    %165 = arith.negf %164 : vector<2x32xf32>
    %166 = math.exp %165 : vector<2x32xf32>
    %cst_114 = arith.constant 1.000000e+00 : f32
    %167 = vector.broadcast %cst_114 : f32 to vector<2x32xf32>
    %168 = arith.addf %167, %166 : vector<2x32xf32>
    %169 = arith.divf %167, %168 : vector<2x32xf32>
    %c0_115 = arith.constant 0 : index
    %c1_116 = arith.constant 1 : index
    %c0_117 = arith.constant 0 : index
    %c64_118 = arith.constant 64 : index
    %170 = vector.load %arg13[%c0_115, %c1_116, %c0_117, %c64_118] : memref<2x8x2x128xf32, #tpu.memory_space<vmem>>, vector<1x1x2x32xf32>
    %171 = vector.shape_cast %170 : vector<1x1x2x32xf32> to vector<2x32xf32>
    %172 = vector.extract_strided_slice %149 {offsets = [0, 0, 64], sizes = [1, 2, 32], strides = [1, 1, 1]} : vector<2x2x128xf32> to vector<1x2x32xf32>
    %173 = vector.shape_cast %172 : vector<1x2x32xf32> to vector<2x32xf32>
    %174 = arith.addf %171, %173 : vector<2x32xf32>
    %175 = math.tanh %174 : vector<2x32xf32>
    %c0_119 = arith.constant 0 : index
    %c1_120 = arith.constant 1 : index
    %c0_121 = arith.constant 0 : index
    %c96_122 = arith.constant 96 : index
    %176 = vector.load %arg13[%c0_119, %c1_120, %c0_121, %c96_122] : memref<2x8x2x128xf32, #tpu.memory_space<vmem>>, vector<1x1x2x32xf32>
    %177 = vector.shape_cast %176 : vector<1x1x2x32xf32> to vector<2x32xf32>
    %178 = vector.extract_strided_slice %149 {offsets = [0, 0, 96], sizes = [1, 2, 32], strides = [1, 1, 1]} : vector<2x2x128xf32> to vector<1x2x32xf32>
    %179 = vector.shape_cast %178 : vector<1x2x32xf32> to vector<2x32xf32>
    %180 = arith.addf %177, %179 : vector<2x32xf32>
    %181 = arith.negf %180 : vector<2x32xf32>
    %182 = math.exp %181 : vector<2x32xf32>
    %cst_123 = arith.constant 1.000000e+00 : f32
    %183 = vector.broadcast %cst_123 : f32 to vector<2x32xf32>
    %184 = arith.addf %183, %182 : vector<2x32xf32>
    %185 = arith.divf %183, %184 : vector<2x32xf32>
    %c0_124 = arith.constant 0 : index
    %c0_125 = arith.constant 0 : index
    %c0_126 = arith.constant 0 : index
    %186 = vector.load %arg15[%c0_124, %c0_125, %c0_126] : memref<2x2x32xf32, #tpu.memory_space<vmem>>, vector<1x2x32xf32>
    %187 = vector.shape_cast %186 : vector<1x2x32xf32> to vector<2x32xf32>
    %188 = arith.mulf %169, %187 : vector<2x32xf32>
    %189 = arith.mulf %159, %175 : vector<2x32xf32>
    %190 = arith.addf %188, %189 : vector<2x32xf32>
    %191 = math.tanh %190 : vector<2x32xf32>
    %192 = arith.mulf %185, %191 : vector<2x32xf32>
    %c0_127 = arith.constant 0 : index
    %c0_128 = arith.constant 0 : index
    %c0_129 = arith.constant 0 : index
    %193 = vector.load %arg15[%c0_127, %c0_128, %c0_129] : memref<2x2x32xf32, #tpu.memory_space<vmem>>, vector<1x2x32xf32>
    %194 = vector.shape_cast %193 : vector<1x2x32xf32> to vector<2x32xf32>
    %195 = vector.shape_cast %190 : vector<2x32xf32> to vector<1x2x32xf32>
    tpu.vector_store %arg15[%c0_127, %c0_128, %c0_129], %195 {strides = array<i32>} : memref<2x2x32xf32, #tpu.memory_space<vmem>>, vector<1x2x32xf32>,
    %c0_130 = arith.constant 0 : index
    %c0_131 = arith.constant 0 : index
    %c0_132 = arith.constant 0 : index
    %196 = vector.load %arg14[%c0_130, %c0_131, %c0_132] : memref<2x2x32xf32, #tpu.memory_space<vmem>>, vector<1x2x32xf32>
    %197 = vector.shape_cast %196 : vector<1x2x32xf32> to vector<2x32xf32>
    %198 = vector.shape_cast %192 : vector<2x32xf32> to vector<1x2x32xf32>
    tpu.vector_store %arg14[%c0_130, %c0_131, %c0_132], %198 {strides = array<i32>} : memref<2x2x32xf32, #tpu.memory_space<vmem>>, vector<1x2x32xf32>,
    %199 = arith.truncf %192 : vector<2x32xf32> to vector<2x32xbf16>
    %c0_133 = arith.constant 0 : index
    %c1_134 = arith.constant 1 : index
    %c0_135 = arith.constant 0 : index
    %200 = vector.load %arg11[%c0_133, %c1_134, %c0_135] : memref<2x8x32xbf16, #tpu.memory_space<vmem>>, vector<2x1x32xbf16>
    %201 = vector.shape_cast %200 : vector<2x1x32xbf16> to vector<2x32xbf16>
    %202 = vector.shape_cast %199 : vector<2x32xbf16> to vector<2x1x32xbf16>
    tpu.vector_store %arg11[%c0_133, %c1_134, %c0_135], %202 {strides = array<i32>} : memref<2x8x32xbf16, #tpu.memory_space<vmem>>, vector<2x1x32xbf16>,
    %c1_136 = arith.constant 1 : index
    %c6 = arith.constant 6 : index
    %c0_137 = arith.constant 0 : index
    %c0_138 = arith.constant 0 : index
    %203 = vector.load %arg13[%c1_136, %c6, %c0_137, %c0_138] : memref<2x8x2x128xf32, #tpu.memory_space<vmem>>, vector<1x1x2x32xf32>
    %204 = vector.shape_cast %203 : vector<1x1x2x32xf32> to vector<2x32xf32>
    %205 = vector.extract_strided_slice %149 {offsets = [1, 0, 0], sizes = [1, 2, 32], strides = [1, 1, 1]} : vector<2x2x128xf32> to vector<1x2x32xf32>
    %206 = vector.shape_cast %205 : vector<1x2x32xf32> to vector<2x32xf32>
    %207 = arith.addf %204, %206 : vector<2x32xf32>
    %208 = arith.negf %207 : vector<2x32xf32>
    %209 = math.exp %208 : vector<2x32xf32>
    %cst_139 = arith.constant 1.000000e+00 : f32
    %210 = vector.broadcast %cst_139 : f32 to vector<2x32xf32>
    %211 = arith.addf %210, %209 : vector<2x32xf32>
    %212 = arith.divf %210, %211 : vector<2x32xf32>
    %c1_140 = arith.constant 1 : index
    %c6_141 = arith.constant 6 : index
    %c0_142 = arith.constant 0 : index
    %c32_143 = arith.constant 32 : index
    %213 = vector.load %arg13[%c1_140, %c6_141, %c0_142, %c32_143] : memref<2x8x2x128xf32, #tpu.memory_space<vmem>>, vector<1x1x2x32xf32>
    %214 = vector.shape_cast %213 : vector<1x1x2x32xf32> to vector<2x32xf32>
    %215 = vector.extract_strided_slice %149 {offsets = [1, 0, 32], sizes = [1, 2, 32], strides = [1, 1, 1]} : vector<2x2x128xf32> to vector<1x2x32xf32>
    %216 = vector.shape_cast %215 : vector<1x2x32xf32> to vector<2x32xf32>
    %217 = arith.addf %214, %216 : vector<2x32xf32>
    %218 = arith.negf %217 : vector<2x32xf32>
    %219 = math.exp %218 : vector<2x32xf32>
    %cst_144 = arith.constant 1.000000e+00 : f32
    %220 = vector.broadcast %cst_144 : f32 to vector<2x32xf32>
    %221 = arith.addf %220, %219 : vector<2x32xf32>
    %222 = arith.divf %220, %221 : vector<2x32xf32>
    %c1_145 = arith.constant 1 : index
    %c6_146 = arith.constant 6 : index
    %c0_147 = arith.constant 0 : index
    %c64_148 = arith.constant 64 : index
    %223 = vector.load %arg13[%c1_145, %c6_146, %c0_147, %c64_148] : memref<2x8x2x128xf32, #tpu.memory_space<vmem>>, vector<1x1x2x32xf32>
    %224 = vector.shape_cast %223 : vector<1x1x2x32xf32> to vector<2x32xf32>
    %225 = vector.extract_strided_slice %149 {offsets = [1, 0, 64], sizes = [1, 2, 32], strides = [1, 1, 1]} : vector<2x2x128xf32> to vector<1x2x32xf32>
    %226 = vector.shape_cast %225 : vector<1x2x32xf32> to vector<2x32xf32>
    %227 = arith.addf %224, %226 : vector<2x32xf32>
    %228 = math.tanh %227 : vector<2x32xf32>
    %c1_149 = arith.constant 1 : index
    %c6_150 = arith.constant 6 : index
    %c0_151 = arith.constant 0 : index
    %c96_152 = arith.constant 96 : index
    %229 = vector.load %arg13[%c1_149, %c6_150, %c0_151, %c96_152] : memref<2x8x2x128xf32, #tpu.memory_space<vmem>>, vector<1x1x2x32xf32>
    %230 = vector.shape_cast %229 : vector<1x1x2x32xf32> to vector<2x32xf32>
    %231 = vector.extract_strided_slice %149 {offsets = [1, 0, 96], sizes = [1, 2, 32], strides = [1, 1, 1]} : vector<2x2x128xf32> to vector<1x2x32xf32>
    %232 = vector.shape_cast %231 : vector<1x2x32xf32> to vector<2x32xf32>
    %233 = arith.addf %230, %232 : vector<2x32xf32>
    %234 = arith.negf %233 : vector<2x32xf32>
    %235 = math.exp %234 : vector<2x32xf32>
    %cst_153 = arith.constant 1.000000e+00 : f32
    %236 = vector.broadcast %cst_153 : f32 to vector<2x32xf32>
    %237 = arith.addf %236, %235 : vector<2x32xf32>
    %238 = arith.divf %236, %237 : vector<2x32xf32>
    %c1_154 = arith.constant 1 : index
    %c0_155 = arith.constant 0 : index
    %c0_156 = arith.constant 0 : index
    %239 = vector.load %arg15[%c1_154, %c0_155, %c0_156] : memref<2x2x32xf32, #tpu.memory_space<vmem>>, vector<1x2x32xf32>
    %240 = vector.shape_cast %239 : vector<1x2x32xf32> to vector<2x32xf32>
    %241 = arith.mulf %222, %240 : vector<2x32xf32>
    %242 = arith.mulf %212, %228 : vector<2x32xf32>
    %243 = arith.addf %241, %242 : vector<2x32xf32>
    %244 = math.tanh %243 : vector<2x32xf32>
    %245 = arith.mulf %238, %244 : vector<2x32xf32>
    %c1_157 = arith.constant 1 : index
    %c0_158 = arith.constant 0 : index
    %c0_159 = arith.constant 0 : index
    %246 = vector.load %arg15[%c1_157, %c0_158, %c0_159] : memref<2x2x32xf32, #tpu.memory_space<vmem>>, vector<1x2x32xf32>
    %247 = vector.shape_cast %246 : vector<1x2x32xf32> to vector<2x32xf32>
    %248 = vector.shape_cast %243 : vector<2x32xf32> to vector<1x2x32xf32>
    tpu.vector_store %arg15[%c1_157, %c0_158, %c0_159], %248 {strides = array<i32>} : memref<2x2x32xf32, #tpu.memory_space<vmem>>, vector<1x2x32xf32>,
    %c1_160 = arith.constant 1 : index
    %c0_161 = arith.constant 0 : index
    %c0_162 = arith.constant 0 : index
    %249 = vector.load %arg14[%c1_160, %c0_161, %c0_162] : memref<2x2x32xf32, #tpu.memory_space<vmem>>, vector<1x2x32xf32>
    %250 = vector.shape_cast %249 : vector<1x2x32xf32> to vector<2x32xf32>
    %251 = vector.shape_cast %245 : vector<2x32xf32> to vector<1x2x32xf32>
    tpu.vector_store %arg14[%c1_160, %c0_161, %c0_162], %251 {strides = array<i32>} : memref<2x2x32xf32, #tpu.memory_space<vmem>>, vector<1x2x32xf32>,
    %252 = arith.truncf %245 : vector<2x32xf32> to vector<2x32xbf16>
    %c0_163 = arith.constant 0 : index
    %c6_164 = arith.constant 6 : index
    %c0_165 = arith.constant 0 : index
    %253 = vector.load %arg12[%c0_163, %c6_164, %c0_165] : memref<2x8x32xbf16, #tpu.memory_space<vmem>>, vector<2x1x32xbf16>
    %254 = vector.shape_cast %253 : vector<2x1x32xbf16> to vector<2x32xbf16>
    %255 = vector.shape_cast %252 : vector<2x32xbf16> to vector<2x1x32xbf16>
    tpu.vector_store %arg12[%c0_163, %c6_164, %c0_165], %255 {strides = array<i32>} : memref<2x8x32xbf16, #tpu.memory_space<vmem>>, vector<2x1x32xbf16>,
    %c0_166 = arith.constant 0 : index
    %c0_167 = arith.constant 0 : index
    %c0_168 = arith.constant 0 : index
    %256 = vector.load %arg14[%c0_166, %c0_167, %c0_168] : memref<2x2x32xf32, #tpu.memory_space<vmem>>, vector<2x2x32xf32>
    %257 = arith.truncf %256 : vector<2x2x32xf32> to vector<2x2x32xbf16>
    "tpu.trace_start"() <{level = 10 : i32, message = "dbh,dhg->dbg"}> : () -> ()
    %cst_169 = arith.constant dense<0.000000e+00> : vector<2x2x128xf32>
    %258 = tpu.matmul %257, %37, %cst_169 {dimension_numbers = #tpu.dot_dimension_numbers<[2], [1], [1], [2], [0, 0, 0, 1, 1, 2], [0], [0]>} : vector<2x2x32xbf16>, vector<2x32x128xbf16>, vector<2x2x128xf32> -> vector<2x2x128xf32>
    "tpu.trace_stop"() : () -> ()
    %c0_170 = arith.constant 0 : index
    %c2 = arith.constant 2 : index
    %c0_171 = arith.constant 0 : index
    %c0_172 = arith.constant 0 : index
    %259 = vector.load %arg13[%c0_170, %c2, %c0_171, %c0_172] : memref<2x8x2x128xf32, #tpu.memory_space<vmem>>, vector<1x1x2x32xf32>
    %260 = vector.shape_cast %259 : vector<1x1x2x32xf32> to vector<2x32xf32>
    %261 = vector.extract_strided_slice %258 {offsets = [0, 0, 0], sizes = [1, 2, 32], strides = [1, 1, 1]} : vector<2x2x128xf32> to vector<1x2x32xf32>
    %262 = vector.shape_cast %261 : vector<1x2x32xf32> to vector<2x32xf32>
    %263 = arith.addf %260, %262 : vector<2x32xf32>
    %264 = arith.negf %263 : vector<2x32xf32>
    %265 = math.exp %264 : vector<2x32xf32>
    %cst_173 = arith.constant 1.000000e+00 : f32
    %266 = vector.broadcast %cst_173 : f32 to vector<2x32xf32>
    %267 = arith.addf %266, %265 : vector<2x32xf32>
    %268 = arith.divf %266, %267 : vector<2x32xf32>
    %c0_174 = arith.constant 0 : index
    %c2_175 = arith.constant 2 : index
    %c0_176 = arith.constant 0 : index
    %c32_177 = arith.constant 32 : index
    %269 = vector.load %arg13[%c0_174, %c2_175, %c0_176, %c32_177] : memref<2x8x2x128xf32, #tpu.memory_space<vmem>>, vector<1x1x2x32xf32>
    %270 = vector.shape_cast %269 : vector<1x1x2x32xf32> to vector<2x32xf32>
    %271 = vector.extract_strided_slice %258 {offsets = [0, 0, 32], sizes = [1, 2, 32], strides = [1, 1, 1]} : vector<2x2x128xf32> to vector<1x2x32xf32>
    %272 = vector.shape_cast %271 : vector<1x2x32xf32> to vector<2x32xf32>
    %273 = arith.addf %270, %272 : vector<2x32xf32>
    %274 = arith.negf %273 : vector<2x32xf32>
    %275 = math.exp %274 : vector<2x32xf32>
    %cst_178 = arith.constant 1.000000e+00 : f32
    %276 = vector.broadcast %cst_178 : f32 to vector<2x32xf32>
    %277 = arith.addf %276, %275 : vector<2x32xf32>
    %278 = arith.divf %276, %277 : vector<2x32xf32>
    %c0_179 = arith.constant 0 : index
    %c2_180 = arith.constant 2 : index
    %c0_181 = arith.constant 0 : index
    %c64_182 = arith.constant 64 : index
    %279 = vector.load %arg13[%c0_179, %c2_180, %c0_181, %c64_182] : memref<2x8x2x128xf32, #tpu.memory_space<vmem>>, vector<1x1x2x32xf32>
    %280 = vector.shape_cast %279 : vector<1x1x2x32xf32> to vector<2x32xf32>
    %281 = vector.extract_strided_slice %258 {offsets = [0, 0, 64], sizes = [1, 2, 32], strides = [1, 1, 1]} : vector<2x2x128xf32> to vector<1x2x32xf32>
    %282 = vector.shape_cast %281 : vector<1x2x32xf32> to vector<2x32xf32>
    %283 = arith.addf %280, %282 : vector<2x32xf32>
    %284 = math.tanh %283 : vector<2x32xf32>
    %c0_183 = arith.constant 0 : index
    %c2_184 = arith.constant 2 : index
    %c0_185 = arith.constant 0 : index
    %c96_186 = arith.constant 96 : index
    %285 = vector.load %arg13[%c0_183, %c2_184, %c0_185, %c96_186] : memref<2x8x2x128xf32, #tpu.memory_space<vmem>>, vector<1x1x2x32xf32>
    %286 = vector.shape_cast %285 : vector<1x1x2x32xf32> to vector<2x32xf32>
    %287 = vector.extract_strided_slice %258 {offsets = [0, 0, 96], sizes = [1, 2, 32], strides = [1, 1, 1]} : vector<2x2x128xf32> to vector<1x2x32xf32>
    %288 = vector.shape_cast %287 : vector<1x2x32xf32> to vector<2x32xf32>
    %289 = arith.addf %286, %288 : vector<2x32xf32>
    %290 = arith.negf %289 : vector<2x32xf32>
    %291 = math.exp %290 : vector<2x32xf32>
    %cst_187 = arith.constant 1.000000e+00 : f32
    %292 = vector.broadcast %cst_187 : f32 to vector<2x32xf32>
    %293 = arith.addf %292, %291 : vector<2x32xf32>
    %294 = arith.divf %292, %293 : vector<2x32xf32>
    %c0_188 = arith.constant 0 : index
    %c0_189 = arith.constant 0 : index
    %c0_190 = arith.constant 0 : index
    %295 = vector.load %arg15[%c0_188, %c0_189, %c0_190] : memref<2x2x32xf32, #tpu.memory_space<vmem>>, vector<1x2x32xf32>
    %296 = vector.shape_cast %295 : vector<1x2x32xf32> to vector<2x32xf32>
    %297 = arith.mulf %278, %296 : vector<2x32xf32>
    %298 = arith.mulf %268, %284 : vector<2x32xf32>
    %299 = arith.addf %297, %298 : vector<2x32xf32>
    %300 = math.tanh %299 : vector<2x32xf32>
    %301 = arith.mulf %294, %300 : vector<2x32xf32>
    %c0_191 = arith.constant 0 : index
    %c0_192 = arith.constant 0 : index
    %c0_193 = arith.constant 0 : index
    %302 = vector.load %arg15[%c0_191, %c0_192, %c0_193] : memref<2x2x32xf32, #tpu.memory_space<vmem>>, vector<1x2x32xf32>
    %303 = vector.shape_cast %302 : vector<1x2x32xf32> to vector<2x32xf32>
    %304 = vector.shape_cast %299 : vector<2x32xf32> to vector<1x2x32xf32>
    tpu.vector_store %arg15[%c0_191, %c0_192, %c0_193], %304 {strides = array<i32>} : memref<2x2x32xf32, #tpu.memory_space<vmem>>, vector<1x2x32xf32>,
    %c0_194 = arith.constant 0 : index
    %c0_195 = arith.constant 0 : index
    %c0_196 = arith.constant 0 : index
    %305 = vector.load %arg14[%c0_194, %c0_195, %c0_196] : memref<2x2x32xf32, #tpu.memory_space<vmem>>, vector<1x2x32xf32>
    %306 = vector.shape_cast %305 : vector<1x2x32xf32> to vector<2x32xf32>
    %307 = vector.shape_cast %301 : vector<2x32xf32> to vector<1x2x32xf32>
    tpu.vector_store %arg14[%c0_194, %c0_195, %c0_196], %307 {strides = array<i32>} : memref<2x2x32xf32, #tpu.memory_space<vmem>>, vector<1x2x32xf32>,
    %308 = arith.truncf %301 : vector<2x32xf32> to vector<2x32xbf16>
    %c0_197 = arith.constant 0 : index
    %c2_198 = arith.constant 2 : index
    %c0_199 = arith.constant 0 : index
    %309 = vector.load %arg11[%c0_197, %c2_198, %c0_199] : memref<2x8x32xbf16, #tpu.memory_space<vmem>>, vector<2x1x32xbf16>
    %310 = vector.shape_cast %309 : vector<2x1x32xbf16> to vector<2x32xbf16>
    %311 = vector.shape_cast %308 : vector<2x32xbf16> to vector<2x1x32xbf16>
    tpu.vector_store %arg11[%c0_197, %c2_198, %c0_199], %311 {strides = array<i32>} : memref<2x8x32xbf16, #tpu.memory_space<vmem>>, vector<2x1x32xbf16>,
    %c1_200 = arith.constant 1 : index
    %c5 = arith.constant 5 : index
    %c0_201 = arith.constant 0 : index
    %c0_202 = arith.constant 0 : index
    %312 = vector.load %arg13[%c1_200, %c5, %c0_201, %c0_202] : memref<2x8x2x128xf32, #tpu.memory_space<vmem>>, vector<1x1x2x32xf32>
    %313 = vector.shape_cast %312 : vector<1x1x2x32xf32> to vector<2x32xf32>
    %314 = vector.extract_strided_slice %258 {offsets = [1, 0, 0], sizes = [1, 2, 32], strides = [1, 1, 1]} : vector<2x2x128xf32> to vector<1x2x32xf32>
    %315 = vector.shape_cast %314 : vector<1x2x32xf32> to vector<2x32xf32>
    %316 = arith.addf %313, %315 : vector<2x32xf32>
    %317 = arith.negf %316 : vector<2x32xf32>
    %318 = math.exp %317 : vector<2x32xf32>
    %cst_203 = arith.constant 1.000000e+00 : f32
    %319 = vector.broadcast %cst_203 : f32 to vector<2x32xf32>
    %320 = arith.addf %319, %318 : vector<2x32xf32>
    %321 = arith.divf %319, %320 : vector<2x32xf32>
    %c1_204 = arith.constant 1 : index
    %c5_205 = arith.constant 5 : index
    %c0_206 = arith.constant 0 : index
    %c32_207 = arith.constant 32 : index
    %322 = vector.load %arg13[%c1_204, %c5_205, %c0_206, %c32_207] : memref<2x8x2x128xf32, #tpu.memory_space<vmem>>, vector<1x1x2x32xf32>
    %323 = vector.shape_cast %322 : vector<1x1x2x32xf32> to vector<2x32xf32>
    %324 = vector.extract_strided_slice %258 {offsets = [1, 0, 32], sizes = [1, 2, 32], strides = [1, 1, 1]} : vector<2x2x128xf32> to vector<1x2x32xf32>
    %325 = vector.shape_cast %324 : vector<1x2x32xf32> to vector<2x32xf32>
    %326 = arith.addf %323, %325 : vector<2x32xf32>
    %327 = arith.negf %326 : vector<2x32xf32>
    %328 = math.exp %327 : vector<2x32xf32>
    %cst_208 = arith.constant 1.000000e+00 : f32
    %329 = vector.broadcast %cst_208 : f32 to vector<2x32xf32>
    %330 = arith.addf %329, %328 : vector<2x32xf32>
    %331 = arith.divf %329, %330 : vector<2x32xf32>
    %c1_209 = arith.constant 1 : index
    %c5_210 = arith.constant 5 : index
    %c0_211 = arith.constant 0 : index
    %c64_212 = arith.constant 64 : index
    %332 = vector.load %arg13[%c1_209, %c5_210, %c0_211, %c64_212] : memref<2x8x2x128xf32, #tpu.memory_space<vmem>>, vector<1x1x2x32xf32>
    %333 = vector.shape_cast %332 : vector<1x1x2x32xf32> to vector<2x32xf32>
    %334 = vector.extract_strided_slice %258 {offsets = [1, 0, 64], sizes = [1, 2, 32], strides = [1, 1, 1]} : vector<2x2x128xf32> to vector<1x2x32xf32>
    %335 = vector.shape_cast %334 : vector<1x2x32xf32> to vector<2x32xf32>
    %336 = arith.addf %333, %335 : vector<2x32xf32>
    %337 = math.tanh %336 : vector<2x32xf32>
    %c1_213 = arith.constant 1 : index
    %c5_214 = arith.constant 5 : index
    %c0_215 = arith.constant 0 : index
    %c96_216 = arith.constant 96 : index
    %338 = vector.load %arg13[%c1_213, %c5_214, %c0_215, %c96_216] : memref<2x8x2x128xf32, #tpu.memory_space<vmem>>, vector<1x1x2x32xf32>
    %339 = vector.shape_cast %338 : vector<1x1x2x32xf32> to vector<2x32xf32>
    %340 = vector.extract_strided_slice %258 {offsets = [1, 0, 96], sizes = [1, 2, 32], strides = [1, 1, 1]} : vector<2x2x128xf32> to vector<1x2x32xf32>
    %341 = vector.shape_cast %340 : vector<1x2x32xf32> to vector<2x32xf32>
    %342 = arith.addf %339, %341 : vector<2x32xf32>
    %343 = arith.negf %342 : vector<2x32xf32>
    %344 = math.exp %343 : vector<2x32xf32>
    %cst_217 = arith.constant 1.000000e+00 : f32
    %345 = vector.broadcast %cst_217 : f32 to vector<2x32xf32>
    %346 = arith.addf %345, %344 : vector<2x32xf32>
    %347 = arith.divf %345, %346 : vector<2x32xf32>
    %c1_218 = arith.constant 1 : index
    %c0_219 = arith.constant 0 : index
    %c0_220 = arith.constant 0 : index
    %348 = vector.load %arg15[%c1_218, %c0_219, %c0_220] : memref<2x2x32xf32, #tpu.memory_space<vmem>>, vector<1x2x32xf32>
    %349 = vector.shape_cast %348 : vector<1x2x32xf32> to vector<2x32xf32>
    %350 = arith.mulf %331, %349 : vector<2x32xf32>
    %351 = arith.mulf %321, %337 : vector<2x32xf32>
    %352 = arith.addf %350, %351 : vector<2x32xf32>
    %353 = math.tanh %352 : vector<2x32xf32>
    %354 = arith.mulf %347, %353 : vector<2x32xf32>
    %c1_221 = arith.constant 1 : index
    %c0_222 = arith.constant 0 : index
    %c0_223 = arith.constant 0 : index
    %355 = vector.load %arg15[%c1_221, %c0_222, %c0_223] : memref<2x2x32xf32, #tpu.memory_space<vmem>>, vector<1x2x32xf32>
    %356 = vector.shape_cast %355 : vector<1x2x32xf32> to vector<2x32xf32>
    %357 = vector.shape_cast %352 : vector<2x32xf32> to vector<1x2x32xf32>
    tpu.vector_store %arg15[%c1_221, %c0_222, %c0_223], %357 {strides = array<i32>} : memref<2x2x32xf32, #tpu.memory_space<vmem>>, vector<1x2x32xf32>,
    %c1_224 = arith.constant 1 : index
    %c0_225 = arith.constant 0 : index
    %c0_226 = arith.constant 0 : index
    %358 = vector.load %arg14[%c1_224, %c0_225, %c0_226] : memref<2x2x32xf32, #tpu.memory_space<vmem>>, vector<1x2x32xf32>
    %359 = vector.shape_cast %358 : vector<1x2x32xf32> to vector<2x32xf32>
    %360 = vector.shape_cast %354 : vector<2x32xf32> to vector<1x2x32xf32>
    tpu.vector_store %arg14[%c1_224, %c0_225, %c0_226], %360 {strides = array<i32>} : memref<2x2x32xf32, #tpu.memory_space<vmem>>, vector<1x2x32xf32>,
    %361 = arith.truncf %354 : vector<2x32xf32> to vector<2x32xbf16>
    %c0_227 = arith.constant 0 : index
    %c5_228 = arith.constant 5 : index
    %c0_229 = arith.constant 0 : index
    %362 = vector.load %arg12[%c0_227, %c5_228, %c0_229] : memref<2x8x32xbf16, #tpu.memory_space<vmem>>, vector<2x1x32xbf16>
    %363 = vector.shape_cast %362 : vector<2x1x32xbf16> to vector<2x32xbf16>
    %364 = vector.shape_cast %361 : vector<2x32xbf16> to vector<2x1x32xbf16>
    tpu.vector_store %arg12[%c0_227, %c5_228, %c0_229], %364 {strides = array<i32>} : memref<2x8x32xbf16, #tpu.memory_space<vmem>>, vector<2x1x32xbf16>,
    %c0_230 = arith.constant 0 : index
    %c0_231 = arith.constant 0 : index
    %c0_232 = arith.constant 0 : index
    %365 = vector.load %arg14[%c0_230, %c0_231, %c0_232] : memref<2x2x32xf32, #tpu.memory_space<vmem>>, vector<2x2x32xf32>
    %366 = arith.truncf %365 : vector<2x2x32xf32> to vector<2x2x32xbf16>
    "tpu.trace_start"() <{level = 10 : i32, message = "dbh,dhg->dbg"}> : () -> ()
    %cst_233 = arith.constant dense<0.000000e+00> : vector<2x2x128xf32>
    %367 = tpu.matmul %366, %37, %cst_233 {dimension_numbers = #tpu.dot_dimension_numbers<[2], [1], [1], [2], [0, 0, 0, 1, 1, 2], [0], [0]>} : vector<2x2x32xbf16>, vector<2x32x128xbf16>, vector<2x2x128xf32> -> vector<2x2x128xf32>
    "tpu.trace_stop"() : () -> ()
    %c0_234 = arith.constant 0 : index
    %c3 = arith.constant 3 : index
    %c0_235 = arith.constant 0 : index
    %c0_236 = arith.constant 0 : index
    %368 = vector.load %arg13[%c0_234, %c3, %c0_235, %c0_236] : memref<2x8x2x128xf32, #tpu.memory_space<vmem>>, vector<1x1x2x32xf32>
    %369 = vector.shape_cast %368 : vector<1x1x2x32xf32> to vector<2x32xf32>
    %370 = vector.extract_strided_slice %367 {offsets = [0, 0, 0], sizes = [1, 2, 32], strides = [1, 1, 1]} : vector<2x2x128xf32> to vector<1x2x32xf32>
    %371 = vector.shape_cast %370 : vector<1x2x32xf32> to vector<2x32xf32>
    %372 = arith.addf %369, %371 : vector<2x32xf32>
    %373 = arith.negf %372 : vector<2x32xf32>
    %374 = math.exp %373 : vector<2x32xf32>
    %cst_237 = arith.constant 1.000000e+00 : f32
    %375 = vector.broadcast %cst_237 : f32 to vector<2x32xf32>
    %376 = arith.addf %375, %374 : vector<2x32xf32>
    %377 = arith.divf %375, %376 : vector<2x32xf32>
    %c0_238 = arith.constant 0 : index
    %c3_239 = arith.constant 3 : index
    %c0_240 = arith.constant 0 : index
    %c32_241 = arith.constant 32 : index
    %378 = vector.load %arg13[%c0_238, %c3_239, %c0_240, %c32_241] : memref<2x8x2x128xf32, #tpu.memory_space<vmem>>, vector<1x1x2x32xf32>
    %379 = vector.shape_cast %378 : vector<1x1x2x32xf32> to vector<2x32xf32>
    %380 = vector.extract_strided_slice %367 {offsets = [0, 0, 32], sizes = [1, 2, 32], strides = [1, 1, 1]} : vector<2x2x128xf32> to vector<1x2x32xf32>
    %381 = vector.shape_cast %380 : vector<1x2x32xf32> to vector<2x32xf32>
    %382 = arith.addf %379, %381 : vector<2x32xf32>
    %383 = arith.negf %382 : vector<2x32xf32>
    %384 = math.exp %383 : vector<2x32xf32>
    %cst_242 = arith.constant 1.000000e+00 : f32
    %385 = vector.broadcast %cst_242 : f32 to vector<2x32xf32>
    %386 = arith.addf %385, %384 : vector<2x32xf32>
    %387 = arith.divf %385, %386 : vector<2x32xf32>
    %c0_243 = arith.constant 0 : index
    %c3_244 = arith.constant 3 : index
    %c0_245 = arith.constant 0 : index
    %c64_246 = arith.constant 64 : index
    %388 = vector.load %arg13[%c0_243, %c3_244, %c0_245, %c64_246] : memref<2x8x2x128xf32, #tpu.memory_space<vmem>>, vector<1x1x2x32xf32>
    %389 = vector.shape_cast %388 : vector<1x1x2x32xf32> to vector<2x32xf32>
    %390 = vector.extract_strided_slice %367 {offsets = [0, 0, 64], sizes = [1, 2, 32], strides = [1, 1, 1]} : vector<2x2x128xf32> to vector<1x2x32xf32>
    %391 = vector.shape_cast %390 : vector<1x2x32xf32> to vector<2x32xf32>
    %392 = arith.addf %389, %391 : vector<2x32xf32>
    %393 = math.tanh %392 : vector<2x32xf32>
    %c0_247 = arith.constant 0 : index
    %c3_248 = arith.constant 3 : index
    %c0_249 = arith.constant 0 : index
    %c96_250 = arith.constant 96 : index
    %394 = vector.load %arg13[%c0_247, %c3_248, %c0_249, %c96_250] : memref<2x8x2x128xf32, #tpu.memory_space<vmem>>, vector<1x1x2x32xf32>
    %395 = vector.shape_cast %394 : vector<1x1x2x32xf32> to vector<2x32xf32>
    %396 = vector.extract_strided_slice %367 {offsets = [0, 0, 96], sizes = [1, 2, 32], strides = [1, 1, 1]} : vector<2x2x128xf32> to vector<1x2x32xf32>
    %397 = vector.shape_cast %396 : vector<1x2x32xf32> to vector<2x32xf32>
    %398 = arith.addf %395, %397 : vector<2x32xf32>
    %399 = arith.negf %398 : vector<2x32xf32>
    %400 = math.exp %399 : vector<2x32xf32>
    %cst_251 = arith.constant 1.000000e+00 : f32
    %401 = vector.broadcast %cst_251 : f32 to vector<2x32xf32>
    %402 = arith.addf %401, %400 : vector<2x32xf32>
    %403 = arith.divf %401, %402 : vector<2x32xf32>
    %c0_252 = arith.constant 0 : index
    %c0_253 = arith.constant 0 : index
    %c0_254 = arith.constant 0 : index
    %404 = vector.load %arg15[%c0_252, %c0_253, %c0_254] : memref<2x2x32xf32, #tpu.memory_space<vmem>>, vector<1x2x32xf32>
    %405 = vector.shape_cast %404 : vector<1x2x32xf32> to vector<2x32xf32>
    %406 = arith.mulf %387, %405 : vector<2x32xf32>
    %407 = arith.mulf %377, %393 : vector<2x32xf32>
    %408 = arith.addf %406, %407 : vector<2x32xf32>
    %409 = math.tanh %408 : vector<2x32xf32>
    %410 = arith.mulf %403, %409 : vector<2x32xf32>
    %c0_255 = arith.constant 0 : index
    %c0_256 = arith.constant 0 : index
    %c0_257 = arith.constant 0 : index
    %411 = vector.load %arg15[%c0_255, %c0_256, %c0_257] : memref<2x2x32xf32, #tpu.memory_space<vmem>>, vector<1x2x32xf32>
    %412 = vector.shape_cast %411 : vector<1x2x32xf32> to vector<2x32xf32>
    %413 = vector.shape_cast %408 : vector<2x32xf32> to vector<1x2x32xf32>
    tpu.vector_store %arg15[%c0_255, %c0_256, %c0_257], %413 {strides = array<i32>} : memref<2x2x32xf32, #tpu.memory_space<vmem>>, vector<1x2x32xf32>,
    %c0_258 = arith.constant 0 : index
    %c0_259 = arith.constant 0 : index
    %c0_260 = arith.constant 0 : index
    %414 = vector.load %arg14[%c0_258, %c0_259, %c0_260] : memref<2x2x32xf32, #tpu.memory_space<vmem>>, vector<1x2x32xf32>
    %415 = vector.shape_cast %414 : vector<1x2x32xf32> to vector<2x32xf32>
    %416 = vector.shape_cast %410 : vector<2x32xf32> to vector<1x2x32xf32>
    tpu.vector_store %arg14[%c0_258, %c0_259, %c0_260], %416 {strides = array<i32>} : memref<2x2x32xf32, #tpu.memory_space<vmem>>, vector<1x2x32xf32>,
    %417 = arith.truncf %410 : vector<2x32xf32> to vector<2x32xbf16>
    %c0_261 = arith.constant 0 : index
    %c3_262 = arith.constant 3 : index
    %c0_263 = arith.constant 0 : index
    %418 = vector.load %arg11[%c0_261, %c3_262, %c0_263] : memref<2x8x32xbf16, #tpu.memory_space<vmem>>, vector<2x1x32xbf16>
    %419 = vector.shape_cast %418 : vector<2x1x32xbf16> to vector<2x32xbf16>
    %420 = vector.shape_cast %417 : vector<2x32xbf16> to vector<2x1x32xbf16>
    tpu.vector_store %arg11[%c0_261, %c3_262, %c0_263], %420 {strides = array<i32>} : memref<2x8x32xbf16, #tpu.memory_space<vmem>>, vector<2x1x32xbf16>,
    %c1_264 = arith.constant 1 : index
    %c4 = arith.constant 4 : index
    %c0_265 = arith.constant 0 : index
    %c0_266 = arith.constant 0 : index
    %421 = vector.load %arg13[%c1_264, %c4, %c0_265, %c0_266] : memref<2x8x2x128xf32, #tpu.memory_space<vmem>>, vector<1x1x2x32xf32>
    %422 = vector.shape_cast %421 : vector<1x1x2x32xf32> to vector<2x32xf32>
    %423 = vector.extract_strided_slice %367 {offsets = [1, 0, 0], sizes = [1, 2, 32], strides = [1, 1, 1]} : vector<2x2x128xf32> to vector<1x2x32xf32>
    %424 = vector.shape_cast %423 : vector<1x2x32xf32> to vector<2x32xf32>
    %425 = arith.addf %422, %424 : vector<2x32xf32>
    %426 = arith.negf %425 : vector<2x32xf32>
    %427 = math.exp %426 : vector<2x32xf32>
    %cst_267 = arith.constant 1.000000e+00 : f32
    %428 = vector.broadcast %cst_267 : f32 to vector<2x32xf32>
    %429 = arith.addf %428, %427 : vector<2x32xf32>
    %430 = arith.divf %428, %429 : vector<2x32xf32>
    %c1_268 = arith.constant 1 : index
    %c4_269 = arith.constant 4 : index
    %c0_270 = arith.constant 0 : index
    %c32_271 = arith.constant 32 : index
    %431 = vector.load %arg13[%c1_268, %c4_269, %c0_270, %c32_271] : memref<2x8x2x128xf32, #tpu.memory_space<vmem>>, vector<1x1x2x32xf32>
    %432 = vector.shape_cast %431 : vector<1x1x2x32xf32> to vector<2x32xf32>
    %433 = vector.extract_strided_slice %367 {offsets = [1, 0, 32], sizes = [1, 2, 32], strides = [1, 1, 1]} : vector<2x2x128xf32> to vector<1x2x32xf32>
    %434 = vector.shape_cast %433 : vector<1x2x32xf32> to vector<2x32xf32>
    %435 = arith.addf %432, %434 : vector<2x32xf32>
    %436 = arith.negf %435 : vector<2x32xf32>
    %437 = math.exp %436 : vector<2x32xf32>
    %cst_272 = arith.constant 1.000000e+00 : f32
    %438 = vector.broadcast %cst_272 : f32 to vector<2x32xf32>
    %439 = arith.addf %438, %437 : vector<2x32xf32>
    %440 = arith.divf %438, %439 : vector<2x32xf32>
    %c1_273 = arith.constant 1 : index
    %c4_274 = arith.constant 4 : index
    %c0_275 = arith.constant 0 : index
    %c64_276 = arith.constant 64 : index
    %441 = vector.load %arg13[%c1_273, %c4_274, %c0_275, %c64_276] : memref<2x8x2x128xf32, #tpu.memory_space<vmem>>, vector<1x1x2x32xf32>
    %442 = vector.shape_cast %441 : vector<1x1x2x32xf32> to vector<2x32xf32>
    %443 = vector.extract_strided_slice %367 {offsets = [1, 0, 64], sizes = [1, 2, 32], strides = [1, 1, 1]} : vector<2x2x128xf32> to vector<1x2x32xf32>
    %444 = vector.shape_cast %443 : vector<1x2x32xf32> to vector<2x32xf32>
    %445 = arith.addf %442, %444 : vector<2x32xf32>
    %446 = math.tanh %445 : vector<2x32xf32>
    %c1_277 = arith.constant 1 : index
    %c4_278 = arith.constant 4 : index
    %c0_279 = arith.constant 0 : index
    %c96_280 = arith.constant 96 : index
    %447 = vector.load %arg13[%c1_277, %c4_278, %c0_279, %c96_280] : memref<2x8x2x128xf32, #tpu.memory_space<vmem>>, vector<1x1x2x32xf32>
    %448 = vector.shape_cast %447 : vector<1x1x2x32xf32> to vector<2x32xf32>
    %449 = vector.extract_strided_slice %367 {offsets = [1, 0, 96], sizes = [1, 2, 32], strides = [1, 1, 1]} : vector<2x2x128xf32> to vector<1x2x32xf32>
    %450 = vector.shape_cast %449 : vector<1x2x32xf32> to vector<2x32xf32>
    %451 = arith.addf %448, %450 : vector<2x32xf32>
    %452 = arith.negf %451 : vector<2x32xf32>
    %453 = math.exp %452 : vector<2x32xf32>
    %cst_281 = arith.constant 1.000000e+00 : f32
    %454 = vector.broadcast %cst_281 : f32 to vector<2x32xf32>
    %455 = arith.addf %454, %453 : vector<2x32xf32>
    %456 = arith.divf %454, %455 : vector<2x32xf32>
    %c1_282 = arith.constant 1 : index
    %c0_283 = arith.constant 0 : index
    %c0_284 = arith.constant 0 : index
    %457 = vector.load %arg15[%c1_282, %c0_283, %c0_284] : memref<2x2x32xf32, #tpu.memory_space<vmem>>, vector<1x2x32xf32>
    %458 = vector.shape_cast %457 : vector<1x2x32xf32> to vector<2x32xf32>
    %459 = arith.mulf %440, %458 : vector<2x32xf32>
    %460 = arith.mulf %430, %446 : vector<2x32xf32>
    %461 = arith.addf %459, %460 : vector<2x32xf32>
    %462 = math.tanh %461 : vector<2x32xf32>
    %463 = arith.mulf %456, %462 : vector<2x32xf32>
    %c1_285 = arith.constant 1 : index
    %c0_286 = arith.constant 0 : index
    %c0_287 = arith.constant 0 : index
    %464 = vector.load %arg15[%c1_285, %c0_286, %c0_287] : memref<2x2x32xf32, #tpu.memory_space<vmem>>, vector<1x2x32xf32>
    %465 = vector.shape_cast %464 : vector<1x2x32xf32> to vector<2x32xf32>
    %466 = vector.shape_cast %461 : vector<2x32xf32> to vector<1x2x32xf32>
    tpu.vector_store %arg15[%c1_285, %c0_286, %c0_287], %466 {strides = array<i32>} : memref<2x2x32xf32, #tpu.memory_space<vmem>>, vector<1x2x32xf32>,
    %c1_288 = arith.constant 1 : index
    %c0_289 = arith.constant 0 : index
    %c0_290 = arith.constant 0 : index
    %467 = vector.load %arg14[%c1_288, %c0_289, %c0_290] : memref<2x2x32xf32, #tpu.memory_space<vmem>>, vector<1x2x32xf32>
    %468 = vector.shape_cast %467 : vector<1x2x32xf32> to vector<2x32xf32>
    %469 = vector.shape_cast %463 : vector<2x32xf32> to vector<1x2x32xf32>
    tpu.vector_store %arg14[%c1_288, %c0_289, %c0_290], %469 {strides = array<i32>} : memref<2x2x32xf32, #tpu.memory_space<vmem>>, vector<1x2x32xf32>,
    %470 = arith.truncf %463 : vector<2x32xf32> to vector<2x32xbf16>
    %c0_291 = arith.constant 0 : index
    %c4_292 = arith.constant 4 : index
    %c0_293 = arith.constant 0 : index
    %471 = vector.load %arg12[%c0_291, %c4_292, %c0_293] : memref<2x8x32xbf16, #tpu.memory_space<vmem>>, vector<2x1x32xbf16>
    %472 = vector.shape_cast %471 : vector<2x1x32xbf16> to vector<2x32xbf16>
    %473 = vector.shape_cast %470 : vector<2x32xbf16> to vector<2x1x32xbf16>
    tpu.vector_store %arg12[%c0_291, %c4_292, %c0_293], %473 {strides = array<i32>} : memref<2x8x32xbf16, #tpu.memory_space<vmem>>, vector<2x1x32xbf16>,
    %c0_294 = arith.constant 0 : index
    %c0_295 = arith.constant 0 : index
    %c0_296 = arith.constant 0 : index
    %474 = vector.load %arg14[%c0_294, %c0_295, %c0_296] : memref<2x2x32xf32, #tpu.memory_space<vmem>>, vector<2x2x32xf32>
    %475 = arith.truncf %474 : vector<2x2x32xf32> to vector<2x2x32xbf16>
    "tpu.trace_start"() <{level = 10 : i32, message = "dbh,dhg->dbg"}> : () -> ()
    %cst_297 = arith.constant dense<0.000000e+00> : vector<2x2x128xf32>
    %476 = tpu.matmul %475, %37, %cst_297 {dimension_numbers = #tpu.dot_dimension_numbers<[2], [1], [1], [2], [0, 0, 0, 1, 1, 2], [0], [0]>} : vector<2x2x32xbf16>, vector<2x32x128xbf16>, vector<2x2x128xf32> -> vector<2x2x128xf32>
    "tpu.trace_stop"() : () -> ()
    %c0_298 = arith.constant 0 : index
    %c4_299 = arith.constant 4 : index
    %c0_300 = arith.constant 0 : index
    %c0_301 = arith.constant 0 : index
    %477 = vector.load %arg13[%c0_298, %c4_299, %c0_300, %c0_301] : memref<2x8x2x128xf32, #tpu.memory_space<vmem>>, vector<1x1x2x32xf32>
    %478 = vector.shape_cast %477 : vector<1x1x2x32xf32> to vector<2x32xf32>
    %479 = vector.extract_strided_slice %476 {offsets = [0, 0, 0], sizes = [1, 2, 32], strides = [1, 1, 1]} : vector<2x2x128xf32> to vector<1x2x32xf32>
    %480 = vector.shape_cast %479 : vector<1x2x32xf32> to vector<2x32xf32>
    %481 = arith.addf %478, %480 : vector<2x32xf32>
    %482 = arith.negf %481 : vector<2x32xf32>
    %483 = math.exp %482 : vector<2x32xf32>
    %cst_302 = arith.constant 1.000000e+00 : f32
    %484 = vector.broadcast %cst_302 : f32 to vector<2x32xf32>
    %485 = arith.addf %484, %483 : vector<2x32xf32>
    %486 = arith.divf %484, %485 : vector<2x32xf32>
    %c0_303 = arith.constant 0 : index
    %c4_304 = arith.constant 4 : index
    %c0_305 = arith.constant 0 : index
    %c32_306 = arith.constant 32 : index
    %487 = vector.load %arg13[%c0_303, %c4_304, %c0_305, %c32_306] : memref<2x8x2x128xf32, #tpu.memory_space<vmem>>, vector<1x1x2x32xf32>
    %488 = vector.shape_cast %487 : vector<1x1x2x32xf32> to vector<2x32xf32>
    %489 = vector.extract_strided_slice %476 {offsets = [0, 0, 32], sizes = [1, 2, 32], strides = [1, 1, 1]} : vector<2x2x128xf32> to vector<1x2x32xf32>
    %490 = vector.shape_cast %489 : vector<1x2x32xf32> to vector<2x32xf32>
    %491 = arith.addf %488, %490 : vector<2x32xf32>
    %492 = arith.negf %491 : vector<2x32xf32>
    %493 = math.exp %492 : vector<2x32xf32>
    %cst_307 = arith.constant 1.000000e+00 : f32
    %494 = vector.broadcast %cst_307 : f32 to vector<2x32xf32>
    %495 = arith.addf %494, %493 : vector<2x32xf32>
    %496 = arith.divf %494, %495 : vector<2x32xf32>
    %c0_308 = arith.constant 0 : index
    %c4_309 = arith.constant 4 : index
    %c0_310 = arith.constant 0 : index
    %c64_311 = arith.constant 64 : index
    %497 = vector.load %arg13[%c0_308, %c4_309, %c0_310, %c64_311] : memref<2x8x2x128xf32, #tpu.memory_space<vmem>>, vector<1x1x2x32xf32>
    %498 = vector.shape_cast %497 : vector<1x1x2x32xf32> to vector<2x32xf32>
    %499 = vector.extract_strided_slice %476 {offsets = [0, 0, 64], sizes = [1, 2, 32], strides = [1, 1, 1]} : vector<2x2x128xf32> to vector<1x2x32xf32>
    %500 = vector.shape_cast %499 : vector<1x2x32xf32> to vector<2x32xf32>
    %501 = arith.addf %498, %500 : vector<2x32xf32>
    %502 = math.tanh %501 : vector<2x32xf32>
    %c0_312 = arith.constant 0 : index
    %c4_313 = arith.constant 4 : index
    %c0_314 = arith.constant 0 : index
    %c96_315 = arith.constant 96 : index
    %503 = vector.load %arg13[%c0_312, %c4_313, %c0_314, %c96_315] : memref<2x8x2x128xf32, #tpu.memory_space<vmem>>, vector<1x1x2x32xf32>
    %504 = vector.shape_cast %503 : vector<1x1x2x32xf32> to vector<2x32xf32>
    %505 = vector.extract_strided_slice %476 {offsets = [0, 0, 96], sizes = [1, 2, 32], strides = [1, 1, 1]} : vector<2x2x128xf32> to vector<1x2x32xf32>
    %506 = vector.shape_cast %505 : vector<1x2x32xf32> to vector<2x32xf32>
    %507 = arith.addf %504, %506 : vector<2x32xf32>
    %508 = arith.negf %507 : vector<2x32xf32>
    %509 = math.exp %508 : vector<2x32xf32>
    %cst_316 = arith.constant 1.000000e+00 : f32
    %510 = vector.broadcast %cst_316 : f32 to vector<2x32xf32>
    %511 = arith.addf %510, %509 : vector<2x32xf32>
    %512 = arith.divf %510, %511 : vector<2x32xf32>
    %c0_317 = arith.constant 0 : index
    %c0_318 = arith.constant 0 : index
    %c0_319 = arith.constant 0 : index
    %513 = vector.load %arg15[%c0_317, %c0_318, %c0_319] : memref<2x2x32xf32, #tpu.memory_space<vmem>>, vector<1x2x32xf32>
    %514 = vector.shape_cast %513 : vector<1x2x32xf32> to vector<2x32xf32>
    %515 = arith.mulf %496, %514 : vector<2x32xf32>
    %516 = arith.mulf %486, %502 : vector<2x32xf32>
    %517 = arith.addf %515, %516 : vector<2x32xf32>
    %518 = math.tanh %517 : vector<2x32xf32>
    %519 = arith.mulf %512, %518 : vector<2x32xf32>
    %c0_320 = arith.constant 0 : index
    %c0_321 = arith.constant 0 : index
    %c0_322 = arith.constant 0 : index
    %520 = vector.load %arg15[%c0_320, %c0_321, %c0_322] : memref<2x2x32xf32, #tpu.memory_space<vmem>>, vector<1x2x32xf32>
    %521 = vector.shape_cast %520 : vector<1x2x32xf32> to vector<2x32xf32>
    %522 = vector.shape_cast %517 : vector<2x32xf32> to vector<1x2x32xf32>
    tpu.vector_store %arg15[%c0_320, %c0_321, %c0_322], %522 {strides = array<i32>} : memref<2x2x32xf32, #tpu.memory_space<vmem>>, vector<1x2x32xf32>,
    %c0_323 = arith.constant 0 : index
    %c0_324 = arith.constant 0 : index
    %c0_325 = arith.constant 0 : index
    %523 = vector.load %arg14[%c0_323, %c0_324, %c0_325] : memref<2x2x32xf32, #tpu.memory_space<vmem>>, vector<1x2x32xf32>
    %524 = vector.shape_cast %523 : vector<1x2x32xf32> to vector<2x32xf32>
    %525 = vector.shape_cast %519 : vector<2x32xf32> to vector<1x2x32xf32>
    tpu.vector_store %arg14[%c0_323, %c0_324, %c0_325], %525 {strides = array<i32>} : memref<2x2x32xf32, #tpu.memory_space<vmem>>, vector<1x2x32xf32>,
    %526 = arith.truncf %519 : vector<2x32xf32> to vector<2x32xbf16>
    %c0_326 = arith.constant 0 : index
    %c4_327 = arith.constant 4 : index
    %c0_328 = arith.constant 0 : index
    %527 = vector.load %arg11[%c0_326, %c4_327, %c0_328] : memref<2x8x32xbf16, #tpu.memory_space<vmem>>, vector<2x1x32xbf16>
    %528 = vector.shape_cast %527 : vector<2x1x32xbf16> to vector<2x32xbf16>
    %529 = vector.shape_cast %526 : vector<2x32xbf16> to vector<2x1x32xbf16>
    tpu.vector_store %arg11[%c0_326, %c4_327, %c0_328], %529 {strides = array<i32>} : memref<2x8x32xbf16, #tpu.memory_space<vmem>>, vector<2x1x32xbf16>,
    %c1_329 = arith.constant 1 : index
    %c3_330 = arith.constant 3 : index
    %c0_331 = arith.constant 0 : index
    %c0_332 = arith.constant 0 : index
    %530 = vector.load %arg13[%c1_329, %c3_330, %c0_331, %c0_332] : memref<2x8x2x128xf32, #tpu.memory_space<vmem>>, vector<1x1x2x32xf32>
    %531 = vector.shape_cast %530 : vector<1x1x2x32xf32> to vector<2x32xf32>
    %532 = vector.extract_strided_slice %476 {offsets = [1, 0, 0], sizes = [1, 2, 32], strides = [1, 1, 1]} : vector<2x2x128xf32> to vector<1x2x32xf32>
    %533 = vector.shape_cast %532 : vector<1x2x32xf32> to vector<2x32xf32>
    %534 = arith.addf %531, %533 : vector<2x32xf32>
    %535 = arith.negf %534 : vector<2x32xf32>
    %536 = math.exp %535 : vector<2x32xf32>
    %cst_333 = arith.constant 1.000000e+00 : f32
    %537 = vector.broadcast %cst_333 : f32 to vector<2x32xf32>
    %538 = arith.addf %537, %536 : vector<2x32xf32>
    %539 = arith.divf %537, %538 : vector<2x32xf32>
    %c1_334 = arith.constant 1 : index
    %c3_335 = arith.constant 3 : index
    %c0_336 = arith.constant 0 : index
    %c32_337 = arith.constant 32 : index
    %540 = vector.load %arg13[%c1_334, %c3_335, %c0_336, %c32_337] : memref<2x8x2x128xf32, #tpu.memory_space<vmem>>, vector<1x1x2x32xf32>
    %541 = vector.shape_cast %540 : vector<1x1x2x32xf32> to vector<2x32xf32>
    %542 = vector.extract_strided_slice %476 {offsets = [1, 0, 32], sizes = [1, 2, 32], strides = [1, 1, 1]} : vector<2x2x128xf32> to vector<1x2x32xf32>
    %543 = vector.shape_cast %542 : vector<1x2x32xf32> to vector<2x32xf32>
    %544 = arith.addf %541, %543 : vector<2x32xf32>
    %545 = arith.negf %544 : vector<2x32xf32>
    %546 = math.exp %545 : vector<2x32xf32>
    %cst_338 = arith.constant 1.000000e+00 : f32
    %547 = vector.broadcast %cst_338 : f32 to vector<2x32xf32>
    %548 = arith.addf %547, %546 : vector<2x32xf32>
    %549 = arith.divf %547, %548 : vector<2x32xf32>
    %c1_339 = arith.constant 1 : index
    %c3_340 = arith.constant 3 : index
    %c0_341 = arith.constant 0 : index
    %c64_342 = arith.constant 64 : index
    %550 = vector.load %arg13[%c1_339, %c3_340, %c0_341, %c64_342] : memref<2x8x2x128xf32, #tpu.memory_space<vmem>>, vector<1x1x2x32xf32>
    %551 = vector.shape_cast %550 : vector<1x1x2x32xf32> to vector<2x32xf32>
    %552 = vector.extract_strided_slice %476 {offsets = [1, 0, 64], sizes = [1, 2, 32], strides = [1, 1, 1]} : vector<2x2x128xf32> to vector<1x2x32xf32>
    %553 = vector.shape_cast %552 : vector<1x2x32xf32> to vector<2x32xf32>
    %554 = arith.addf %551, %553 : vector<2x32xf32>
    %555 = math.tanh %554 : vector<2x32xf32>
    %c1_343 = arith.constant 1 : index
    %c3_344 = arith.constant 3 : index
    %c0_345 = arith.constant 0 : index
    %c96_346 = arith.constant 96 : index
    %556 = vector.load %arg13[%c1_343, %c3_344, %c0_345, %c96_346] : memref<2x8x2x128xf32, #tpu.memory_space<vmem>>, vector<1x1x2x32xf32>
    %557 = vector.shape_cast %556 : vector<1x1x2x32xf32> to vector<2x32xf32>
    %558 = vector.extract_strided_slice %476 {offsets = [1, 0, 96], sizes = [1, 2, 32], strides = [1, 1, 1]} : vector<2x2x128xf32> to vector<1x2x32xf32>
    %559 = vector.shape_cast %558 : vector<1x2x32xf32> to vector<2x32xf32>
    %560 = arith.addf %557, %559 : vector<2x32xf32>
    %561 = arith.negf %560 : vector<2x32xf32>
    %562 = math.exp %561 : vector<2x32xf32>
    %cst_347 = arith.constant 1.000000e+00 : f32
    %563 = vector.broadcast %cst_347 : f32 to vector<2x32xf32>
    %564 = arith.addf %563, %562 : vector<2x32xf32>
    %565 = arith.divf %563, %564 : vector<2x32xf32>
    %c1_348 = arith.constant 1 : index
    %c0_349 = arith.constant 0 : index
    %c0_350 = arith.constant 0 : index
    %566 = vector.load %arg15[%c1_348, %c0_349, %c0_350] : memref<2x2x32xf32, #tpu.memory_space<vmem>>, vector<1x2x32xf32>
    %567 = vector.shape_cast %566 : vector<1x2x32xf32> to vector<2x32xf32>
    %568 = arith.mulf %549, %567 : vector<2x32xf32>
    %569 = arith.mulf %539, %555 : vector<2x32xf32>
    %570 = arith.addf %568, %569 : vector<2x32xf32>
    %571 = math.tanh %570 : vector<2x32xf32>
    %572 = arith.mulf %565, %571 : vector<2x32xf32>
    %c1_351 = arith.constant 1 : index
    %c0_352 = arith.constant 0 : index
    %c0_353 = arith.constant 0 : index
    %573 = vector.load %arg15[%c1_351, %c0_352, %c0_353] : memref<2x2x32xf32, #tpu.memory_space<vmem>>, vector<1x2x32xf32>
    %574 = vector.shape_cast %573 : vector<1x2x32xf32> to vector<2x32xf32>
    %575 = vector.shape_cast %570 : vector<2x32xf32> to vector<1x2x32xf32>
    tpu.vector_store %arg15[%c1_351, %c0_352, %c0_353], %575 {strides = array<i32>} : memref<2x2x32xf32, #tpu.memory_space<vmem>>, vector<1x2x32xf32>,
    %c1_354 = arith.constant 1 : index
    %c0_355 = arith.constant 0 : index
    %c0_356 = arith.constant 0 : index
    %576 = vector.load %arg14[%c1_354, %c0_355, %c0_356] : memref<2x2x32xf32, #tpu.memory_space<vmem>>, vector<1x2x32xf32>
    %577 = vector.shape_cast %576 : vector<1x2x32xf32> to vector<2x32xf32>
    %578 = vector.shape_cast %572 : vector<2x32xf32> to vector<1x2x32xf32>
    tpu.vector_store %arg14[%c1_354, %c0_355, %c0_356], %578 {strides = array<i32>} : memref<2x2x32xf32, #tpu.memory_space<vmem>>, vector<1x2x32xf32>,
    %579 = arith.truncf %572 : vector<2x32xf32> to vector<2x32xbf16>
    %c0_357 = arith.constant 0 : index
    %c3_358 = arith.constant 3 : index
    %c0_359 = arith.constant 0 : index
    %580 = vector.load %arg12[%c0_357, %c3_358, %c0_359] : memref<2x8x32xbf16, #tpu.memory_space<vmem>>, vector<2x1x32xbf16>
    %581 = vector.shape_cast %580 : vector<2x1x32xbf16> to vector<2x32xbf16>
    %582 = vector.shape_cast %579 : vector<2x32xbf16> to vector<2x1x32xbf16>
    tpu.vector_store %arg12[%c0_357, %c3_358, %c0_359], %582 {strides = array<i32>} : memref<2x8x32xbf16, #tpu.memory_space<vmem>>, vector<2x1x32xbf16>,
    %c0_360 = arith.constant 0 : index
    %c0_361 = arith.constant 0 : index
    %c0_362 = arith.constant 0 : index
    %583 = vector.load %arg14[%c0_360, %c0_361, %c0_362] : memref<2x2x32xf32, #tpu.memory_space<vmem>>, vector<2x2x32xf32>
    %584 = arith.truncf %583 : vector<2x2x32xf32> to vector<2x2x32xbf16>
    "tpu.trace_start"() <{level = 10 : i32, message = "dbh,dhg->dbg"}> : () -> ()
    %cst_363 = arith.constant dense<0.000000e+00> : vector<2x2x128xf32>
    %585 = tpu.matmul %584, %37, %cst_363 {dimension_numbers = #tpu.dot_dimension_numbers<[2], [1], [1], [2], [0, 0, 0, 1, 1, 2], [0], [0]>} : vector<2x2x32xbf16>, vector<2x32x128xbf16>, vector<2x2x128xf32> -> vector<2x2x128xf32>
    "tpu.trace_stop"() : () -> ()
    %c0_364 = arith.constant 0 : index
    %c5_365 = arith.constant 5 : index
    %c0_366 = arith.constant 0 : index
    %c0_367 = arith.constant 0 : index
    %586 = vector.load %arg13[%c0_364, %c5_365, %c0_366, %c0_367] : memref<2x8x2x128xf32, #tpu.memory_space<vmem>>, vector<1x1x2x32xf32>
    %587 = vector.shape_cast %586 : vector<1x1x2x32xf32> to vector<2x32xf32>
    %588 = vector.extract_strided_slice %585 {offsets = [0, 0, 0], sizes = [1, 2, 32], strides = [1, 1, 1]} : vector<2x2x128xf32> to vector<1x2x32xf32>
    %589 = vector.shape_cast %588 : vector<1x2x32xf32> to vector<2x32xf32>
    %590 = arith.addf %587, %589 : vector<2x32xf32>
    %591 = arith.negf %590 : vector<2x32xf32>
    %592 = math.exp %591 : vector<2x32xf32>
    %cst_368 = arith.constant 1.000000e+00 : f32
    %593 = vector.broadcast %cst_368 : f32 to vector<2x32xf32>
    %594 = arith.addf %593, %592 : vector<2x32xf32>
    %595 = arith.divf %593, %594 : vector<2x32xf32>
    %c0_369 = arith.constant 0 : index
    %c5_370 = arith.constant 5 : index
    %c0_371 = arith.constant 0 : index
    %c32_372 = arith.constant 32 : index
    %596 = vector.load %arg13[%c0_369, %c5_370, %c0_371, %c32_372] : memref<2x8x2x128xf32, #tpu.memory_space<vmem>>, vector<1x1x2x32xf32>
    %597 = vector.shape_cast %596 : vector<1x1x2x32xf32> to vector<2x32xf32>
    %598 = vector.extract_strided_slice %585 {offsets = [0, 0, 32], sizes = [1, 2, 32], strides = [1, 1, 1]} : vector<2x2x128xf32> to vector<1x2x32xf32>
    %599 = vector.shape_cast %598 : vector<1x2x32xf32> to vector<2x32xf32>
    %600 = arith.addf %597, %599 : vector<2x32xf32>
    %601 = arith.negf %600 : vector<2x32xf32>
    %602 = math.exp %601 : vector<2x32xf32>
    %cst_373 = arith.constant 1.000000e+00 : f32
    %603 = vector.broadcast %cst_373 : f32 to vector<2x32xf32>
    %604 = arith.addf %603, %602 : vector<2x32xf32>
    %605 = arith.divf %603, %604 : vector<2x32xf32>
    %c0_374 = arith.constant 0 : index
    %c5_375 = arith.constant 5 : index
    %c0_376 = arith.constant 0 : index
    %c64_377 = arith.constant 64 : index
    %606 = vector.load %arg13[%c0_374, %c5_375, %c0_376, %c64_377] : memref<2x8x2x128xf32, #tpu.memory_space<vmem>>, vector<1x1x2x32xf32>
    %607 = vector.shape_cast %606 : vector<1x1x2x32xf32> to vector<2x32xf32>
    %608 = vector.extract_strided_slice %585 {offsets = [0, 0, 64], sizes = [1, 2, 32], strides = [1, 1, 1]} : vector<2x2x128xf32> to vector<1x2x32xf32>
    %609 = vector.shape_cast %608 : vector<1x2x32xf32> to vector<2x32xf32>
    %610 = arith.addf %607, %609 : vector<2x32xf32>
    %611 = math.tanh %610 : vector<2x32xf32>
    %c0_378 = arith.constant 0 : index
    %c5_379 = arith.constant 5 : index
    %c0_380 = arith.constant 0 : index
    %c96_381 = arith.constant 96 : index
    %612 = vector.load %arg13[%c0_378, %c5_379, %c0_380, %c96_381] : memref<2x8x2x128xf32, #tpu.memory_space<vmem>>, vector<1x1x2x32xf32>
    %613 = vector.shape_cast %612 : vector<1x1x2x32xf32> to vector<2x32xf32>
    %614 = vector.extract_strided_slice %585 {offsets = [0, 0, 96], sizes = [1, 2, 32], strides = [1, 1, 1]} : vector<2x2x128xf32> to vector<1x2x32xf32>
    %615 = vector.shape_cast %614 : vector<1x2x32xf32> to vector<2x32xf32>
    %616 = arith.addf %613, %615 : vector<2x32xf32>
    %617 = arith.negf %616 : vector<2x32xf32>
    %618 = math.exp %617 : vector<2x32xf32>
    %cst_382 = arith.constant 1.000000e+00 : f32
    %619 = vector.broadcast %cst_382 : f32 to vector<2x32xf32>
    %620 = arith.addf %619, %618 : vector<2x32xf32>
    %621 = arith.divf %619, %620 : vector<2x32xf32>
    %c0_383 = arith.constant 0 : index
    %c0_384 = arith.constant 0 : index
    %c0_385 = arith.constant 0 : index
    %622 = vector.load %arg15[%c0_383, %c0_384, %c0_385] : memref<2x2x32xf32, #tpu.memory_space<vmem>>, vector<1x2x32xf32>
    %623 = vector.shape_cast %622 : vector<1x2x32xf32> to vector<2x32xf32>
    %624 = arith.mulf %605, %623 : vector<2x32xf32>
    %625 = arith.mulf %595, %611 : vector<2x32xf32>
    %626 = arith.addf %624, %625 : vector<2x32xf32>
    %627 = math.tanh %626 : vector<2x32xf32>
    %628 = arith.mulf %621, %627 : vector<2x32xf32>
    %c0_386 = arith.constant 0 : index
    %c0_387 = arith.constant 0 : index
    %c0_388 = arith.constant 0 : index
    %629 = vector.load %arg15[%c0_386, %c0_387, %c0_388] : memref<2x2x32xf32, #tpu.memory_space<vmem>>, vector<1x2x32xf32>
    %630 = vector.shape_cast %629 : vector<1x2x32xf32> to vector<2x32xf32>
    %631 = vector.shape_cast %626 : vector<2x32xf32> to vector<1x2x32xf32>
    tpu.vector_store %arg15[%c0_386, %c0_387, %c0_388], %631 {strides = array<i32>} : memref<2x2x32xf32, #tpu.memory_space<vmem>>, vector<1x2x32xf32>,
    %c0_389 = arith.constant 0 : index
    %c0_390 = arith.constant 0 : index
    %c0_391 = arith.constant 0 : index
    %632 = vector.load %arg14[%c0_389, %c0_390, %c0_391] : memref<2x2x32xf32, #tpu.memory_space<vmem>>, vector<1x2x32xf32>
    %633 = vector.shape_cast %632 : vector<1x2x32xf32> to vector<2x32xf32>
    %634 = vector.shape_cast %628 : vector<2x32xf32> to vector<1x2x32xf32>
    tpu.vector_store %arg14[%c0_389, %c0_390, %c0_391], %634 {strides = array<i32>} : memref<2x2x32xf32, #tpu.memory_space<vmem>>, vector<1x2x32xf32>,
    %635 = arith.truncf %628 : vector<2x32xf32> to vector<2x32xbf16>
    %c0_392 = arith.constant 0 : index
    %c5_393 = arith.constant 5 : index
    %c0_394 = arith.constant 0 : index
    %636 = vector.load %arg11[%c0_392, %c5_393, %c0_394] : memref<2x8x32xbf16, #tpu.memory_space<vmem>>, vector<2x1x32xbf16>
    %637 = vector.shape_cast %636 : vector<2x1x32xbf16> to vector<2x32xbf16>
    %638 = vector.shape_cast %635 : vector<2x32xbf16> to vector<2x1x32xbf16>
    tpu.vector_store %arg11[%c0_392, %c5_393, %c0_394], %638 {strides = array<i32>} : memref<2x8x32xbf16, #tpu.memory_space<vmem>>, vector<2x1x32xbf16>,
    %c1_395 = arith.constant 1 : index
    %c2_396 = arith.constant 2 : index
    %c0_397 = arith.constant 0 : index
    %c0_398 = arith.constant 0 : index
    %639 = vector.load %arg13[%c1_395, %c2_396, %c0_397, %c0_398] : memref<2x8x2x128xf32, #tpu.memory_space<vmem>>, vector<1x1x2x32xf32>
    %640 = vector.shape_cast %639 : vector<1x1x2x32xf32> to vector<2x32xf32>
    %641 = vector.extract_strided_slice %585 {offsets = [1, 0, 0], sizes = [1, 2, 32], strides = [1, 1, 1]} : vector<2x2x128xf32> to vector<1x2x32xf32>
    %642 = vector.shape_cast %641 : vector<1x2x32xf32> to vector<2x32xf32>
    %643 = arith.addf %640, %642 : vector<2x32xf32>
    %644 = arith.negf %643 : vector<2x32xf32>
    %645 = math.exp %644 : vector<2x32xf32>
    %cst_399 = arith.constant 1.000000e+00 : f32
    %646 = vector.broadcast %cst_399 : f32 to vector<2x32xf32>
    %647 = arith.addf %646, %645 : vector<2x32xf32>
    %648 = arith.divf %646, %647 : vector<2x32xf32>
    %c1_400 = arith.constant 1 : index
    %c2_401 = arith.constant 2 : index
    %c0_402 = arith.constant 0 : index
    %c32_403 = arith.constant 32 : index
    %649 = vector.load %arg13[%c1_400, %c2_401, %c0_402, %c32_403] : memref<2x8x2x128xf32, #tpu.memory_space<vmem>>, vector<1x1x2x32xf32>
    %650 = vector.shape_cast %649 : vector<1x1x2x32xf32> to vector<2x32xf32>
    %651 = vector.extract_strided_slice %585 {offsets = [1, 0, 32], sizes = [1, 2, 32], strides = [1, 1, 1]} : vector<2x2x128xf32> to vector<1x2x32xf32>
    %652 = vector.shape_cast %651 : vector<1x2x32xf32> to vector<2x32xf32>
    %653 = arith.addf %650, %652 : vector<2x32xf32>
    %654 = arith.negf %653 : vector<2x32xf32>
    %655 = math.exp %654 : vector<2x32xf32>
    %cst_404 = arith.constant 1.000000e+00 : f32
    %656 = vector.broadcast %cst_404 : f32 to vector<2x32xf32>
    %657 = arith.addf %656, %655 : vector<2x32xf32>
    %658 = arith.divf %656, %657 : vector<2x32xf32>
    %c1_405 = arith.constant 1 : index
    %c2_406 = arith.constant 2 : index
    %c0_407 = arith.constant 0 : index
    %c64_408 = arith.constant 64 : index
    %659 = vector.load %arg13[%c1_405, %c2_406, %c0_407, %c64_408] : memref<2x8x2x128xf32, #tpu.memory_space<vmem>>, vector<1x1x2x32xf32>
    %660 = vector.shape_cast %659 : vector<1x1x2x32xf32> to vector<2x32xf32>
    %661 = vector.extract_strided_slice %585 {offsets = [1, 0, 64], sizes = [1, 2, 32], strides = [1, 1, 1]} : vector<2x2x128xf32> to vector<1x2x32xf32>
    %662 = vector.shape_cast %661 : vector<1x2x32xf32> to vector<2x32xf32>
    %663 = arith.addf %660, %662 : vector<2x32xf32>
    %664 = math.tanh %663 : vector<2x32xf32>
    %c1_409 = arith.constant 1 : index
    %c2_410 = arith.constant 2 : index
    %c0_411 = arith.constant 0 : index
    %c96_412 = arith.constant 96 : index
    %665 = vector.load %arg13[%c1_409, %c2_410, %c0_411, %c96_412] : memref<2x8x2x128xf32, #tpu.memory_space<vmem>>, vector<1x1x2x32xf32>
    %666 = vector.shape_cast %665 : vector<1x1x2x32xf32> to vector<2x32xf32>
    %667 = vector.extract_strided_slice %585 {offsets = [1, 0, 96], sizes = [1, 2, 32], strides = [1, 1, 1]} : vector<2x2x128xf32> to vector<1x2x32xf32>
    %668 = vector.shape_cast %667 : vector<1x2x32xf32> to vector<2x32xf32>
    %669 = arith.addf %666, %668 : vector<2x32xf32>
    %670 = arith.negf %669 : vector<2x32xf32>
    %671 = math.exp %670 : vector<2x32xf32>
    %cst_413 = arith.constant 1.000000e+00 : f32
    %672 = vector.broadcast %cst_413 : f32 to vector<2x32xf32>
    %673 = arith.addf %672, %671 : vector<2x32xf32>
    %674 = arith.divf %672, %673 : vector<2x32xf32>
    %c1_414 = arith.constant 1 : index
    %c0_415 = arith.constant 0 : index
    %c0_416 = arith.constant 0 : index
    %675 = vector.load %arg15[%c1_414, %c0_415, %c0_416] : memref<2x2x32xf32, #tpu.memory_space<vmem>>, vector<1x2x32xf32>
    %676 = vector.shape_cast %675 : vector<1x2x32xf32> to vector<2x32xf32>
    %677 = arith.mulf %658, %676 : vector<2x32xf32>
    %678 = arith.mulf %648, %664 : vector<2x32xf32>
    %679 = arith.addf %677, %678 : vector<2x32xf32>
    %680 = math.tanh %679 : vector<2x32xf32>
    %681 = arith.mulf %674, %680 : vector<2x32xf32>
    %c1_417 = arith.constant 1 : index
    %c0_418 = arith.constant 0 : index
    %c0_419 = arith.constant 0 : index
    %682 = vector.load %arg15[%c1_417, %c0_418, %c0_419] : memref<2x2x32xf32, #tpu.memory_space<vmem>>, vector<1x2x32xf32>
    %683 = vector.shape_cast %682 : vector<1x2x32xf32> to vector<2x32xf32>
    %684 = vector.shape_cast %679 : vector<2x32xf32> to vector<1x2x32xf32>
    tpu.vector_store %arg15[%c1_417, %c0_418, %c0_419], %684 {strides = array<i32>} : memref<2x2x32xf32, #tpu.memory_space<vmem>>, vector<1x2x32xf32>,
    %c1_420 = arith.constant 1 : index
    %c0_421 = arith.constant 0 : index
    %c0_422 = arith.constant 0 : index
    %685 = vector.load %arg14[%c1_420, %c0_421, %c0_422] : memref<2x2x32xf32, #tpu.memory_space<vmem>>, vector<1x2x32xf32>
    %686 = vector.shape_cast %685 : vector<1x2x32xf32> to vector<2x32xf32>
    %687 = vector.shape_cast %681 : vector<2x32xf32> to vector<1x2x32xf32>
    tpu.vector_store %arg14[%c1_420, %c0_421, %c0_422], %687 {strides = array<i32>} : memref<2x2x32xf32, #tpu.memory_space<vmem>>, vector<1x2x32xf32>,
    %688 = arith.truncf %681 : vector<2x32xf32> to vector<2x32xbf16>
    %c0_423 = arith.constant 0 : index
    %c2_424 = arith.constant 2 : index
    %c0_425 = arith.constant 0 : index
    %689 = vector.load %arg12[%c0_423, %c2_424, %c0_425] : memref<2x8x32xbf16, #tpu.memory_space<vmem>>, vector<2x1x32xbf16>
    %690 = vector.shape_cast %689 : vector<2x1x32xbf16> to vector<2x32xbf16>
    %691 = vector.shape_cast %688 : vector<2x32xbf16> to vector<2x1x32xbf16>
    tpu.vector_store %arg12[%c0_423, %c2_424, %c0_425], %691 {strides = array<i32>} : memref<2x8x32xbf16, #tpu.memory_space<vmem>>, vector<2x1x32xbf16>,
    %c0_426 = arith.constant 0 : index
    %c0_427 = arith.constant 0 : index
    %c0_428 = arith.constant 0 : index
    %692 = vector.load %arg14[%c0_426, %c0_427, %c0_428] : memref<2x2x32xf32, #tpu.memory_space<vmem>>, vector<2x2x32xf32>
    %693 = arith.truncf %692 : vector<2x2x32xf32> to vector<2x2x32xbf16>
    "tpu.trace_start"() <{level = 10 : i32, message = "dbh,dhg->dbg"}> : () -> ()
    %cst_429 = arith.constant dense<0.000000e+00> : vector<2x2x128xf32>
    %694 = tpu.matmul %693, %37, %cst_429 {dimension_numbers = #tpu.dot_dimension_numbers<[2], [1], [1], [2], [0, 0, 0, 1, 1, 2], [0], [0]>} : vector<2x2x32xbf16>, vector<2x32x128xbf16>, vector<2x2x128xf32> -> vector<2x2x128xf32>
    "tpu.trace_stop"() : () -> ()
    %c0_430 = arith.constant 0 : index
    %c6_431 = arith.constant 6 : index
    %c0_432 = arith.constant 0 : index
    %c0_433 = arith.constant 0 : index
    %695 = vector.load %arg13[%c0_430, %c6_431, %c0_432, %c0_433] : memref<2x8x2x128xf32, #tpu.memory_space<vmem>>, vector<1x1x2x32xf32>
    %696 = vector.shape_cast %695 : vector<1x1x2x32xf32> to vector<2x32xf32>
    %697 = vector.extract_strided_slice %694 {offsets = [0, 0, 0], sizes = [1, 2, 32], strides = [1, 1, 1]} : vector<2x2x128xf32> to vector<1x2x32xf32>
    %698 = vector.shape_cast %697 : vector<1x2x32xf32> to vector<2x32xf32>
    %699 = arith.addf %696, %698 : vector<2x32xf32>
    %700 = arith.negf %699 : vector<2x32xf32>
    %701 = math.exp %700 : vector<2x32xf32>
    %cst_434 = arith.constant 1.000000e+00 : f32
    %702 = vector.broadcast %cst_434 : f32 to vector<2x32xf32>
    %703 = arith.addf %702, %701 : vector<2x32xf32>
    %704 = arith.divf %702, %703 : vector<2x32xf32>
    %c0_435 = arith.constant 0 : index
    %c6_436 = arith.constant 6 : index
    %c0_437 = arith.constant 0 : index
    %c32_438 = arith.constant 32 : index
    %705 = vector.load %arg13[%c0_435, %c6_436, %c0_437, %c32_438] : memref<2x8x2x128xf32, #tpu.memory_space<vmem>>, vector<1x1x2x32xf32>
    %706 = vector.shape_cast %705 : vector<1x1x2x32xf32> to vector<2x32xf32>
    %707 = vector.extract_strided_slice %694 {offsets = [0, 0, 32], sizes = [1, 2, 32], strides = [1, 1, 1]} : vector<2x2x128xf32> to vector<1x2x32xf32>
    %708 = vector.shape_cast %707 : vector<1x2x32xf32> to vector<2x32xf32>
    %709 = arith.addf %706, %708 : vector<2x32xf32>
    %710 = arith.negf %709 : vector<2x32xf32>
    %711 = math.exp %710 : vector<2x32xf32>
    %cst_439 = arith.constant 1.000000e+00 : f32
    %712 = vector.broadcast %cst_439 : f32 to vector<2x32xf32>
    %713 = arith.addf %712, %711 : vector<2x32xf32>
    %714 = arith.divf %712, %713 : vector<2x32xf32>
    %c0_440 = arith.constant 0 : index
    %c6_441 = arith.constant 6 : index
    %c0_442 = arith.constant 0 : index
    %c64_443 = arith.constant 64 : index
    %715 = vector.load %arg13[%c0_440, %c6_441, %c0_442, %c64_443] : memref<2x8x2x128xf32, #tpu.memory_space<vmem>>, vector<1x1x2x32xf32>
    %716 = vector.shape_cast %715 : vector<1x1x2x32xf32> to vector<2x32xf32>
    %717 = vector.extract_strided_slice %694 {offsets = [0, 0, 64], sizes = [1, 2, 32], strides = [1, 1, 1]} : vector<2x2x128xf32> to vector<1x2x32xf32>
    %718 = vector.shape_cast %717 : vector<1x2x32xf32> to vector<2x32xf32>
    %719 = arith.addf %716, %718 : vector<2x32xf32>
    %720 = math.tanh %719 : vector<2x32xf32>
    %c0_444 = arith.constant 0 : index
    %c6_445 = arith.constant 6 : index
    %c0_446 = arith.constant 0 : index
    %c96_447 = arith.constant 96 : index
    %721 = vector.load %arg13[%c0_444, %c6_445, %c0_446, %c96_447] : memref<2x8x2x128xf32, #tpu.memory_space<vmem>>, vector<1x1x2x32xf32>
    %722 = vector.shape_cast %721 : vector<1x1x2x32xf32> to vector<2x32xf32>
    %723 = vector.extract_strided_slice %694 {offsets = [0, 0, 96], sizes = [1, 2, 32], strides = [1, 1, 1]} : vector<2x2x128xf32> to vector<1x2x32xf32>
    %724 = vector.shape_cast %723 : vector<1x2x32xf32> to vector<2x32xf32>
    %725 = arith.addf %722, %724 : vector<2x32xf32>
    %726 = arith.negf %725 : vector<2x32xf32>
    %727 = math.exp %726 : vector<2x32xf32>
    %cst_448 = arith.constant 1.000000e+00 : f32
    %728 = vector.broadcast %cst_448 : f32 to vector<2x32xf32>
    %729 = arith.addf %728, %727 : vector<2x32xf32>
    %730 = arith.divf %728, %729 : vector<2x32xf32>
    %c0_449 = arith.constant 0 : index
    %c0_450 = arith.constant 0 : index
    %c0_451 = arith.constant 0 : index
    %731 = vector.load %arg15[%c0_449, %c0_450, %c0_451] : memref<2x2x32xf32, #tpu.memory_space<vmem>>, vector<1x2x32xf32>
    %732 = vector.shape_cast %731 : vector<1x2x32xf32> to vector<2x32xf32>
    %733 = arith.mulf %714, %732 : vector<2x32xf32>
    %734 = arith.mulf %704, %720 : vector<2x32xf32>
    %735 = arith.addf %733, %734 : vector<2x32xf32>
    %736 = math.tanh %735 : vector<2x32xf32>
    %737 = arith.mulf %730, %736 : vector<2x32xf32>
    %c0_452 = arith.constant 0 : index
    %c0_453 = arith.constant 0 : index
    %c0_454 = arith.constant 0 : index
    %738 = vector.load %arg15[%c0_452, %c0_453, %c0_454] : memref<2x2x32xf32, #tpu.memory_space<vmem>>, vector<1x2x32xf32>
    %739 = vector.shape_cast %738 : vector<1x2x32xf32> to vector<2x32xf32>
    %740 = vector.shape_cast %735 : vector<2x32xf32> to vector<1x2x32xf32>
    tpu.vector_store %arg15[%c0_452, %c0_453, %c0_454], %740 {strides = array<i32>} : memref<2x2x32xf32, #tpu.memory_space<vmem>>, vector<1x2x32xf32>,
    %c0_455 = arith.constant 0 : index
    %c0_456 = arith.constant 0 : index
    %c0_457 = arith.constant 0 : index
    %741 = vector.load %arg14[%c0_455, %c0_456, %c0_457] : memref<2x2x32xf32, #tpu.memory_space<vmem>>, vector<1x2x32xf32>
    %742 = vector.shape_cast %741 : vector<1x2x32xf32> to vector<2x32xf32>
    %743 = vector.shape_cast %737 : vector<2x32xf32> to vector<1x2x32xf32>
    tpu.vector_store %arg14[%c0_455, %c0_456, %c0_457], %743 {strides = array<i32>} : memref<2x2x32xf32, #tpu.memory_space<vmem>>, vector<1x2x32xf32>,
    %744 = arith.truncf %737 : vector<2x32xf32> to vector<2x32xbf16>
    %c0_458 = arith.constant 0 : index
    %c6_459 = arith.constant 6 : index
    %c0_460 = arith.constant 0 : index
    %745 = vector.load %arg11[%c0_458, %c6_459, %c0_460] : memref<2x8x32xbf16, #tpu.memory_space<vmem>>, vector<2x1x32xbf16>
    %746 = vector.shape_cast %745 : vector<2x1x32xbf16> to vector<2x32xbf16>
    %747 = vector.shape_cast %744 : vector<2x32xbf16> to vector<2x1x32xbf16>
    tpu.vector_store %arg11[%c0_458, %c6_459, %c0_460], %747 {strides = array<i32>} : memref<2x8x32xbf16, #tpu.memory_space<vmem>>, vector<2x1x32xbf16>,
    %c1_461 = arith.constant 1 : index
    %c1_462 = arith.constant 1 : index
    %c0_463 = arith.constant 0 : index
    %c0_464 = arith.constant 0 : index
    %748 = vector.load %arg13[%c1_461, %c1_462, %c0_463, %c0_464] : memref<2x8x2x128xf32, #tpu.memory_space<vmem>>, vector<1x1x2x32xf32>
    %749 = vector.shape_cast %748 : vector<1x1x2x32xf32> to vector<2x32xf32>
    %750 = vector.extract_strided_slice %694 {offsets = [1, 0, 0], sizes = [1, 2, 32], strides = [1, 1, 1]} : vector<2x2x128xf32> to vector<1x2x32xf32>
    %751 = vector.shape_cast %750 : vector<1x2x32xf32> to vector<2x32xf32>
    %752 = arith.addf %749, %751 : vector<2x32xf32>
    %753 = arith.negf %752 : vector<2x32xf32>
    %754 = math.exp %753 : vector<2x32xf32>
    %cst_465 = arith.constant 1.000000e+00 : f32
    %755 = vector.broadcast %cst_465 : f32 to vector<2x32xf32>
    %756 = arith.addf %755, %754 : vector<2x32xf32>
    %757 = arith.divf %755, %756 : vector<2x32xf32>
    %c1_466 = arith.constant 1 : index
    %c1_467 = arith.constant 1 : index
    %c0_468 = arith.constant 0 : index
    %c32_469 = arith.constant 32 : index
    %758 = vector.load %arg13[%c1_466, %c1_467, %c0_468, %c32_469] : memref<2x8x2x128xf32, #tpu.memory_space<vmem>>, vector<1x1x2x32xf32>
    %759 = vector.shape_cast %758 : vector<1x1x2x32xf32> to vector<2x32xf32>
    %760 = vector.extract_strided_slice %694 {offsets = [1, 0, 32], sizes = [1, 2, 32], strides = [1, 1, 1]} : vector<2x2x128xf32> to vector<1x2x32xf32>
    %761 = vector.shape_cast %760 : vector<1x2x32xf32> to vector<2x32xf32>
    %762 = arith.addf %759, %761 : vector<2x32xf32>
    %763 = arith.negf %762 : vector<2x32xf32>
    %764 = math.exp %763 : vector<2x32xf32>
    %cst_470 = arith.constant 1.000000e+00 : f32
    %765 = vector.broadcast %cst_470 : f32 to vector<2x32xf32>
    %766 = arith.addf %765, %764 : vector<2x32xf32>
    %767 = arith.divf %765, %766 : vector<2x32xf32>
    %c1_471 = arith.constant 1 : index
    %c1_472 = arith.constant 1 : index
    %c0_473 = arith.constant 0 : index
    %c64_474 = arith.constant 64 : index
    %768 = vector.load %arg13[%c1_471, %c1_472, %c0_473, %c64_474] : memref<2x8x2x128xf32, #tpu.memory_space<vmem>>, vector<1x1x2x32xf32>
    %769 = vector.shape_cast %768 : vector<1x1x2x32xf32> to vector<2x32xf32>
    %770 = vector.extract_strided_slice %694 {offsets = [1, 0, 64], sizes = [1, 2, 32], strides = [1, 1, 1]} : vector<2x2x128xf32> to vector<1x2x32xf32>
    %771 = vector.shape_cast %770 : vector<1x2x32xf32> to vector<2x32xf32>
    %772 = arith.addf %769, %771 : vector<2x32xf32>
    %773 = math.tanh %772 : vector<2x32xf32>
    %c1_475 = arith.constant 1 : index
    %c1_476 = arith.constant 1 : index
    %c0_477 = arith.constant 0 : index
    %c96_478 = arith.constant 96 : index
    %774 = vector.load %arg13[%c1_475, %c1_476, %c0_477, %c96_478] : memref<2x8x2x128xf32, #tpu.memory_space<vmem>>, vector<1x1x2x32xf32>
    %775 = vector.shape_cast %774 : vector<1x1x2x32xf32> to vector<2x32xf32>
    %776 = vector.extract_strided_slice %694 {offsets = [1, 0, 96], sizes = [1, 2, 32], strides = [1, 1, 1]} : vector<2x2x128xf32> to vector<1x2x32xf32>
    %777 = vector.shape_cast %776 : vector<1x2x32xf32> to vector<2x32xf32>
    %778 = arith.addf %775, %777 : vector<2x32xf32>
    %779 = arith.negf %778 : vector<2x32xf32>
    %780 = math.exp %779 : vector<2x32xf32>
    %cst_479 = arith.constant 1.000000e+00 : f32
    %781 = vector.broadcast %cst_479 : f32 to vector<2x32xf32>
    %782 = arith.addf %781, %780 : vector<2x32xf32>
    %783 = arith.divf %781, %782 : vector<2x32xf32>
    %c1_480 = arith.constant 1 : index
    %c0_481 = arith.constant 0 : index
    %c0_482 = arith.constant 0 : index
    %784 = vector.load %arg15[%c1_480, %c0_481, %c0_482] : memref<2x2x32xf32, #tpu.memory_space<vmem>>, vector<1x2x32xf32>
    %785 = vector.shape_cast %784 : vector<1x2x32xf32> to vector<2x32xf32>
    %786 = arith.mulf %767, %785 : vector<2x32xf32>
    %787 = arith.mulf %757, %773 : vector<2x32xf32>
    %788 = arith.addf %786, %787 : vector<2x32xf32>
    %789 = math.tanh %788 : vector<2x32xf32>
    %790 = arith.mulf %783, %789 : vector<2x32xf32>
    %c1_483 = arith.constant 1 : index
    %c0_484 = arith.constant 0 : index
    %c0_485 = arith.constant 0 : index
    %791 = vector.load %arg15[%c1_483, %c0_484, %c0_485] : memref<2x2x32xf32, #tpu.memory_space<vmem>>, vector<1x2x32xf32>
    %792 = vector.shape_cast %791 : vector<1x2x32xf32> to vector<2x32xf32>
    %793 = vector.shape_cast %788 : vector<2x32xf32> to vector<1x2x32xf32>
    tpu.vector_store %arg15[%c1_483, %c0_484, %c0_485], %793 {strides = array<i32>} : memref<2x2x32xf32, #tpu.memory_space<vmem>>, vector<1x2x32xf32>,
    %c1_486 = arith.constant 1 : index
    %c0_487 = arith.constant 0 : index
    %c0_488 = arith.constant 0 : index
    %794 = vector.load %arg14[%c1_486, %c0_487, %c0_488] : memref<2x2x32xf32, #tpu.memory_space<vmem>>, vector<1x2x32xf32>
    %795 = vector.shape_cast %794 : vector<1x2x32xf32> to vector<2x32xf32>
    %796 = vector.shape_cast %790 : vector<2x32xf32> to vector<1x2x32xf32>
    tpu.vector_store %arg14[%c1_486, %c0_487, %c0_488], %796 {strides = array<i32>} : memref<2x2x32xf32, #tpu.memory_space<vmem>>, vector<1x2x32xf32>,
    %797 = arith.truncf %790 : vector<2x32xf32> to vector<2x32xbf16>
    %c0_489 = arith.constant 0 : index
    %c1_490 = arith.constant 1 : index
    %c0_491 = arith.constant 0 : index
    %798 = vector.load %arg12[%c0_489, %c1_490, %c0_491] : memref<2x8x32xbf16, #tpu.memory_space<vmem>>, vector<2x1x32xbf16>
    %799 = vector.shape_cast %798 : vector<2x1x32xbf16> to vector<2x32xbf16>
    %800 = vector.shape_cast %797 : vector<2x32xbf16> to vector<2x1x32xbf16>
    tpu.vector_store %arg12[%c0_489, %c1_490, %c0_491], %800 {strides = array<i32>} : memref<2x8x32xbf16, #tpu.memory_space<vmem>>, vector<2x1x32xbf16>,
    %c0_492 = arith.constant 0 : index
    %c0_493 = arith.constant 0 : index
    %c0_494 = arith.constant 0 : index
    %801 = vector.load %arg14[%c0_492, %c0_493, %c0_494] : memref<2x2x32xf32, #tpu.memory_space<vmem>>, vector<2x2x32xf32>
    %802 = arith.truncf %801 : vector<2x2x32xf32> to vector<2x2x32xbf16>
    "tpu.trace_start"() <{level = 10 : i32, message = "dbh,dhg->dbg"}> : () -> ()
    %cst_495 = arith.constant dense<0.000000e+00> : vector<2x2x128xf32>
    %803 = tpu.matmul %802, %37, %cst_495 {dimension_numbers = #tpu.dot_dimension_numbers<[2], [1], [1], [2], [0, 0, 0, 1, 1, 2], [0], [0]>} : vector<2x2x32xbf16>, vector<2x32x128xbf16>, vector<2x2x128xf32> -> vector<2x2x128xf32>
    "tpu.trace_stop"() : () -> ()
    %c0_496 = arith.constant 0 : index
    %c7_497 = arith.constant 7 : index
    %c0_498 = arith.constant 0 : index
    %c0_499 = arith.constant 0 : index
    %804 = vector.load %arg13[%c0_496, %c7_497, %c0_498, %c0_499] : memref<2x8x2x128xf32, #tpu.memory_space<vmem>>, vector<1x1x2x32xf32>
    %805 = vector.shape_cast %804 : vector<1x1x2x32xf32> to vector<2x32xf32>
    %806 = vector.extract_strided_slice %803 {offsets = [0, 0, 0], sizes = [1, 2, 32], strides = [1, 1, 1]} : vector<2x2x128xf32> to vector<1x2x32xf32>
    %807 = vector.shape_cast %806 : vector<1x2x32xf32> to vector<2x32xf32>
    %808 = arith.addf %805, %807 : vector<2x32xf32>
    %809 = arith.negf %808 : vector<2x32xf32>
    %810 = math.exp %809 : vector<2x32xf32>
    %cst_500 = arith.constant 1.000000e+00 : f32
    %811 = vector.broadcast %cst_500 : f32 to vector<2x32xf32>
    %812 = arith.addf %811, %810 : vector<2x32xf32>
    %813 = arith.divf %811, %812 : vector<2x32xf32>
    %c0_501 = arith.constant 0 : index
    %c7_502 = arith.constant 7 : index
    %c0_503 = arith.constant 0 : index
    %c32_504 = arith.constant 32 : index
    %814 = vector.load %arg13[%c0_501, %c7_502, %c0_503, %c32_504] : memref<2x8x2x128xf32, #tpu.memory_space<vmem>>, vector<1x1x2x32xf32>
    %815 = vector.shape_cast %814 : vector<1x1x2x32xf32> to vector<2x32xf32>
    %816 = vector.extract_strided_slice %803 {offsets = [0, 0, 32], sizes = [1, 2, 32], strides = [1, 1, 1]} : vector<2x2x128xf32> to vector<1x2x32xf32>
    %817 = vector.shape_cast %816 : vector<1x2x32xf32> to vector<2x32xf32>
    %818 = arith.addf %815, %817 : vector<2x32xf32>
    %819 = arith.negf %818 : vector<2x32xf32>
    %820 = math.exp %819 : vector<2x32xf32>
    %cst_505 = arith.constant 1.000000e+00 : f32
    %821 = vector.broadcast %cst_505 : f32 to vector<2x32xf32>
    %822 = arith.addf %821, %820 : vector<2x32xf32>
    %823 = arith.divf %821, %822 : vector<2x32xf32>
    %c0_506 = arith.constant 0 : index
    %c7_507 = arith.constant 7 : index
    %c0_508 = arith.constant 0 : index
    %c64_509 = arith.constant 64 : index
    %824 = vector.load %arg13[%c0_506, %c7_507, %c0_508, %c64_509] : memref<2x8x2x128xf32, #tpu.memory_space<vmem>>, vector<1x1x2x32xf32>
    %825 = vector.shape_cast %824 : vector<1x1x2x32xf32> to vector<2x32xf32>
    %826 = vector.extract_strided_slice %803 {offsets = [0, 0, 64], sizes = [1, 2, 32], strides = [1, 1, 1]} : vector<2x2x128xf32> to vector<1x2x32xf32>
    %827 = vector.shape_cast %826 : vector<1x2x32xf32> to vector<2x32xf32>
    %828 = arith.addf %825, %827 : vector<2x32xf32>
    %829 = math.tanh %828 : vector<2x32xf32>
    %c0_510 = arith.constant 0 : index
    %c7_511 = arith.constant 7 : index
    %c0_512 = arith.constant 0 : index
    %c96_513 = arith.constant 96 : index
    %830 = vector.load %arg13[%c0_510, %c7_511, %c0_512, %c96_513] : memref<2x8x2x128xf32, #tpu.memory_space<vmem>>, vector<1x1x2x32xf32>
    %831 = vector.shape_cast %830 : vector<1x1x2x32xf32> to vector<2x32xf32>
    %832 = vector.extract_strided_slice %803 {offsets = [0, 0, 96], sizes = [1, 2, 32], strides = [1, 1, 1]} : vector<2x2x128xf32> to vector<1x2x32xf32>
    %833 = vector.shape_cast %832 : vector<1x2x32xf32> to vector<2x32xf32>
    %834 = arith.addf %831, %833 : vector<2x32xf32>
    %835 = arith.negf %834 : vector<2x32xf32>
    %836 = math.exp %835 : vector<2x32xf32>
    %cst_514 = arith.constant 1.000000e+00 : f32
    %837 = vector.broadcast %cst_514 : f32 to vector<2x32xf32>
    %838 = arith.addf %837, %836 : vector<2x32xf32>
    %839 = arith.divf %837, %838 : vector<2x32xf32>
    %c0_515 = arith.constant 0 : index
    %c0_516 = arith.constant 0 : index
    %c0_517 = arith.constant 0 : index
    %840 = vector.load %arg15[%c0_515, %c0_516, %c0_517] : memref<2x2x32xf32, #tpu.memory_space<vmem>>, vector<1x2x32xf32>
    %841 = vector.shape_cast %840 : vector<1x2x32xf32> to vector<2x32xf32>
    %842 = arith.mulf %823, %841 : vector<2x32xf32>
    %843 = arith.mulf %813, %829 : vector<2x32xf32>
    %844 = arith.addf %842, %843 : vector<2x32xf32>
    %845 = math.tanh %844 : vector<2x32xf32>
    %846 = arith.mulf %839, %845 : vector<2x32xf32>
    %c0_518 = arith.constant 0 : index
    %c0_519 = arith.constant 0 : index
    %c0_520 = arith.constant 0 : index
    %847 = vector.load %arg15[%c0_518, %c0_519, %c0_520] : memref<2x2x32xf32, #tpu.memory_space<vmem>>, vector<1x2x32xf32>
    %848 = vector.shape_cast %847 : vector<1x2x32xf32> to vector<2x32xf32>
    %849 = vector.shape_cast %844 : vector<2x32xf32> to vector<1x2x32xf32>
    tpu.vector_store %arg15[%c0_518, %c0_519, %c0_520], %849 {strides = array<i32>} : memref<2x2x32xf32, #tpu.memory_space<vmem>>, vector<1x2x32xf32>,
    %c0_521 = arith.constant 0 : index
    %c0_522 = arith.constant 0 : index
    %c0_523 = arith.constant 0 : index
    %850 = vector.load %arg14[%c0_521, %c0_522, %c0_523] : memref<2x2x32xf32, #tpu.memory_space<vmem>>, vector<1x2x32xf32>
    %851 = vector.shape_cast %850 : vector<1x2x32xf32> to vector<2x32xf32>
    %852 = vector.shape_cast %846 : vector<2x32xf32> to vector<1x2x32xf32>
    tpu.vector_store %arg14[%c0_521, %c0_522, %c0_523], %852 {strides = array<i32>} : memref<2x2x32xf32, #tpu.memory_space<vmem>>, vector<1x2x32xf32>,
    %853 = arith.truncf %846 : vector<2x32xf32> to vector<2x32xbf16>
    %c0_524 = arith.constant 0 : index
    %c7_525 = arith.constant 7 : index
    %c0_526 = arith.constant 0 : index
    %854 = vector.load %arg11[%c0_524, %c7_525, %c0_526] : memref<2x8x32xbf16, #tpu.memory_space<vmem>>, vector<2x1x32xbf16>
    %855 = vector.shape_cast %854 : vector<2x1x32xbf16> to vector<2x32xbf16>
    %856 = vector.shape_cast %853 : vector<2x32xbf16> to vector<2x1x32xbf16>
    tpu.vector_store %arg11[%c0_524, %c7_525, %c0_526], %856 {strides = array<i32>} : memref<2x8x32xbf16, #tpu.memory_space<vmem>>, vector<2x1x32xbf16>,
    %c1_527 = arith.constant 1 : index
    %c0_528 = arith.constant 0 : index
    %c0_529 = arith.constant 0 : index
    %c0_530 = arith.constant 0 : index
    %857 = vector.load %arg13[%c1_527, %c0_528, %c0_529, %c0_530] : memref<2x8x2x128xf32, #tpu.memory_space<vmem>>, vector<1x1x2x32xf32>
    %858 = vector.shape_cast %857 : vector<1x1x2x32xf32> to vector<2x32xf32>
    %859 = vector.extract_strided_slice %803 {offsets = [1, 0, 0], sizes = [1, 2, 32], strides = [1, 1, 1]} : vector<2x2x128xf32> to vector<1x2x32xf32>
    %860 = vector.shape_cast %859 : vector<1x2x32xf32> to vector<2x32xf32>
    %861 = arith.addf %858, %860 : vector<2x32xf32>
    %862 = arith.negf %861 : vector<2x32xf32>
    %863 = math.exp %862 : vector<2x32xf32>
    %cst_531 = arith.constant 1.000000e+00 : f32
    %864 = vector.broadcast %cst_531 : f32 to vector<2x32xf32>
    %865 = arith.addf %864, %863 : vector<2x32xf32>
    %866 = arith.divf %864, %865 : vector<2x32xf32>
    %c1_532 = arith.constant 1 : index
    %c0_533 = arith.constant 0 : index
    %c0_534 = arith.constant 0 : index
    %c32_535 = arith.constant 32 : index
    %867 = vector.load %arg13[%c1_532, %c0_533, %c0_534, %c32_535] : memref<2x8x2x128xf32, #tpu.memory_space<vmem>>, vector<1x1x2x32xf32>
    %868 = vector.shape_cast %867 : vector<1x1x2x32xf32> to vector<2x32xf32>
    %869 = vector.extract_strided_slice %803 {offsets = [1, 0, 32], sizes = [1, 2, 32], strides = [1, 1, 1]} : vector<2x2x128xf32> to vector<1x2x32xf32>
    %870 = vector.shape_cast %869 : vector<1x2x32xf32> to vector<2x32xf32>
    %871 = arith.addf %868, %870 : vector<2x32xf32>
    %872 = arith.negf %871 : vector<2x32xf32>
    %873 = math.exp %872 : vector<2x32xf32>
    %cst_536 = arith.constant 1.000000e+00 : f32
    %874 = vector.broadcast %cst_536 : f32 to vector<2x32xf32>
    %875 = arith.addf %874, %873 : vector<2x32xf32>
    %876 = arith.divf %874, %875 : vector<2x32xf32>
    %c1_537 = arith.constant 1 : index
    %c0_538 = arith.constant 0 : index
    %c0_539 = arith.constant 0 : index
    %c64_540 = arith.constant 64 : index
    %877 = vector.load %arg13[%c1_537, %c0_538, %c0_539, %c64_540] : memref<2x8x2x128xf32, #tpu.memory_space<vmem>>, vector<1x1x2x32xf32>
    %878 = vector.shape_cast %877 : vector<1x1x2x32xf32> to vector<2x32xf32>
    %879 = vector.extract_strided_slice %803 {offsets = [1, 0, 64], sizes = [1, 2, 32], strides = [1, 1, 1]} : vector<2x2x128xf32> to vector<1x2x32xf32>
    %880 = vector.shape_cast %879 : vector<1x2x32xf32> to vector<2x32xf32>
    %881 = arith.addf %878, %880 : vector<2x32xf32>
    %882 = math.tanh %881 : vector<2x32xf32>
    %c1_541 = arith.constant 1 : index
    %c0_542 = arith.constant 0 : index
    %c0_543 = arith.constant 0 : index
    %c96_544 = arith.constant 96 : index
    %883 = vector.load %arg13[%c1_541, %c0_542, %c0_543, %c96_544] : memref<2x8x2x128xf32, #tpu.memory_space<vmem>>, vector<1x1x2x32xf32>
    %884 = vector.shape_cast %883 : vector<1x1x2x32xf32> to vector<2x32xf32>
    %885 = vector.extract_strided_slice %803 {offsets = [1, 0, 96], sizes = [1, 2, 32], strides = [1, 1, 1]} : vector<2x2x128xf32> to vector<1x2x32xf32>
    %886 = vector.shape_cast %885 : vector<1x2x32xf32> to vector<2x32xf32>
    %887 = arith.addf %884, %886 : vector<2x32xf32>
    %888 = arith.negf %887 : vector<2x32xf32>
    %889 = math.exp %888 : vector<2x32xf32>
    %cst_545 = arith.constant 1.000000e+00 : f32
    %890 = vector.broadcast %cst_545 : f32 to vector<2x32xf32>
    %891 = arith.addf %890, %889 : vector<2x32xf32>
    %892 = arith.divf %890, %891 : vector<2x32xf32>
    %c1_546 = arith.constant 1 : index
    %c0_547 = arith.constant 0 : index
    %c0_548 = arith.constant 0 : index
    %893 = vector.load %arg15[%c1_546, %c0_547, %c0_548] : memref<2x2x32xf32, #tpu.memory_space<vmem>>, vector<1x2x32xf32>
    %894 = vector.shape_cast %893 : vector<1x2x32xf32> to vector<2x32xf32>
    %895 = arith.mulf %876, %894 : vector<2x32xf32>
    %896 = arith.mulf %866, %882 : vector<2x32xf32>
    %897 = arith.addf %895, %896 : vector<2x32xf32>
    %898 = math.tanh %897 : vector<2x32xf32>
    %899 = arith.mulf %892, %898 : vector<2x32xf32>
    %c1_549 = arith.constant 1 : index
    %c0_550 = arith.constant 0 : index
    %c0_551 = arith.constant 0 : index
    %900 = vector.load %arg15[%c1_549, %c0_550, %c0_551] : memref<2x2x32xf32, #tpu.memory_space<vmem>>, vector<1x2x32xf32>
    %901 = vector.shape_cast %900 : vector<1x2x32xf32> to vector<2x32xf32>
    %902 = vector.shape_cast %897 : vector<2x32xf32> to vector<1x2x32xf32>
    tpu.vector_store %arg15[%c1_549, %c0_550, %c0_551], %902 {strides = array<i32>} : memref<2x2x32xf32, #tpu.memory_space<vmem>>, vector<1x2x32xf32>,
    %c1_552 = arith.constant 1 : index
    %c0_553 = arith.constant 0 : index
    %c0_554 = arith.constant 0 : index
    %903 = vector.load %arg14[%c1_552, %c0_553, %c0_554] : memref<2x2x32xf32, #tpu.memory_space<vmem>>, vector<1x2x32xf32>
    %904 = vector.shape_cast %903 : vector<1x2x32xf32> to vector<2x32xf32>
    %905 = vector.shape_cast %899 : vector<2x32xf32> to vector<1x2x32xf32>
    tpu.vector_store %arg14[%c1_552, %c0_553, %c0_554], %905 {strides = array<i32>} : memref<2x2x32xf32, #tpu.memory_space<vmem>>, vector<1x2x32xf32>,
    %906 = arith.truncf %899 : vector<2x32xf32> to vector<2x32xbf16>
    %c0_555 = arith.constant 0 : index
    %c0_556 = arith.constant 0 : index
    %c0_557 = arith.constant 0 : index
    %907 = vector.load %arg12[%c0_555, %c0_556, %c0_557] : memref<2x8x32xbf16, #tpu.memory_space<vmem>>, vector<2x1x32xbf16>
    %908 = vector.shape_cast %907 : vector<2x1x32xbf16> to vector<2x32xbf16>
    %909 = vector.shape_cast %906 : vector<2x32xbf16> to vector<2x1x32xbf16>
    tpu.vector_store %arg12[%c0_555, %c0_556, %c0_557], %909 {strides = array<i32>} : memref<2x8x32xbf16, #tpu.memory_space<vmem>>, vector<2x1x32xbf16>,
    return
  }
  func.func @transform_0(%arg0: i32) -> (i32, i32, i32) {
    %c0_i32 = arith.constant 0 : i32
    %c0_i32_0 = arith.constant 0 : i32
    %c0_i32_1 = arith.constant 0 : i32
    return %arg0, %c0_i32, %c0_i32_0 : i32, i32, i32
  }
  func.func @transform_1(%arg0: i32) -> (i32, i32, i32) {
    %c0_i32 = arith.constant 0 : i32
    %c0_i32_0 = arith.constant 0 : i32
    %c0_i32_1 = arith.constant 0 : i32
    return %arg0, %c0_i32, %c0_i32_0 : i32, i32, i32
  }
  func.func @transform_2(%arg0: i32) -> (i32, i32, i32) {
    %c0_i32 = arith.constant 0 : i32
    %0 = arith.subi %c0_i32, %arg0 : i32
    %c0_i32_0 = arith.constant 0 : i32
    %c0_i32_1 = arith.constant 0 : i32
    %c0_i32_2 = arith.constant 0 : i32
    return %0, %c0_i32_0, %c0_i32_1 : i32, i32, i32
  }
  func.func @transform_3(%arg0: i32) -> (i32, i32, i32) {
    %c0_i32 = arith.constant 0 : i32
    %0 = arith.subi %c0_i32, %arg0 : i32
    %c0_i32_0 = arith.constant 0 : i32
    %c0_i32_1 = arith.constant 0 : i32
    %c0_i32_2 = arith.constant 0 : i32
    return %0, %c0_i32_0, %c0_i32_1 : i32, i32, i32
  }
  func.func @transform_4(%arg0: i32) -> (i32, i32) {
    %c0_i32 = arith.constant 0 : i32
    %c0_i32_0 = arith.constant 0 : i32
    %c0_i32_1 = arith.constant 0 : i32
    return %c0_i32, %c0_i32_0 : i32, i32
  }
  func.func @transform_5(%arg0: i32) -> (i32, i32) {
    %c0_i32 = arith.constant 0 : i32
    %c0_i32_0 = arith.constant 0 : i32
    %c0_i32_1 = arith.constant 0 : i32
    return %c0_i32, %c0_i32_0 : i32, i32
  }
  func.func @transform_6(%arg0: i32) -> (i32, i32) {
    %c0_i32 = arith.constant 0 : i32
    %c0_i32_0 = arith.constant 0 : i32
    %c0_i32_1 = arith.constant 0 : i32
    return %c0_i32, %c0_i32_0 : i32, i32
  }
  func.func @transform_7(%arg0: i32) -> (i32, i32) {
    %c0_i32 = arith.constant 0 : i32
    %c0_i32_0 = arith.constant 0 : i32
    %c0_i32_1 = arith.constant 0 : i32
    return %c0_i32, %c0_i32_0 : i32, i32
  }
  func.func @transform_8(%arg0: i32) -> (i32, i32, i32) {
    %c0_i32 = arith.constant 0 : i32
    %c0_i32_0 = arith.constant 0 : i32
    %c0_i32_1 = arith.constant 0 : i32
    %c0_i32_2 = arith.constant 0 : i32
    return %c0_i32, %c0_i32_0, %c0_i32_1 : i32, i32, i32
  }
  func.func @transform_9(%arg0: i32) -> (i32, i32, i32) {
    %c0_i32 = arith.constant 0 : i32
    %c0_i32_0 = arith.constant 0 : i32
    %c0_i32_1 = arith.constant 0 : i32
    %c0_i32_2 = arith.constant 0 : i32
    return %c0_i32, %c0_i32_0, %c0_i32_1 : i32, i32, i32
  }
  func.func @transform_10(%arg0: i32) -> (i32, i32, i32) {
    %c0_i32 = arith.constant 0 : i32
    %c0_i32_0 = arith.constant 0 : i32
    %c0_i32_1 = arith.constant 0 : i32
    return %c0_i32, %arg0, %c0_i32_0 : i32, i32, i32
  }
  func.func @transform_11(%arg0: i32) -> (i32, i32, i32) {
    %c0_i32 = arith.constant 0 : i32
    %0 = arith.subi %c0_i32, %arg0 : i32
    %c0_i32_0 = arith.constant 0 : i32
    %c0_i32_1 = arith.constant 0 : i32
    %c0_i32_2 = arith.constant 0 : i32
    return %c0_i32_0, %0, %c0_i32_1 : i32, i32, i32
  }
}

module attributes {stable_mosaic.version = 11 : i64} {
  func.func @kernel(%arg0: i32, %arg1: memref<8x2x16xbf16, #tpu.memory_space<vmem>>, %arg2: memref<8x2x16xbf16, #tpu.memory_space<vmem>>, %arg3: memref<16x128xbf16, #tpu.memory_space<vmem>>, %arg4: memref<16x128xbf16, #tpu.memory_space<vmem>>, %arg5: memref<2x1x128xf32, #tpu.memory_space<vmem>>, %arg6: memref<2x32x128xbf16, #tpu.memory_space<vmem>>, %arg7: memref<8x2x32xbf16, #tpu.memory_space<vmem>>, %arg8: memref<8x2x32xbf16, #tpu.memory_space<vmem>>, %arg9: memref<2x8x2x128xf32, #tpu.memory_space<vmem>>, %arg10: memref<2x2x32xf32, #tpu.memory_space<vmem>>, %arg11: memref<2x2x32xf32, #tpu.memory_space<vmem>>) attributes {dimension_semantics = [#tpu.dimension_semantics<arbitrary>], iteration_bounds = array<i64: 1>, scalar_prefetch = 0 : i64, scratch_operands = 3 : i64, tpu.core_type = #tpu.core_type<tc>, window_params = [{transform_indices = @transform_0, window_bounds = array<i64: 8, 2, 16>}, {transform_indices = @transform_1, window_bounds = array<i64: 8, 2, 16>}, {pipeline_mode = #tpu.pipeline_mode<synchronous>, transform_indices = @transform_2, window_bounds = array<i64: 16, 128>}, {pipeline_mode = #tpu.pipeline_mode<synchronous>, transform_indices = @transform_3, window_bounds = array<i64: 16, 128>}, {pipeline_mode = #tpu.pipeline_mode<synchronous>, transform_indices = @transform_4, window_bounds = array<i64: 2, 1, 128>}, {pipeline_mode = #tpu.pipeline_mode<synchronous>, transform_indices = @transform_5, window_bounds = array<i64: 2, 32, 128>}, {transform_indices = @transform_6, window_bounds = array<i64: 8, 2, 32>}, {transform_indices = @transform_7, window_bounds = array<i64: 8, 2, 32>}]} {
    %c0_i32 = arith.constant 0 : i32
    %0 = arith.cmpi eq, %arg0, %c0_i32 : i32
    %1 = arith.extui %0 : i1 to i32
    %c0_i32_0 = arith.constant 0 : i32
    %2 = arith.cmpi ne, %1, %c0_i32_0 : i32
    scf.if %2 {
      %cst_546 = arith.constant 0.000000e+00 : f32
      %900 = vector.broadcast %cst_546 : f32 to vector<2x2x32xf32>
      %c0_547 = arith.constant 0 : index
      %c0_548 = arith.constant 0 : index
      %c0_549 = arith.constant 0 : index
      %901 = vector.load %arg10[%c0_547, %c0_548, %c0_549] : memref<2x2x32xf32, #tpu.memory_space<vmem>>, vector<2x2x32xf32>
      tpu.vector_store %arg10[%c0_547, %c0_548, %c0_549], %900 {strides = array<i32>} : memref<2x2x32xf32, #tpu.memory_space<vmem>>, vector<2x2x32xf32>,
      %cst_550 = arith.constant 0.000000e+00 : f32
      %902 = vector.broadcast %cst_550 : f32 to vector<2x2x32xf32>
      %c0_551 = arith.constant 0 : index
      %c0_552 = arith.constant 0 : index
      %c0_553 = arith.constant 0 : index
      %903 = vector.load %arg11[%c0_551, %c0_552, %c0_553] : memref<2x2x32xf32, #tpu.memory_space<vmem>>, vector<2x2x32xf32>
      tpu.vector_store %arg11[%c0_551, %c0_552, %c0_553], %902 {strides = array<i32>} : memref<2x2x32xf32, #tpu.memory_space<vmem>>, vector<2x2x32xf32>,
    } else {
    }
    %c0 = arith.constant 0 : index
    %c0_1 = arith.constant 0 : index
    %c0_2 = arith.constant 0 : index
    %3 = vector.load %arg1[%c0, %c0_1, %c0_2] : memref<8x2x16xbf16, #tpu.memory_space<vmem>>, vector<8x2x16xbf16>
    %4 = vector.shape_cast %3 : vector<8x2x16xbf16> to vector<16x16xbf16>
    %c0_3 = arith.constant 0 : index
    %c0_4 = arith.constant 0 : index
    %5 = vector.load %arg3[%c0_3, %c0_4] : memref<16x128xbf16, #tpu.memory_space<vmem>>, vector<16x128xbf16>
    %cst = arith.constant dense<0.000000e+00> : vector<16x128xf32>
    %6 = tpu.matmul %4, %5, %cst {dimension_numbers = #tpu.dot_dimension_numbers<[1], [0], [0], [1], [0, 0, 1, 1], [], []>} : vector<16x16xbf16>, vector<16x128xbf16>, vector<16x128xf32> -> vector<16x128xf32>
    %c0_5 = arith.constant 0 : index
    %c0_6 = arith.constant 0 : index
    %c0_7 = arith.constant 0 : index
    %7 = vector.load %arg5[%c0_5, %c0_6, %c0_7] : memref<2x1x128xf32, #tpu.memory_space<vmem>>, vector<1x1x128xf32>
    %8 = vector.shape_cast %7 : vector<1x1x128xf32> to vector<1x128xf32>
    %9 = vector.broadcast %8 : vector<1x128xf32> to vector<16x128xf32>
    %10 = arith.addf %6, %9 : vector<16x128xf32>
    %11 = vector.shape_cast %10 : vector<16x128xf32> to vector<8x2x128xf32>
    %c0_8 = arith.constant 0 : index
    %c0_9 = arith.constant 0 : index
    %c0_10 = arith.constant 0 : index
    %c0_11 = arith.constant 0 : index
    %12 = vector.load %arg9[%c0_8, %c0_9, %c0_10, %c0_11] : memref<2x8x2x128xf32, #tpu.memory_space<vmem>>, vector<1x8x2x128xf32>
    %13 = vector.shape_cast %12 : vector<1x8x2x128xf32> to vector<8x2x128xf32>
    %14 = vector.shape_cast %11 : vector<8x2x128xf32> to vector<1x8x2x128xf32>
    tpu.vector_store %arg9[%c0_8, %c0_9, %c0_10, %c0_11], %14 {strides = array<i32>} : memref<2x8x2x128xf32, #tpu.memory_space<vmem>>, vector<1x8x2x128xf32>,
    %c0_12 = arith.constant 0 : index
    %c0_13 = arith.constant 0 : index
    %c0_14 = arith.constant 0 : index
    %15 = vector.load %arg2[%c0_12, %c0_13, %c0_14] : memref<8x2x16xbf16, #tpu.memory_space<vmem>>, vector<8x2x16xbf16>
    %16 = vector.shape_cast %15 : vector<8x2x16xbf16> to vector<16x16xbf16>
    %c0_15 = arith.constant 0 : index
    %c0_16 = arith.constant 0 : index
    %17 = vector.load %arg4[%c0_15, %c0_16] : memref<16x128xbf16, #tpu.memory_space<vmem>>, vector<16x128xbf16>
    %cst_17 = arith.constant dense<0.000000e+00> : vector<16x128xf32>
    %18 = tpu.matmul %16, %17, %cst_17 {dimension_numbers = #tpu.dot_dimension_numbers<[1], [0], [0], [1], [0, 0, 1, 1], [], []>} : vector<16x16xbf16>, vector<16x128xbf16>, vector<16x128xf32> -> vector<16x128xf32>
    %c1 = arith.constant 1 : index
    %c0_18 = arith.constant 0 : index
    %c0_19 = arith.constant 0 : index
    %19 = vector.load %arg5[%c1, %c0_18, %c0_19] : memref<2x1x128xf32, #tpu.memory_space<vmem>>, vector<1x1x128xf32>
    %20 = vector.shape_cast %19 : vector<1x1x128xf32> to vector<1x128xf32>
    %21 = vector.broadcast %20 : vector<1x128xf32> to vector<16x128xf32>
    %22 = arith.addf %18, %21 : vector<16x128xf32>
    %23 = vector.shape_cast %22 : vector<16x128xf32> to vector<8x2x128xf32>
    %c1_20 = arith.constant 1 : index
    %c0_21 = arith.constant 0 : index
    %c0_22 = arith.constant 0 : index
    %c0_23 = arith.constant 0 : index
    %24 = vector.load %arg9[%c1_20, %c0_21, %c0_22, %c0_23] : memref<2x8x2x128xf32, #tpu.memory_space<vmem>>, vector<1x8x2x128xf32>
    %25 = vector.shape_cast %24 : vector<1x8x2x128xf32> to vector<8x2x128xf32>
    %26 = vector.shape_cast %23 : vector<8x2x128xf32> to vector<1x8x2x128xf32>
    tpu.vector_store %arg9[%c1_20, %c0_21, %c0_22, %c0_23], %26 {strides = array<i32>} : memref<2x8x2x128xf32, #tpu.memory_space<vmem>>, vector<1x8x2x128xf32>,
    %c0_24 = arith.constant 0 : index
    %c0_25 = arith.constant 0 : index
    %c0_26 = arith.constant 0 : index
    %27 = vector.load %arg6[%c0_24, %c0_25, %c0_26] : memref<2x32x128xbf16, #tpu.memory_space<vmem>>, vector<2x32x128xbf16>
    %c0_27 = arith.constant 0 : index
    %c0_28 = arith.constant 0 : index
    %c0_29 = arith.constant 0 : index
    %28 = vector.load %arg10[%c0_27, %c0_28, %c0_29] : memref<2x2x32xf32, #tpu.memory_space<vmem>>, vector<2x2x32xf32>
    %29 = arith.truncf %28 : vector<2x2x32xf32> to vector<2x2x32xbf16>
    "tpu.trace_start"() <{level = 10 : i32, message = "dbh,dhg->dbg"}> : () -> ()
    %cst_30 = arith.constant dense<0.000000e+00> : vector<2x2x128xf32>
    %30 = tpu.matmul %29, %27, %cst_30 {dimension_numbers = #tpu.dot_dimension_numbers<[2], [1], [1], [2], [0, 0, 0, 1, 1, 2], [0], [0]>} : vector<2x2x32xbf16>, vector<2x32x128xbf16>, vector<2x2x128xf32> -> vector<2x2x128xf32>
    "tpu.trace_stop"() : () -> ()
    %c0_31 = arith.constant 0 : index
    %c0_32 = arith.constant 0 : index
    %c0_33 = arith.constant 0 : index
    %c0_34 = arith.constant 0 : index
    %31 = vector.load %arg9[%c0_31, %c0_32, %c0_33, %c0_34] : memref<2x8x2x128xf32, #tpu.memory_space<vmem>>, vector<1x1x2x32xf32>
    %32 = vector.shape_cast %31 : vector<1x1x2x32xf32> to vector<2x32xf32>
    %33 = vector.extract_strided_slice %30 {offsets = [0, 0, 0], sizes = [1, 2, 32], strides = [1, 1, 1]} : vector<2x2x128xf32> to vector<1x2x32xf32>
    %34 = vector.shape_cast %33 : vector<1x2x32xf32> to vector<2x32xf32>
    %35 = arith.addf %32, %34 : vector<2x32xf32>
    %36 = arith.negf %35 : vector<2x32xf32>
    %37 = math.exp %36 : vector<2x32xf32>
    %cst_35 = arith.constant 1.000000e+00 : f32
    %38 = vector.broadcast %cst_35 : f32 to vector<2x32xf32>
    %39 = arith.addf %38, %37 : vector<2x32xf32>
    %40 = arith.divf %38, %39 : vector<2x32xf32>
    %c0_36 = arith.constant 0 : index
    %c0_37 = arith.constant 0 : index
    %c0_38 = arith.constant 0 : index
    %c32 = arith.constant 32 : index
    %41 = vector.load %arg9[%c0_36, %c0_37, %c0_38, %c32] : memref<2x8x2x128xf32, #tpu.memory_space<vmem>>, vector<1x1x2x32xf32>
    %42 = vector.shape_cast %41 : vector<1x1x2x32xf32> to vector<2x32xf32>
    %43 = vector.extract_strided_slice %30 {offsets = [0, 0, 32], sizes = [1, 2, 32], strides = [1, 1, 1]} : vector<2x2x128xf32> to vector<1x2x32xf32>
    %44 = vector.shape_cast %43 : vector<1x2x32xf32> to vector<2x32xf32>
    %45 = arith.addf %42, %44 : vector<2x32xf32>
    %46 = arith.negf %45 : vector<2x32xf32>
    %47 = math.exp %46 : vector<2x32xf32>
    %cst_39 = arith.constant 1.000000e+00 : f32
    %48 = vector.broadcast %cst_39 : f32 to vector<2x32xf32>
    %49 = arith.addf %48, %47 : vector<2x32xf32>
    %50 = arith.divf %48, %49 : vector<2x32xf32>
    %c0_40 = arith.constant 0 : index
    %c0_41 = arith.constant 0 : index
    %c0_42 = arith.constant 0 : index
    %c64 = arith.constant 64 : index
    %51 = vector.load %arg9[%c0_40, %c0_41, %c0_42, %c64] : memref<2x8x2x128xf32, #tpu.memory_space<vmem>>, vector<1x1x2x32xf32>
    %52 = vector.shape_cast %51 : vector<1x1x2x32xf32> to vector<2x32xf32>
    %53 = vector.extract_strided_slice %30 {offsets = [0, 0, 64], sizes = [1, 2, 32], strides = [1, 1, 1]} : vector<2x2x128xf32> to vector<1x2x32xf32>
    %54 = vector.shape_cast %53 : vector<1x2x32xf32> to vector<2x32xf32>
    %55 = arith.addf %52, %54 : vector<2x32xf32>
    %56 = math.tanh %55 : vector<2x32xf32>
    %c0_43 = arith.constant 0 : index
    %c0_44 = arith.constant 0 : index
    %c0_45 = arith.constant 0 : index
    %c96 = arith.constant 96 : index
    %57 = vector.load %arg9[%c0_43, %c0_44, %c0_45, %c96] : memref<2x8x2x128xf32, #tpu.memory_space<vmem>>, vector<1x1x2x32xf32>
    %58 = vector.shape_cast %57 : vector<1x1x2x32xf32> to vector<2x32xf32>
    %59 = vector.extract_strided_slice %30 {offsets = [0, 0, 96], sizes = [1, 2, 32], strides = [1, 1, 1]} : vector<2x2x128xf32> to vector<1x2x32xf32>
    %60 = vector.shape_cast %59 : vector<1x2x32xf32> to vector<2x32xf32>
    %61 = arith.addf %58, %60 : vector<2x32xf32>
    %62 = arith.negf %61 : vector<2x32xf32>
    %63 = math.exp %62 : vector<2x32xf32>
    %cst_46 = arith.constant 1.000000e+00 : f32
    %64 = vector.broadcast %cst_46 : f32 to vector<2x32xf32>
    %65 = arith.addf %64, %63 : vector<2x32xf32>
    %66 = arith.divf %64, %65 : vector<2x32xf32>
    %c0_47 = arith.constant 0 : index
    %c0_48 = arith.constant 0 : index
    %c0_49 = arith.constant 0 : index
    %67 = vector.load %arg11[%c0_47, %c0_48, %c0_49] : memref<2x2x32xf32, #tpu.memory_space<vmem>>, vector<1x2x32xf32>
    %68 = vector.shape_cast %67 : vector<1x2x32xf32> to vector<2x32xf32>
    %69 = arith.mulf %50, %68 : vector<2x32xf32>
    %70 = arith.mulf %40, %56 : vector<2x32xf32>
    %71 = arith.addf %69, %70 : vector<2x32xf32>
    %72 = math.tanh %71 : vector<2x32xf32>
    %73 = arith.mulf %66, %72 : vector<2x32xf32>
    %c0_50 = arith.constant 0 : index
    %c0_51 = arith.constant 0 : index
    %c0_52 = arith.constant 0 : index
    %74 = vector.load %arg11[%c0_50, %c0_51, %c0_52] : memref<2x2x32xf32, #tpu.memory_space<vmem>>, vector<1x2x32xf32>
    %75 = vector.shape_cast %74 : vector<1x2x32xf32> to vector<2x32xf32>
    %76 = vector.shape_cast %71 : vector<2x32xf32> to vector<1x2x32xf32>
    tpu.vector_store %arg11[%c0_50, %c0_51, %c0_52], %76 {strides = array<i32>} : memref<2x2x32xf32, #tpu.memory_space<vmem>>, vector<1x2x32xf32>,
    %c0_53 = arith.constant 0 : index
    %c0_54 = arith.constant 0 : index
    %c0_55 = arith.constant 0 : index
    %77 = vector.load %arg10[%c0_53, %c0_54, %c0_55] : memref<2x2x32xf32, #tpu.memory_space<vmem>>, vector<1x2x32xf32>
    %78 = vector.shape_cast %77 : vector<1x2x32xf32> to vector<2x32xf32>
    %79 = vector.shape_cast %73 : vector<2x32xf32> to vector<1x2x32xf32>
    tpu.vector_store %arg10[%c0_53, %c0_54, %c0_55], %79 {strides = array<i32>} : memref<2x2x32xf32, #tpu.memory_space<vmem>>, vector<1x2x32xf32>,
    %80 = arith.truncf %73 : vector<2x32xf32> to vector<2x32xbf16>
    %c0_56 = arith.constant 0 : index
    %c0_57 = arith.constant 0 : index
    %c0_58 = arith.constant 0 : index
    %81 = vector.load %arg7[%c0_56, %c0_57, %c0_58] : memref<8x2x32xbf16, #tpu.memory_space<vmem>>, vector<1x2x32xbf16>
    %82 = vector.shape_cast %81 : vector<1x2x32xbf16> to vector<2x32xbf16>
    %83 = vector.shape_cast %80 : vector<2x32xbf16> to vector<1x2x32xbf16>
    tpu.vector_store %arg7[%c0_56, %c0_57, %c0_58], %83 {strides = array<i32>} : memref<8x2x32xbf16, #tpu.memory_space<vmem>>, vector<1x2x32xbf16>,
    %c1_59 = arith.constant 1 : index
    %c7 = arith.constant 7 : index
    %c0_60 = arith.constant 0 : index
    %c0_61 = arith.constant 0 : index
    %84 = vector.load %arg9[%c1_59, %c7, %c0_60, %c0_61] : memref<2x8x2x128xf32, #tpu.memory_space<vmem>>, vector<1x1x2x32xf32>
    %85 = vector.shape_cast %84 : vector<1x1x2x32xf32> to vector<2x32xf32>
    %86 = vector.extract_strided_slice %30 {offsets = [1, 0, 0], sizes = [1, 2, 32], strides = [1, 1, 1]} : vector<2x2x128xf32> to vector<1x2x32xf32>
    %87 = vector.shape_cast %86 : vector<1x2x32xf32> to vector<2x32xf32>
    %88 = arith.addf %85, %87 : vector<2x32xf32>
    %89 = arith.negf %88 : vector<2x32xf32>
    %90 = math.exp %89 : vector<2x32xf32>
    %cst_62 = arith.constant 1.000000e+00 : f32
    %91 = vector.broadcast %cst_62 : f32 to vector<2x32xf32>
    %92 = arith.addf %91, %90 : vector<2x32xf32>
    %93 = arith.divf %91, %92 : vector<2x32xf32>
    %c1_63 = arith.constant 1 : index
    %c7_64 = arith.constant 7 : index
    %c0_65 = arith.constant 0 : index
    %c32_66 = arith.constant 32 : index
    %94 = vector.load %arg9[%c1_63, %c7_64, %c0_65, %c32_66] : memref<2x8x2x128xf32, #tpu.memory_space<vmem>>, vector<1x1x2x32xf32>
    %95 = vector.shape_cast %94 : vector<1x1x2x32xf32> to vector<2x32xf32>
    %96 = vector.extract_strided_slice %30 {offsets = [1, 0, 32], sizes = [1, 2, 32], strides = [1, 1, 1]} : vector<2x2x128xf32> to vector<1x2x32xf32>
    %97 = vector.shape_cast %96 : vector<1x2x32xf32> to vector<2x32xf32>
    %98 = arith.addf %95, %97 : vector<2x32xf32>
    %99 = arith.negf %98 : vector<2x32xf32>
    %100 = math.exp %99 : vector<2x32xf32>
    %cst_67 = arith.constant 1.000000e+00 : f32
    %101 = vector.broadcast %cst_67 : f32 to vector<2x32xf32>
    %102 = arith.addf %101, %100 : vector<2x32xf32>
    %103 = arith.divf %101, %102 : vector<2x32xf32>
    %c1_68 = arith.constant 1 : index
    %c7_69 = arith.constant 7 : index
    %c0_70 = arith.constant 0 : index
    %c64_71 = arith.constant 64 : index
    %104 = vector.load %arg9[%c1_68, %c7_69, %c0_70, %c64_71] : memref<2x8x2x128xf32, #tpu.memory_space<vmem>>, vector<1x1x2x32xf32>
    %105 = vector.shape_cast %104 : vector<1x1x2x32xf32> to vector<2x32xf32>
    %106 = vector.extract_strided_slice %30 {offsets = [1, 0, 64], sizes = [1, 2, 32], strides = [1, 1, 1]} : vector<2x2x128xf32> to vector<1x2x32xf32>
    %107 = vector.shape_cast %106 : vector<1x2x32xf32> to vector<2x32xf32>
    %108 = arith.addf %105, %107 : vector<2x32xf32>
    %109 = math.tanh %108 : vector<2x32xf32>
    %c1_72 = arith.constant 1 : index
    %c7_73 = arith.constant 7 : index
    %c0_74 = arith.constant 0 : index
    %c96_75 = arith.constant 96 : index
    %110 = vector.load %arg9[%c1_72, %c7_73, %c0_74, %c96_75] : memref<2x8x2x128xf32, #tpu.memory_space<vmem>>, vector<1x1x2x32xf32>
    %111 = vector.shape_cast %110 : vector<1x1x2x32xf32> to vector<2x32xf32>
    %112 = vector.extract_strided_slice %30 {offsets = [1, 0, 96], sizes = [1, 2, 32], strides = [1, 1, 1]} : vector<2x2x128xf32> to vector<1x2x32xf32>
    %113 = vector.shape_cast %112 : vector<1x2x32xf32> to vector<2x32xf32>
    %114 = arith.addf %111, %113 : vector<2x32xf32>
    %115 = arith.negf %114 : vector<2x32xf32>
    %116 = math.exp %115 : vector<2x32xf32>
    %cst_76 = arith.constant 1.000000e+00 : f32
    %117 = vector.broadcast %cst_76 : f32 to vector<2x32xf32>
    %118 = arith.addf %117, %116 : vector<2x32xf32>
    %119 = arith.divf %117, %118 : vector<2x32xf32>
    %c1_77 = arith.constant 1 : index
    %c0_78 = arith.constant 0 : index
    %c0_79 = arith.constant 0 : index
    %120 = vector.load %arg11[%c1_77, %c0_78, %c0_79] : memref<2x2x32xf32, #tpu.memory_space<vmem>>, vector<1x2x32xf32>
    %121 = vector.shape_cast %120 : vector<1x2x32xf32> to vector<2x32xf32>
    %122 = arith.mulf %103, %121 : vector<2x32xf32>
    %123 = arith.mulf %93, %109 : vector<2x32xf32>
    %124 = arith.addf %122, %123 : vector<2x32xf32>
    %125 = math.tanh %124 : vector<2x32xf32>
    %126 = arith.mulf %119, %125 : vector<2x32xf32>
    %c1_80 = arith.constant 1 : index
    %c0_81 = arith.constant 0 : index
    %c0_82 = arith.constant 0 : index
    %127 = vector.load %arg11[%c1_80, %c0_81, %c0_82] : memref<2x2x32xf32, #tpu.memory_space<vmem>>, vector<1x2x32xf32>
    %128 = vector.shape_cast %127 : vector<1x2x32xf32> to vector<2x32xf32>
    %129 = vector.shape_cast %124 : vector<2x32xf32> to vector<1x2x32xf32>
    tpu.vector_store %arg11[%c1_80, %c0_81, %c0_82], %129 {strides = array<i32>} : memref<2x2x32xf32, #tpu.memory_space<vmem>>, vector<1x2x32xf32>,
    %c1_83 = arith.constant 1 : index
    %c0_84 = arith.constant 0 : index
    %c0_85 = arith.constant 0 : index
    %130 = vector.load %arg10[%c1_83, %c0_84, %c0_85] : memref<2x2x32xf32, #tpu.memory_space<vmem>>, vector<1x2x32xf32>
    %131 = vector.shape_cast %130 : vector<1x2x32xf32> to vector<2x32xf32>
    %132 = vector.shape_cast %126 : vector<2x32xf32> to vector<1x2x32xf32>
    tpu.vector_store %arg10[%c1_83, %c0_84, %c0_85], %132 {strides = array<i32>} : memref<2x2x32xf32, #tpu.memory_space<vmem>>, vector<1x2x32xf32>,
    %133 = arith.truncf %126 : vector<2x32xf32> to vector<2x32xbf16>
    %c7_86 = arith.constant 7 : index
    %c0_87 = arith.constant 0 : index
    %c0_88 = arith.constant 0 : index
    %134 = vector.load %arg8[%c7_86, %c0_87, %c0_88] : memref<8x2x32xbf16, #tpu.memory_space<vmem>>, vector<1x2x32xbf16>
    %135 = vector.shape_cast %134 : vector<1x2x32xbf16> to vector<2x32xbf16>
    %136 = vector.shape_cast %133 : vector<2x32xbf16> to vector<1x2x32xbf16>
    tpu.vector_store %arg8[%c7_86, %c0_87, %c0_88], %136 {strides = array<i32>} : memref<8x2x32xbf16, #tpu.memory_space<vmem>>, vector<1x2x32xbf16>,
    %c0_89 = arith.constant 0 : index
    %c0_90 = arith.constant 0 : index
    %c0_91 = arith.constant 0 : index
    %137 = vector.load %arg10[%c0_89, %c0_90, %c0_91] : memref<2x2x32xf32, #tpu.memory_space<vmem>>, vector<2x2x32xf32>
    %138 = arith.truncf %137 : vector<2x2x32xf32> to vector<2x2x32xbf16>
    "tpu.trace_start"() <{level = 10 : i32, message = "dbh,dhg->dbg"}> : () -> ()
    %cst_92 = arith.constant dense<0.000000e+00> : vector<2x2x128xf32>
    %139 = tpu.matmul %138, %27, %cst_92 {dimension_numbers = #tpu.dot_dimension_numbers<[2], [1], [1], [2], [0, 0, 0, 1, 1, 2], [0], [0]>} : vector<2x2x32xbf16>, vector<2x32x128xbf16>, vector<2x2x128xf32> -> vector<2x2x128xf32>
    "tpu.trace_stop"() : () -> ()
    %c0_93 = arith.constant 0 : index
    %c1_94 = arith.constant 1 : index
    %c0_95 = arith.constant 0 : index
    %c0_96 = arith.constant 0 : index
    %140 = vector.load %arg9[%c0_93, %c1_94, %c0_95, %c0_96] : memref<2x8x2x128xf32, #tpu.memory_space<vmem>>, vector<1x1x2x32xf32>
    %141 = vector.shape_cast %140 : vector<1x1x2x32xf32> to vector<2x32xf32>
    %142 = vector.extract_strided_slice %139 {offsets = [0, 0, 0], sizes = [1, 2, 32], strides = [1, 1, 1]} : vector<2x2x128xf32> to vector<1x2x32xf32>
    %143 = vector.shape_cast %142 : vector<1x2x32xf32> to vector<2x32xf32>
    %144 = arith.addf %141, %143 : vector<2x32xf32>
    %145 = arith.negf %144 : vector<2x32xf32>
    %146 = math.exp %145 : vector<2x32xf32>
    %cst_97 = arith.constant 1.000000e+00 : f32
    %147 = vector.broadcast %cst_97 : f32 to vector<2x32xf32>
    %148 = arith.addf %147, %146 : vector<2x32xf32>
    %149 = arith.divf %147, %148 : vector<2x32xf32>
    %c0_98 = arith.constant 0 : index
    %c1_99 = arith.constant 1 : index
    %c0_100 = arith.constant 0 : index
    %c32_101 = arith.constant 32 : index
    %150 = vector.load %arg9[%c0_98, %c1_99, %c0_100, %c32_101] : memref<2x8x2x128xf32, #tpu.memory_space<vmem>>, vector<1x1x2x32xf32>
    %151 = vector.shape_cast %150 : vector<1x1x2x32xf32> to vector<2x32xf32>
    %152 = vector.extract_strided_slice %139 {offsets = [0, 0, 32], sizes = [1, 2, 32], strides = [1, 1, 1]} : vector<2x2x128xf32> to vector<1x2x32xf32>
    %153 = vector.shape_cast %152 : vector<1x2x32xf32> to vector<2x32xf32>
    %154 = arith.addf %151, %153 : vector<2x32xf32>
    %155 = arith.negf %154 : vector<2x32xf32>
    %156 = math.exp %155 : vector<2x32xf32>
    %cst_102 = arith.constant 1.000000e+00 : f32
    %157 = vector.broadcast %cst_102 : f32 to vector<2x32xf32>
    %158 = arith.addf %157, %156 : vector<2x32xf32>
    %159 = arith.divf %157, %158 : vector<2x32xf32>
    %c0_103 = arith.constant 0 : index
    %c1_104 = arith.constant 1 : index
    %c0_105 = arith.constant 0 : index
    %c64_106 = arith.constant 64 : index
    %160 = vector.load %arg9[%c0_103, %c1_104, %c0_105, %c64_106] : memref<2x8x2x128xf32, #tpu.memory_space<vmem>>, vector<1x1x2x32xf32>
    %161 = vector.shape_cast %160 : vector<1x1x2x32xf32> to vector<2x32xf32>
    %162 = vector.extract_strided_slice %139 {offsets = [0, 0, 64], sizes = [1, 2, 32], strides = [1, 1, 1]} : vector<2x2x128xf32> to vector<1x2x32xf32>
    %163 = vector.shape_cast %162 : vector<1x2x32xf32> to vector<2x32xf32>
    %164 = arith.addf %161, %163 : vector<2x32xf32>
    %165 = math.tanh %164 : vector<2x32xf32>
    %c0_107 = arith.constant 0 : index
    %c1_108 = arith.constant 1 : index
    %c0_109 = arith.constant 0 : index
    %c96_110 = arith.constant 96 : index
    %166 = vector.load %arg9[%c0_107, %c1_108, %c0_109, %c96_110] : memref<2x8x2x128xf32, #tpu.memory_space<vmem>>, vector<1x1x2x32xf32>
    %167 = vector.shape_cast %166 : vector<1x1x2x32xf32> to vector<2x32xf32>
    %168 = vector.extract_strided_slice %139 {offsets = [0, 0, 96], sizes = [1, 2, 32], strides = [1, 1, 1]} : vector<2x2x128xf32> to vector<1x2x32xf32>
    %169 = vector.shape_cast %168 : vector<1x2x32xf32> to vector<2x32xf32>
    %170 = arith.addf %167, %169 : vector<2x32xf32>
    %171 = arith.negf %170 : vector<2x32xf32>
    %172 = math.exp %171 : vector<2x32xf32>
    %cst_111 = arith.constant 1.000000e+00 : f32
    %173 = vector.broadcast %cst_111 : f32 to vector<2x32xf32>
    %174 = arith.addf %173, %172 : vector<2x32xf32>
    %175 = arith.divf %173, %174 : vector<2x32xf32>
    %c0_112 = arith.constant 0 : index
    %c0_113 = arith.constant 0 : index
    %c0_114 = arith.constant 0 : index
    %176 = vector.load %arg11[%c0_112, %c0_113, %c0_114] : memref<2x2x32xf32, #tpu.memory_space<vmem>>, vector<1x2x32xf32>
    %177 = vector.shape_cast %176 : vector<1x2x32xf32> to vector<2x32xf32>
    %178 = arith.mulf %159, %177 : vector<2x32xf32>
    %179 = arith.mulf %149, %165 : vector<2x32xf32>
    %180 = arith.addf %178, %179 : vector<2x32xf32>
    %181 = math.tanh %180 : vector<2x32xf32>
    %182 = arith.mulf %175, %181 : vector<2x32xf32>
    %c0_115 = arith.constant 0 : index
    %c0_116 = arith.constant 0 : index
    %c0_117 = arith.constant 0 : index
    %183 = vector.load %arg11[%c0_115, %c0_116, %c0_117] : memref<2x2x32xf32, #tpu.memory_space<vmem>>, vector<1x2x32xf32>
    %184 = vector.shape_cast %183 : vector<1x2x32xf32> to vector<2x32xf32>
    %185 = vector.shape_cast %180 : vector<2x32xf32> to vector<1x2x32xf32>
    tpu.vector_store %arg11[%c0_115, %c0_116, %c0_117], %185 {strides = array<i32>} : memref<2x2x32xf32, #tpu.memory_space<vmem>>, vector<1x2x32xf32>,
    %c0_118 = arith.constant 0 : index
    %c0_119 = arith.constant 0 : index
    %c0_120 = arith.constant 0 : index
    %186 = vector.load %arg10[%c0_118, %c0_119, %c0_120] : memref<2x2x32xf32, #tpu.memory_space<vmem>>, vector<1x2x32xf32>
    %187 = vector.shape_cast %186 : vector<1x2x32xf32> to vector<2x32xf32>
    %188 = vector.shape_cast %182 : vector<2x32xf32> to vector<1x2x32xf32>
    tpu.vector_store %arg10[%c0_118, %c0_119, %c0_120], %188 {strides = array<i32>} : memref<2x2x32xf32, #tpu.memory_space<vmem>>, vector<1x2x32xf32>,
    %189 = arith.truncf %182 : vector<2x32xf32> to vector<2x32xbf16>
    %c1_121 = arith.constant 1 : index
    %c0_122 = arith.constant 0 : index
    %c0_123 = arith.constant 0 : index
    %190 = vector.load %arg7[%c1_121, %c0_122, %c0_123] : memref<8x2x32xbf16, #tpu.memory_space<vmem>>, vector<1x2x32xbf16>
    %191 = vector.shape_cast %190 : vector<1x2x32xbf16> to vector<2x32xbf16>
    %192 = vector.shape_cast %189 : vector<2x32xbf16> to vector<1x2x32xbf16>
    tpu.vector_store %arg7[%c1_121, %c0_122, %c0_123], %192 {strides = array<i32>} : memref<8x2x32xbf16, #tpu.memory_space<vmem>>, vector<1x2x32xbf16>,
    %c1_124 = arith.constant 1 : index
    %c6 = arith.constant 6 : index
    %c0_125 = arith.constant 0 : index
    %c0_126 = arith.constant 0 : index
    %193 = vector.load %arg9[%c1_124, %c6, %c0_125, %c0_126] : memref<2x8x2x128xf32, #tpu.memory_space<vmem>>, vector<1x1x2x32xf32>
    %194 = vector.shape_cast %193 : vector<1x1x2x32xf32> to vector<2x32xf32>
    %195 = vector.extract_strided_slice %139 {offsets = [1, 0, 0], sizes = [1, 2, 32], strides = [1, 1, 1]} : vector<2x2x128xf32> to vector<1x2x32xf32>
    %196 = vector.shape_cast %195 : vector<1x2x32xf32> to vector<2x32xf32>
    %197 = arith.addf %194, %196 : vector<2x32xf32>
    %198 = arith.negf %197 : vector<2x32xf32>
    %199 = math.exp %198 : vector<2x32xf32>
    %cst_127 = arith.constant 1.000000e+00 : f32
    %200 = vector.broadcast %cst_127 : f32 to vector<2x32xf32>
    %201 = arith.addf %200, %199 : vector<2x32xf32>
    %202 = arith.divf %200, %201 : vector<2x32xf32>
    %c1_128 = arith.constant 1 : index
    %c6_129 = arith.constant 6 : index
    %c0_130 = arith.constant 0 : index
    %c32_131 = arith.constant 32 : index
    %203 = vector.load %arg9[%c1_128, %c6_129, %c0_130, %c32_131] : memref<2x8x2x128xf32, #tpu.memory_space<vmem>>, vector<1x1x2x32xf32>
    %204 = vector.shape_cast %203 : vector<1x1x2x32xf32> to vector<2x32xf32>
    %205 = vector.extract_strided_slice %139 {offsets = [1, 0, 32], sizes = [1, 2, 32], strides = [1, 1, 1]} : vector<2x2x128xf32> to vector<1x2x32xf32>
    %206 = vector.shape_cast %205 : vector<1x2x32xf32> to vector<2x32xf32>
    %207 = arith.addf %204, %206 : vector<2x32xf32>
    %208 = arith.negf %207 : vector<2x32xf32>
    %209 = math.exp %208 : vector<2x32xf32>
    %cst_132 = arith.constant 1.000000e+00 : f32
    %210 = vector.broadcast %cst_132 : f32 to vector<2x32xf32>
    %211 = arith.addf %210, %209 : vector<2x32xf32>
    %212 = arith.divf %210, %211 : vector<2x32xf32>
    %c1_133 = arith.constant 1 : index
    %c6_134 = arith.constant 6 : index
    %c0_135 = arith.constant 0 : index
    %c64_136 = arith.constant 64 : index
    %213 = vector.load %arg9[%c1_133, %c6_134, %c0_135, %c64_136] : memref<2x8x2x128xf32, #tpu.memory_space<vmem>>, vector<1x1x2x32xf32>
    %214 = vector.shape_cast %213 : vector<1x1x2x32xf32> to vector<2x32xf32>
    %215 = vector.extract_strided_slice %139 {offsets = [1, 0, 64], sizes = [1, 2, 32], strides = [1, 1, 1]} : vector<2x2x128xf32> to vector<1x2x32xf32>
    %216 = vector.shape_cast %215 : vector<1x2x32xf32> to vector<2x32xf32>
    %217 = arith.addf %214, %216 : vector<2x32xf32>
    %218 = math.tanh %217 : vector<2x32xf32>
    %c1_137 = arith.constant 1 : index
    %c6_138 = arith.constant 6 : index
    %c0_139 = arith.constant 0 : index
    %c96_140 = arith.constant 96 : index
    %219 = vector.load %arg9[%c1_137, %c6_138, %c0_139, %c96_140] : memref<2x8x2x128xf32, #tpu.memory_space<vmem>>, vector<1x1x2x32xf32>
    %220 = vector.shape_cast %219 : vector<1x1x2x32xf32> to vector<2x32xf32>
    %221 = vector.extract_strided_slice %139 {offsets = [1, 0, 96], sizes = [1, 2, 32], strides = [1, 1, 1]} : vector<2x2x128xf32> to vector<1x2x32xf32>
    %222 = vector.shape_cast %221 : vector<1x2x32xf32> to vector<2x32xf32>
    %223 = arith.addf %220, %222 : vector<2x32xf32>
    %224 = arith.negf %223 : vector<2x32xf32>
    %225 = math.exp %224 : vector<2x32xf32>
    %cst_141 = arith.constant 1.000000e+00 : f32
    %226 = vector.broadcast %cst_141 : f32 to vector<2x32xf32>
    %227 = arith.addf %226, %225 : vector<2x32xf32>
    %228 = arith.divf %226, %227 : vector<2x32xf32>
    %c1_142 = arith.constant 1 : index
    %c0_143 = arith.constant 0 : index
    %c0_144 = arith.constant 0 : index
    %229 = vector.load %arg11[%c1_142, %c0_143, %c0_144] : memref<2x2x32xf32, #tpu.memory_space<vmem>>, vector<1x2x32xf32>
    %230 = vector.shape_cast %229 : vector<1x2x32xf32> to vector<2x32xf32>
    %231 = arith.mulf %212, %230 : vector<2x32xf32>
    %232 = arith.mulf %202, %218 : vector<2x32xf32>
    %233 = arith.addf %231, %232 : vector<2x32xf32>
    %234 = math.tanh %233 : vector<2x32xf32>
    %235 = arith.mulf %228, %234 : vector<2x32xf32>
    %c1_145 = arith.constant 1 : index
    %c0_146 = arith.constant 0 : index
    %c0_147 = arith.constant 0 : index
    %236 = vector.load %arg11[%c1_145, %c0_146, %c0_147] : memref<2x2x32xf32, #tpu.memory_space<vmem>>, vector<1x2x32xf32>
    %237 = vector.shape_cast %236 : vector<1x2x32xf32> to vector<2x32xf32>
    %238 = vector.shape_cast %233 : vector<2x32xf32> to vector<1x2x32xf32>
    tpu.vector_store %arg11[%c1_145, %c0_146, %c0_147], %238 {strides = array<i32>} : memref<2x2x32xf32, #tpu.memory_space<vmem>>, vector<1x2x32xf32>,
    %c1_148 = arith.constant 1 : index
    %c0_149 = arith.constant 0 : index
    %c0_150 = arith.constant 0 : index
    %239 = vector.load %arg10[%c1_148, %c0_149, %c0_150] : memref<2x2x32xf32, #tpu.memory_space<vmem>>, vector<1x2x32xf32>
    %240 = vector.shape_cast %239 : vector<1x2x32xf32> to vector<2x32xf32>
    %241 = vector.shape_cast %235 : vector<2x32xf32> to vector<1x2x32xf32>
    tpu.vector_store %arg10[%c1_148, %c0_149, %c0_150], %241 {strides = array<i32>} : memref<2x2x32xf32, #tpu.memory_space<vmem>>, vector<1x2x32xf32>,
    %242 = arith.truncf %235 : vector<2x32xf32> to vector<2x32xbf16>
    %c6_151 = arith.constant 6 : index
    %c0_152 = arith.constant 0 : index
    %c0_153 = arith.constant 0 : index
    %243 = vector.load %arg8[%c6_151, %c0_152, %c0_153] : memref<8x2x32xbf16, #tpu.memory_space<vmem>>, vector<1x2x32xbf16>
    %244 = vector.shape_cast %243 : vector<1x2x32xbf16> to vector<2x32xbf16>
    %245 = vector.shape_cast %242 : vector<2x32xbf16> to vector<1x2x32xbf16>
    tpu.vector_store %arg8[%c6_151, %c0_152, %c0_153], %245 {strides = array<i32>} : memref<8x2x32xbf16, #tpu.memory_space<vmem>>, vector<1x2x32xbf16>,
    %c0_154 = arith.constant 0 : index
    %c0_155 = arith.constant 0 : index
    %c0_156 = arith.constant 0 : index
    %246 = vector.load %arg10[%c0_154, %c0_155, %c0_156] : memref<2x2x32xf32, #tpu.memory_space<vmem>>, vector<2x2x32xf32>
    %247 = arith.truncf %246 : vector<2x2x32xf32> to vector<2x2x32xbf16>
    "tpu.trace_start"() <{level = 10 : i32, message = "dbh,dhg->dbg"}> : () -> ()
    %cst_157 = arith.constant dense<0.000000e+00> : vector<2x2x128xf32>
    %248 = tpu.matmul %247, %27, %cst_157 {dimension_numbers = #tpu.dot_dimension_numbers<[2], [1], [1], [2], [0, 0, 0, 1, 1, 2], [0], [0]>} : vector<2x2x32xbf16>, vector<2x32x128xbf16>, vector<2x2x128xf32> -> vector<2x2x128xf32>
    "tpu.trace_stop"() : () -> ()
    %c0_158 = arith.constant 0 : index
    %c2 = arith.constant 2 : index
    %c0_159 = arith.constant 0 : index
    %c0_160 = arith.constant 0 : index
    %249 = vector.load %arg9[%c0_158, %c2, %c0_159, %c0_160] : memref<2x8x2x128xf32, #tpu.memory_space<vmem>>, vector<1x1x2x32xf32>
    %250 = vector.shape_cast %249 : vector<1x1x2x32xf32> to vector<2x32xf32>
    %251 = vector.extract_strided_slice %248 {offsets = [0, 0, 0], sizes = [1, 2, 32], strides = [1, 1, 1]} : vector<2x2x128xf32> to vector<1x2x32xf32>
    %252 = vector.shape_cast %251 : vector<1x2x32xf32> to vector<2x32xf32>
    %253 = arith.addf %250, %252 : vector<2x32xf32>
    %254 = arith.negf %253 : vector<2x32xf32>
    %255 = math.exp %254 : vector<2x32xf32>
    %cst_161 = arith.constant 1.000000e+00 : f32
    %256 = vector.broadcast %cst_161 : f32 to vector<2x32xf32>
    %257 = arith.addf %256, %255 : vector<2x32xf32>
    %258 = arith.divf %256, %257 : vector<2x32xf32>
    %c0_162 = arith.constant 0 : index
    %c2_163 = arith.constant 2 : index
    %c0_164 = arith.constant 0 : index
    %c32_165 = arith.constant 32 : index
    %259 = vector.load %arg9[%c0_162, %c2_163, %c0_164, %c32_165] : memref<2x8x2x128xf32, #tpu.memory_space<vmem>>, vector<1x1x2x32xf32>
    %260 = vector.shape_cast %259 : vector<1x1x2x32xf32> to vector<2x32xf32>
    %261 = vector.extract_strided_slice %248 {offsets = [0, 0, 32], sizes = [1, 2, 32], strides = [1, 1, 1]} : vector<2x2x128xf32> to vector<1x2x32xf32>
    %262 = vector.shape_cast %261 : vector<1x2x32xf32> to vector<2x32xf32>
    %263 = arith.addf %260, %262 : vector<2x32xf32>
    %264 = arith.negf %263 : vector<2x32xf32>
    %265 = math.exp %264 : vector<2x32xf32>
    %cst_166 = arith.constant 1.000000e+00 : f32
    %266 = vector.broadcast %cst_166 : f32 to vector<2x32xf32>
    %267 = arith.addf %266, %265 : vector<2x32xf32>
    %268 = arith.divf %266, %267 : vector<2x32xf32>
    %c0_167 = arith.constant 0 : index
    %c2_168 = arith.constant 2 : index
    %c0_169 = arith.constant 0 : index
    %c64_170 = arith.constant 64 : index
    %269 = vector.load %arg9[%c0_167, %c2_168, %c0_169, %c64_170] : memref<2x8x2x128xf32, #tpu.memory_space<vmem>>, vector<1x1x2x32xf32>
    %270 = vector.shape_cast %269 : vector<1x1x2x32xf32> to vector<2x32xf32>
    %271 = vector.extract_strided_slice %248 {offsets = [0, 0, 64], sizes = [1, 2, 32], strides = [1, 1, 1]} : vector<2x2x128xf32> to vector<1x2x32xf32>
    %272 = vector.shape_cast %271 : vector<1x2x32xf32> to vector<2x32xf32>
    %273 = arith.addf %270, %272 : vector<2x32xf32>
    %274 = math.tanh %273 : vector<2x32xf32>
    %c0_171 = arith.constant 0 : index
    %c2_172 = arith.constant 2 : index
    %c0_173 = arith.constant 0 : index
    %c96_174 = arith.constant 96 : index
    %275 = vector.load %arg9[%c0_171, %c2_172, %c0_173, %c96_174] : memref<2x8x2x128xf32, #tpu.memory_space<vmem>>, vector<1x1x2x32xf32>
    %276 = vector.shape_cast %275 : vector<1x1x2x32xf32> to vector<2x32xf32>
    %277 = vector.extract_strided_slice %248 {offsets = [0, 0, 96], sizes = [1, 2, 32], strides = [1, 1, 1]} : vector<2x2x128xf32> to vector<1x2x32xf32>
    %278 = vector.shape_cast %277 : vector<1x2x32xf32> to vector<2x32xf32>
    %279 = arith.addf %276, %278 : vector<2x32xf32>
    %280 = arith.negf %279 : vector<2x32xf32>
    %281 = math.exp %280 : vector<2x32xf32>
    %cst_175 = arith.constant 1.000000e+00 : f32
    %282 = vector.broadcast %cst_175 : f32 to vector<2x32xf32>
    %283 = arith.addf %282, %281 : vector<2x32xf32>
    %284 = arith.divf %282, %283 : vector<2x32xf32>
    %c0_176 = arith.constant 0 : index
    %c0_177 = arith.constant 0 : index
    %c0_178 = arith.constant 0 : index
    %285 = vector.load %arg11[%c0_176, %c0_177, %c0_178] : memref<2x2x32xf32, #tpu.memory_space<vmem>>, vector<1x2x32xf32>
    %286 = vector.shape_cast %285 : vector<1x2x32xf32> to vector<2x32xf32>
    %287 = arith.mulf %268, %286 : vector<2x32xf32>
    %288 = arith.mulf %258, %274 : vector<2x32xf32>
    %289 = arith.addf %287, %288 : vector<2x32xf32>
    %290 = math.tanh %289 : vector<2x32xf32>
    %291 = arith.mulf %284, %290 : vector<2x32xf32>
    %c0_179 = arith.constant 0 : index
    %c0_180 = arith.constant 0 : index
    %c0_181 = arith.constant 0 : index
    %292 = vector.load %arg11[%c0_179, %c0_180, %c0_181] : memref<2x2x32xf32, #tpu.memory_space<vmem>>, vector<1x2x32xf32>
    %293 = vector.shape_cast %292 : vector<1x2x32xf32> to vector<2x32xf32>
    %294 = vector.shape_cast %289 : vector<2x32xf32> to vector<1x2x32xf32>
    tpu.vector_store %arg11[%c0_179, %c0_180, %c0_181], %294 {strides = array<i32>} : memref<2x2x32xf32, #tpu.memory_space<vmem>>, vector<1x2x32xf32>,
    %c0_182 = arith.constant 0 : index
    %c0_183 = arith.constant 0 : index
    %c0_184 = arith.constant 0 : index
    %295 = vector.load %arg10[%c0_182, %c0_183, %c0_184] : memref<2x2x32xf32, #tpu.memory_space<vmem>>, vector<1x2x32xf32>
    %296 = vector.shape_cast %295 : vector<1x2x32xf32> to vector<2x32xf32>
    %297 = vector.shape_cast %291 : vector<2x32xf32> to vector<1x2x32xf32>
    tpu.vector_store %arg10[%c0_182, %c0_183, %c0_184], %297 {strides = array<i32>} : memref<2x2x32xf32, #tpu.memory_space<vmem>>, vector<1x2x32xf32>,
    %298 = arith.truncf %291 : vector<2x32xf32> to vector<2x32xbf16>
    %c2_185 = arith.constant 2 : index
    %c0_186 = arith.constant 0 : index
    %c0_187 = arith.constant 0 : index
    %299 = vector.load %arg7[%c2_185, %c0_186, %c0_187] : memref<8x2x32xbf16, #tpu.memory_space<vmem>>, vector<1x2x32xbf16>
    %300 = vector.shape_cast %299 : vector<1x2x32xbf16> to vector<2x32xbf16>
    %301 = vector.shape_cast %298 : vector<2x32xbf16> to vector<1x2x32xbf16>
    tpu.vector_store %arg7[%c2_185, %c0_186, %c0_187], %301 {strides = array<i32>} : memref<8x2x32xbf16, #tpu.memory_space<vmem>>, vector<1x2x32xbf16>,
    %c1_188 = arith.constant 1 : index
    %c5 = arith.constant 5 : index
    %c0_189 = arith.constant 0 : index
    %c0_190 = arith.constant 0 : index
    %302 = vector.load %arg9[%c1_188, %c5, %c0_189, %c0_190] : memref<2x8x2x128xf32, #tpu.memory_space<vmem>>, vector<1x1x2x32xf32>
    %303 = vector.shape_cast %302 : vector<1x1x2x32xf32> to vector<2x32xf32>
    %304 = vector.extract_strided_slice %248 {offsets = [1, 0, 0], sizes = [1, 2, 32], strides = [1, 1, 1]} : vector<2x2x128xf32> to vector<1x2x32xf32>
    %305 = vector.shape_cast %304 : vector<1x2x32xf32> to vector<2x32xf32>
    %306 = arith.addf %303, %305 : vector<2x32xf32>
    %307 = arith.negf %306 : vector<2x32xf32>
    %308 = math.exp %307 : vector<2x32xf32>
    %cst_191 = arith.constant 1.000000e+00 : f32
    %309 = vector.broadcast %cst_191 : f32 to vector<2x32xf32>
    %310 = arith.addf %309, %308 : vector<2x32xf32>
    %311 = arith.divf %309, %310 : vector<2x32xf32>
    %c1_192 = arith.constant 1 : index
    %c5_193 = arith.constant 5 : index
    %c0_194 = arith.constant 0 : index
    %c32_195 = arith.constant 32 : index
    %312 = vector.load %arg9[%c1_192, %c5_193, %c0_194, %c32_195] : memref<2x8x2x128xf32, #tpu.memory_space<vmem>>, vector<1x1x2x32xf32>
    %313 = vector.shape_cast %312 : vector<1x1x2x32xf32> to vector<2x32xf32>
    %314 = vector.extract_strided_slice %248 {offsets = [1, 0, 32], sizes = [1, 2, 32], strides = [1, 1, 1]} : vector<2x2x128xf32> to vector<1x2x32xf32>
    %315 = vector.shape_cast %314 : vector<1x2x32xf32> to vector<2x32xf32>
    %316 = arith.addf %313, %315 : vector<2x32xf32>
    %317 = arith.negf %316 : vector<2x32xf32>
    %318 = math.exp %317 : vector<2x32xf32>
    %cst_196 = arith.constant 1.000000e+00 : f32
    %319 = vector.broadcast %cst_196 : f32 to vector<2x32xf32>
    %320 = arith.addf %319, %318 : vector<2x32xf32>
    %321 = arith.divf %319, %320 : vector<2x32xf32>
    %c1_197 = arith.constant 1 : index
    %c5_198 = arith.constant 5 : index
    %c0_199 = arith.constant 0 : index
    %c64_200 = arith.constant 64 : index
    %322 = vector.load %arg9[%c1_197, %c5_198, %c0_199, %c64_200] : memref<2x8x2x128xf32, #tpu.memory_space<vmem>>, vector<1x1x2x32xf32>
    %323 = vector.shape_cast %322 : vector<1x1x2x32xf32> to vector<2x32xf32>
    %324 = vector.extract_strided_slice %248 {offsets = [1, 0, 64], sizes = [1, 2, 32], strides = [1, 1, 1]} : vector<2x2x128xf32> to vector<1x2x32xf32>
    %325 = vector.shape_cast %324 : vector<1x2x32xf32> to vector<2x32xf32>
    %326 = arith.addf %323, %325 : vector<2x32xf32>
    %327 = math.tanh %326 : vector<2x32xf32>
    %c1_201 = arith.constant 1 : index
    %c5_202 = arith.constant 5 : index
    %c0_203 = arith.constant 0 : index
    %c96_204 = arith.constant 96 : index
    %328 = vector.load %arg9[%c1_201, %c5_202, %c0_203, %c96_204] : memref<2x8x2x128xf32, #tpu.memory_space<vmem>>, vector<1x1x2x32xf32>
    %329 = vector.shape_cast %328 : vector<1x1x2x32xf32> to vector<2x32xf32>
    %330 = vector.extract_strided_slice %248 {offsets = [1, 0, 96], sizes = [1, 2, 32], strides = [1, 1, 1]} : vector<2x2x128xf32> to vector<1x2x32xf32>
    %331 = vector.shape_cast %330 : vector<1x2x32xf32> to vector<2x32xf32>
    %332 = arith.addf %329, %331 : vector<2x32xf32>
    %333 = arith.negf %332 : vector<2x32xf32>
    %334 = math.exp %333 : vector<2x32xf32>
    %cst_205 = arith.constant 1.000000e+00 : f32
    %335 = vector.broadcast %cst_205 : f32 to vector<2x32xf32>
    %336 = arith.addf %335, %334 : vector<2x32xf32>
    %337 = arith.divf %335, %336 : vector<2x32xf32>
    %c1_206 = arith.constant 1 : index
    %c0_207 = arith.constant 0 : index
    %c0_208 = arith.constant 0 : index
    %338 = vector.load %arg11[%c1_206, %c0_207, %c0_208] : memref<2x2x32xf32, #tpu.memory_space<vmem>>, vector<1x2x32xf32>
    %339 = vector.shape_cast %338 : vector<1x2x32xf32> to vector<2x32xf32>
    %340 = arith.mulf %321, %339 : vector<2x32xf32>
    %341 = arith.mulf %311, %327 : vector<2x32xf32>
    %342 = arith.addf %340, %341 : vector<2x32xf32>
    %343 = math.tanh %342 : vector<2x32xf32>
    %344 = arith.mulf %337, %343 : vector<2x32xf32>
    %c1_209 = arith.constant 1 : index
    %c0_210 = arith.constant 0 : index
    %c0_211 = arith.constant 0 : index
    %345 = vector.load %arg11[%c1_209, %c0_210, %c0_211] : memref<2x2x32xf32, #tpu.memory_space<vmem>>, vector<1x2x32xf32>
    %346 = vector.shape_cast %345 : vector<1x2x32xf32> to vector<2x32xf32>
    %347 = vector.shape_cast %342 : vector<2x32xf32> to vector<1x2x32xf32>
    tpu.vector_store %arg11[%c1_209, %c0_210, %c0_211], %347 {strides = array<i32>} : memref<2x2x32xf32, #tpu.memory_space<vmem>>, vector<1x2x32xf32>,
    %c1_212 = arith.constant 1 : index
    %c0_213 = arith.constant 0 : index
    %c0_214 = arith.constant 0 : index
    %348 = vector.load %arg10[%c1_212, %c0_213, %c0_214] : memref<2x2x32xf32, #tpu.memory_space<vmem>>, vector<1x2x32xf32>
    %349 = vector.shape_cast %348 : vector<1x2x32xf32> to vector<2x32xf32>
    %350 = vector.shape_cast %344 : vector<2x32xf32> to vector<1x2x32xf32>
    tpu.vector_store %arg10[%c1_212, %c0_213, %c0_214], %350 {strides = array<i32>} : memref<2x2x32xf32, #tpu.memory_space<vmem>>, vector<1x2x32xf32>,
    %351 = arith.truncf %344 : vector<2x32xf32> to vector<2x32xbf16>
    %c5_215 = arith.constant 5 : index
    %c0_216 = arith.constant 0 : index
    %c0_217 = arith.constant 0 : index
    %352 = vector.load %arg8[%c5_215, %c0_216, %c0_217] : memref<8x2x32xbf16, #tpu.memory_space<vmem>>, vector<1x2x32xbf16>
    %353 = vector.shape_cast %352 : vector<1x2x32xbf16> to vector<2x32xbf16>
    %354 = vector.shape_cast %351 : vector<2x32xbf16> to vector<1x2x32xbf16>
    tpu.vector_store %arg8[%c5_215, %c0_216, %c0_217], %354 {strides = array<i32>} : memref<8x2x32xbf16, #tpu.memory_space<vmem>>, vector<1x2x32xbf16>,
    %c0_218 = arith.constant 0 : index
    %c0_219 = arith.constant 0 : index
    %c0_220 = arith.constant 0 : index
    %355 = vector.load %arg10[%c0_218, %c0_219, %c0_220] : memref<2x2x32xf32, #tpu.memory_space<vmem>>, vector<2x2x32xf32>
    %356 = arith.truncf %355 : vector<2x2x32xf32> to vector<2x2x32xbf16>
    "tpu.trace_start"() <{level = 10 : i32, message = "dbh,dhg->dbg"}> : () -> ()
    %cst_221 = arith.constant dense<0.000000e+00> : vector<2x2x128xf32>
    %357 = tpu.matmul %356, %27, %cst_221 {dimension_numbers = #tpu.dot_dimension_numbers<[2], [1], [1], [2], [0, 0, 0, 1, 1, 2], [0], [0]>} : vector<2x2x32xbf16>, vector<2x32x128xbf16>, vector<2x2x128xf32> -> vector<2x2x128xf32>
    "tpu.trace_stop"() : () -> ()
    %c0_222 = arith.constant 0 : index
    %c3 = arith.constant 3 : index
    %c0_223 = arith.constant 0 : index
    %c0_224 = arith.constant 0 : index
    %358 = vector.load %arg9[%c0_222, %c3, %c0_223, %c0_224] : memref<2x8x2x128xf32, #tpu.memory_space<vmem>>, vector<1x1x2x32xf32>
    %359 = vector.shape_cast %358 : vector<1x1x2x32xf32> to vector<2x32xf32>
    %360 = vector.extract_strided_slice %357 {offsets = [0, 0, 0], sizes = [1, 2, 32], strides = [1, 1, 1]} : vector<2x2x128xf32> to vector<1x2x32xf32>
    %361 = vector.shape_cast %360 : vector<1x2x32xf32> to vector<2x32xf32>
    %362 = arith.addf %359, %361 : vector<2x32xf32>
    %363 = arith.negf %362 : vector<2x32xf32>
    %364 = math.exp %363 : vector<2x32xf32>
    %cst_225 = arith.constant 1.000000e+00 : f32
    %365 = vector.broadcast %cst_225 : f32 to vector<2x32xf32>
    %366 = arith.addf %365, %364 : vector<2x32xf32>
    %367 = arith.divf %365, %366 : vector<2x32xf32>
    %c0_226 = arith.constant 0 : index
    %c3_227 = arith.constant 3 : index
    %c0_228 = arith.constant 0 : index
    %c32_229 = arith.constant 32 : index
    %368 = vector.load %arg9[%c0_226, %c3_227, %c0_228, %c32_229] : memref<2x8x2x128xf32, #tpu.memory_space<vmem>>, vector<1x1x2x32xf32>
    %369 = vector.shape_cast %368 : vector<1x1x2x32xf32> to vector<2x32xf32>
    %370 = vector.extract_strided_slice %357 {offsets = [0, 0, 32], sizes = [1, 2, 32], strides = [1, 1, 1]} : vector<2x2x128xf32> to vector<1x2x32xf32>
    %371 = vector.shape_cast %370 : vector<1x2x32xf32> to vector<2x32xf32>
    %372 = arith.addf %369, %371 : vector<2x32xf32>
    %373 = arith.negf %372 : vector<2x32xf32>
    %374 = math.exp %373 : vector<2x32xf32>
    %cst_230 = arith.constant 1.000000e+00 : f32
    %375 = vector.broadcast %cst_230 : f32 to vector<2x32xf32>
    %376 = arith.addf %375, %374 : vector<2x32xf32>
    %377 = arith.divf %375, %376 : vector<2x32xf32>
    %c0_231 = arith.constant 0 : index
    %c3_232 = arith.constant 3 : index
    %c0_233 = arith.constant 0 : index
    %c64_234 = arith.constant 64 : index
    %378 = vector.load %arg9[%c0_231, %c3_232, %c0_233, %c64_234] : memref<2x8x2x128xf32, #tpu.memory_space<vmem>>, vector<1x1x2x32xf32>
    %379 = vector.shape_cast %378 : vector<1x1x2x32xf32> to vector<2x32xf32>
    %380 = vector.extract_strided_slice %357 {offsets = [0, 0, 64], sizes = [1, 2, 32], strides = [1, 1, 1]} : vector<2x2x128xf32> to vector<1x2x32xf32>
    %381 = vector.shape_cast %380 : vector<1x2x32xf32> to vector<2x32xf32>
    %382 = arith.addf %379, %381 : vector<2x32xf32>
    %383 = math.tanh %382 : vector<2x32xf32>
    %c0_235 = arith.constant 0 : index
    %c3_236 = arith.constant 3 : index
    %c0_237 = arith.constant 0 : index
    %c96_238 = arith.constant 96 : index
    %384 = vector.load %arg9[%c0_235, %c3_236, %c0_237, %c96_238] : memref<2x8x2x128xf32, #tpu.memory_space<vmem>>, vector<1x1x2x32xf32>
    %385 = vector.shape_cast %384 : vector<1x1x2x32xf32> to vector<2x32xf32>
    %386 = vector.extract_strided_slice %357 {offsets = [0, 0, 96], sizes = [1, 2, 32], strides = [1, 1, 1]} : vector<2x2x128xf32> to vector<1x2x32xf32>
    %387 = vector.shape_cast %386 : vector<1x2x32xf32> to vector<2x32xf32>
    %388 = arith.addf %385, %387 : vector<2x32xf32>
    %389 = arith.negf %388 : vector<2x32xf32>
    %390 = math.exp %389 : vector<2x32xf32>
    %cst_239 = arith.constant 1.000000e+00 : f32
    %391 = vector.broadcast %cst_239 : f32 to vector<2x32xf32>
    %392 = arith.addf %391, %390 : vector<2x32xf32>
    %393 = arith.divf %391, %392 : vector<2x32xf32>
    %c0_240 = arith.constant 0 : index
    %c0_241 = arith.constant 0 : index
    %c0_242 = arith.constant 0 : index
    %394 = vector.load %arg11[%c0_240, %c0_241, %c0_242] : memref<2x2x32xf32, #tpu.memory_space<vmem>>, vector<1x2x32xf32>
    %395 = vector.shape_cast %394 : vector<1x2x32xf32> to vector<2x32xf32>
    %396 = arith.mulf %377, %395 : vector<2x32xf32>
    %397 = arith.mulf %367, %383 : vector<2x32xf32>
    %398 = arith.addf %396, %397 : vector<2x32xf32>
    %399 = math.tanh %398 : vector<2x32xf32>
    %400 = arith.mulf %393, %399 : vector<2x32xf32>
    %c0_243 = arith.constant 0 : index
    %c0_244 = arith.constant 0 : index
    %c0_245 = arith.constant 0 : index
    %401 = vector.load %arg11[%c0_243, %c0_244, %c0_245] : memref<2x2x32xf32, #tpu.memory_space<vmem>>, vector<1x2x32xf32>
    %402 = vector.shape_cast %401 : vector<1x2x32xf32> to vector<2x32xf32>
    %403 = vector.shape_cast %398 : vector<2x32xf32> to vector<1x2x32xf32>
    tpu.vector_store %arg11[%c0_243, %c0_244, %c0_245], %403 {strides = array<i32>} : memref<2x2x32xf32, #tpu.memory_space<vmem>>, vector<1x2x32xf32>,
    %c0_246 = arith.constant 0 : index
    %c0_247 = arith.constant 0 : index
    %c0_248 = arith.constant 0 : index
    %404 = vector.load %arg10[%c0_246, %c0_247, %c0_248] : memref<2x2x32xf32, #tpu.memory_space<vmem>>, vector<1x2x32xf32>
    %405 = vector.shape_cast %404 : vector<1x2x32xf32> to vector<2x32xf32>
    %406 = vector.shape_cast %400 : vector<2x32xf32> to vector<1x2x32xf32>
    tpu.vector_store %arg10[%c0_246, %c0_247, %c0_248], %406 {strides = array<i32>} : memref<2x2x32xf32, #tpu.memory_space<vmem>>, vector<1x2x32xf32>,
    %407 = arith.truncf %400 : vector<2x32xf32> to vector<2x32xbf16>
    %c3_249 = arith.constant 3 : index
    %c0_250 = arith.constant 0 : index
    %c0_251 = arith.constant 0 : index
    %408 = vector.load %arg7[%c3_249, %c0_250, %c0_251] : memref<8x2x32xbf16, #tpu.memory_space<vmem>>, vector<1x2x32xbf16>
    %409 = vector.shape_cast %408 : vector<1x2x32xbf16> to vector<2x32xbf16>
    %410 = vector.shape_cast %407 : vector<2x32xbf16> to vector<1x2x32xbf16>
    tpu.vector_store %arg7[%c3_249, %c0_250, %c0_251], %410 {strides = array<i32>} : memref<8x2x32xbf16, #tpu.memory_space<vmem>>, vector<1x2x32xbf16>,
    %c1_252 = arith.constant 1 : index
    %c4 = arith.constant 4 : index
    %c0_253 = arith.constant 0 : index
    %c0_254 = arith.constant 0 : index
    %411 = vector.load %arg9[%c1_252, %c4, %c0_253, %c0_254] : memref<2x8x2x128xf32, #tpu.memory_space<vmem>>, vector<1x1x2x32xf32>
    %412 = vector.shape_cast %411 : vector<1x1x2x32xf32> to vector<2x32xf32>
    %413 = vector.extract_strided_slice %357 {offsets = [1, 0, 0], sizes = [1, 2, 32], strides = [1, 1, 1]} : vector<2x2x128xf32> to vector<1x2x32xf32>
    %414 = vector.shape_cast %413 : vector<1x2x32xf32> to vector<2x32xf32>
    %415 = arith.addf %412, %414 : vector<2x32xf32>
    %416 = arith.negf %415 : vector<2x32xf32>
    %417 = math.exp %416 : vector<2x32xf32>
    %cst_255 = arith.constant 1.000000e+00 : f32
    %418 = vector.broadcast %cst_255 : f32 to vector<2x32xf32>
    %419 = arith.addf %418, %417 : vector<2x32xf32>
    %420 = arith.divf %418, %419 : vector<2x32xf32>
    %c1_256 = arith.constant 1 : index
    %c4_257 = arith.constant 4 : index
    %c0_258 = arith.constant 0 : index
    %c32_259 = arith.constant 32 : index
    %421 = vector.load %arg9[%c1_256, %c4_257, %c0_258, %c32_259] : memref<2x8x2x128xf32, #tpu.memory_space<vmem>>, vector<1x1x2x32xf32>
    %422 = vector.shape_cast %421 : vector<1x1x2x32xf32> to vector<2x32xf32>
    %423 = vector.extract_strided_slice %357 {offsets = [1, 0, 32], sizes = [1, 2, 32], strides = [1, 1, 1]} : vector<2x2x128xf32> to vector<1x2x32xf32>
    %424 = vector.shape_cast %423 : vector<1x2x32xf32> to vector<2x32xf32>
    %425 = arith.addf %422, %424 : vector<2x32xf32>
    %426 = arith.negf %425 : vector<2x32xf32>
    %427 = math.exp %426 : vector<2x32xf32>
    %cst_260 = arith.constant 1.000000e+00 : f32
    %428 = vector.broadcast %cst_260 : f32 to vector<2x32xf32>
    %429 = arith.addf %428, %427 : vector<2x32xf32>
    %430 = arith.divf %428, %429 : vector<2x32xf32>
    %c1_261 = arith.constant 1 : index
    %c4_262 = arith.constant 4 : index
    %c0_263 = arith.constant 0 : index
    %c64_264 = arith.constant 64 : index
    %431 = vector.load %arg9[%c1_261, %c4_262, %c0_263, %c64_264] : memref<2x8x2x128xf32, #tpu.memory_space<vmem>>, vector<1x1x2x32xf32>
    %432 = vector.shape_cast %431 : vector<1x1x2x32xf32> to vector<2x32xf32>
    %433 = vector.extract_strided_slice %357 {offsets = [1, 0, 64], sizes = [1, 2, 32], strides = [1, 1, 1]} : vector<2x2x128xf32> to vector<1x2x32xf32>
    %434 = vector.shape_cast %433 : vector<1x2x32xf32> to vector<2x32xf32>
    %435 = arith.addf %432, %434 : vector<2x32xf32>
    %436 = math.tanh %435 : vector<2x32xf32>
    %c1_265 = arith.constant 1 : index
    %c4_266 = arith.constant 4 : index
    %c0_267 = arith.constant 0 : index
    %c96_268 = arith.constant 96 : index
    %437 = vector.load %arg9[%c1_265, %c4_266, %c0_267, %c96_268] : memref<2x8x2x128xf32, #tpu.memory_space<vmem>>, vector<1x1x2x32xf32>
    %438 = vector.shape_cast %437 : vector<1x1x2x32xf32> to vector<2x32xf32>
    %439 = vector.extract_strided_slice %357 {offsets = [1, 0, 96], sizes = [1, 2, 32], strides = [1, 1, 1]} : vector<2x2x128xf32> to vector<1x2x32xf32>
    %440 = vector.shape_cast %439 : vector<1x2x32xf32> to vector<2x32xf32>
    %441 = arith.addf %438, %440 : vector<2x32xf32>
    %442 = arith.negf %441 : vector<2x32xf32>
    %443 = math.exp %442 : vector<2x32xf32>
    %cst_269 = arith.constant 1.000000e+00 : f32
    %444 = vector.broadcast %cst_269 : f32 to vector<2x32xf32>
    %445 = arith.addf %444, %443 : vector<2x32xf32>
    %446 = arith.divf %444, %445 : vector<2x32xf32>
    %c1_270 = arith.constant 1 : index
    %c0_271 = arith.constant 0 : index
    %c0_272 = arith.constant 0 : index
    %447 = vector.load %arg11[%c1_270, %c0_271, %c0_272] : memref<2x2x32xf32, #tpu.memory_space<vmem>>, vector<1x2x32xf32>
    %448 = vector.shape_cast %447 : vector<1x2x32xf32> to vector<2x32xf32>
    %449 = arith.mulf %430, %448 : vector<2x32xf32>
    %450 = arith.mulf %420, %436 : vector<2x32xf32>
    %451 = arith.addf %449, %450 : vector<2x32xf32>
    %452 = math.tanh %451 : vector<2x32xf32>
    %453 = arith.mulf %446, %452 : vector<2x32xf32>
    %c1_273 = arith.constant 1 : index
    %c0_274 = arith.constant 0 : index
    %c0_275 = arith.constant 0 : index
    %454 = vector.load %arg11[%c1_273, %c0_274, %c0_275] : memref<2x2x32xf32, #tpu.memory_space<vmem>>, vector<1x2x32xf32>
    %455 = vector.shape_cast %454 : vector<1x2x32xf32> to vector<2x32xf32>
    %456 = vector.shape_cast %451 : vector<2x32xf32> to vector<1x2x32xf32>
    tpu.vector_store %arg11[%c1_273, %c0_274, %c0_275], %456 {strides = array<i32>} : memref<2x2x32xf32, #tpu.memory_space<vmem>>, vector<1x2x32xf32>,
    %c1_276 = arith.constant 1 : index
    %c0_277 = arith.constant 0 : index
    %c0_278 = arith.constant 0 : index
    %457 = vector.load %arg10[%c1_276, %c0_277, %c0_278] : memref<2x2x32xf32, #tpu.memory_space<vmem>>, vector<1x2x32xf32>
    %458 = vector.shape_cast %457 : vector<1x2x32xf32> to vector<2x32xf32>
    %459 = vector.shape_cast %453 : vector<2x32xf32> to vector<1x2x32xf32>
    tpu.vector_store %arg10[%c1_276, %c0_277, %c0_278], %459 {strides = array<i32>} : memref<2x2x32xf32, #tpu.memory_space<vmem>>, vector<1x2x32xf32>,
    %460 = arith.truncf %453 : vector<2x32xf32> to vector<2x32xbf16>
    %c4_279 = arith.constant 4 : index
    %c0_280 = arith.constant 0 : index
    %c0_281 = arith.constant 0 : index
    %461 = vector.load %arg8[%c4_279, %c0_280, %c0_281] : memref<8x2x32xbf16, #tpu.memory_space<vmem>>, vector<1x2x32xbf16>
    %462 = vector.shape_cast %461 : vector<1x2x32xbf16> to vector<2x32xbf16>
    %463 = vector.shape_cast %460 : vector<2x32xbf16> to vector<1x2x32xbf16>
    tpu.vector_store %arg8[%c4_279, %c0_280, %c0_281], %463 {strides = array<i32>} : memref<8x2x32xbf16, #tpu.memory_space<vmem>>, vector<1x2x32xbf16>,
    %c0_282 = arith.constant 0 : index
    %c0_283 = arith.constant 0 : index
    %c0_284 = arith.constant 0 : index
    %464 = vector.load %arg10[%c0_282, %c0_283, %c0_284] : memref<2x2x32xf32, #tpu.memory_space<vmem>>, vector<2x2x32xf32>
    %465 = arith.truncf %464 : vector<2x2x32xf32> to vector<2x2x32xbf16>
    "tpu.trace_start"() <{level = 10 : i32, message = "dbh,dhg->dbg"}> : () -> ()
    %cst_285 = arith.constant dense<0.000000e+00> : vector<2x2x128xf32>
    %466 = tpu.matmul %465, %27, %cst_285 {dimension_numbers = #tpu.dot_dimension_numbers<[2], [1], [1], [2], [0, 0, 0, 1, 1, 2], [0], [0]>} : vector<2x2x32xbf16>, vector<2x32x128xbf16>, vector<2x2x128xf32> -> vector<2x2x128xf32>
    "tpu.trace_stop"() : () -> ()
    %c0_286 = arith.constant 0 : index
    %c4_287 = arith.constant 4 : index
    %c0_288 = arith.constant 0 : index
    %c0_289 = arith.constant 0 : index
    %467 = vector.load %arg9[%c0_286, %c4_287, %c0_288, %c0_289] : memref<2x8x2x128xf32, #tpu.memory_space<vmem>>, vector<1x1x2x32xf32>
    %468 = vector.shape_cast %467 : vector<1x1x2x32xf32> to vector<2x32xf32>
    %469 = vector.extract_strided_slice %466 {offsets = [0, 0, 0], sizes = [1, 2, 32], strides = [1, 1, 1]} : vector<2x2x128xf32> to vector<1x2x32xf32>
    %470 = vector.shape_cast %469 : vector<1x2x32xf32> to vector<2x32xf32>
    %471 = arith.addf %468, %470 : vector<2x32xf32>
    %472 = arith.negf %471 : vector<2x32xf32>
    %473 = math.exp %472 : vector<2x32xf32>
    %cst_290 = arith.constant 1.000000e+00 : f32
    %474 = vector.broadcast %cst_290 : f32 to vector<2x32xf32>
    %475 = arith.addf %474, %473 : vector<2x32xf32>
    %476 = arith.divf %474, %475 : vector<2x32xf32>
    %c0_291 = arith.constant 0 : index
    %c4_292 = arith.constant 4 : index
    %c0_293 = arith.constant 0 : index
    %c32_294 = arith.constant 32 : index
    %477 = vector.load %arg9[%c0_291, %c4_292, %c0_293, %c32_294] : memref<2x8x2x128xf32, #tpu.memory_space<vmem>>, vector<1x1x2x32xf32>
    %478 = vector.shape_cast %477 : vector<1x1x2x32xf32> to vector<2x32xf32>
    %479 = vector.extract_strided_slice %466 {offsets = [0, 0, 32], sizes = [1, 2, 32], strides = [1, 1, 1]} : vector<2x2x128xf32> to vector<1x2x32xf32>
    %480 = vector.shape_cast %479 : vector<1x2x32xf32> to vector<2x32xf32>
    %481 = arith.addf %478, %480 : vector<2x32xf32>
    %482 = arith.negf %481 : vector<2x32xf32>
    %483 = math.exp %482 : vector<2x32xf32>
    %cst_295 = arith.constant 1.000000e+00 : f32
    %484 = vector.broadcast %cst_295 : f32 to vector<2x32xf32>
    %485 = arith.addf %484, %483 : vector<2x32xf32>
    %486 = arith.divf %484, %485 : vector<2x32xf32>
    %c0_296 = arith.constant 0 : index
    %c4_297 = arith.constant 4 : index
    %c0_298 = arith.constant 0 : index
    %c64_299 = arith.constant 64 : index
    %487 = vector.load %arg9[%c0_296, %c4_297, %c0_298, %c64_299] : memref<2x8x2x128xf32, #tpu.memory_space<vmem>>, vector<1x1x2x32xf32>
    %488 = vector.shape_cast %487 : vector<1x1x2x32xf32> to vector<2x32xf32>
    %489 = vector.extract_strided_slice %466 {offsets = [0, 0, 64], sizes = [1, 2, 32], strides = [1, 1, 1]} : vector<2x2x128xf32> to vector<1x2x32xf32>
    %490 = vector.shape_cast %489 : vector<1x2x32xf32> to vector<2x32xf32>
    %491 = arith.addf %488, %490 : vector<2x32xf32>
    %492 = math.tanh %491 : vector<2x32xf32>
    %c0_300 = arith.constant 0 : index
    %c4_301 = arith.constant 4 : index
    %c0_302 = arith.constant 0 : index
    %c96_303 = arith.constant 96 : index
    %493 = vector.load %arg9[%c0_300, %c4_301, %c0_302, %c96_303] : memref<2x8x2x128xf32, #tpu.memory_space<vmem>>, vector<1x1x2x32xf32>
    %494 = vector.shape_cast %493 : vector<1x1x2x32xf32> to vector<2x32xf32>
    %495 = vector.extract_strided_slice %466 {offsets = [0, 0, 96], sizes = [1, 2, 32], strides = [1, 1, 1]} : vector<2x2x128xf32> to vector<1x2x32xf32>
    %496 = vector.shape_cast %495 : vector<1x2x32xf32> to vector<2x32xf32>
    %497 = arith.addf %494, %496 : vector<2x32xf32>
    %498 = arith.negf %497 : vector<2x32xf32>
    %499 = math.exp %498 : vector<2x32xf32>
    %cst_304 = arith.constant 1.000000e+00 : f32
    %500 = vector.broadcast %cst_304 : f32 to vector<2x32xf32>
    %501 = arith.addf %500, %499 : vector<2x32xf32>
    %502 = arith.divf %500, %501 : vector<2x32xf32>
    %c0_305 = arith.constant 0 : index
    %c0_306 = arith.constant 0 : index
    %c0_307 = arith.constant 0 : index
    %503 = vector.load %arg11[%c0_305, %c0_306, %c0_307] : memref<2x2x32xf32, #tpu.memory_space<vmem>>, vector<1x2x32xf32>
    %504 = vector.shape_cast %503 : vector<1x2x32xf32> to vector<2x32xf32>
    %505 = arith.mulf %486, %504 : vector<2x32xf32>
    %506 = arith.mulf %476, %492 : vector<2x32xf32>
    %507 = arith.addf %505, %506 : vector<2x32xf32>
    %508 = math.tanh %507 : vector<2x32xf32>
    %509 = arith.mulf %502, %508 : vector<2x32xf32>
    %c0_308 = arith.constant 0 : index
    %c0_309 = arith.constant 0 : index
    %c0_310 = arith.constant 0 : index
    %510 = vector.load %arg11[%c0_308, %c0_309, %c0_310] : memref<2x2x32xf32, #tpu.memory_space<vmem>>, vector<1x2x32xf32>
    %511 = vector.shape_cast %510 : vector<1x2x32xf32> to vector<2x32xf32>
    %512 = vector.shape_cast %507 : vector<2x32xf32> to vector<1x2x32xf32>
    tpu.vector_store %arg11[%c0_308, %c0_309, %c0_310], %512 {strides = array<i32>} : memref<2x2x32xf32, #tpu.memory_space<vmem>>, vector<1x2x32xf32>,
    %c0_311 = arith.constant 0 : index
    %c0_312 = arith.constant 0 : index
    %c0_313 = arith.constant 0 : index
    %513 = vector.load %arg10[%c0_311, %c0_312, %c0_313] : memref<2x2x32xf32, #tpu.memory_space<vmem>>, vector<1x2x32xf32>
    %514 = vector.shape_cast %513 : vector<1x2x32xf32> to vector<2x32xf32>
    %515 = vector.shape_cast %509 : vector<2x32xf32> to vector<1x2x32xf32>
    tpu.vector_store %arg10[%c0_311, %c0_312, %c0_313], %515 {strides = array<i32>} : memref<2x2x32xf32, #tpu.memory_space<vmem>>, vector<1x2x32xf32>,
    %516 = arith.truncf %509 : vector<2x32xf32> to vector<2x32xbf16>
    %c4_314 = arith.constant 4 : index
    %c0_315 = arith.constant 0 : index
    %c0_316 = arith.constant 0 : index
    %517 = vector.load %arg7[%c4_314, %c0_315, %c0_316] : memref<8x2x32xbf16, #tpu.memory_space<vmem>>, vector<1x2x32xbf16>
    %518 = vector.shape_cast %517 : vector<1x2x32xbf16> to vector<2x32xbf16>
    %519 = vector.shape_cast %516 : vector<2x32xbf16> to vector<1x2x32xbf16>
    tpu.vector_store %arg7[%c4_314, %c0_315, %c0_316], %519 {strides = array<i32>} : memref<8x2x32xbf16, #tpu.memory_space<vmem>>, vector<1x2x32xbf16>,
    %c1_317 = arith.constant 1 : index
    %c3_318 = arith.constant 3 : index
    %c0_319 = arith.constant 0 : index
    %c0_320 = arith.constant 0 : index
    %520 = vector.load %arg9[%c1_317, %c3_318, %c0_319, %c0_320] : memref<2x8x2x128xf32, #tpu.memory_space<vmem>>, vector<1x1x2x32xf32>
    %521 = vector.shape_cast %520 : vector<1x1x2x32xf32> to vector<2x32xf32>
    %522 = vector.extract_strided_slice %466 {offsets = [1, 0, 0], sizes = [1, 2, 32], strides = [1, 1, 1]} : vector<2x2x128xf32> to vector<1x2x32xf32>
    %523 = vector.shape_cast %522 : vector<1x2x32xf32> to vector<2x32xf32>
    %524 = arith.addf %521, %523 : vector<2x32xf32>
    %525 = arith.negf %524 : vector<2x32xf32>
    %526 = math.exp %525 : vector<2x32xf32>
    %cst_321 = arith.constant 1.000000e+00 : f32
    %527 = vector.broadcast %cst_321 : f32 to vector<2x32xf32>
    %528 = arith.addf %527, %526 : vector<2x32xf32>
    %529 = arith.divf %527, %528 : vector<2x32xf32>
    %c1_322 = arith.constant 1 : index
    %c3_323 = arith.constant 3 : index
    %c0_324 = arith.constant 0 : index
    %c32_325 = arith.constant 32 : index
    %530 = vector.load %arg9[%c1_322, %c3_323, %c0_324, %c32_325] : memref<2x8x2x128xf32, #tpu.memory_space<vmem>>, vector<1x1x2x32xf32>
    %531 = vector.shape_cast %530 : vector<1x1x2x32xf32> to vector<2x32xf32>
    %532 = vector.extract_strided_slice %466 {offsets = [1, 0, 32], sizes = [1, 2, 32], strides = [1, 1, 1]} : vector<2x2x128xf32> to vector<1x2x32xf32>
    %533 = vector.shape_cast %532 : vector<1x2x32xf32> to vector<2x32xf32>
    %534 = arith.addf %531, %533 : vector<2x32xf32>
    %535 = arith.negf %534 : vector<2x32xf32>
    %536 = math.exp %535 : vector<2x32xf32>
    %cst_326 = arith.constant 1.000000e+00 : f32
    %537 = vector.broadcast %cst_326 : f32 to vector<2x32xf32>
    %538 = arith.addf %537, %536 : vector<2x32xf32>
    %539 = arith.divf %537, %538 : vector<2x32xf32>
    %c1_327 = arith.constant 1 : index
    %c3_328 = arith.constant 3 : index
    %c0_329 = arith.constant 0 : index
    %c64_330 = arith.constant 64 : index
    %540 = vector.load %arg9[%c1_327, %c3_328, %c0_329, %c64_330] : memref<2x8x2x128xf32, #tpu.memory_space<vmem>>, vector<1x1x2x32xf32>
    %541 = vector.shape_cast %540 : vector<1x1x2x32xf32> to vector<2x32xf32>
    %542 = vector.extract_strided_slice %466 {offsets = [1, 0, 64], sizes = [1, 2, 32], strides = [1, 1, 1]} : vector<2x2x128xf32> to vector<1x2x32xf32>
    %543 = vector.shape_cast %542 : vector<1x2x32xf32> to vector<2x32xf32>
    %544 = arith.addf %541, %543 : vector<2x32xf32>
    %545 = math.tanh %544 : vector<2x32xf32>
    %c1_331 = arith.constant 1 : index
    %c3_332 = arith.constant 3 : index
    %c0_333 = arith.constant 0 : index
    %c96_334 = arith.constant 96 : index
    %546 = vector.load %arg9[%c1_331, %c3_332, %c0_333, %c96_334] : memref<2x8x2x128xf32, #tpu.memory_space<vmem>>, vector<1x1x2x32xf32>
    %547 = vector.shape_cast %546 : vector<1x1x2x32xf32> to vector<2x32xf32>
    %548 = vector.extract_strided_slice %466 {offsets = [1, 0, 96], sizes = [1, 2, 32], strides = [1, 1, 1]} : vector<2x2x128xf32> to vector<1x2x32xf32>
    %549 = vector.shape_cast %548 : vector<1x2x32xf32> to vector<2x32xf32>
    %550 = arith.addf %547, %549 : vector<2x32xf32>
    %551 = arith.negf %550 : vector<2x32xf32>
    %552 = math.exp %551 : vector<2x32xf32>
    %cst_335 = arith.constant 1.000000e+00 : f32
    %553 = vector.broadcast %cst_335 : f32 to vector<2x32xf32>
    %554 = arith.addf %553, %552 : vector<2x32xf32>
    %555 = arith.divf %553, %554 : vector<2x32xf32>
    %c1_336 = arith.constant 1 : index
    %c0_337 = arith.constant 0 : index
    %c0_338 = arith.constant 0 : index
    %556 = vector.load %arg11[%c1_336, %c0_337, %c0_338] : memref<2x2x32xf32, #tpu.memory_space<vmem>>, vector<1x2x32xf32>
    %557 = vector.shape_cast %556 : vector<1x2x32xf32> to vector<2x32xf32>
    %558 = arith.mulf %539, %557 : vector<2x32xf32>
    %559 = arith.mulf %529, %545 : vector<2x32xf32>
    %560 = arith.addf %558, %559 : vector<2x32xf32>
    %561 = math.tanh %560 : vector<2x32xf32>
    %562 = arith.mulf %555, %561 : vector<2x32xf32>
    %c1_339 = arith.constant 1 : index
    %c0_340 = arith.constant 0 : index
    %c0_341 = arith.constant 0 : index
    %563 = vector.load %arg11[%c1_339, %c0_340, %c0_341] : memref<2x2x32xf32, #tpu.memory_space<vmem>>, vector<1x2x32xf32>
    %564 = vector.shape_cast %563 : vector<1x2x32xf32> to vector<2x32xf32>
    %565 = vector.shape_cast %560 : vector<2x32xf32> to vector<1x2x32xf32>
    tpu.vector_store %arg11[%c1_339, %c0_340, %c0_341], %565 {strides = array<i32>} : memref<2x2x32xf32, #tpu.memory_space<vmem>>, vector<1x2x32xf32>,
    %c1_342 = arith.constant 1 : index
    %c0_343 = arith.constant 0 : index
    %c0_344 = arith.constant 0 : index
    %566 = vector.load %arg10[%c1_342, %c0_343, %c0_344] : memref<2x2x32xf32, #tpu.memory_space<vmem>>, vector<1x2x32xf32>
    %567 = vector.shape_cast %566 : vector<1x2x32xf32> to vector<2x32xf32>
    %568 = vector.shape_cast %562 : vector<2x32xf32> to vector<1x2x32xf32>
    tpu.vector_store %arg10[%c1_342, %c0_343, %c0_344], %568 {strides = array<i32>} : memref<2x2x32xf32, #tpu.memory_space<vmem>>, vector<1x2x32xf32>,
    %569 = arith.truncf %562 : vector<2x32xf32> to vector<2x32xbf16>
    %c3_345 = arith.constant 3 : index
    %c0_346 = arith.constant 0 : index
    %c0_347 = arith.constant 0 : index
    %570 = vector.load %arg8[%c3_345, %c0_346, %c0_347] : memref<8x2x32xbf16, #tpu.memory_space<vmem>>, vector<1x2x32xbf16>
    %571 = vector.shape_cast %570 : vector<1x2x32xbf16> to vector<2x32xbf16>
    %572 = vector.shape_cast %569 : vector<2x32xbf16> to vector<1x2x32xbf16>
    tpu.vector_store %arg8[%c3_345, %c0_346, %c0_347], %572 {strides = array<i32>} : memref<8x2x32xbf16, #tpu.memory_space<vmem>>, vector<1x2x32xbf16>,
    %c0_348 = arith.constant 0 : index
    %c0_349 = arith.constant 0 : index
    %c0_350 = arith.constant 0 : index
    %573 = vector.load %arg10[%c0_348, %c0_349, %c0_350] : memref<2x2x32xf32, #tpu.memory_space<vmem>>, vector<2x2x32xf32>
    %574 = arith.truncf %573 : vector<2x2x32xf32> to vector<2x2x32xbf16>
    "tpu.trace_start"() <{level = 10 : i32, message = "dbh,dhg->dbg"}> : () -> ()
    %cst_351 = arith.constant dense<0.000000e+00> : vector<2x2x128xf32>
    %575 = tpu.matmul %574, %27, %cst_351 {dimension_numbers = #tpu.dot_dimension_numbers<[2], [1], [1], [2], [0, 0, 0, 1, 1, 2], [0], [0]>} : vector<2x2x32xbf16>, vector<2x32x128xbf16>, vector<2x2x128xf32> -> vector<2x2x128xf32>
    "tpu.trace_stop"() : () -> ()
    %c0_352 = arith.constant 0 : index
    %c5_353 = arith.constant 5 : index
    %c0_354 = arith.constant 0 : index
    %c0_355 = arith.constant 0 : index
    %576 = vector.load %arg9[%c0_352, %c5_353, %c0_354, %c0_355] : memref<2x8x2x128xf32, #tpu.memory_space<vmem>>, vector<1x1x2x32xf32>
    %577 = vector.shape_cast %576 : vector<1x1x2x32xf32> to vector<2x32xf32>
    %578 = vector.extract_strided_slice %575 {offsets = [0, 0, 0], sizes = [1, 2, 32], strides = [1, 1, 1]} : vector<2x2x128xf32> to vector<1x2x32xf32>
    %579 = vector.shape_cast %578 : vector<1x2x32xf32> to vector<2x32xf32>
    %580 = arith.addf %577, %579 : vector<2x32xf32>
    %581 = arith.negf %580 : vector<2x32xf32>
    %582 = math.exp %581 : vector<2x32xf32>
    %cst_356 = arith.constant 1.000000e+00 : f32
    %583 = vector.broadcast %cst_356 : f32 to vector<2x32xf32>
    %584 = arith.addf %583, %582 : vector<2x32xf32>
    %585 = arith.divf %583, %584 : vector<2x32xf32>
    %c0_357 = arith.constant 0 : index
    %c5_358 = arith.constant 5 : index
    %c0_359 = arith.constant 0 : index
    %c32_360 = arith.constant 32 : index
    %586 = vector.load %arg9[%c0_357, %c5_358, %c0_359, %c32_360] : memref<2x8x2x128xf32, #tpu.memory_space<vmem>>, vector<1x1x2x32xf32>
    %587 = vector.shape_cast %586 : vector<1x1x2x32xf32> to vector<2x32xf32>
    %588 = vector.extract_strided_slice %575 {offsets = [0, 0, 32], sizes = [1, 2, 32], strides = [1, 1, 1]} : vector<2x2x128xf32> to vector<1x2x32xf32>
    %589 = vector.shape_cast %588 : vector<1x2x32xf32> to vector<2x32xf32>
    %590 = arith.addf %587, %589 : vector<2x32xf32>
    %591 = arith.negf %590 : vector<2x32xf32>
    %592 = math.exp %591 : vector<2x32xf32>
    %cst_361 = arith.constant 1.000000e+00 : f32
    %593 = vector.broadcast %cst_361 : f32 to vector<2x32xf32>
    %594 = arith.addf %593, %592 : vector<2x32xf32>
    %595 = arith.divf %593, %594 : vector<2x32xf32>
    %c0_362 = arith.constant 0 : index
    %c5_363 = arith.constant 5 : index
    %c0_364 = arith.constant 0 : index
    %c64_365 = arith.constant 64 : index
    %596 = vector.load %arg9[%c0_362, %c5_363, %c0_364, %c64_365] : memref<2x8x2x128xf32, #tpu.memory_space<vmem>>, vector<1x1x2x32xf32>
    %597 = vector.shape_cast %596 : vector<1x1x2x32xf32> to vector<2x32xf32>
    %598 = vector.extract_strided_slice %575 {offsets = [0, 0, 64], sizes = [1, 2, 32], strides = [1, 1, 1]} : vector<2x2x128xf32> to vector<1x2x32xf32>
    %599 = vector.shape_cast %598 : vector<1x2x32xf32> to vector<2x32xf32>
    %600 = arith.addf %597, %599 : vector<2x32xf32>
    %601 = math.tanh %600 : vector<2x32xf32>
    %c0_366 = arith.constant 0 : index
    %c5_367 = arith.constant 5 : index
    %c0_368 = arith.constant 0 : index
    %c96_369 = arith.constant 96 : index
    %602 = vector.load %arg9[%c0_366, %c5_367, %c0_368, %c96_369] : memref<2x8x2x128xf32, #tpu.memory_space<vmem>>, vector<1x1x2x32xf32>
    %603 = vector.shape_cast %602 : vector<1x1x2x32xf32> to vector<2x32xf32>
    %604 = vector.extract_strided_slice %575 {offsets = [0, 0, 96], sizes = [1, 2, 32], strides = [1, 1, 1]} : vector<2x2x128xf32> to vector<1x2x32xf32>
    %605 = vector.shape_cast %604 : vector<1x2x32xf32> to vector<2x32xf32>
    %606 = arith.addf %603, %605 : vector<2x32xf32>
    %607 = arith.negf %606 : vector<2x32xf32>
    %608 = math.exp %607 : vector<2x32xf32>
    %cst_370 = arith.constant 1.000000e+00 : f32
    %609 = vector.broadcast %cst_370 : f32 to vector<2x32xf32>
    %610 = arith.addf %609, %608 : vector<2x32xf32>
    %611 = arith.divf %609, %610 : vector<2x32xf32>
    %c0_371 = arith.constant 0 : index
    %c0_372 = arith.constant 0 : index
    %c0_373 = arith.constant 0 : index
    %612 = vector.load %arg11[%c0_371, %c0_372, %c0_373] : memref<2x2x32xf32, #tpu.memory_space<vmem>>, vector<1x2x32xf32>
    %613 = vector.shape_cast %612 : vector<1x2x32xf32> to vector<2x32xf32>
    %614 = arith.mulf %595, %613 : vector<2x32xf32>
    %615 = arith.mulf %585, %601 : vector<2x32xf32>
    %616 = arith.addf %614, %615 : vector<2x32xf32>
    %617 = math.tanh %616 : vector<2x32xf32>
    %618 = arith.mulf %611, %617 : vector<2x32xf32>
    %c0_374 = arith.constant 0 : index
    %c0_375 = arith.constant 0 : index
    %c0_376 = arith.constant 0 : index
    %619 = vector.load %arg11[%c0_374, %c0_375, %c0_376] : memref<2x2x32xf32, #tpu.memory_space<vmem>>, vector<1x2x32xf32>
    %620 = vector.shape_cast %619 : vector<1x2x32xf32> to vector<2x32xf32>
    %621 = vector.shape_cast %616 : vector<2x32xf32> to vector<1x2x32xf32>
    tpu.vector_store %arg11[%c0_374, %c0_375, %c0_376], %621 {strides = array<i32>} : memref<2x2x32xf32, #tpu.memory_space<vmem>>, vector<1x2x32xf32>,
    %c0_377 = arith.constant 0 : index
    %c0_378 = arith.constant 0 : index
    %c0_379 = arith.constant 0 : index
    %622 = vector.load %arg10[%c0_377, %c0_378, %c0_379] : memref<2x2x32xf32, #tpu.memory_space<vmem>>, vector<1x2x32xf32>
    %623 = vector.shape_cast %622 : vector<1x2x32xf32> to vector<2x32xf32>
    %624 = vector.shape_cast %618 : vector<2x32xf32> to vector<1x2x32xf32>
    tpu.vector_store %arg10[%c0_377, %c0_378, %c0_379], %624 {strides = array<i32>} : memref<2x2x32xf32, #tpu.memory_space<vmem>>, vector<1x2x32xf32>,
    %625 = arith.truncf %618 : vector<2x32xf32> to vector<2x32xbf16>
    %c5_380 = arith.constant 5 : index
    %c0_381 = arith.constant 0 : index
    %c0_382 = arith.constant 0 : index
    %626 = vector.load %arg7[%c5_380, %c0_381, %c0_382] : memref<8x2x32xbf16, #tpu.memory_space<vmem>>, vector<1x2x32xbf16>
    %627 = vector.shape_cast %626 : vector<1x2x32xbf16> to vector<2x32xbf16>
    %628 = vector.shape_cast %625 : vector<2x32xbf16> to vector<1x2x32xbf16>
    tpu.vector_store %arg7[%c5_380, %c0_381, %c0_382], %628 {strides = array<i32>} : memref<8x2x32xbf16, #tpu.memory_space<vmem>>, vector<1x2x32xbf16>,
    %c1_383 = arith.constant 1 : index
    %c2_384 = arith.constant 2 : index
    %c0_385 = arith.constant 0 : index
    %c0_386 = arith.constant 0 : index
    %629 = vector.load %arg9[%c1_383, %c2_384, %c0_385, %c0_386] : memref<2x8x2x128xf32, #tpu.memory_space<vmem>>, vector<1x1x2x32xf32>
    %630 = vector.shape_cast %629 : vector<1x1x2x32xf32> to vector<2x32xf32>
    %631 = vector.extract_strided_slice %575 {offsets = [1, 0, 0], sizes = [1, 2, 32], strides = [1, 1, 1]} : vector<2x2x128xf32> to vector<1x2x32xf32>
    %632 = vector.shape_cast %631 : vector<1x2x32xf32> to vector<2x32xf32>
    %633 = arith.addf %630, %632 : vector<2x32xf32>
    %634 = arith.negf %633 : vector<2x32xf32>
    %635 = math.exp %634 : vector<2x32xf32>
    %cst_387 = arith.constant 1.000000e+00 : f32
    %636 = vector.broadcast %cst_387 : f32 to vector<2x32xf32>
    %637 = arith.addf %636, %635 : vector<2x32xf32>
    %638 = arith.divf %636, %637 : vector<2x32xf32>
    %c1_388 = arith.constant 1 : index
    %c2_389 = arith.constant 2 : index
    %c0_390 = arith.constant 0 : index
    %c32_391 = arith.constant 32 : index
    %639 = vector.load %arg9[%c1_388, %c2_389, %c0_390, %c32_391] : memref<2x8x2x128xf32, #tpu.memory_space<vmem>>, vector<1x1x2x32xf32>
    %640 = vector.shape_cast %639 : vector<1x1x2x32xf32> to vector<2x32xf32>
    %641 = vector.extract_strided_slice %575 {offsets = [1, 0, 32], sizes = [1, 2, 32], strides = [1, 1, 1]} : vector<2x2x128xf32> to vector<1x2x32xf32>
    %642 = vector.shape_cast %641 : vector<1x2x32xf32> to vector<2x32xf32>
    %643 = arith.addf %640, %642 : vector<2x32xf32>
    %644 = arith.negf %643 : vector<2x32xf32>
    %645 = math.exp %644 : vector<2x32xf32>
    %cst_392 = arith.constant 1.000000e+00 : f32
    %646 = vector.broadcast %cst_392 : f32 to vector<2x32xf32>
    %647 = arith.addf %646, %645 : vector<2x32xf32>
    %648 = arith.divf %646, %647 : vector<2x32xf32>
    %c1_393 = arith.constant 1 : index
    %c2_394 = arith.constant 2 : index
    %c0_395 = arith.constant 0 : index
    %c64_396 = arith.constant 64 : index
    %649 = vector.load %arg9[%c1_393, %c2_394, %c0_395, %c64_396] : memref<2x8x2x128xf32, #tpu.memory_space<vmem>>, vector<1x1x2x32xf32>
    %650 = vector.shape_cast %649 : vector<1x1x2x32xf32> to vector<2x32xf32>
    %651 = vector.extract_strided_slice %575 {offsets = [1, 0, 64], sizes = [1, 2, 32], strides = [1, 1, 1]} : vector<2x2x128xf32> to vector<1x2x32xf32>
    %652 = vector.shape_cast %651 : vector<1x2x32xf32> to vector<2x32xf32>
    %653 = arith.addf %650, %652 : vector<2x32xf32>
    %654 = math.tanh %653 : vector<2x32xf32>
    %c1_397 = arith.constant 1 : index
    %c2_398 = arith.constant 2 : index
    %c0_399 = arith.constant 0 : index
    %c96_400 = arith.constant 96 : index
    %655 = vector.load %arg9[%c1_397, %c2_398, %c0_399, %c96_400] : memref<2x8x2x128xf32, #tpu.memory_space<vmem>>, vector<1x1x2x32xf32>
    %656 = vector.shape_cast %655 : vector<1x1x2x32xf32> to vector<2x32xf32>
    %657 = vector.extract_strided_slice %575 {offsets = [1, 0, 96], sizes = [1, 2, 32], strides = [1, 1, 1]} : vector<2x2x128xf32> to vector<1x2x32xf32>
    %658 = vector.shape_cast %657 : vector<1x2x32xf32> to vector<2x32xf32>
    %659 = arith.addf %656, %658 : vector<2x32xf32>
    %660 = arith.negf %659 : vector<2x32xf32>
    %661 = math.exp %660 : vector<2x32xf32>
    %cst_401 = arith.constant 1.000000e+00 : f32
    %662 = vector.broadcast %cst_401 : f32 to vector<2x32xf32>
    %663 = arith.addf %662, %661 : vector<2x32xf32>
    %664 = arith.divf %662, %663 : vector<2x32xf32>
    %c1_402 = arith.constant 1 : index
    %c0_403 = arith.constant 0 : index
    %c0_404 = arith.constant 0 : index
    %665 = vector.load %arg11[%c1_402, %c0_403, %c0_404] : memref<2x2x32xf32, #tpu.memory_space<vmem>>, vector<1x2x32xf32>
    %666 = vector.shape_cast %665 : vector<1x2x32xf32> to vector<2x32xf32>
    %667 = arith.mulf %648, %666 : vector<2x32xf32>
    %668 = arith.mulf %638, %654 : vector<2x32xf32>
    %669 = arith.addf %667, %668 : vector<2x32xf32>
    %670 = math.tanh %669 : vector<2x32xf32>
    %671 = arith.mulf %664, %670 : vector<2x32xf32>
    %c1_405 = arith.constant 1 : index
    %c0_406 = arith.constant 0 : index
    %c0_407 = arith.constant 0 : index
    %672 = vector.load %arg11[%c1_405, %c0_406, %c0_407] : memref<2x2x32xf32, #tpu.memory_space<vmem>>, vector<1x2x32xf32>
    %673 = vector.shape_cast %672 : vector<1x2x32xf32> to vector<2x32xf32>
    %674 = vector.shape_cast %669 : vector<2x32xf32> to vector<1x2x32xf32>
    tpu.vector_store %arg11[%c1_405, %c0_406, %c0_407], %674 {strides = array<i32>} : memref<2x2x32xf32, #tpu.memory_space<vmem>>, vector<1x2x32xf32>,
    %c1_408 = arith.constant 1 : index
    %c0_409 = arith.constant 0 : index
    %c0_410 = arith.constant 0 : index
    %675 = vector.load %arg10[%c1_408, %c0_409, %c0_410] : memref<2x2x32xf32, #tpu.memory_space<vmem>>, vector<1x2x32xf32>
    %676 = vector.shape_cast %675 : vector<1x2x32xf32> to vector<2x32xf32>
    %677 = vector.shape_cast %671 : vector<2x32xf32> to vector<1x2x32xf32>
    tpu.vector_store %arg10[%c1_408, %c0_409, %c0_410], %677 {strides = array<i32>} : memref<2x2x32xf32, #tpu.memory_space<vmem>>, vector<1x2x32xf32>,
    %678 = arith.truncf %671 : vector<2x32xf32> to vector<2x32xbf16>
    %c2_411 = arith.constant 2 : index
    %c0_412 = arith.constant 0 : index
    %c0_413 = arith.constant 0 : index
    %679 = vector.load %arg8[%c2_411, %c0_412, %c0_413] : memref<8x2x32xbf16, #tpu.memory_space<vmem>>, vector<1x2x32xbf16>
    %680 = vector.shape_cast %679 : vector<1x2x32xbf16> to vector<2x32xbf16>
    %681 = vector.shape_cast %678 : vector<2x32xbf16> to vector<1x2x32xbf16>
    tpu.vector_store %arg8[%c2_411, %c0_412, %c0_413], %681 {strides = array<i32>} : memref<8x2x32xbf16, #tpu.memory_space<vmem>>, vector<1x2x32xbf16>,
    %c0_414 = arith.constant 0 : index
    %c0_415 = arith.constant 0 : index
    %c0_416 = arith.constant 0 : index
    %682 = vector.load %arg10[%c0_414, %c0_415, %c0_416] : memref<2x2x32xf32, #tpu.memory_space<vmem>>, vector<2x2x32xf32>
    %683 = arith.truncf %682 : vector<2x2x32xf32> to vector<2x2x32xbf16>
    "tpu.trace_start"() <{level = 10 : i32, message = "dbh,dhg->dbg"}> : () -> ()
    %cst_417 = arith.constant dense<0.000000e+00> : vector<2x2x128xf32>
    %684 = tpu.matmul %683, %27, %cst_417 {dimension_numbers = #tpu.dot_dimension_numbers<[2], [1], [1], [2], [0, 0, 0, 1, 1, 2], [0], [0]>} : vector<2x2x32xbf16>, vector<2x32x128xbf16>, vector<2x2x128xf32> -> vector<2x2x128xf32>
    "tpu.trace_stop"() : () -> ()
    %c0_418 = arith.constant 0 : index
    %c6_419 = arith.constant 6 : index
    %c0_420 = arith.constant 0 : index
    %c0_421 = arith.constant 0 : index
    %685 = vector.load %arg9[%c0_418, %c6_419, %c0_420, %c0_421] : memref<2x8x2x128xf32, #tpu.memory_space<vmem>>, vector<1x1x2x32xf32>
    %686 = vector.shape_cast %685 : vector<1x1x2x32xf32> to vector<2x32xf32>
    %687 = vector.extract_strided_slice %684 {offsets = [0, 0, 0], sizes = [1, 2, 32], strides = [1, 1, 1]} : vector<2x2x128xf32> to vector<1x2x32xf32>
    %688 = vector.shape_cast %687 : vector<1x2x32xf32> to vector<2x32xf32>
    %689 = arith.addf %686, %688 : vector<2x32xf32>
    %690 = arith.negf %689 : vector<2x32xf32>
    %691 = math.exp %690 : vector<2x32xf32>
    %cst_422 = arith.constant 1.000000e+00 : f32
    %692 = vector.broadcast %cst_422 : f32 to vector<2x32xf32>
    %693 = arith.addf %692, %691 : vector<2x32xf32>
    %694 = arith.divf %692, %693 : vector<2x32xf32>
    %c0_423 = arith.constant 0 : index
    %c6_424 = arith.constant 6 : index
    %c0_425 = arith.constant 0 : index
    %c32_426 = arith.constant 32 : index
    %695 = vector.load %arg9[%c0_423, %c6_424, %c0_425, %c32_426] : memref<2x8x2x128xf32, #tpu.memory_space<vmem>>, vector<1x1x2x32xf32>
    %696 = vector.shape_cast %695 : vector<1x1x2x32xf32> to vector<2x32xf32>
    %697 = vector.extract_strided_slice %684 {offsets = [0, 0, 32], sizes = [1, 2, 32], strides = [1, 1, 1]} : vector<2x2x128xf32> to vector<1x2x32xf32>
    %698 = vector.shape_cast %697 : vector<1x2x32xf32> to vector<2x32xf32>
    %699 = arith.addf %696, %698 : vector<2x32xf32>
    %700 = arith.negf %699 : vector<2x32xf32>
    %701 = math.exp %700 : vector<2x32xf32>
    %cst_427 = arith.constant 1.000000e+00 : f32
    %702 = vector.broadcast %cst_427 : f32 to vector<2x32xf32>
    %703 = arith.addf %702, %701 : vector<2x32xf32>
    %704 = arith.divf %702, %703 : vector<2x32xf32>
    %c0_428 = arith.constant 0 : index
    %c6_429 = arith.constant 6 : index
    %c0_430 = arith.constant 0 : index
    %c64_431 = arith.constant 64 : index
    %705 = vector.load %arg9[%c0_428, %c6_429, %c0_430, %c64_431] : memref<2x8x2x128xf32, #tpu.memory_space<vmem>>, vector<1x1x2x32xf32>
    %706 = vector.shape_cast %705 : vector<1x1x2x32xf32> to vector<2x32xf32>
    %707 = vector.extract_strided_slice %684 {offsets = [0, 0, 64], sizes = [1, 2, 32], strides = [1, 1, 1]} : vector<2x2x128xf32> to vector<1x2x32xf32>
    %708 = vector.shape_cast %707 : vector<1x2x32xf32> to vector<2x32xf32>
    %709 = arith.addf %706, %708 : vector<2x32xf32>
    %710 = math.tanh %709 : vector<2x32xf32>
    %c0_432 = arith.constant 0 : index
    %c6_433 = arith.constant 6 : index
    %c0_434 = arith.constant 0 : index
    %c96_435 = arith.constant 96 : index
    %711 = vector.load %arg9[%c0_432, %c6_433, %c0_434, %c96_435] : memref<2x8x2x128xf32, #tpu.memory_space<vmem>>, vector<1x1x2x32xf32>
    %712 = vector.shape_cast %711 : vector<1x1x2x32xf32> to vector<2x32xf32>
    %713 = vector.extract_strided_slice %684 {offsets = [0, 0, 96], sizes = [1, 2, 32], strides = [1, 1, 1]} : vector<2x2x128xf32> to vector<1x2x32xf32>
    %714 = vector.shape_cast %713 : vector<1x2x32xf32> to vector<2x32xf32>
    %715 = arith.addf %712, %714 : vector<2x32xf32>
    %716 = arith.negf %715 : vector<2x32xf32>
    %717 = math.exp %716 : vector<2x32xf32>
    %cst_436 = arith.constant 1.000000e+00 : f32
    %718 = vector.broadcast %cst_436 : f32 to vector<2x32xf32>
    %719 = arith.addf %718, %717 : vector<2x32xf32>
    %720 = arith.divf %718, %719 : vector<2x32xf32>
    %c0_437 = arith.constant 0 : index
    %c0_438 = arith.constant 0 : index
    %c0_439 = arith.constant 0 : index
    %721 = vector.load %arg11[%c0_437, %c0_438, %c0_439] : memref<2x2x32xf32, #tpu.memory_space<vmem>>, vector<1x2x32xf32>
    %722 = vector.shape_cast %721 : vector<1x2x32xf32> to vector<2x32xf32>
    %723 = arith.mulf %704, %722 : vector<2x32xf32>
    %724 = arith.mulf %694, %710 : vector<2x32xf32>
    %725 = arith.addf %723, %724 : vector<2x32xf32>
    %726 = math.tanh %725 : vector<2x32xf32>
    %727 = arith.mulf %720, %726 : vector<2x32xf32>
    %c0_440 = arith.constant 0 : index
    %c0_441 = arith.constant 0 : index
    %c0_442 = arith.constant 0 : index
    %728 = vector.load %arg11[%c0_440, %c0_441, %c0_442] : memref<2x2x32xf32, #tpu.memory_space<vmem>>, vector<1x2x32xf32>
    %729 = vector.shape_cast %728 : vector<1x2x32xf32> to vector<2x32xf32>
    %730 = vector.shape_cast %725 : vector<2x32xf32> to vector<1x2x32xf32>
    tpu.vector_store %arg11[%c0_440, %c0_441, %c0_442], %730 {strides = array<i32>} : memref<2x2x32xf32, #tpu.memory_space<vmem>>, vector<1x2x32xf32>,
    %c0_443 = arith.constant 0 : index
    %c0_444 = arith.constant 0 : index
    %c0_445 = arith.constant 0 : index
    %731 = vector.load %arg10[%c0_443, %c0_444, %c0_445] : memref<2x2x32xf32, #tpu.memory_space<vmem>>, vector<1x2x32xf32>
    %732 = vector.shape_cast %731 : vector<1x2x32xf32> to vector<2x32xf32>
    %733 = vector.shape_cast %727 : vector<2x32xf32> to vector<1x2x32xf32>
    tpu.vector_store %arg10[%c0_443, %c0_444, %c0_445], %733 {strides = array<i32>} : memref<2x2x32xf32, #tpu.memory_space<vmem>>, vector<1x2x32xf32>,
    %734 = arith.truncf %727 : vector<2x32xf32> to vector<2x32xbf16>
    %c6_446 = arith.constant 6 : index
    %c0_447 = arith.constant 0 : index
    %c0_448 = arith.constant 0 : index
    %735 = vector.load %arg7[%c6_446, %c0_447, %c0_448] : memref<8x2x32xbf16, #tpu.memory_space<vmem>>, vector<1x2x32xbf16>
    %736 = vector.shape_cast %735 : vector<1x2x32xbf16> to vector<2x32xbf16>
    %737 = vector.shape_cast %734 : vector<2x32xbf16> to vector<1x2x32xbf16>
    tpu.vector_store %arg7[%c6_446, %c0_447, %c0_448], %737 {strides = array<i32>} : memref<8x2x32xbf16, #tpu.memory_space<vmem>>, vector<1x2x32xbf16>,
    %c1_449 = arith.constant 1 : index
    %c1_450 = arith.constant 1 : index
    %c0_451 = arith.constant 0 : index
    %c0_452 = arith.constant 0 : index
    %738 = vector.load %arg9[%c1_449, %c1_450, %c0_451, %c0_452] : memref<2x8x2x128xf32, #tpu.memory_space<vmem>>, vector<1x1x2x32xf32>
    %739 = vector.shape_cast %738 : vector<1x1x2x32xf32> to vector<2x32xf32>
    %740 = vector.extract_strided_slice %684 {offsets = [1, 0, 0], sizes = [1, 2, 32], strides = [1, 1, 1]} : vector<2x2x128xf32> to vector<1x2x32xf32>
    %741 = vector.shape_cast %740 : vector<1x2x32xf32> to vector<2x32xf32>
    %742 = arith.addf %739, %741 : vector<2x32xf32>
    %743 = arith.negf %742 : vector<2x32xf32>
    %744 = math.exp %743 : vector<2x32xf32>
    %cst_453 = arith.constant 1.000000e+00 : f32
    %745 = vector.broadcast %cst_453 : f32 to vector<2x32xf32>
    %746 = arith.addf %745, %744 : vector<2x32xf32>
    %747 = arith.divf %745, %746 : vector<2x32xf32>
    %c1_454 = arith.constant 1 : index
    %c1_455 = arith.constant 1 : index
    %c0_456 = arith.constant 0 : index
    %c32_457 = arith.constant 32 : index
    %748 = vector.load %arg9[%c1_454, %c1_455, %c0_456, %c32_457] : memref<2x8x2x128xf32, #tpu.memory_space<vmem>>, vector<1x1x2x32xf32>
    %749 = vector.shape_cast %748 : vector<1x1x2x32xf32> to vector<2x32xf32>
    %750 = vector.extract_strided_slice %684 {offsets = [1, 0, 32], sizes = [1, 2, 32], strides = [1, 1, 1]} : vector<2x2x128xf32> to vector<1x2x32xf32>
    %751 = vector.shape_cast %750 : vector<1x2x32xf32> to vector<2x32xf32>
    %752 = arith.addf %749, %751 : vector<2x32xf32>
    %753 = arith.negf %752 : vector<2x32xf32>
    %754 = math.exp %753 : vector<2x32xf32>
    %cst_458 = arith.constant 1.000000e+00 : f32
    %755 = vector.broadcast %cst_458 : f32 to vector<2x32xf32>
    %756 = arith.addf %755, %754 : vector<2x32xf32>
    %757 = arith.divf %755, %756 : vector<2x32xf32>
    %c1_459 = arith.constant 1 : index
    %c1_460 = arith.constant 1 : index
    %c0_461 = arith.constant 0 : index
    %c64_462 = arith.constant 64 : index
    %758 = vector.load %arg9[%c1_459, %c1_460, %c0_461, %c64_462] : memref<2x8x2x128xf32, #tpu.memory_space<vmem>>, vector<1x1x2x32xf32>
    %759 = vector.shape_cast %758 : vector<1x1x2x32xf32> to vector<2x32xf32>
    %760 = vector.extract_strided_slice %684 {offsets = [1, 0, 64], sizes = [1, 2, 32], strides = [1, 1, 1]} : vector<2x2x128xf32> to vector<1x2x32xf32>
    %761 = vector.shape_cast %760 : vector<1x2x32xf32> to vector<2x32xf32>
    %762 = arith.addf %759, %761 : vector<2x32xf32>
    %763 = math.tanh %762 : vector<2x32xf32>
    %c1_463 = arith.constant 1 : index
    %c1_464 = arith.constant 1 : index
    %c0_465 = arith.constant 0 : index
    %c96_466 = arith.constant 96 : index
    %764 = vector.load %arg9[%c1_463, %c1_464, %c0_465, %c96_466] : memref<2x8x2x128xf32, #tpu.memory_space<vmem>>, vector<1x1x2x32xf32>
    %765 = vector.shape_cast %764 : vector<1x1x2x32xf32> to vector<2x32xf32>
    %766 = vector.extract_strided_slice %684 {offsets = [1, 0, 96], sizes = [1, 2, 32], strides = [1, 1, 1]} : vector<2x2x128xf32> to vector<1x2x32xf32>
    %767 = vector.shape_cast %766 : vector<1x2x32xf32> to vector<2x32xf32>
    %768 = arith.addf %765, %767 : vector<2x32xf32>
    %769 = arith.negf %768 : vector<2x32xf32>
    %770 = math.exp %769 : vector<2x32xf32>
    %cst_467 = arith.constant 1.000000e+00 : f32
    %771 = vector.broadcast %cst_467 : f32 to vector<2x32xf32>
    %772 = arith.addf %771, %770 : vector<2x32xf32>
    %773 = arith.divf %771, %772 : vector<2x32xf32>
    %c1_468 = arith.constant 1 : index
    %c0_469 = arith.constant 0 : index
    %c0_470 = arith.constant 0 : index
    %774 = vector.load %arg11[%c1_468, %c0_469, %c0_470] : memref<2x2x32xf32, #tpu.memory_space<vmem>>, vector<1x2x32xf32>
    %775 = vector.shape_cast %774 : vector<1x2x32xf32> to vector<2x32xf32>
    %776 = arith.mulf %757, %775 : vector<2x32xf32>
    %777 = arith.mulf %747, %763 : vector<2x32xf32>
    %778 = arith.addf %776, %777 : vector<2x32xf32>
    %779 = math.tanh %778 : vector<2x32xf32>
    %780 = arith.mulf %773, %779 : vector<2x32xf32>
    %c1_471 = arith.constant 1 : index
    %c0_472 = arith.constant 0 : index
    %c0_473 = arith.constant 0 : index
    %781 = vector.load %arg11[%c1_471, %c0_472, %c0_473] : memref<2x2x32xf32, #tpu.memory_space<vmem>>, vector<1x2x32xf32>
    %782 = vector.shape_cast %781 : vector<1x2x32xf32> to vector<2x32xf32>
    %783 = vector.shape_cast %778 : vector<2x32xf32> to vector<1x2x32xf32>
    tpu.vector_store %arg11[%c1_471, %c0_472, %c0_473], %783 {strides = array<i32>} : memref<2x2x32xf32, #tpu.memory_space<vmem>>, vector<1x2x32xf32>,
    %c1_474 = arith.constant 1 : index
    %c0_475 = arith.constant 0 : index
    %c0_476 = arith.constant 0 : index
    %784 = vector.load %arg10[%c1_474, %c0_475, %c0_476] : memref<2x2x32xf32, #tpu.memory_space<vmem>>, vector<1x2x32xf32>
    %785 = vector.shape_cast %784 : vector<1x2x32xf32> to vector<2x32xf32>
    %786 = vector.shape_cast %780 : vector<2x32xf32> to vector<1x2x32xf32>
    tpu.vector_store %arg10[%c1_474, %c0_475, %c0_476], %786 {strides = array<i32>} : memref<2x2x32xf32, #tpu.memory_space<vmem>>, vector<1x2x32xf32>,
    %787 = arith.truncf %780 : vector<2x32xf32> to vector<2x32xbf16>
    %c1_477 = arith.constant 1 : index
    %c0_478 = arith.constant 0 : index
    %c0_479 = arith.constant 0 : index
    %788 = vector.load %arg8[%c1_477, %c0_478, %c0_479] : memref<8x2x32xbf16, #tpu.memory_space<vmem>>, vector<1x2x32xbf16>
    %789 = vector.shape_cast %788 : vector<1x2x32xbf16> to vector<2x32xbf16>
    %790 = vector.shape_cast %787 : vector<2x32xbf16> to vector<1x2x32xbf16>
    tpu.vector_store %arg8[%c1_477, %c0_478, %c0_479], %790 {strides = array<i32>} : memref<8x2x32xbf16, #tpu.memory_space<vmem>>, vector<1x2x32xbf16>,
    %c0_480 = arith.constant 0 : index
    %c0_481 = arith.constant 0 : index
    %c0_482 = arith.constant 0 : index
    %791 = vector.load %arg10[%c0_480, %c0_481, %c0_482] : memref<2x2x32xf32, #tpu.memory_space<vmem>>, vector<2x2x32xf32>
    %792 = arith.truncf %791 : vector<2x2x32xf32> to vector<2x2x32xbf16>
    "tpu.trace_start"() <{level = 10 : i32, message = "dbh,dhg->dbg"}> : () -> ()
    %cst_483 = arith.constant dense<0.000000e+00> : vector<2x2x128xf32>
    %793 = tpu.matmul %792, %27, %cst_483 {dimension_numbers = #tpu.dot_dimension_numbers<[2], [1], [1], [2], [0, 0, 0, 1, 1, 2], [0], [0]>} : vector<2x2x32xbf16>, vector<2x32x128xbf16>, vector<2x2x128xf32> -> vector<2x2x128xf32>
    "tpu.trace_stop"() : () -> ()
    %c0_484 = arith.constant 0 : index
    %c7_485 = arith.constant 7 : index
    %c0_486 = arith.constant 0 : index
    %c0_487 = arith.constant 0 : index
    %794 = vector.load %arg9[%c0_484, %c7_485, %c0_486, %c0_487] : memref<2x8x2x128xf32, #tpu.memory_space<vmem>>, vector<1x1x2x32xf32>
    %795 = vector.shape_cast %794 : vector<1x1x2x32xf32> to vector<2x32xf32>
    %796 = vector.extract_strided_slice %793 {offsets = [0, 0, 0], sizes = [1, 2, 32], strides = [1, 1, 1]} : vector<2x2x128xf32> to vector<1x2x32xf32>
    %797 = vector.shape_cast %796 : vector<1x2x32xf32> to vector<2x32xf32>
    %798 = arith.addf %795, %797 : vector<2x32xf32>
    %799 = arith.negf %798 : vector<2x32xf32>
    %800 = math.exp %799 : vector<2x32xf32>
    %cst_488 = arith.constant 1.000000e+00 : f32
    %801 = vector.broadcast %cst_488 : f32 to vector<2x32xf32>
    %802 = arith.addf %801, %800 : vector<2x32xf32>
    %803 = arith.divf %801, %802 : vector<2x32xf32>
    %c0_489 = arith.constant 0 : index
    %c7_490 = arith.constant 7 : index
    %c0_491 = arith.constant 0 : index
    %c32_492 = arith.constant 32 : index
    %804 = vector.load %arg9[%c0_489, %c7_490, %c0_491, %c32_492] : memref<2x8x2x128xf32, #tpu.memory_space<vmem>>, vector<1x1x2x32xf32>
    %805 = vector.shape_cast %804 : vector<1x1x2x32xf32> to vector<2x32xf32>
    %806 = vector.extract_strided_slice %793 {offsets = [0, 0, 32], sizes = [1, 2, 32], strides = [1, 1, 1]} : vector<2x2x128xf32> to vector<1x2x32xf32>
    %807 = vector.shape_cast %806 : vector<1x2x32xf32> to vector<2x32xf32>
    %808 = arith.addf %805, %807 : vector<2x32xf32>
    %809 = arith.negf %808 : vector<2x32xf32>
    %810 = math.exp %809 : vector<2x32xf32>
    %cst_493 = arith.constant 1.000000e+00 : f32
    %811 = vector.broadcast %cst_493 : f32 to vector<2x32xf32>
    %812 = arith.addf %811, %810 : vector<2x32xf32>
    %813 = arith.divf %811, %812 : vector<2x32xf32>
    %c0_494 = arith.constant 0 : index
    %c7_495 = arith.constant 7 : index
    %c0_496 = arith.constant 0 : index
    %c64_497 = arith.constant 64 : index
    %814 = vector.load %arg9[%c0_494, %c7_495, %c0_496, %c64_497] : memref<2x8x2x128xf32, #tpu.memory_space<vmem>>, vector<1x1x2x32xf32>
    %815 = vector.shape_cast %814 : vector<1x1x2x32xf32> to vector<2x32xf32>
    %816 = vector.extract_strided_slice %793 {offsets = [0, 0, 64], sizes = [1, 2, 32], strides = [1, 1, 1]} : vector<2x2x128xf32> to vector<1x2x32xf32>
    %817 = vector.shape_cast %816 : vector<1x2x32xf32> to vector<2x32xf32>
    %818 = arith.addf %815, %817 : vector<2x32xf32>
    %819 = math.tanh %818 : vector<2x32xf32>
    %c0_498 = arith.constant 0 : index
    %c7_499 = arith.constant 7 : index
    %c0_500 = arith.constant 0 : index
    %c96_501 = arith.constant 96 : index
    %820 = vector.load %arg9[%c0_498, %c7_499, %c0_500, %c96_501] : memref<2x8x2x128xf32, #tpu.memory_space<vmem>>, vector<1x1x2x32xf32>
    %821 = vector.shape_cast %820 : vector<1x1x2x32xf32> to vector<2x32xf32>
    %822 = vector.extract_strided_slice %793 {offsets = [0, 0, 96], sizes = [1, 2, 32], strides = [1, 1, 1]} : vector<2x2x128xf32> to vector<1x2x32xf32>
    %823 = vector.shape_cast %822 : vector<1x2x32xf32> to vector<2x32xf32>
    %824 = arith.addf %821, %823 : vector<2x32xf32>
    %825 = arith.negf %824 : vector<2x32xf32>
    %826 = math.exp %825 : vector<2x32xf32>
    %cst_502 = arith.constant 1.000000e+00 : f32
    %827 = vector.broadcast %cst_502 : f32 to vector<2x32xf32>
    %828 = arith.addf %827, %826 : vector<2x32xf32>
    %829 = arith.divf %827, %828 : vector<2x32xf32>
    %c0_503 = arith.constant 0 : index
    %c0_504 = arith.constant 0 : index
    %c0_505 = arith.constant 0 : index
    %830 = vector.load %arg11[%c0_503, %c0_504, %c0_505] : memref<2x2x32xf32, #tpu.memory_space<vmem>>, vector<1x2x32xf32>
    %831 = vector.shape_cast %830 : vector<1x2x32xf32> to vector<2x32xf32>
    %832 = arith.mulf %813, %831 : vector<2x32xf32>
    %833 = arith.mulf %803, %819 : vector<2x32xf32>
    %834 = arith.addf %832, %833 : vector<2x32xf32>
    %835 = math.tanh %834 : vector<2x32xf32>
    %836 = arith.mulf %829, %835 : vector<2x32xf32>
    %c0_506 = arith.constant 0 : index
    %c0_507 = arith.constant 0 : index
    %c0_508 = arith.constant 0 : index
    %837 = vector.load %arg11[%c0_506, %c0_507, %c0_508] : memref<2x2x32xf32, #tpu.memory_space<vmem>>, vector<1x2x32xf32>
    %838 = vector.shape_cast %837 : vector<1x2x32xf32> to vector<2x32xf32>
    %839 = vector.shape_cast %834 : vector<2x32xf32> to vector<1x2x32xf32>
    tpu.vector_store %arg11[%c0_506, %c0_507, %c0_508], %839 {strides = array<i32>} : memref<2x2x32xf32, #tpu.memory_space<vmem>>, vector<1x2x32xf32>,
    %c0_509 = arith.constant 0 : index
    %c0_510 = arith.constant 0 : index
    %c0_511 = arith.constant 0 : index
    %840 = vector.load %arg10[%c0_509, %c0_510, %c0_511] : memref<2x2x32xf32, #tpu.memory_space<vmem>>, vector<1x2x32xf32>
    %841 = vector.shape_cast %840 : vector<1x2x32xf32> to vector<2x32xf32>
    %842 = vector.shape_cast %836 : vector<2x32xf32> to vector<1x2x32xf32>
    tpu.vector_store %arg10[%c0_509, %c0_510, %c0_511], %842 {strides = array<i32>} : memref<2x2x32xf32, #tpu.memory_space<vmem>>, vector<1x2x32xf32>,
    %843 = arith.truncf %836 : vector<2x32xf32> to vector<2x32xbf16>
    %c7_512 = arith.constant 7 : index
    %c0_513 = arith.constant 0 : index
    %c0_514 = arith.constant 0 : index
    %844 = vector.load %arg7[%c7_512, %c0_513, %c0_514] : memref<8x2x32xbf16, #tpu.memory_space<vmem>>, vector<1x2x32xbf16>
    %845 = vector.shape_cast %844 : vector<1x2x32xbf16> to vector<2x32xbf16>
    %846 = vector.shape_cast %843 : vector<2x32xbf16> to vector<1x2x32xbf16>
    tpu.vector_store %arg7[%c7_512, %c0_513, %c0_514], %846 {strides = array<i32>} : memref<8x2x32xbf16, #tpu.memory_space<vmem>>, vector<1x2x32xbf16>,
    %c1_515 = arith.constant 1 : index
    %c0_516 = arith.constant 0 : index
    %c0_517 = arith.constant 0 : index
    %c0_518 = arith.constant 0 : index
    %847 = vector.load %arg9[%c1_515, %c0_516, %c0_517, %c0_518] : memref<2x8x2x128xf32, #tpu.memory_space<vmem>>, vector<1x1x2x32xf32>
    %848 = vector.shape_cast %847 : vector<1x1x2x32xf32> to vector<2x32xf32>
    %849 = vector.extract_strided_slice %793 {offsets = [1, 0, 0], sizes = [1, 2, 32], strides = [1, 1, 1]} : vector<2x2x128xf32> to vector<1x2x32xf32>
    %850 = vector.shape_cast %849 : vector<1x2x32xf32> to vector<2x32xf32>
    %851 = arith.addf %848, %850 : vector<2x32xf32>
    %852 = arith.negf %851 : vector<2x32xf32>
    %853 = math.exp %852 : vector<2x32xf32>
    %cst_519 = arith.constant 1.000000e+00 : f32
    %854 = vector.broadcast %cst_519 : f32 to vector<2x32xf32>
    %855 = arith.addf %854, %853 : vector<2x32xf32>
    %856 = arith.divf %854, %855 : vector<2x32xf32>
    %c1_520 = arith.constant 1 : index
    %c0_521 = arith.constant 0 : index
    %c0_522 = arith.constant 0 : index
    %c32_523 = arith.constant 32 : index
    %857 = vector.load %arg9[%c1_520, %c0_521, %c0_522, %c32_523] : memref<2x8x2x128xf32, #tpu.memory_space<vmem>>, vector<1x1x2x32xf32>
    %858 = vector.shape_cast %857 : vector<1x1x2x32xf32> to vector<2x32xf32>
    %859 = vector.extract_strided_slice %793 {offsets = [1, 0, 32], sizes = [1, 2, 32], strides = [1, 1, 1]} : vector<2x2x128xf32> to vector<1x2x32xf32>
    %860 = vector.shape_cast %859 : vector<1x2x32xf32> to vector<2x32xf32>
    %861 = arith.addf %858, %860 : vector<2x32xf32>
    %862 = arith.negf %861 : vector<2x32xf32>
    %863 = math.exp %862 : vector<2x32xf32>
    %cst_524 = arith.constant 1.000000e+00 : f32
    %864 = vector.broadcast %cst_524 : f32 to vector<2x32xf32>
    %865 = arith.addf %864, %863 : vector<2x32xf32>
    %866 = arith.divf %864, %865 : vector<2x32xf32>
    %c1_525 = arith.constant 1 : index
    %c0_526 = arith.constant 0 : index
    %c0_527 = arith.constant 0 : index
    %c64_528 = arith.constant 64 : index
    %867 = vector.load %arg9[%c1_525, %c0_526, %c0_527, %c64_528] : memref<2x8x2x128xf32, #tpu.memory_space<vmem>>, vector<1x1x2x32xf32>
    %868 = vector.shape_cast %867 : vector<1x1x2x32xf32> to vector<2x32xf32>
    %869 = vector.extract_strided_slice %793 {offsets = [1, 0, 64], sizes = [1, 2, 32], strides = [1, 1, 1]} : vector<2x2x128xf32> to vector<1x2x32xf32>
    %870 = vector.shape_cast %869 : vector<1x2x32xf32> to vector<2x32xf32>
    %871 = arith.addf %868, %870 : vector<2x32xf32>
    %872 = math.tanh %871 : vector<2x32xf32>
    %c1_529 = arith.constant 1 : index
    %c0_530 = arith.constant 0 : index
    %c0_531 = arith.constant 0 : index
    %c96_532 = arith.constant 96 : index
    %873 = vector.load %arg9[%c1_529, %c0_530, %c0_531, %c96_532] : memref<2x8x2x128xf32, #tpu.memory_space<vmem>>, vector<1x1x2x32xf32>
    %874 = vector.shape_cast %873 : vector<1x1x2x32xf32> to vector<2x32xf32>
    %875 = vector.extract_strided_slice %793 {offsets = [1, 0, 96], sizes = [1, 2, 32], strides = [1, 1, 1]} : vector<2x2x128xf32> to vector<1x2x32xf32>
    %876 = vector.shape_cast %875 : vector<1x2x32xf32> to vector<2x32xf32>
    %877 = arith.addf %874, %876 : vector<2x32xf32>
    %878 = arith.negf %877 : vector<2x32xf32>
    %879 = math.exp %878 : vector<2x32xf32>
    %cst_533 = arith.constant 1.000000e+00 : f32
    %880 = vector.broadcast %cst_533 : f32 to vector<2x32xf32>
    %881 = arith.addf %880, %879 : vector<2x32xf32>
    %882 = arith.divf %880, %881 : vector<2x32xf32>
    %c1_534 = arith.constant 1 : index
    %c0_535 = arith.constant 0 : index
    %c0_536 = arith.constant 0 : index
    %883 = vector.load %arg11[%c1_534, %c0_535, %c0_536] : memref<2x2x32xf32, #tpu.memory_space<vmem>>, vector<1x2x32xf32>
    %884 = vector.shape_cast %883 : vector<1x2x32xf32> to vector<2x32xf32>
    %885 = arith.mulf %866, %884 : vector<2x32xf32>
    %886 = arith.mulf %856, %872 : vector<2x32xf32>
    %887 = arith.addf %885, %886 : vector<2x32xf32>
    %888 = math.tanh %887 : vector<2x32xf32>
    %889 = arith.mulf %882, %888 : vector<2x32xf32>
    %c1_537 = arith.constant 1 : index
    %c0_538 = arith.constant 0 : index
    %c0_539 = arith.constant 0 : index
    %890 = vector.load %arg11[%c1_537, %c0_538, %c0_539] : memref<2x2x32xf32, #tpu.memory_space<vmem>>, vector<1x2x32xf32>
    %891 = vector.shape_cast %890 : vector<1x2x32xf32> to vector<2x32xf32>
    %892 = vector.shape_cast %887 : vector<2x32xf32> to vector<1x2x32xf32>
    tpu.vector_store %arg11[%c1_537, %c0_538, %c0_539], %892 {strides = array<i32>} : memref<2x2x32xf32, #tpu.memory_space<vmem>>, vector<1x2x32xf32>,
    %c1_540 = arith.constant 1 : index
    %c0_541 = arith.constant 0 : index
    %c0_542 = arith.constant 0 : index
    %893 = vector.load %arg10[%c1_540, %c0_541, %c0_542] : memref<2x2x32xf32, #tpu.memory_space<vmem>>, vector<1x2x32xf32>
    %894 = vector.shape_cast %893 : vector<1x2x32xf32> to vector<2x32xf32>
    %895 = vector.shape_cast %889 : vector<2x32xf32> to vector<1x2x32xf32>
    tpu.vector_store %arg10[%c1_540, %c0_541, %c0_542], %895 {strides = array<i32>} : memref<2x2x32xf32, #tpu.memory_space<vmem>>, vector<1x2x32xf32>,
    %896 = arith.truncf %889 : vector<2x32xf32> to vector<2x32xbf16>
    %c0_543 = arith.constant 0 : index
    %c0_544 = arith.constant 0 : index
    %c0_545 = arith.constant 0 : index
    %897 = vector.load %arg8[%c0_543, %c0_544, %c0_545] : memref<8x2x32xbf16, #tpu.memory_space<vmem>>, vector<1x2x32xbf16>
    %898 = vector.shape_cast %897 : vector<1x2x32xbf16> to vector<2x32xbf16>
    %899 = vector.shape_cast %896 : vector<2x32xbf16> to vector<1x2x32xbf16>
    tpu.vector_store %arg8[%c0_543, %c0_544, %c0_545], %899 {strides = array<i32>} : memref<8x2x32xbf16, #tpu.memory_space<vmem>>, vector<1x2x32xbf16>,
    return
  }
  func.func @transform_0(%arg0: i32) -> (i32, i32, i32) {
    %c0_i32 = arith.constant 0 : i32
    %c0_i32_0 = arith.constant 0 : i32
    %c0_i32_1 = arith.constant 0 : i32
    return %arg0, %c0_i32, %c0_i32_0 : i32, i32, i32
  }
  func.func @transform_1(%arg0: i32) -> (i32, i32, i32) {
    %c0_i32 = arith.constant 0 : i32
    %0 = arith.subi %c0_i32, %arg0 : i32
    %c0_i32_0 = arith.constant 0 : i32
    %c0_i32_1 = arith.constant 0 : i32
    %c0_i32_2 = arith.constant 0 : i32
    return %0, %c0_i32_0, %c0_i32_1 : i32, i32, i32
  }
  func.func @transform_2(%arg0: i32) -> (i32, i32) {
    %c0_i32 = arith.constant 0 : i32
    %c0_i32_0 = arith.constant 0 : i32
    %c0_i32_1 = arith.constant 0 : i32
    return %c0_i32, %c0_i32_0 : i32, i32
  }
  func.func @transform_3(%arg0: i32) -> (i32, i32) {
    %c0_i32 = arith.constant 0 : i32
    %c0_i32_0 = arith.constant 0 : i32
    %c0_i32_1 = arith.constant 0 : i32
    return %c0_i32, %c0_i32_0 : i32, i32
  }
  func.func @transform_4(%arg0: i32) -> (i32, i32, i32) {
    %c0_i32 = arith.constant 0 : i32
    %c0_i32_0 = arith.constant 0 : i32
    %c0_i32_1 = arith.constant 0 : i32
    %c0_i32_2 = arith.constant 0 : i32
    return %c0_i32, %c0_i32_0, %c0_i32_1 : i32, i32, i32
  }
  func.func @transform_5(%arg0: i32) -> (i32, i32, i32) {
    %c0_i32 = arith.constant 0 : i32
    %c0_i32_0 = arith.constant 0 : i32
    %c0_i32_1 = arith.constant 0 : i32
    %c0_i32_2 = arith.constant 0 : i32
    return %c0_i32, %c0_i32_0, %c0_i32_1 : i32, i32, i32
  }
  func.func @transform_6(%arg0: i32) -> (i32, i32, i32) {
    %c0_i32 = arith.constant 0 : i32
    %c0_i32_0 = arith.constant 0 : i32
    %c0_i32_1 = arith.constant 0 : i32
    return %arg0, %c0_i32, %c0_i32_0 : i32, i32, i32
  }
  func.func @transform_7(%arg0: i32) -> (i32, i32, i32) {
    %c0_i32 = arith.constant 0 : i32
    %0 = arith.subi %c0_i32, %arg0 : i32
    %c0_i32_0 = arith.constant 0 : i32
    %c0_i32_1 = arith.constant 0 : i32
    %c0_i32_2 = arith.constant 0 : i32
    return %0, %c0_i32_0, %c0_i32_1 : i32, i32, i32
  }
}

</mosaic_0001>

<bundles_post_ra>
// kernel: lstm_model_forward.5
= control target key start
LH: loop header
LB: loop body
LE: loop exit
PB: predicated region body
PF: predicated region fallthrough
CT: control target
= control target key end

     0   :  { %s967_s0 = inlined_call_operand.vmem [shape: bf16[2,8,32], index: 0, kind: input, shape index: {}]   ;;  %s968_s1 = inlined_call_operand.vmem [shape: bf16[2,8,32], index: 1, kind: input, shape index: {}]   ;;  %s969_s2 = inlined_call_operand.vmem [shape: bf16[32,128], index: 2, kind: input, shape index: {}]   ;;  %s970_s3 = inlined_call_operand.vmem [shape: bf16[32,128], index: 3, kind: input, shape index: {}]   ;;  %s971_s4 = inlined_call_operand.vmem [shape: f32[1,128], index: 4, kind: input, shape index: {}]   ;;  %s972_s5 = inlined_call_operand.vmem [shape: f32[1,128], index: 5, kind: input, shape index: {}]   ;;  %s973_s6 = inlined_call_operand.<no memory space> [shape: f32[1,1], index: 6, kind: input, shape index: {}]   ;;  %s974_s7 = inlined_call_operand.vmem [shape: bf16[32,3], index: 7, kind: input, shape index: {}]   ;;  %s975_s8 = inlined_call_operand.vmem [shape: bf16[32,3], index: 8, kind: input, shape index: {}]   ;;  %s976_s9 = inlined_call_operand.vmem [shape: f32[1,3], index: 9, kind: input, shape index: {}]   ;;  %s977_s10 = inlined_call_operand.hbm [shape: f32[2,3], index: 10, kind: output, shape index: {}]  }
   0x1   :  { %v15_v0 = vstv %s973_s6 }
   0x2   :  { %16 = vst [vmem:[#allocation2] sm:$0x1] %v15_v0 }
   0x3   :  { %v750_v1 = vld [vmem:[%s970_s3] sm:$0xff]   ;;  %v790_v2 = vmov 0.0   ;;  %v752_v4 = vld [vmem:[%s970_s3 + $0x8] sm:$0xff]   ;;  %vm791_vm0 = vmmov 0   ;;  %vm68_vm1 = vcmask 261120  }
   0x4   :  { %688 = vmatprep.subr.bf16.mxu0 %v790_v2  ;;  %696 = vmatprep.subr.bf16.mxu1 %v790_v2  ;;  %v751_v3 = vld [vmem:[%s969_s2] sm:$0xff]   ;;  %v753_v5 = vld [vmem:[%s969_s2 + $0x8] sm:$0xff]  }
   0x5   :  { %689 = vmatpush3.bf16.msra.mxu0 %v750_v1  ;;  %692 = vmatprep.mubr.msk.bf16.mxu0 %vm791_vm0, %v790_v2  ;;  %v875_v6 = vld [vmem:[%s968_s1] sm:$0xf]  ;;  %v880_v7 = vld [vmem:[%s968_s1 + $0x4] sm:$0xf] }
   0x6   :  { %697 = vmatpush3.bf16.msra.mxu1 %v751_v3  ;;  %690 = vmatprep.subr.bf16.mxu0 %v790_v2  ;;  %v885_v8 = vld [vmem:[%s967_s0] sm:$0xf]  ;;  %v646_v9 = vcombine.low %v875_v6, %v880_v7  ;;  %v892_v10 = vld [vmem:[%s967_s0 + $0x4] sm:$0xf] }
   0x7   :  { %698 = vmatprep.subr.bf16.mxu1 %v790_v2  ;;  %700 = vmatprep.mubr.msk.bf16.mxu1 %vm791_vm0, %v790_v2  ;;  %v650_v11 = vcombine.low %v885_v8, %v892_v10 }
   0x9   :  { %691 = vmatpush3.bf16.msra.mxu0 %v752_v4 }
   0xa   :  { %699 = vmatpush3.bf16.msra.mxu1 %v753_v5  ;;  %704 = vmatprep.subr.bf16.mxu0 %v790_v2 }
   0xb   :  { %710 = vmatprep.subr.bf16.mxu1 %v790_v2 }
   0xc   :  { %17 = vsyncpa [#allocation4], 0  ;;  %693 = vmatmul.mubr.msk.bf16.vlgmr.msra.gmra.mrb[0].mxu0 %vm68_vm1, %v646_v9  ;;  %v654_v15 = vld [vmem:[%s971_s4] ss:$0 sm:$0xff]  ;;  %v792_v30 = vmov 0   ;;  %v215_v36 = vlaneseq  ;;  %vm225_vm2 = vcmask 1041409  }
   0xd   :  { %701 = vmatmul.mubr.msk.bf16.vlgmr.msra.gmra.mrb[0].mxu1 %vm68_vm1, %v650_v11  ;;  %706 = vmatprep.mubr.msk.bf16.mxu0 %vm791_vm0, %v790_v2  ;;  %v655_v24 = vld [vmem:[%s972_s5] ss:$0 sm:$0xff]  ;;  %vm228_vm3 = vcmask 58368   ;;  %vm300_vm4 = vcmask 1043456   ;;  %vm296_vm5 = vcmask 64512   ;;  %s793_s16 = smov [#allocation3]  }
   0xe   :  { %712 = vmatprep.mubr.msk.bf16.mxu1 %vm791_vm0, %v790_v2  ;;  %748 = vset.pattern.permute.xlu1 %v792_v30  ;;  %v656_v31 = vld [vmem:[#allocation2] ss:$0 sm:$0xff]  ;;  %v216_v37 = vand.u32 127, %v215_v36  ;;  %v218_v38 = vshrl.u32 %v215_v36, 7  ;;  %v358_v63 = vsel %vm300_vm4, %v892_v10, 0  ;;  %v302_v0 = vsel %vm300_vm4, %v885_v8, 0 }
   0xf   :  { %749 = vset.pattern.permute.xlu0 %v792_v30  ;;  %711 = vmatpush3.bf16.msra.mxu1 %v358_v63  ;;  %s638_s17 = sshll.u32 %s793_s16, 4  ;;  %vm630_vm6 = vcmask 17408   ;;  %s639_s17 = int_to_ptr.vmem [resolvable:$true] %s638_s17 }
  0x10   :  { %v219_v40 = vsub.s32 %v216_v37, %v218_v38  ;;  %v235_v46 = vsub.s32 0, %v218_v38  ;;  %v239_v47 = vsub.s32 1, %v218_v38  ;;  %705 = vmatpush3.bf16.msra.mxu0 %v302_v0  ;;  %722 = vmatprep.subr.bf16.mxu1 %v790_v2  ;;  %s766_s18 = scalar_lea.vmem %s639_s17, 32  ;;  %p771_p1 = scmp.lt.s32.totalorder %s639_s17, %s639_s17 }
  0x11   :  { %716 = vmatprep.subr.bf16.mxu0 %v790_v2  ;;  %p767_p0 = scmp.ne.s32.totalorder %s639_s17, %s766_s18  ;;  %p772_p2 = scmp.lt.s32.totalorder %s766_s18, %s766_s18 }
  0x13   :  { %p773_p3 = por %p772_p2, %p771_p1 }
  0x15   :  { %p774_p4 = pnand %p773_p3, %p767_p0 }
  0xdf   :  { %v106_v12 = vpop.f32.mrb[0].mxu0 }
  0xe0   :  { %v167_v13 = vpop.f32.mrb[0].mxu1  ;;  %v694_v14 = vpop.f32.mrb[1].mxu0 }
  0xe1   :  { %v168_v16 = vadd.f32 %v167_v13, %v106_v12  ;;  %v702_v17 = vpop.f32.mrb[1].mxu1  ;;  %v109_v18 = vpop.f32.mrb[2].mxu0 }
  0xe2   :  { %v170_v19 = vpop.f32.mrb[2].mxu1  ;;  %v695_v20 = vpop.f32.mrb[3].mxu0 }
  0xe3   :  { %v171_v21 = vadd.f32 %v170_v19, %v109_v18  ;;  %v703_v22 = vpop.f32.mrb[3].mxu1  ;;  %v181_v23 = vadd.f32 %v654_v15, %v168_v16  ;;  %v450_v20 = vsel %vm300_vm4, %v880_v7, 0  ;;  %v757_v7 = vld [vmem:[%s974_s7 + $0x8] sm:$0xff]  }
  0xe4   :  { %v758_v22 = vld [vmem:[%s975_s8] sm:$0xff]  }
  0xe5   :  { %v182_v25 = vadd.f32 %v654_v15, %v171_v21  ;;  %v183_v26 = vmax.f32 %v181_v23, 0.0  ;;  %v407_v21 = vsel %vm300_vm4, %v875_v6, 0  ;;  %v756_v6 = vld [vmem:[%s974_s7] sm:$0xff]   ;;  %v759_v23 = vld [vmem:[%s975_s8 + $0x8] sm:$0xff]  }
  0xe7   :  { %v184_v27 = vmax.f32 %v182_v25, 0.0  ;;  %v192_v28 = vmul.f32 %v655_v24, %v183_v26 }
  0xe9   :  { %194 = vadd.xlane.f32.xlu0 %v192_v28  ;;  %v193_v29 = vmul.f32 %v655_v24, %v184_v27 }
  0xed   :  { %196 = vadd.xlane.f32.xlu0 %v193_v29 }
 0x176   :  { %v195_v32 = vpop.xlane.xlu0 %194 }
 0x177   :  { %v205_v33 = vadd.f32 %v656_v31, %v195_v32 }
 0x179   :  { %210 = vperm.xlu1 %748, %v205_v33  }
 0x17a   :  { %v197_v34 = vpop.xlane.xlu0 %196 }
 0x17b   :  { %v206_v35 = vadd.f32 %v656_v31, %v197_v34 }
 0x17d   :  { %213 = vperm.xlu1 %748, %v206_v35  }
 0x1f8   :  { %v211_v39 = vpop.permute.xlu1 %210 }
 0x1f9   :  { %v220_v42 = vrot.slane %v211_v39, %v219_v40 }
 0x1fc   :  { %v214_v41 = vpop.permute.xlu1 %213 }
 0x1fd   :  { %v224_v43 = vrot.slane %v214_v41, %v219_v40 }
 0x1ff   :  { %v226_v44 = vsel %vm225_vm2, %v224_v43, %v220_v42 }
 0x200   :  { %v229_v45 = vsel %vm228_vm3, %v226_v44, -inf }
 0x201   :  { %230 = vmax.xlane.f32.xlu0 %v229_v45 }
 0x28e   :  { %v231_v48 = vpop.xlane.xlu0 %230 }
 0x28f   :  { %v236_v49 = vrot.slane %v231_v48, %v235_v46  ;;  %v240_v50 = vrot.slane %v231_v48, %v239_v47 }
 0x291   :  { %v243_v51 = vsub.f32 %v205_v33, %v236_v49  ;;  %v244_v52 = vsub.f32 %v206_v35, %v240_v50 }
 0x293   :  { %v245_v53 = vmul.f32 1.442695, %v243_v51  ;;  %v247_v54 = vmul.f32 1.442695, %v244_v52 }
 0x295   :  { %760 = vpow2.f32 %v245_v53 }
 0x296   :  { %762 = vpow2.f32 %v247_v54 }
 0x29f   :  { %v761_v55 = vpop.eup %760 }
 0x2a0   :  { %v763_v56 = vpop.eup %762  ;;  %252 = vperm.xlu1 %748, %v761_v55  }
 0x2a1   :  { %255 = vperm.xlu0 %749, %v763_v56  }
 0x31f   :  { %v253_v57 = vpop.permute.xlu1 %252 }
 0x320   :  { %v256_v58 = vpop.permute.xlu0 %255  ;;  %v260_v59 = vrot.slane %v253_v57, %v219_v40 }
 0x321   :  { %v264_v60 = vrot.slane %v256_v58, %v219_v40  ;;  %v667_v58 = vld [vmem:[%s976_s9] ss:$0 sm:$0xff] }
 0x323   :  { %v265_v61 = vsel %vm225_vm2, %v264_v60, %v260_v59 }
 0x324   :  { %v267_v62 = vsel %vm228_vm3, %v265_v61, 0.0 }
 0x325   :  { %268 = vadd.xlane.f32.xlu1 %v267_v62 }
 0x3b2   :  { %v269_v1 = vpop.xlane.xlu1 %268 }
 0x3b3   :  { %764 = vrcp.f32 %v269_v1 }
 0x3bd   :  { %v765_v3 = vpop.eup %764 }
 0x3be   :  { %v279_v4 = vrot.slane %v765_v3, %v239_v47  ;;  %v275_v5 = vrot.slane %v765_v3, %v235_v46 }
 0x3c0   :  { %v283_v9 = vmul.f32 %v763_v56, %v279_v4  ;;  %v282_v11 = vmul.f32 %v761_v55, %v275_v5 }
 0x3c2   :  { %v285_v12 = vpack.c.bf16 %v283_v9, %v283_v9  ;;  %v284_v13 = vpack.c.bf16 %v282_v11, %v282_v11 }
 0x3c4   :  { %v345_v14 = vunpack.c.l.b16 %v285_v12  ;;  %v287_v10 = vunpack.c.l.b16 %v284_v13 }
 0x3c6   :  { %347 = vperm.xlu1 %748, %v345_v14   ;;  %289 = vperm.xlu0 %749, %v287_v10  }
 0x445   :  { %v348_v8 = vpop.permute.xlu1 %347  ;;  %v290_v15 = vpop.permute.xlu0 %289 }
 0x446   :  { %v352_v16 = vrot.slane %v348_v8, %v219_v40  ;;  %v294_v17 = vrot.slane %v290_v15, %v219_v40 }
 0x448   :  { %v353_v18 = vpack.c.b16 %v352_v16, %v352_v16  ;;  %v295_v19 = vpack.c.b16 %v294_v17, %v294_v17 }
 0x44a   :  { %707 = vmatmul.mubr.msk.bf16.vlgmr.msra.gmra.mrb[4].mxu0 %vm296_vm5, %v295_v19  ;;  %713 = vmatmul.mubr.msk.bf16.vlgmr.msra.gmra.mrb[4].mxu1 %vm296_vm5, %v353_v18 }
 0x44b   :  { %723 = vmatpush3.bf16.msra.mxu1 %v450_v20  ;;  %717 = vmatpush3.bf16.msra.mxu0 %v407_v21 }
 0x44c   :  { %718 = vmatprep.mubr.msk.bf16.mxu0 %vm791_vm0, %v790_v2  ;;  %724 = vmatprep.mubr.msk.bf16.mxu1 %vm791_vm0, %v790_v2 }
 0x44d   :  { %736 = vmatprep.subr.bf16.mxu1 %v790_v2  ;;  %728 = vmatprep.subr.bf16.mxu0 %v790_v2 }
 0x452   :  { %719 = vmatmul.mubr.msk.bf16.vlgmr.msra.gmra.mrb[8].mxu0 %vm296_vm5, %v295_v19  ;;  %725 = vmatmul.mubr.msk.bf16.vlgmr.msra.gmra.mrb[8].mxu1 %vm296_vm5, %v353_v18 }
 0x453   :  { %740 = vmatprep.mubr.msk.bf16.mxu1 %vm791_vm0, %v790_v2  ;;  %732 = vmatprep.mubr.msk.bf16.mxu0 %vm791_vm0, %v790_v2 }
 0x454   :  { %737 = vmatpush3.bf16.msra.mxu1 %v756_v6  ;;  %729 = vmatpush3.bf16.msra.mxu0 %v758_v22 }
 0x455   :  { %738 = vmatprep.subr.bf16.mxu1 %v790_v2  ;;  %730 = vmatprep.subr.bf16.mxu0 %v790_v2 }
 0x458   :  { %739 = vmatpush3.bf16.msra.mxu1 %v757_v7  ;;  %731 = vmatpush3.bf16.msra.mxu0 %v759_v23 }
 0x51d   :  { %v338_v24 = vpop.f32.mrb[4].mxu0  ;;  %v394_v25 = vpop.f32.mrb[4].mxu1 }
 0x51e   :  { %v400_v26 = vpack.c.bf16 %v338_v24, %v338_v24  ;;  %v401_v27 = vpack.c.bf16 %v394_v25, %v394_v25  ;;  %v708_v28 = vpop.f32.mrb[5].mxu0  ;;  %v714_v29 = vpop.f32.mrb[5].mxu1 }
 0x51f   :  { %v341_v30 = vpop.f32.mrb[6].mxu0  ;;  %v397_v31 = vpop.f32.mrb[6].mxu1 }
 0x520   :  { %v563_v32 = vunpack.c.l.b16 %v401_v27  ;;  %v709_v33 = vpop.f32.mrb[7].mxu0  ;;  %v715_v34 = vpop.f32.mrb[7].mxu1  ;;  %v562_v35 = vunpack.c.l.b16 %v400_v26 }
 0x522   :  { %v564_v36 = vrot.slane %v563_v32, 7 }
 0x524   :  { %v565_v2 = vsel %vm225_vm2, %v564_v36, %v562_v35 }
 0x525   :  { %v566_v37 = vpack.c.b16 %v565_v2, %v565_v2  ;;  %v443_v38 = vpop.f32.mrb[8].mxu0  ;;  %v486_v39 = vpop.f32.mrb[8].mxu1 }
 0x526   :  { %v492_v40 = vpack.c.bf16 %v443_v38, %v443_v38  ;;  %v493_v41 = vpack.c.bf16 %v486_v39, %v486_v39  ;;  %v720_v42 = vpop.f32.mrb[9].mxu0  ;;  %v726_v43 = vpop.f32.mrb[9].mxu1 }
 0x527   :  { %v446_v44 = vpop.f32.mrb[10].mxu0  ;;  %v489_v45 = vpop.f32.mrb[10].mxu1  ;;  %741 = vmatmul.mubr.msk.bf16.vlgmr.msra.gmra.mrb[12].mxu1 %vm68_vm1, %v566_v37 }
 0x528   :  { %v501_v46 = vunpack.c.l.b16 %v493_v41  ;;  %v721_v47 = vpop.f32.mrb[11].mxu0  ;;  %v727_v48 = vpop.f32.mrb[11].mxu1  ;;  %v500_v49 = vunpack.c.l.b16 %v492_v40 }
 0x52a   :  { %v502_v50 = vrot.slane %v501_v46, 7 }
 0x52c   :  { %v503_v51 = vsel %vm225_vm2, %v502_v50, %v500_v49 }
 0x52d   :  { %v504_v52 = vpack.c.b16 %v503_v51, %v503_v51 }
 0x52f   :  { %733 = vmatmul.mubr.msk.bf16.vlgmr.msra.gmra.mrb[12].mxu0 %vm68_vm1, %v504_v52 }
 0x5fa   :  { %v616_v53 = vpop.f32.mrb[12].mxu1 }
 0x5fb   :  { %v742_v54 = vpop.f32.mrb[13].mxu1 }
 0x5fc   :  { %v619_v55 = vpop.f32.mrb[14].mxu1 }
 0x5fd   :  { %v743_v56 = vpop.f32.mrb[15].mxu1 }
 0x602   :  { %v554_v57 = vpop.f32.mrb[12].mxu0 }
 0x603   :  { %v617_v59 = vadd.f32 %v616_v53, %v554_v57  ;;  %v734_v60 = vpop.f32.mrb[13].mxu0 }
 0x604   :  { %v557_v61 = vpop.f32.mrb[14].mxu0 }
 0x605   :  { %v629_v62 = vadd.f32 %v667_v58, %v617_v59  ;;  %v735_v63 = vpop.f32.mrb[15].mxu0 }
 0x607   :  { %631 = vst.msk [vmem:[#allocation3] sm:$0x3] %vm630_vm6, %v629_v62 }
 0x608   :  { %777 = shalt.err (!%p774_p4)
}
 0x609   :  { %s778_s9 = scalar_lea.hbm %s977_s10, 32 }
 0x60a   :  { %p779_p5 = scmp.ne.s32.totalorder %s977_s10, %s778_s9  ;;  %p782_p6 = scmp.lt.u32.totalorder %s778_s9, %s977_s10 }
 0x60c   :  { %p784_p7 = pnand %p782_p6, %p779_p5 }
 0x60e   :  { %787 = shalt.err (!%p784_p7)
}
 0x60f   :  { %641 = dma.vmem_to_hbm [thread:$0]  %s639_s17, 32, %s977_s10, [#allocation4]  }
 0x610   :  { %788 = dma.done.wait [#allocation4], 32  }
 0x611   :  { %789 = vsyncadd [#allocation4], 4294967264 }
 0x612   :  { %645 = vsyncpa [#allocation4], 1 }

// kernel: lstm_model_forward.3
= control target key start
LH: loop header
LB: loop body
LE: loop exit
PB: predicated region body
PF: predicated region fallthrough
CT: control target
= control target key end

     0   :  { %v98_v0 = vlaneseq  ;;  %v2611_v1 = vmov 0.0   ;;  %v2612_v3 = vmov 1966171168   ;;  %vm2613_vm0 = vmmov 0   ;;  %s2614_s14 = smov 32   ;;  %s2617_s21 = smov 96   ;;  %s3215_s2 = inlined_call_operand.vmem [shape: bf16[16,128], index: 2, kind: input, shape index: {}]   ;;  %s3216_s3 = inlined_call_operand.vmem [shape: bf16[16,128], index: 3, kind: input, shape index: {}]   ;;  %s3217_s0 = inlined_call_operand.vmem [shape: bf16[8,2,16], index: 0, kind: input, shape index: {}, may-alias: {0,1}]   ;;  %s3218_s1 = inlined_call_operand.vmem [shape: bf16[8,2,16], index: 1, kind: input, shape index: {}, may-alias: {0,1}]   ;;  %s3219_s5 = inlined_call_operand.vmem [shape: bf16[2,32,128], index: 5, kind: input, shape index: {}]   ;;  %s3220_s4 = inlined_call_operand.vmem [shape: f32[2,1,128], index: 4, kind: input, shape index: {}]   ;;  %s3221_s6 = inlined_call_operand.vmem [shape: bf16[8,2,32], index: 6, kind: output, shape index: {0}]   ;;  %s3222_s7 = inlined_call_operand.vmem [shape: bf16[8,2,32], index: 7, kind: output, shape index: {1}]  }
   0x1   :  { %2326 = vmatprep.subr.bf16.mxu0 %v2611_v1  ;;  %2332 = vmatprep.subr.bf16.mxu1 %v2611_v1  ;;  %v2473_v2 = vld [vmem:[%s3215_s2] sm:$0xff]   ;;  %v96_v4 = vunpack.c.l.s4 %v2612_v3  ;;  %vm61_vm1 = vcmask 254976   ;;  %vm146_vm2 = vcmask 130048   ;;  %v2754_v51 = vld [vmem:[%s3219_s5 + $0x10] sm:$0xff]   ;;  %v2760_v53 = vld [vmem:[%s3219_s5 + $0x8] sm:$0xff]   ;;  %vm445_vm3 = vcmask 261120  }
   0x2   :  { %v2474_v5 = vld [vmem:[%s3216_s3] sm:$0xff]   ;;  %2328 = vmatprep.mubr.msk.bf16.mxu0 %vm2613_vm0, %v2611_v1  ;;  %2334 = vmatprep.mubr.msk.bf16.mxu1 %vm2613_vm0, %v2611_v1  ;;  %v2670_v6 = vshrl.u32 %v98_v0, 7  ;;  %62 = vst.msk [vmem:[#allocation3] sm:$0x3] %vm61_vm1, %v2611_v1  ;;  %63 = vst.msk [vmem:[#allocation3 + $0x2] sm:$0x3] %vm61_vm1, %v2611_v1 }
   0x3   :  { %2327 = vmatpush3.bf16.msra.mxu0 %v2473_v2  ;;  %v66_v7 = vld [vmem:[%s3217_s0] sm:$0x1]  ;;  %v67_v8 = vld [vmem:[%s3217_s0 + $0x1] sm:$0x1]  ;;  %v68_v9 = vld [vmem:[%s3217_s0 + $0x2] sm:$0x1]  ;;  %v97_v10 = vunpack.c.0.s8 %v96_v4  ;;  %2333 = vmatpush3.bf16.msra.mxu1 %v2474_v5 }
   0x4   :  { %v69_v11 = vld [vmem:[%s3217_s0 + $0x3] sm:$0x1]  ;;  %v70_v12 = vld [vmem:[%s3217_s0 + $0x4] sm:$0x1]  ;;  %v71_v13 = vld [vmem:[%s3217_s0 + $0x5] sm:$0x1]  ;;  %v91_v14 = vcombine.low %v66_v7, %v67_v8  ;;  %2338 = vmatprep.subr.bf16.mxu0 %v2611_v1  ;;  %2346 = vmatprep.subr.bf16.mxu1 %v2611_v1 }
   0x5   :  { %v72_v15 = vld [vmem:[%s3217_s0 + $0x6] sm:$0x1]  ;;  %v73_v16 = vld [vmem:[%s3217_s0 + $0x7] sm:$0x1]  ;;  %v92_v17 = vcombine.low %v68_v9, %v69_v11  ;;  %v93_v18 = vcombine.low %v70_v12, %v71_v13  ;;  %v2698_v19 = vsub.s32 %v97_v10, %v2670_v6  ;;  %v243_v20 = vld [vmem:[%s3218_s1] sm:$0x1] }
   0x6   :  { %v94_v21 = vcombine.low %v72_v15, %v73_v16  ;;  %v244_v22 = vld [vmem:[%s3218_s1 + $0x1] sm:$0x1]  ;;  %v245_v23 = vld [vmem:[%s3218_s1 + $0x2] sm:$0x1]  ;;  %v246_v24 = vld [vmem:[%s3218_s1 + $0x3] sm:$0x1] }
   0x7   :  { %v101_v25 = vrot.slane %v91_v14, %v2698_v19  ;;  %v108_v26 = vrot.slane %v92_v17, %v2698_v19  ;;  %v115_v27 = vrot.slane %v93_v18, %v2698_v19  ;;  %v247_v28 = vld [vmem:[%s3218_s1 + $0x4] sm:$0x1]  ;;  %v248_v29 = vld [vmem:[%s3218_s1 + $0x5] sm:$0x1]  ;;  %v249_v30 = vld [vmem:[%s3218_s1 + $0x6] sm:$0x1]  ;;  %v269_v31 = vcombine.low %v243_v20, %v244_v22 }
   0x8   :  { %v122_v32 = vrot.slane %v94_v21, %v2698_v19  ;;  %v250_v33 = vld [vmem:[%s3218_s1 + $0x7] sm:$0x1]  ;;  %v270_v34 = vcombine.low %v245_v23, %v246_v24  ;;  %v271_v35 = vcombine.low %v247_v28, %v248_v29  ;;  %64 = vst.msk [vmem:[#allocation4] sm:$0x3] %vm61_vm1, %v2611_v1  ;;  %65 = vst.msk [vmem:[#allocation4 + $0x2] sm:$0x3] %vm61_vm1, %v2611_v1 }
   0x9   :  { %v123_v36 = vcombine.low %v101_v25, %v108_v26  ;;  %v272_v37 = vcombine.low %v249_v30, %v250_v33  ;;  %v279_v38 = vrot.slane %v269_v31, %v2698_v19  ;;  %v2746_v47 = vld [vmem:[%s3219_s5] sm:$0xff]   ;;  %v2771_v58 = vld [vmem:[%s3219_s5 + $0x18] sm:$0xff]   ;;  %v2615_v61 = vmov 1983009808  }
   0xa   :  { %v124_v39 = vcombine.low %v115_v27, %v122_v32  ;;  %v286_v40 = vrot.slane %v270_v34, %v2698_v19  ;;  %v293_v41 = vrot.slane %v271_v35, %v2698_v19  ;;  %v429_v54 = vld [vmem:[#allocation3] sm:$0x3]  ;;  %v430_v59 = vld [vmem:[#allocation3 + $0x2] sm:$0x3]  ;;  %v195_v62 = vunpack.c.l.s4 %v2615_v61 }
   0xb   :  { %v131_v42 = vrot.slane %v123_v36, %v2698_v19  ;;  %v300_v43 = vrot.slane %v272_v37, %v2698_v19  ;;  %v431_v57 = vpack.c.bf16 %v429_v54, %v429_v54  ;;  %v432_v60 = vpack.c.bf16 %v430_v59, %v430_v59  ;;  %v2209_v0 = vld [vmem:[%s3220_s4] ss:$0 sm:$0xff]  ;;  %v2217_v5 = vld [vmem:[%s3220_s4 + $0x1] ss:$0 sm:$0xff]  ;;  %s2616_s4 = smov 64  }
   0xc   :  { %v138_v44 = vrot.slane %v124_v39, %v2698_v19  ;;  %v301_v45 = vcombine.low %v279_v38, %v286_v40  ;;  %v196_v63 = vunpack.c.0.s8 %v195_v62  ;;  %vm605_vm4 = vcmask 253952  }
   0xd   :  { %v302_v46 = vcombine.low %v293_v41, %v300_v43 }
   0xe   :  { %v139_v48 = vcombine.low %v131_v42, %v138_v44  ;;  %v309_v49 = vrot.slane %v301_v45, %v2698_v19  ;;  %v199_v4 = vsub.s32 %v196_v63, %v2670_v6 }
   0xf   :  { %v316_v50 = vrot.slane %v302_v46, %v2698_v19  ;;  %v553_v55 = vld [vmem:[#allocation4] sm:$0x3]  ;;  %v618_v56 = vld [vmem:[#allocation4 + $0x2] sm:$0x3] }
  0x10   :  { %2329 = vmatmul.mubr.msk.bf16.vlgmr.msra.gmra.mrb[0].mxu0 %vm146_vm2, %v139_v48  ;;  %555 = vrot.lane.b32.xlu1 %v553_v55, %s2614_s14 }
  0x11   :  { %v317_v52 = vcombine.low %v309_v49, %v316_v50  ;;  %2339 = vmatpush3.bf16.msra.mxu0 %v2746_v47  ;;  %2342 = vmatprep.mubr.msk.bf16.mxu0 %vm2613_vm0, %v2611_v1 }
  0x12   :  { %2340 = vmatprep.subr.bf16.mxu0 %v2611_v1 }
  0x13   :  { %2335 = vmatmul.mubr.msk.bf16.vlgmr.msra.gmra.mrb[0].mxu1 %vm146_vm2, %v317_v52 }
  0x14   :  { %2347 = vmatpush3.bf16.msra.mxu1 %v2754_v51  ;;  %2350 = vmatprep.mubr.msk.bf16.mxu1 %vm2613_vm0, %v2611_v1 }
  0x15   :  { %2341 = vmatpush3.bf16.msra.mxu0 %v2760_v53  ;;  %2348 = vmatprep.subr.bf16.mxu1 %v2611_v1 }
  0x16   :  { %620 = vrot.lane.b32.xlu1 %v618_v56, %s2614_s14  ;;  %2354 = vmatprep.subr.bf16.mxu0 %v2611_v1 }
  0x18   :  { %2343 = vmatmul.mubr.msk.bf16.vlgmr.msra.gmra.mrb[4].mxu0 %vm445_vm3, %v431_v57  ;;  %2349 = vmatpush3.bf16.msra.mxu1 %v2771_v58 }
  0x19   :  { %2355 = vmatpush3.bf16.msra.mxu0 %v2746_v47  ;;  %2358 = vmatprep.mubr.msk.bf16.mxu0 %vm2613_vm0, %v2611_v1 }
  0x1a   :  { %2356 = vmatprep.subr.bf16.mxu0 %v2611_v1  ;;  %2362 = vmatprep.subr.bf16.mxu1 %v2611_v1 }
  0x1b   :  { %2351 = vmatmul.mubr.msk.bf16.vlgmr.msra.gmra.mrb[4].mxu1 %vm445_vm3, %v432_v60 }
  0x1c   :  { %2363 = vmatpush3.bf16.msra.mxu1 %v2754_v51  ;;  %2366 = vmatprep.mubr.msk.bf16.mxu1 %vm2613_vm0, %v2611_v1 }
  0x1d   :  { %2357 = vmatpush3.bf16.msra.mxu0 %v2760_v53  ;;  %2364 = vmatprep.subr.bf16.mxu1 %v2611_v1 }
  0x1e   :  { %2370 = vmatprep.subr.bf16.mxu0 %v2611_v1 }
  0x20   :  { %2365 = vmatpush3.bf16.msra.mxu1 %v2771_v58 }
  0x21   :  { %2378 = vmatprep.subr.bf16.mxu1 %v2611_v1 }
  0xe3   :  { %v184_v2 = vpop.f32.mrb[0].mxu0 }
  0xe4   :  { %v185_v3 = vadd.f32 %v2209_v0, %v184_v2  ;;  %v2330_v7 = vpop.f32.mrb[1].mxu0 }
  0xe5   :  { %v187_v8 = vpop.f32.mrb[2].mxu0 }
  0xe6   :  { %v193_v9 = vcombine.high %v185_v3, %v185_v3  ;;  %v200_v10 = vrot.slane %v185_v3, %v199_v4  ;;  %2212 = vst.sshfl [vmem:[#allocation2] sm:$0x3 pattern:$0x76325410] %v185_v3  ;;  %v361_v11 = vpop.f32.mrb[0].mxu1  ;;  %v188_v12 = vadd.f32 %v2209_v0, %v187_v8  ;;  %v2331_v13 = vpop.f32.mrb[3].mxu0 }
  0xe7   :  { %v362_v14 = vadd.f32 %v2217_v5, %v361_v11  ;;  %v2336_v15 = vpop.f32.mrb[1].mxu1 }
  0xe8   :  { %v207_v16 = vrot.slane %v193_v9, %v199_v4  ;;  %v208_v17 = vcombine.high %v200_v10, %v200_v10  ;;  %2213 = vst.sshfl [vmem:[#allocation2 + $0x4] sm:$0x3 pattern:$0x76325410] %v193_v9  ;;  %v364_v18 = vpop.f32.mrb[2].mxu1  ;;  %v210_v20 = vcombine.high %v188_v12, %v188_v12  ;;  %v217_v6 = vrot.slane %v188_v12, %v199_v4 }
  0xe9   :  { %2214 = vst.sshfl [vmem:[#allocation2 + $0x8] sm:$0x3 pattern:$0x76325410] %v188_v12  ;;  %v370_v21 = vcombine.high %v362_v14, %v362_v14  ;;  %v377_v22 = vrot.slane %v362_v14, %v199_v4  ;;  %v365_v23 = vadd.f32 %v2217_v5, %v364_v18  ;;  %v2337_v24 = vpop.f32.mrb[3].mxu1 }
  0xea   :  { %2220 = vst.sshfl [vmem:[#allocation2 + $0x10] sm:$0x3 pattern:$0x76325410] %v362_v14  ;;  %v209_v25 = vcombine.high %v207_v16, %v207_v16  ;;  %236 = vst [vmem:[#allocation2 + $0x2] sm:$0x3] %v208_v17  ;;  %v224_v26 = vrot.slane %v210_v20, %v199_v4  ;;  %v225_v27 = vcombine.high %v217_v6, %v217_v6 }
  0xeb   :  { %2215 = vst.sshfl [vmem:[#allocation2 + $0xc] sm:$0x3 pattern:$0x76325410] %v210_v20  ;;  %v384_v28 = vrot.slane %v370_v21, %v199_v4  ;;  %v385_v29 = vcombine.high %v377_v22, %v377_v22  ;;  %v387_v30 = vcombine.high %v365_v23, %v365_v23  ;;  %v394_v31 = vrot.slane %v365_v23, %v199_v4  ;;  %v483_v32 = vpop.f32.mrb[4].mxu0 }
  0xec   :  { %2221 = vst.sshfl [vmem:[#allocation2 + $0x14] sm:$0x3 pattern:$0x76325410] %v370_v21  ;;  %238 = vst [vmem:[#allocation2 + $0x6] sm:$0x3] %v209_v25  ;;  %v226_v33 = vcombine.high %v224_v26, %v224_v26 }
  0xed   :  { %2222 = vst.sshfl [vmem:[#allocation2 + $0x18] sm:$0x3 pattern:$0x76325410] %v365_v23  ;;  %240 = vst [vmem:[#allocation2 + $0xa] sm:$0x3] %v225_v27  ;;  %v386_v35 = vcombine.high %v384_v28, %v384_v28  ;;  %v401_v36 = vrot.slane %v387_v30, %v199_v4  ;;  %v402_v37 = vcombine.high %v394_v31, %v394_v31  ;;  %v556_v4 = vpop.permute.xlu1 %555 }
  0xee   :  { %v2344_v34 = vpop.f32.mrb[5].mxu0  ;;  %414 = vst [vmem:[#allocation2 + $0x12] sm:$0x3] %v385_v29  ;;  %v544_v38 = vld [vmem:[#allocation2] sm:$0x3]  ;;  %v538_v42 = vpop.f32.mrb[4].mxu1 }
  0xef   :  { %2223 = vst.sshfl [vmem:[#allocation2 + $0x1c] sm:$0x3 pattern:$0x76325410] %v387_v30  ;;  %v486_v39 = vpop.f32.mrb[6].mxu0  ;;  %v545_v40 = vadd.f32 %v544_v38, %v483_v32  ;;  %v403_v43 = vcombine.high %v401_v36, %v401_v36  ;;  %v2352_v44 = vpop.f32.mrb[5].mxu1 }
  0xf0   :  { %242 = vst [vmem:[#allocation2 + $0xe] sm:$0x3] %v226_v33  ;;  %v2345_v41 = vpop.f32.mrb[7].mxu0  ;;  %416 = vst [vmem:[#allocation2 + $0x16] sm:$0x3] %v386_v35  ;;  %v541_v45 = vpop.f32.mrb[6].mxu1 }
  0xf1   :  { %418 = vst [vmem:[#allocation2 + $0x1a] sm:$0x3] %v402_v37  ;;  %2479 = vtanh.f32 %v545_v40  ;;  %420 = vst [vmem:[#allocation2 + $0x1e] sm:$0x3] %v403_v43  ;;  %v2353_v46 = vpop.f32.mrb[7].mxu1  ;;  %v621_v9 = vpop.permute.xlu1 %620 }
  0xf2   :  { %v2230_v54 = vmul.f32 -1.442695, %v545_v40  ;;  %v763_v28 = vld [vmem:[#allocation2 + $0x2] sm:$0x3] }
  0xf6   :  { %v826_v34 = vld [vmem:[#allocation2 + $0x1c] sm:$0x3] }
  0xf8   :  { %v608_v48 = vld [vmem:[#allocation2 + $0x1e] sm:$0x3] }
  0xf9   :  { %v609_v49 = vadd.f32 %v608_v48, %v538_v42 }
  0xfb   :  { %v2480_v50 = vpop.eup %2479  ;;  %2481 = vtanh.f32 %v609_v49  ;;  %v2231_v55 = vmul.f32 -1.442695, %v609_v49 }
  0xfc   :  { %560 = vrot.lane.b32.xlu0 %v2480_v50, %s2616_s4  ;;  %2483 = vpow2.f32 %v2230_v54 }
  0xfd   :  { %2485 = vpow2.f32 %v2231_v55 }
 0x105   :  { %v2482_v52 = vpop.eup %2481 }
 0x106   :  { %625 = vrot.lane.b32.xlu0 %v2482_v52, %s2616_s4  ;;  %v2484_v56 = vpop.eup %2483 }
 0x107   :  { %v549_v57 = vadd.f32 1.0, %v2484_v56  ;;  %v2486_v59 = vpop.eup %2485 }
 0x108   :  { %v613_v60 = vadd.f32 1.0, %v2486_v59 }
 0x109   :  { %2487 = vrcp.f32 %v549_v57 }
 0x10a   :  { %2489 = vrcp.f32 %v613_v60 }
 0x113   :  { %v2488_v61 = vpop.eup %2487 }
 0x114   :  { %v2490_v0 = vpop.eup %2489  ;;  %v558_v5 = vmul.f32 %v2488_v61, %v556_v4 }
 0x115   :  { %v623_v10 = vmul.f32 %v2490_v0, %v621_v9 }
 0x16e   :  { %v561_v62 = vpop.permute.xlu0 %560 }
 0x16f   :  { %v563_v63 = vmul.f32 %v2488_v61, %v561_v62 }
 0x171   :  { %565 = vrot.lane.b32.xlu0 %v563_v63, %s2614_s14 }
 0x178   :  { %v626_v2 = vpop.permute.xlu0 %625 }
 0x179   :  { %v628_v3 = vmul.f32 %v2490_v0, %v626_v2 }
 0x17b   :  { %630 = vrot.lane.b32.xlu1 %v628_v3, %s2614_s14 }
 0x1e3   :  { %v566_v7 = vpop.permute.xlu0 %565 }
 0x1e4   :  { %v568_v8 = vadd.f32 %v566_v7, %v558_v5 }
 0x1e6   :  { %2491 = vtanh.f32 %v568_v8 }
 0x1ed   :  { %v631_v11 = vpop.permute.xlu1 %630 }
 0x1ee   :  { %v633_v12 = vadd.f32 %v631_v11, %v623_v10 }
 0x1f0   :  { %v2492_v13 = vpop.eup %2491  ;;  %2493 = vtanh.f32 %v633_v12 }
 0x1f1   :  { %571 = vrot.lane.b32.xlu0 %v2492_v13, %s2616_s4 }
 0x1fa   :  { %v2494_v14 = vpop.eup %2493 }
 0x1fb   :  { %636 = vrot.lane.b32.xlu1 %v2494_v14, %s2616_s4 }
 0x263   :  { %v572_v15 = vpop.permute.xlu0 %571 }
 0x264   :  { %v2808_v16 = vmul.f32 %v2488_v61, %v572_v15 }
 0x266   :  { %582 = vrot.lane.b32.xlu0 %v2808_v16, %s2614_s14 }
 0x26a   :  { %576 = vrot.lane.b32.xlu0 %v568_v8, %s2617_s21 }
 0x26d   :  { %v637_v17 = vpop.permute.xlu1 %636 }
 0x26e   :  { %v2813_v18 = vmul.f32 %v2490_v0, %v637_v17 }
 0x270   :  { %646 = vrot.lane.b32.xlu1 %v2813_v18, %s2614_s14 }
 0x274   :  { %641 = vrot.lane.b32.xlu1 %v633_v12, %s2617_s21 }
 0x2d8   :  { %v583_v20 = vpop.permute.xlu0 %582 }
 0x2d9   :  { %585 = vst.msk [vmem:[#allocation3] sm:$0x3] %vm61_vm1, %v583_v20 }
 0x2dc   :  { %v577_v6 = vpop.permute.xlu0 %576 }
 0x2dd   :  { %580 = vst.msk [vmem:[#allocation4] sm:$0x3] %vm61_vm1, %v577_v6 }
 0x2e0   :  { %v672_v21 = vld [vmem:[#allocation3] sm:$0x3] }
 0x2e1   :  { %v674_v22 = vpack.c.bf16 %v672_v21, %v672_v21 }
 0x2e2   :  { %v647_v23 = vpop.permute.xlu1 %646 }
 0x2e3   :  { %2359 = vmatmul.mubr.msk.bf16.vlgmr.msra.gmra.mrb[8].mxu0 %vm445_vm3, %v674_v22  ;;  %650 = vst.msk [vmem:[#allocation3 + $0x2] sm:$0x3] %vm61_vm1, %v647_v23  ;;  %v979_v22 = vld [vmem:[#allocation2 + $0x4] sm:$0x3] }
 0x2e4   :  { %2371 = vmatpush3.bf16.msra.mxu0 %v2746_v47  ;;  %2374 = vmatprep.mubr.msk.bf16.mxu0 %vm2613_vm0, %v2611_v1  ;;  %v772_v40 = vld [vmem:[#allocation4] sm:$0x3] }
 0x2e5   :  { %2372 = vmatprep.subr.bf16.mxu0 %v2611_v1 }
 0x2e6   :  { %v642_v24 = vpop.permute.xlu1 %641 }
 0x2e7   :  { %644 = vst.msk [vmem:[#allocation4 + $0x2] sm:$0x3] %vm61_vm1, %v642_v24 }
 0x2e8   :  { %2373 = vmatpush3.bf16.msra.mxu0 %v2760_v53 }
 0x2e9   :  { %2386 = vmatprep.subr.bf16.mxu0 %v2611_v1 }
 0x2ea   :  { %v673_v25 = vld [vmem:[#allocation3 + $0x2] sm:$0x3] }
 0x2eb   :  { %v675_v26 = vpack.c.bf16 %v673_v25, %v673_v25 }
 0x2ed   :  { %2367 = vmatmul.mubr.msk.bf16.vlgmr.msra.gmra.mrb[8].mxu1 %vm445_vm3, %v675_v26 }
 0x2ee   :  { %2379 = vmatpush3.bf16.msra.mxu1 %v2754_v51  ;;  %2382 = vmatprep.mubr.msk.bf16.mxu1 %vm2613_vm0, %v2611_v1  ;;  %v835_v42 = vld [vmem:[#allocation4 + $0x2] sm:$0x3] }
 0x2ef   :  { %2380 = vmatprep.subr.bf16.mxu1 %v2611_v1 }
 0x2f2   :  { %2381 = vmatpush3.bf16.msra.mxu1 %v2771_v58 }
 0x2f3   :  { %2394 = vmatprep.subr.bf16.mxu1 %v2611_v1 }
 0x3b6   :  { %v713_v27 = vpop.f32.mrb[8].mxu0 }
 0x3b7   :  { %v764_v29 = vadd.f32 %v763_v28, %v713_v27  ;;  %v2360_v30 = vpop.f32.mrb[9].mxu0  ;;  %v1042_v28 = vld [vmem:[#allocation2 + $0x1a] sm:$0x3] }
 0x3b8   :  { %v716_v31 = vpop.f32.mrb[10].mxu0 }
 0x3b9   :  { %2495 = vtanh.f32 %v764_v29  ;;  %v2361_v32 = vpop.f32.mrb[11].mxu0  ;;  %v2235_v43 = vmul.f32 -1.442695, %v764_v29 }
 0x3c0   :  { %v756_v33 = vpop.f32.mrb[8].mxu1 }
 0x3c1   :  { %v827_v35 = vadd.f32 %v826_v34, %v756_v33  ;;  %v2368_v36 = vpop.f32.mrb[9].mxu1 }
 0x3c2   :  { %v759_v38 = vpop.f32.mrb[10].mxu1 }
 0x3c3   :  { %v2496_v37 = vpop.eup %2495  ;;  %2497 = vtanh.f32 %v827_v35  ;;  %v2369_v39 = vpop.f32.mrb[11].mxu1  ;;  %v2237_v44 = vmul.f32 -1.442695, %v827_v35 }
 0x3c4   :  { %779 = vrot.lane.b32.xlu0 %v2496_v37, %s2616_s4  ;;  %2499 = vpow2.f32 %v2235_v43 }
 0x3c5   :  { %2501 = vpow2.f32 %v2237_v44 }
 0x3c8   :  { %774 = vrot.lane.b32.xlu0 %v772_v40, %s2614_s14 }
 0x3cd   :  { %v2498_v41 = vpop.eup %2497 }
 0x3ce   :  { %842 = vrot.lane.b32.xlu1 %v2498_v41, %s2616_s4  ;;  %v2500_v45 = vpop.eup %2499 }
 0x3cf   :  { %v768_v46 = vadd.f32 1.0, %v2500_v45  ;;  %v2502_v48 = vpop.eup %2501 }
 0x3d0   :  { %v831_v49 = vadd.f32 1.0, %v2502_v48 }
 0x3d1   :  { %2503 = vrcp.f32 %v768_v46 }
 0x3d2   :  { %837 = vrot.lane.b32.xlu1 %v835_v42, %s2614_s14  ;;  %2505 = vrcp.f32 %v831_v49 }
 0x3db   :  { %v2504_v50 = vpop.eup %2503 }
 0x3dc   :  { %v2506_v55 = vpop.eup %2505 }
 0x436   :  { %v780_v52 = vpop.permute.xlu0 %779 }
 0x437   :  { %v782_v54 = vmul.f32 %v2504_v50, %v780_v52 }
 0x439   :  { %784 = vrot.lane.b32.xlu0 %v782_v54, %s2614_s14 }
 0x43a   :  { %v775_v59 = vpop.permute.xlu0 %774 }
 0x43b   :  { %v777_v60 = vmul.f32 %v2504_v50, %v775_v59 }
 0x440   :  { %v843_v56 = vpop.permute.xlu1 %842 }
 0x441   :  { %v845_v57 = vmul.f32 %v2506_v55, %v843_v56 }
 0x443   :  { %847 = vrot.lane.b32.xlu1 %v845_v57, %s2614_s14 }
 0x444   :  { %v838_v63 = vpop.permute.xlu1 %837 }
 0x445   :  { %v840_v0 = vmul.f32 %v2506_v55, %v838_v63 }
 0x4ab   :  { %v785_v61 = vpop.permute.xlu0 %784 }
 0x4ac   :  { %v787_v62 = vadd.f32 %v785_v61, %v777_v60 }
 0x4ae   :  { %2507 = vtanh.f32 %v787_v62 }
 0x4b5   :  { %v848_v2 = vpop.permute.xlu1 %847 }
 0x4b6   :  { %v850_v3 = vadd.f32 %v848_v2, %v840_v0 }
 0x4b8   :  { %v2508_v4 = vpop.eup %2507  ;;  %2509 = vtanh.f32 %v850_v3 }
 0x4b9   :  { %790 = vrot.lane.b32.xlu0 %v2508_v4, %s2616_s4 }
 0x4c2   :  { %v2510_v5 = vpop.eup %2509 }
 0x4c3   :  { %853 = vrot.lane.b32.xlu1 %v2510_v5, %s2616_s4 }
 0x52b   :  { %v791_v7 = vpop.permute.xlu0 %790 }
 0x52c   :  { %v2844_v8 = vmul.f32 %v2504_v50, %v791_v7 }
 0x52e   :  { %800 = vrot.lane.b32.xlu0 %v2844_v8, %s2614_s14 }
 0x532   :  { %795 = vrot.lane.b32.xlu0 %v787_v62, %s2617_s21 }
 0x535   :  { %v854_v9 = vpop.permute.xlu1 %853 }
 0x536   :  { %v2849_v10 = vmul.f32 %v2506_v55, %v854_v9 }
 0x538   :  { %863 = vrot.lane.b32.xlu1 %v2849_v10, %s2614_s14 }
 0x53c   :  { %858 = vrot.lane.b32.xlu1 %v850_v3, %s2617_s21 }
 0x5a0   :  { %v801_v11 = vpop.permute.xlu0 %800 }
 0x5a1   :  { %803 = vst.msk [vmem:[#allocation3] sm:$0x3] %vm61_vm1, %v801_v11 }
 0x5a4   :  { %v796_v12 = vpop.permute.xlu0 %795 }
 0x5a5   :  { %798 = vst.msk [vmem:[#allocation4] sm:$0x3] %vm61_vm1, %v796_v12 }
 0x5a8   :  { %v888_v13 = vld [vmem:[#allocation3] sm:$0x3] }
 0x5a9   :  { %v890_v14 = vpack.c.bf16 %v888_v13, %v888_v13 }
 0x5aa   :  { %v864_v15 = vpop.permute.xlu1 %863 }
 0x5ab   :  { %2375 = vmatmul.mubr.msk.bf16.vlgmr.msra.gmra.mrb[12].mxu0 %vm445_vm3, %v890_v14  ;;  %866 = vst.msk [vmem:[#allocation3 + $0x2] sm:$0x3] %vm61_vm1, %v864_v15 }
 0x5ac   :  { %2387 = vmatpush3.bf16.msra.mxu0 %v2746_v47  ;;  %2390 = vmatprep.mubr.msk.bf16.mxu0 %vm2613_vm0, %v2611_v1  ;;  %v988_v34 = vld [vmem:[#allocation4] sm:$0x3] }
 0x5ad   :  { %2388 = vmatprep.subr.bf16.mxu0 %v2611_v1 }
 0x5ae   :  { %v859_v17 = vpop.permute.xlu1 %858 }
 0x5af   :  { %861 = vst.msk [vmem:[#allocation4 + $0x2] sm:$0x3] %vm61_vm1, %v859_v17  ;;  %v1195_v17 = vld [vmem:[#allocation2 + $0x6] sm:$0x3] }
 0x5b0   :  { %2389 = vmatpush3.bf16.msra.mxu0 %v2760_v53 }
 0x5b1   :  { %2402 = vmatprep.subr.bf16.mxu0 %v2611_v1 }
 0x5b2   :  { %v889_v20 = vld [vmem:[#allocation3 + $0x2] sm:$0x3] }
 0x5b3   :  { %v891_v6 = vpack.c.bf16 %v889_v20, %v889_v20 }
 0x5b5   :  { %2383 = vmatmul.mubr.msk.bf16.vlgmr.msra.gmra.mrb[12].mxu1 %vm445_vm3, %v891_v6 }
 0x5b6   :  { %2395 = vmatpush3.bf16.msra.mxu1 %v2754_v51  ;;  %2398 = vmatprep.mubr.msk.bf16.mxu1 %vm2613_vm0, %v2611_v1  ;;  %v1051_v36 = vld [vmem:[#allocation4 + $0x2] sm:$0x3] }
 0x5b7   :  { %2396 = vmatprep.subr.bf16.mxu1 %v2611_v1 }
 0x5ba   :  { %2397 = vmatpush3.bf16.msra.mxu1 %v2771_v58 }
 0x5bb   :  { %2410 = vmatprep.subr.bf16.mxu1 %v2611_v1 }
 0x67e   :  { %v929_v21 = vpop.f32.mrb[12].mxu0 }
 0x67f   :  { %v980_v23 = vadd.f32 %v979_v22, %v929_v21  ;;  %v2376_v24 = vpop.f32.mrb[13].mxu0 }
 0x680   :  { %v932_v25 = vpop.f32.mrb[14].mxu0  ;;  %v1258_v24 = vld [vmem:[#allocation2 + $0x18] sm:$0x3] }
 0x681   :  { %2511 = vtanh.f32 %v980_v23  ;;  %v2377_v26 = vpop.f32.mrb[15].mxu0  ;;  %v2241_v37 = vmul.f32 -1.442695, %v980_v23 }
 0x688   :  { %v972_v27 = vpop.f32.mrb[12].mxu1 }
 0x689   :  { %v1043_v29 = vadd.f32 %v1042_v28, %v972_v27  ;;  %v2384_v30 = vpop.f32.mrb[13].mxu1 }
 0x68a   :  { %v975_v32 = vpop.f32.mrb[14].mxu1 }
 0x68b   :  { %v2512_v31 = vpop.eup %2511  ;;  %2513 = vtanh.f32 %v1043_v29  ;;  %v2385_v33 = vpop.f32.mrb[15].mxu1  ;;  %v2243_v38 = vmul.f32 -1.442695, %v1043_v29 }
 0x68c   :  { %995 = vrot.lane.b32.xlu0 %v2512_v31, %s2616_s4  ;;  %2515 = vpow2.f32 %v2241_v37 }
 0x68d   :  { %2517 = vpow2.f32 %v2243_v38 }
 0x690   :  { %990 = vrot.lane.b32.xlu0 %v988_v34, %s2614_s14 }
 0x695   :  { %v2514_v35 = vpop.eup %2513 }
 0x696   :  { %1058 = vrot.lane.b32.xlu1 %v2514_v35, %s2616_s4  ;;  %v2516_v39 = vpop.eup %2515 }
 0x697   :  { %v984_v40 = vadd.f32 1.0, %v2516_v39  ;;  %v2518_v41 = vpop.eup %2517 }
 0x698   :  { %v1047_v42 = vadd.f32 1.0, %v2518_v41 }
 0x699   :  { %2519 = vrcp.f32 %v984_v40 }
 0x69a   :  { %1053 = vrot.lane.b32.xlu1 %v1051_v36, %s2614_s14  ;;  %2521 = vrcp.f32 %v1047_v42 }
 0x6a3   :  { %v2520_v43 = vpop.eup %2519 }
 0x6a4   :  { %v2522_v46 = vpop.eup %2521 }
 0x6fe   :  { %v996_v44 = vpop.permute.xlu0 %995 }
 0x6ff   :  { %v998_v45 = vmul.f32 %v2520_v43, %v996_v44 }
 0x701   :  { %1000 = vrot.lane.b32.xlu0 %v998_v45, %s2614_s14 }
 0x702   :  { %v991_v50 = vpop.permute.xlu0 %990 }
 0x703   :  { %v993_v52 = vmul.f32 %v2520_v43, %v991_v50 }
 0x708   :  { %v1059_v48 = vpop.permute.xlu1 %1058 }
 0x709   :  { %v1061_v49 = vmul.f32 %v2522_v46, %v1059_v48 }
 0x70b   :  { %1063 = vrot.lane.b32.xlu1 %v1061_v49, %s2614_s14 }
 0x70c   :  { %v1054_v56 = vpop.permute.xlu1 %1053 }
 0x70d   :  { %v1056_v57 = vmul.f32 %v2522_v46, %v1054_v56 }
 0x773   :  { %v1001_v54 = vpop.permute.xlu0 %1000 }
 0x774   :  { %v1003_v55 = vadd.f32 %v1001_v54, %v993_v52 }
 0x776   :  { %2523 = vtanh.f32 %v1003_v55 }
 0x77d   :  { %v1064_v59 = vpop.permute.xlu1 %1063 }
 0x77e   :  { %v1066_v60 = vadd.f32 %v1064_v59, %v1056_v57 }
 0x780   :  { %v2524_v61 = vpop.eup %2523  ;;  %2525 = vtanh.f32 %v1066_v60 }
 0x781   :  { %1006 = vrot.lane.b32.xlu0 %v2524_v61, %s2616_s4 }
 0x78a   :  { %v2526_v62 = vpop.eup %2525 }
 0x78b   :  { %1069 = vrot.lane.b32.xlu1 %v2526_v62, %s2616_s4 }
 0x7f3   :  { %v1007_v63 = vpop.permute.xlu0 %1006 }
 0x7f4   :  { %v2880_v0 = vmul.f32 %v2520_v43, %v1007_v63 }
 0x7f6   :  { %1016 = vrot.lane.b32.xlu0 %v2880_v0, %s2614_s14 }
 0x7fa   :  { %1011 = vrot.lane.b32.xlu0 %v1003_v55, %s2617_s21 }
 0x7fd   :  { %v1070_v2 = vpop.permute.xlu1 %1069 }
 0x7fe   :  { %v2885_v3 = vmul.f32 %v2522_v46, %v1070_v2 }
 0x800   :  { %1079 = vrot.lane.b32.xlu1 %v2885_v3, %s2614_s14 }
 0x804   :  { %1074 = vrot.lane.b32.xlu1 %v1066_v60, %s2617_s21 }
 0x868   :  { %v1017_v4 = vpop.permute.xlu0 %1016 }
 0x869   :  { %1019 = vst.msk [vmem:[#allocation3] sm:$0x3] %vm61_vm1, %v1017_v4 }
 0x86c   :  { %v1012_v5 = vpop.permute.xlu0 %1011 }
 0x86d   :  { %1014 = vst.msk [vmem:[#allocation4] sm:$0x3] %vm61_vm1, %v1012_v5 }
 0x870   :  { %v1104_v7 = vld [vmem:[#allocation3] sm:$0x3] }
 0x871   :  { %v1106_v9 = vpack.c.bf16 %v1104_v7, %v1104_v7 }
 0x872   :  { %v1080_v11 = vpop.permute.xlu1 %1079 }
 0x873   :  { %2391 = vmatmul.mubr.msk.bf16.vlgmr.msra.gmra.mrb[16].mxu0 %vm445_vm3, %v1106_v9  ;;  %1082 = vst.msk [vmem:[#allocation3 + $0x2] sm:$0x3] %vm61_vm1, %v1080_v11 }
 0x874   :  { %2403 = vmatpush3.bf16.msra.mxu0 %v2746_v47  ;;  %2406 = vmatprep.mubr.msk.bf16.mxu0 %vm2613_vm0, %v2611_v1  ;;  %v1204_v30 = vld [vmem:[#allocation4] sm:$0x3] }
 0x875   :  { %2404 = vmatprep.subr.bf16.mxu0 %v2611_v1 }
 0x876   :  { %v1075_v12 = vpop.permute.xlu1 %1074 }
 0x877   :  { %1077 = vst.msk [vmem:[#allocation4 + $0x2] sm:$0x3] %vm61_vm1, %v1075_v12 }
 0x878   :  { %2405 = vmatpush3.bf16.msra.mxu0 %v2760_v53 }
 0x879   :  { %2418 = vmatprep.subr.bf16.mxu0 %v2611_v1 }
 0x87a   :  { %v1105_v13 = vld [vmem:[#allocation3 + $0x2] sm:$0x3] }
 0x87b   :  { %v1107_v14 = vpack.c.bf16 %v1105_v13, %v1105_v13 }
 0x87d   :  { %2399 = vmatmul.mubr.msk.bf16.vlgmr.msra.gmra.mrb[16].mxu1 %vm445_vm3, %v1107_v14  ;;  %v1411_v14 = vld [vmem:[#allocation2 + $0x8] sm:$0x3] }
 0x87e   :  { %2411 = vmatpush3.bf16.msra.mxu1 %v2754_v51  ;;  %2414 = vmatprep.mubr.msk.bf16.mxu1 %vm2613_vm0, %v2611_v1  ;;  %v1267_v32 = vld [vmem:[#allocation4 + $0x2] sm:$0x3] }
 0x87f   :  { %2412 = vmatprep.subr.bf16.mxu1 %v2611_v1 }
 0x882   :  { %2413 = vmatpush3.bf16.msra.mxu1 %v2771_v58 }
 0x883   :  { %2426 = vmatprep.subr.bf16.mxu1 %v2611_v1 }
 0x946   :  { %v1145_v15 = vpop.f32.mrb[16].mxu0 }
 0x947   :  { %v1196_v20 = vadd.f32 %v1195_v17, %v1145_v15  ;;  %v2392_v6 = vpop.f32.mrb[17].mxu0 }
 0x948   :  { %v1148_v21 = vpop.f32.mrb[18].mxu0 }
 0x949   :  { %2527 = vtanh.f32 %v1196_v20  ;;  %v2393_v22 = vpop.f32.mrb[19].mxu0  ;;  %v2247_v33 = vmul.f32 -1.442695, %v1196_v20 }
 0x94a   :  { %v1474_v22 = vld [vmem:[#allocation2 + $0x16] sm:$0x3] }
 0x950   :  { %v1188_v23 = vpop.f32.mrb[16].mxu1 }
 0x951   :  { %v1259_v25 = vadd.f32 %v1258_v24, %v1188_v23  ;;  %v2400_v26 = vpop.f32.mrb[17].mxu1 }
 0x952   :  { %v1191_v28 = vpop.f32.mrb[18].mxu1 }
 0x953   :  { %v2528_v27 = vpop.eup %2527  ;;  %2529 = vtanh.f32 %v1259_v25  ;;  %v2401_v29 = vpop.f32.mrb[19].mxu1  ;;  %v2249_v34 = vmul.f32 -1.442695, %v1259_v25 }
 0x954   :  { %1211 = vrot.lane.b32.xlu0 %v2528_v27, %s2616_s4  ;;  %2531 = vpow2.f32 %v2247_v33 }
 0x955   :  { %2533 = vpow2.f32 %v2249_v34 }
 0x958   :  { %1206 = vrot.lane.b32.xlu0 %v1204_v30, %s2614_s14 }
 0x95d   :  { %v2530_v31 = vpop.eup %2529 }
 0x95e   :  { %1274 = vrot.lane.b32.xlu1 %v2530_v31, %s2616_s4  ;;  %v2532_v35 = vpop.eup %2531 }
 0x95f   :  { %v1200_v36 = vadd.f32 1.0, %v2532_v35  ;;  %v2534_v37 = vpop.eup %2533 }
 0x960   :  { %v1263_v38 = vadd.f32 1.0, %v2534_v37 }
 0x961   :  { %2535 = vrcp.f32 %v1200_v36 }
 0x962   :  { %1269 = vrot.lane.b32.xlu1 %v1267_v32, %s2614_s14  ;;  %2537 = vrcp.f32 %v1263_v38 }
 0x96b   :  { %v2536_v39 = vpop.eup %2535 }
 0x96c   :  { %v2538_v42 = vpop.eup %2537 }
 0x9c6   :  { %v1212_v40 = vpop.permute.xlu0 %1211 }
 0x9c7   :  { %v1214_v41 = vmul.f32 %v2536_v39, %v1212_v40 }
 0x9c9   :  { %1216 = vrot.lane.b32.xlu0 %v1214_v41, %s2614_s14 }
 0x9ca   :  { %v1207_v45 = vpop.permute.xlu0 %1206 }
 0x9cb   :  { %v1209_v46 = vmul.f32 %v2536_v39, %v1207_v45 }
 0x9d0   :  { %v1275_v43 = vpop.permute.xlu1 %1274 }
 0x9d1   :  { %v1277_v44 = vmul.f32 %v2538_v42, %v1275_v43 }
 0x9d3   :  { %1279 = vrot.lane.b32.xlu1 %v1277_v44, %s2614_s14 }
 0x9d4   :  { %v1270_v50 = vpop.permute.xlu1 %1269 }
 0x9d5   :  { %v1272_v52 = vmul.f32 %v2538_v42, %v1270_v50 }
 0xa3b   :  { %v1217_v48 = vpop.permute.xlu0 %1216 }
 0xa3c   :  { %v1219_v49 = vadd.f32 %v1217_v48, %v1209_v46 }
 0xa3e   :  { %2539 = vtanh.f32 %v1219_v49 }
 0xa45   :  { %v1280_v54 = vpop.permute.xlu1 %1279 }
 0xa46   :  { %v1282_v55 = vadd.f32 %v1280_v54, %v1272_v52 }
 0xa48   :  { %v2540_v56 = vpop.eup %2539  ;;  %2541 = vtanh.f32 %v1282_v55 }
 0xa49   :  { %1222 = vrot.lane.b32.xlu0 %v2540_v56, %s2616_s4 }
 0xa52   :  { %v2542_v57 = vpop.eup %2541 }
 0xa53   :  { %1285 = vrot.lane.b32.xlu1 %v2542_v57, %s2616_s4 }
 0xabb   :  { %v1223_v59 = vpop.permute.xlu0 %1222 }
 0xabc   :  { %v2916_v60 = vmul.f32 %v2536_v39, %v1223_v59 }
 0xabe   :  { %1232 = vrot.lane.b32.xlu0 %v2916_v60, %s2614_s14 }
 0xac2   :  { %1227 = vrot.lane.b32.xlu0 %v1219_v49, %s2617_s21 }
 0xac5   :  { %v1286_v61 = vpop.permute.xlu1 %1285 }
 0xac6   :  { %v2921_v62 = vmul.f32 %v2538_v42, %v1286_v61 }
 0xac8   :  { %1295 = vrot.lane.b32.xlu1 %v2921_v62, %s2614_s14 }
 0xacc   :  { %1290 = vrot.lane.b32.xlu1 %v1282_v55, %s2617_s21 }
 0xb30   :  { %v1233_v63 = vpop.permute.xlu0 %1232 }
 0xb31   :  { %1235 = vst.msk [vmem:[#allocation3] sm:$0x3] %vm61_vm1, %v1233_v63 }
 0xb34   :  { %v1228_v2 = vpop.permute.xlu0 %1227 }
 0xb35   :  { %1230 = vst.msk [vmem:[#allocation4] sm:$0x3] %vm61_vm1, %v1228_v2 }
 0xb38   :  { %v1320_v4 = vld [vmem:[#allocation3] sm:$0x3] }
 0xb39   :  { %v1322_v5 = vpack.c.bf16 %v1320_v4, %v1320_v4 }
 0xb3a   :  { %v1296_v7 = vpop.permute.xlu1 %1295 }
 0xb3b   :  { %2407 = vmatmul.mubr.msk.bf16.vlgmr.msra.gmra.mrb[20].mxu0 %vm445_vm3, %v1322_v5  ;;  %1298 = vst.msk [vmem:[#allocation3 + $0x2] sm:$0x3] %vm61_vm1, %v1296_v7 }
 0xb3c   :  { %2419 = vmatpush3.bf16.msra.mxu0 %v2746_v47  ;;  %2422 = vmatprep.mubr.msk.bf16.mxu0 %vm2613_vm0, %v2611_v1  ;;  %v1420_v27 = vld [vmem:[#allocation4] sm:$0x3] }
 0xb3d   :  { %2420 = vmatprep.subr.bf16.mxu0 %v2611_v1 }
 0xb3e   :  { %v1291_v9 = vpop.permute.xlu1 %1290 }
 0xb3f   :  { %1293 = vst.msk [vmem:[#allocation4 + $0x2] sm:$0x3] %vm61_vm1, %v1291_v9 }
 0xb40   :  { %2421 = vmatpush3.bf16.msra.mxu0 %v2760_v53 }
 0xb41   :  { %2434 = vmatprep.subr.bf16.mxu0 %v2611_v1 }
 0xb42   :  { %v1321_v11 = vld [vmem:[#allocation3 + $0x2] sm:$0x3] }
 0xb43   :  { %v1323_v12 = vpack.c.bf16 %v1321_v11, %v1321_v11 }
 0xb45   :  { %2415 = vmatmul.mubr.msk.bf16.vlgmr.msra.gmra.mrb[20].mxu1 %vm445_vm3, %v1323_v12  ;;  %v1627_v12 = vld [vmem:[#allocation2 + $0xa] sm:$0x3] }
 0xb46   :  { %2427 = vmatpush3.bf16.msra.mxu1 %v2754_v51  ;;  %2430 = vmatprep.mubr.msk.bf16.mxu1 %vm2613_vm0, %v2611_v1  ;;  %v1483_v29 = vld [vmem:[#allocation4 + $0x2] sm:$0x3] }
 0xb47   :  { %2428 = vmatprep.subr.bf16.mxu1 %v2611_v1 }
 0xb4a   :  { %2429 = vmatpush3.bf16.msra.mxu1 %v2771_v58 }
 0xb4b   :  { %2442 = vmatprep.subr.bf16.mxu1 %v2611_v1 }
 0xc0e   :  { %v1361_v13 = vpop.f32.mrb[20].mxu0 }
 0xc0f   :  { %v1412_v15 = vadd.f32 %v1411_v14, %v1361_v13  ;;  %v2408_v17 = vpop.f32.mrb[21].mxu0 }
 0xc10   :  { %v1364_v20 = vpop.f32.mrb[22].mxu0 }
 0xc11   :  { %2543 = vtanh.f32 %v1412_v15  ;;  %v2409_v6 = vpop.f32.mrb[23].mxu0  ;;  %v2253_v30 = vmul.f32 -1.442695, %v1412_v15 }
 0xc12   :  { %v1690_v6 = vld [vmem:[#allocation2 + $0x14] sm:$0x3] }
 0xc18   :  { %v1404_v21 = vpop.f32.mrb[20].mxu1 }
 0xc19   :  { %v1475_v23 = vadd.f32 %v1474_v22, %v1404_v21  ;;  %v2416_v51 = vpop.f32.mrb[21].mxu1 }
 0xc1a   :  { %v1407_v25 = vpop.f32.mrb[22].mxu1 }
 0xc1b   :  { %v2544_v24 = vpop.eup %2543  ;;  %2545 = vtanh.f32 %v1475_v23  ;;  %v2417_v26 = vpop.f32.mrb[23].mxu1  ;;  %v2255_v31 = vmul.f32 -1.442695, %v1475_v23 }
 0xc1c   :  { %1427 = vrot.lane.b32.xlu0 %v2544_v24, %s2616_s4  ;;  %2547 = vpow2.f32 %v2253_v30 }
 0xc1d   :  { %2549 = vpow2.f32 %v2255_v31 }
 0xc20   :  { %1422 = vrot.lane.b32.xlu0 %v1420_v27, %s2614_s14 }
 0xc25   :  { %v2546_v28 = vpop.eup %2545 }
 0xc26   :  { %1490 = vrot.lane.b32.xlu1 %v2546_v28, %s2616_s4  ;;  %v2548_v32 = vpop.eup %2547 }
 0xc27   :  { %v1416_v33 = vadd.f32 1.0, %v2548_v32  ;;  %v2550_v34 = vpop.eup %2549 }
 0xc28   :  { %v1479_v35 = vadd.f32 1.0, %v2550_v34 }
 0xc29   :  { %2551 = vrcp.f32 %v1416_v33 }
 0xc2a   :  { %1485 = vrot.lane.b32.xlu1 %v1483_v29, %s2614_s14  ;;  %2553 = vrcp.f32 %v1479_v35 }
 0xc33   :  { %v2552_v36 = vpop.eup %2551 }
 0xc34   :  { %v2554_v39 = vpop.eup %2553 }
 0xc8e   :  { %v1428_v37 = vpop.permute.xlu0 %1427 }
 0xc8f   :  { %v1430_v38 = vmul.f32 %v2552_v36, %v1428_v37 }
 0xc91   :  { %1432 = vrot.lane.b32.xlu0 %v1430_v38, %s2614_s14 }
 0xc92   :  { %v1423_v42 = vpop.permute.xlu0 %1422 }
 0xc93   :  { %v1425_v43 = vmul.f32 %v2552_v36, %v1423_v42 }
 0xc98   :  { %v1491_v40 = vpop.permute.xlu1 %1490 }
 0xc99   :  { %v1493_v41 = vmul.f32 %v2554_v39, %v1491_v40 }
 0xc9b   :  { %1495 = vrot.lane.b32.xlu1 %v1493_v41, %s2614_s14 }
 0xc9c   :  { %v1486_v46 = vpop.permute.xlu1 %1485 }
 0xc9d   :  { %v1488_v48 = vmul.f32 %v2554_v39, %v1486_v46 }
 0xd03   :  { %v1433_v44 = vpop.permute.xlu0 %1432 }
 0xd04   :  { %v1435_v45 = vadd.f32 %v1433_v44, %v1425_v43 }
 0xd06   :  { %2555 = vtanh.f32 %v1435_v45 }
 0xd0d   :  { %v1496_v49 = vpop.permute.xlu1 %1495 }
 0xd0e   :  { %v1498_v50 = vadd.f32 %v1496_v49, %v1488_v48 }
 0xd10   :  { %v2556_v52 = vpop.eup %2555  ;;  %2557 = vtanh.f32 %v1498_v50 }
 0xd11   :  { %1438 = vrot.lane.b32.xlu0 %v2556_v52, %s2616_s4 }
 0xd1a   :  { %v2558_v54 = vpop.eup %2557 }
 0xd1b   :  { %1501 = vrot.lane.b32.xlu1 %v2558_v54, %s2616_s4 }
 0xd83   :  { %v1439_v55 = vpop.permute.xlu0 %1438 }
 0xd84   :  { %v2952_v56 = vmul.f32 %v2552_v36, %v1439_v55 }
 0xd86   :  { %1448 = vrot.lane.b32.xlu0 %v2952_v56, %s2614_s14 }
 0xd8a   :  { %1443 = vrot.lane.b32.xlu0 %v1435_v45, %s2617_s21 }
 0xd8d   :  { %v1502_v57 = vpop.permute.xlu1 %1501 }
 0xd8e   :  { %v2957_v59 = vmul.f32 %v2554_v39, %v1502_v57 }
 0xd90   :  { %1511 = vrot.lane.b32.xlu1 %v2957_v59, %s2614_s14 }
 0xd94   :  { %1506 = vrot.lane.b32.xlu1 %v1498_v50, %s2617_s21 }
 0xdf8   :  { %v1449_v61 = vpop.permute.xlu0 %1448 }
 0xdf9   :  { %1451 = vst.msk [vmem:[#allocation3] sm:$0x3] %vm61_vm1, %v1449_v61 }
 0xdfc   :  { %v1444_v63 = vpop.permute.xlu0 %1443 }
 0xdfd   :  { %1446 = vst.msk [vmem:[#allocation4] sm:$0x3] %vm61_vm1, %v1444_v63 }
 0xe00   :  { %v1536_v2 = vld [vmem:[#allocation3] sm:$0x3] }
 0xe01   :  { %v1538_v4 = vpack.c.bf16 %v1536_v2, %v1536_v2 }
 0xe02   :  { %v1512_v5 = vpop.permute.xlu1 %1511 }
 0xe03   :  { %2423 = vmatmul.mubr.msk.bf16.vlgmr.msra.gmra.mrb[24].mxu0 %vm445_vm3, %v1538_v4  ;;  %1514 = vst.msk [vmem:[#allocation3 + $0x2] sm:$0x3] %vm61_vm1, %v1512_v5  ;;  %v2608_v5 = vld [vmem:[%s3219_s5] sm:$0xff]  }
 0xe04   :  { %2435 = vmatpush3.bf16.msra.mxu0 %v2746_v47  ;;  %2438 = vmatprep.mubr.msk.bf16.mxu0 %vm2613_vm0, %v2611_v1  ;;  %v2977_v47 = vld [vmem:[%s3219_s5 + $0x10] sm:$0xff]  }
 0xe05   :  { %2436 = vmatprep.subr.bf16.mxu0 %v2611_v1 }
 0xe06   :  { %v1507_v7 = vpop.permute.xlu1 %1506 }
 0xe07   :  { %1509 = vst.msk [vmem:[#allocation4 + $0x2] sm:$0x3] %vm61_vm1, %v1507_v7 }
 0xe08   :  { %2437 = vmatpush3.bf16.msra.mxu0 %v2760_v53 }
 0xe09   :  { %2450 = vmatprep.subr.bf16.mxu0 %v2611_v1 }
 0xe0a   :  { %v1537_v9 = vld [vmem:[#allocation3 + $0x2] sm:$0x3] }
 0xe0b   :  { %v1539_v11 = vpack.c.bf16 %v1537_v9, %v1537_v9  ;;  %v2609_v9 = vld [vmem:[%s3219_s5 + $0x8] sm:$0xff]  }
 0xe0d   :  { %2431 = vmatmul.mubr.msk.bf16.vlgmr.msra.gmra.mrb[24].mxu1 %vm445_vm3, %v1539_v11 }
 0xe0e   :  { %2443 = vmatpush3.bf16.msra.mxu1 %v2977_v47  ;;  %2446 = vmatprep.mubr.msk.bf16.mxu1 %vm2613_vm0, %v2611_v1  ;;  %v1699_v26 = vld [vmem:[#allocation4 + $0x2] sm:$0x3] }
 0xe0f   :  { %2444 = vmatprep.subr.bf16.mxu1 %v2611_v1 }
 0xe12   :  { %2445 = vmatpush3.bf16.msra.mxu1 %v2771_v58  ;;  %v1636_v58 = vld [vmem:[#allocation4] sm:$0x3] }
 0xe13   :  { %2458 = vmatprep.subr.bf16.mxu1 %v2611_v1 }
 0xed6   :  { %v1577_v53 = vpop.f32.mrb[24].mxu0 }
 0xed7   :  { %v1628_v13 = vadd.f32 %v1627_v12, %v1577_v53  ;;  %v2424_v14 = vpop.f32.mrb[25].mxu0  ;;  %v2610_v12 = vld [vmem:[%s3219_s5 + $0x18] sm:$0xff]  }
 0xed8   :  { %v1580_v15 = vpop.f32.mrb[26].mxu0  ;;  %v1843_v14 = vld [vmem:[#allocation2 + $0xc] sm:$0x3] }
 0xed9   :  { %2559 = vtanh.f32 %v1628_v13  ;;  %v2425_v17 = vpop.f32.mrb[27].mxu0  ;;  %v2259_v27 = vmul.f32 -1.442695, %v1628_v13 }
 0xee0   :  { %v1620_v20 = vpop.f32.mrb[24].mxu1 }
 0xee1   :  { %v1691_v21 = vadd.f32 %v1690_v6, %v1620_v20  ;;  %v2432_v22 = vpop.f32.mrb[25].mxu1 }
 0xee2   :  { %v1623_v51 = vpop.f32.mrb[26].mxu1  ;;  %v1906_v22 = vld [vmem:[#allocation2 + $0x12] sm:$0x3] }
 0xee3   :  { %v2560_v23 = vpop.eup %2559  ;;  %2561 = vtanh.f32 %v1691_v21  ;;  %v2433_v24 = vpop.f32.mrb[27].mxu1  ;;  %v2261_v28 = vmul.f32 -1.442695, %v1691_v21 }
 0xee4   :  { %1643 = vrot.lane.b32.xlu0 %v2560_v23, %s2616_s4  ;;  %2563 = vpow2.f32 %v2259_v27 }
 0xee5   :  { %2565 = vpow2.f32 %v2261_v28 }
 0xee8   :  { %1638 = vrot.lane.b32.xlu0 %v1636_v58, %s2614_s14 }
 0xeed   :  { %v2562_v25 = vpop.eup %2561 }
 0xeee   :  { %1706 = vrot.lane.b32.xlu1 %v2562_v25, %s2616_s4  ;;  %v2564_v29 = vpop.eup %2563 }
 0xeef   :  { %v1632_v30 = vadd.f32 1.0, %v2564_v29  ;;  %v2566_v31 = vpop.eup %2565 }
 0xef0   :  { %v1695_v32 = vadd.f32 1.0, %v2566_v31 }
 0xef1   :  { %2567 = vrcp.f32 %v1632_v30 }
 0xef2   :  { %1701 = vrot.lane.b32.xlu1 %v1699_v26, %s2614_s14  ;;  %2569 = vrcp.f32 %v1695_v32 }
 0xefb   :  { %v2568_v33 = vpop.eup %2567 }
 0xefc   :  { %v2570_v36 = vpop.eup %2569 }
 0xf56   :  { %v1644_v34 = vpop.permute.xlu0 %1643 }
 0xf57   :  { %v1646_v35 = vmul.f32 %v2568_v33, %v1644_v34 }
 0xf59   :  { %1648 = vrot.lane.b32.xlu0 %v1646_v35, %s2614_s14 }
 0xf5a   :  { %v1639_v39 = vpop.permute.xlu0 %1638 }
 0xf5b   :  { %v1641_v40 = vmul.f32 %v2568_v33, %v1639_v39 }
 0xf60   :  { %v1707_v37 = vpop.permute.xlu1 %1706 }
 0xf61   :  { %v1709_v38 = vmul.f32 %v2570_v36, %v1707_v37 }
 0xf63   :  { %1711 = vrot.lane.b32.xlu1 %v1709_v38, %s2614_s14 }
 0xf64   :  { %v1702_v43 = vpop.permute.xlu1 %1701 }
 0xf65   :  { %v1704_v44 = vmul.f32 %v2570_v36, %v1702_v43 }
 0xfcb   :  { %v1649_v41 = vpop.permute.xlu0 %1648 }
 0xfcc   :  { %v1651_v42 = vadd.f32 %v1649_v41, %v1641_v40 }
 0xfce   :  { %2571 = vtanh.f32 %v1651_v42 }
 0xfd5   :  { %v1712_v45 = vpop.permute.xlu1 %1711 }
 0xfd6   :  { %v1714_v46 = vadd.f32 %v1712_v45, %v1704_v44 }
 0xfd8   :  { %v2572_v48 = vpop.eup %2571  ;;  %2573 = vtanh.f32 %v1714_v46 }
 0xfd9   :  { %1654 = vrot.lane.b32.xlu0 %v2572_v48, %s2616_s4 }
 0xfe2   :  { %v2574_v49 = vpop.eup %2573 }
 0xfe3   :  { %1717 = vrot.lane.b32.xlu1 %v2574_v49, %s2616_s4 }
0x104b   :  { %v1655_v50 = vpop.permute.xlu0 %1654 }
0x104c   :  { %v2993_v52 = vmul.f32 %v2568_v33, %v1655_v50 }
0x104e   :  { %1664 = vrot.lane.b32.xlu0 %v2993_v52, %s2614_s14 }
0x1052   :  { %1659 = vrot.lane.b32.xlu0 %v1651_v42, %s2617_s21 }
0x1055   :  { %v1718_v54 = vpop.permute.xlu1 %1717 }
0x1056   :  { %v2998_v55 = vmul.f32 %v2570_v36, %v1718_v54 }
0x1058   :  { %1727 = vrot.lane.b32.xlu1 %v2998_v55, %s2614_s14 }
0x105c   :  { %1722 = vrot.lane.b32.xlu1 %v1714_v46, %s2617_s21 }
0x10c0   :  { %v1665_v57 = vpop.permute.xlu0 %1664 }
0x10c1   :  { %1667 = vst.msk [vmem:[#allocation3] sm:$0x3] %vm61_vm1, %v1665_v57 }
0x10c4   :  { %v1660_v61 = vpop.permute.xlu0 %1659 }
0x10c5   :  { %1662 = vst.msk [vmem:[#allocation4] sm:$0x3] %vm61_vm1, %v1660_v61 }
0x10c8   :  { %v1752_v63 = vld [vmem:[#allocation3] sm:$0x3] }
0x10c9   :  { %v1754_v2 = vpack.c.bf16 %v1752_v63, %v1752_v63 }
0x10ca   :  { %v1728_v4 = vpop.permute.xlu1 %1727 }
0x10cb   :  { %2439 = vmatmul.mubr.msk.bf16.vlgmr.msra.gmra.mrb[28].mxu0 %vm445_vm3, %v1754_v2  ;;  %1730 = vst.msk [vmem:[#allocation3 + $0x2] sm:$0x3] %vm61_vm1, %v1728_v4 }
0x10cc   :  { %2451 = vmatpush3.bf16.msra.mxu0 %v2608_v5  ;;  %2454 = vmatprep.mubr.msk.bf16.mxu0 %vm2613_vm0, %v2611_v1  ;;  %v1852_v58 = vld [vmem:[#allocation4] sm:$0x3] }
0x10cd   :  { %2452 = vmatprep.subr.bf16.mxu0 %v2611_v1 }
0x10ce   :  { %v1723_v7 = vpop.permute.xlu1 %1722 }
0x10cf   :  { %1725 = vst.msk [vmem:[#allocation4 + $0x2] sm:$0x3] %vm61_vm1, %v1723_v7 }
0x10d0   :  { %2453 = vmatpush3.bf16.msra.mxu0 %v2609_v9 }
0x10d2   :  { %v1753_v11 = vld [vmem:[#allocation3 + $0x2] sm:$0x3] }
0x10d3   :  { %v1755_v53 = vpack.c.bf16 %v1753_v11, %v1753_v11 }
0x10d5   :  { %2447 = vmatmul.mubr.msk.bf16.vlgmr.msra.gmra.mrb[28].mxu1 %vm445_vm3, %v1755_v53 }
0x10d6   :  { %2459 = vmatpush3.bf16.msra.mxu1 %v2977_v47  ;;  %2462 = vmatprep.mubr.msk.bf16.mxu1 %vm2613_vm0, %v2611_v1  ;;  %v1915_v26 = vld [vmem:[#allocation4 + $0x2] sm:$0x3] }
0x10d7   :  { %2460 = vmatprep.subr.bf16.mxu1 %v2611_v1 }
0x10da   :  { %2461 = vmatpush3.bf16.msra.mxu1 %v2610_v12 }
0x119e   :  { %v1793_v13 = vpop.f32.mrb[28].mxu0 }
0x119f   :  { %v1844_v15 = vadd.f32 %v1843_v14, %v1793_v13  ;;  %v2440_v17 = vpop.f32.mrb[29].mxu0  ;;  %v2059_v13 = vld [vmem:[#allocation2 + $0xe] sm:$0x3] }
0x11a0   :  { %v1796_v20 = vpop.f32.mrb[30].mxu0 }
0x11a1   :  { %2575 = vtanh.f32 %v1844_v15  ;;  %v2441_v6 = vpop.f32.mrb[31].mxu0  ;;  %v2265_v27 = vmul.f32 -1.442695, %v1844_v15 }
0x11a8   :  { %v1836_v21 = vpop.f32.mrb[28].mxu1 }
0x11a9   :  { %v1907_v47 = vadd.f32 %v1906_v22, %v1836_v21  ;;  %v2448_v23 = vpop.f32.mrb[29].mxu1  ;;  %v2121_v21 = vld [vmem:[#allocation2 + $0x10] sm:$0x3] }
0x11aa   :  { %v1839_v24 = vpop.f32.mrb[30].mxu1 }
0x11ab   :  { %v2576_v51 = vpop.eup %2575  ;;  %2577 = vtanh.f32 %v1907_v47  ;;  %v2449_v1 = vpop.f32.mrb[31].mxu1  ;;  %v2267_v28 = vmul.f32 -1.442695, %v1907_v47 }
0x11ac   :  { %1859 = vrot.lane.b32.xlu0 %v2576_v51, %s2616_s4  ;;  %2579 = vpow2.f32 %v2265_v27 }
0x11ad   :  { %2581 = vpow2.f32 %v2267_v28 }
0x11b0   :  { %1854 = vrot.lane.b32.xlu0 %v1852_v58, %s2614_s14 }
0x11b5   :  { %v2578_v25 = vpop.eup %2577 }
0x11b6   :  { %1922 = vrot.lane.b32.xlu1 %v2578_v25, %s2616_s4  ;;  %v2580_v29 = vpop.eup %2579 }
0x11b7   :  { %v1848_v30 = vadd.f32 1.0, %v2580_v29  ;;  %v2582_v31 = vpop.eup %2581 }
0x11b8   :  { %v1911_v32 = vadd.f32 1.0, %v2582_v31 }
0x11b9   :  { %2583 = vrcp.f32 %v1848_v30 }
0x11ba   :  { %1917 = vrot.lane.b32.xlu1 %v1915_v26, %s2614_s14  ;;  %2585 = vrcp.f32 %v1911_v32 }
0x11c3   :  { %v2584_v33 = vpop.eup %2583 }
0x11c4   :  { %v2586_v36 = vpop.eup %2585 }
0x121e   :  { %v1860_v34 = vpop.permute.xlu0 %1859 }
0x121f   :  { %v1862_v35 = vmul.f32 %v2584_v33, %v1860_v34 }
0x1221   :  { %1864 = vrot.lane.b32.xlu0 %v1862_v35, %s2614_s14 }
0x1222   :  { %v1855_v39 = vpop.permute.xlu0 %1854 }
0x1223   :  { %v1857_v40 = vmul.f32 %v2584_v33, %v1855_v39 }
0x1228   :  { %v1923_v37 = vpop.permute.xlu1 %1922 }
0x1229   :  { %v1925_v38 = vmul.f32 %v2586_v36, %v1923_v37 }
0x122b   :  { %1927 = vrot.lane.b32.xlu1 %v1925_v38, %s2614_s14 }
0x122c   :  { %v1918_v43 = vpop.permute.xlu1 %1917 }
0x122d   :  { %v1920_v44 = vmul.f32 %v2586_v36, %v1918_v43  ;;  %v586_v43 = vpack.c.bf16 %v2808_v16, %v2808_v16 }
0x1293   :  { %v1865_v41 = vpop.permute.xlu0 %1864 }
0x1294   :  { %v1867_v42 = vadd.f32 %v1865_v41, %v1857_v40 }
0x1296   :  { %2587 = vtanh.f32 %v1867_v42 }
0x129d   :  { %v1928_v45 = vpop.permute.xlu1 %1927 }
0x129e   :  { %v1930_v46 = vadd.f32 %v1928_v45, %v1920_v44 }
0x12a0   :  { %v2588_v48 = vpop.eup %2587  ;;  %2589 = vtanh.f32 %v1930_v46 }
0x12a1   :  { %1870 = vrot.lane.b32.xlu0 %v2588_v48, %s2616_s4  ;;  %v804_v48 = vpack.c.bf16 %v2844_v8, %v2844_v8  ;;  %v1236_v8 = vpack.c.bf16 %v2916_v60, %v2916_v60 }
0x12aa   :  { %v2590_v49 = vpop.eup %2589 }
0x12ab   :  { %1933 = vrot.lane.b32.xlu1 %v2590_v49, %s2616_s4 }
0x1313   :  { %v1871_v50 = vpop.permute.xlu0 %1870 }
0x1314   :  { %v3033_v54 = vmul.f32 %v2584_v33, %v1871_v50 }
0x1316   :  { %1880 = vrot.lane.b32.xlu0 %v3033_v54, %s2614_s14 }
0x131a   :  { %1875 = vrot.lane.b32.xlu0 %v1867_v42, %s2617_s21 }
0x131d   :  { %v1934_v57 = vpop.permute.xlu1 %1933 }
0x131e   :  { %v3038_v61 = vmul.f32 %v2586_v36, %v1934_v57  ;;  %v812_v57 = vrot.slane %v804_v48, %v2698_v19 }
0x1320   :  { %1943 = vrot.lane.b32.xlu1 %v3038_v61, %s2614_s14 }
0x1324   :  { %1938 = vrot.lane.b32.xlu1 %v1930_v46, %s2617_s21  ;;  %v594_v46 = vrot.slane %v586_v43, %v2698_v19 }
0x1326   :  { %v601_v16 = vrot.slane %v594_v46, %v2698_v19 }
0x1388   :  { %v1881_v63 = vpop.permute.xlu0 %1880 }
0x1389   :  { %1883 = vst.msk [vmem:[#allocation3] sm:$0x3] %vm61_vm1, %v1881_v63  ;;  %v1020_v63 = vpack.c.bf16 %v2880_v0, %v2880_v0  ;;  %v867_v0 = vpack.c.bf16 %v2849_v10, %v2849_v10 }
0x138b   :  { %v875_v60 = vrot.slane %v867_v0, %v2698_v19 }
0x138c   :  { %v1876_v2 = vpop.permute.xlu0 %1875 }
0x138d   :  { %1878 = vst.msk [vmem:[#allocation4] sm:$0x3] %vm61_vm1, %v1876_v2  ;;  %v651_v2 = vpack.c.bf16 %v2813_v18, %v2813_v18  ;;  %v1452_v18 = vpack.c.bf16 %v2952_v56, %v2952_v56  ;;  %v1668_v56 = vpack.c.bf16 %v2993_v52, %v2993_v52 }
0x1390   :  { %v1968_v4 = vld [vmem:[#allocation3] sm:$0x3] }
0x1391   :  { %v1970_v5 = vpack.c.bf16 %v1968_v4, %v1968_v4  ;;  %v1028_v4 = vrot.slane %v1020_v63, %v2698_v19 }
0x1392   :  { %v1944_v7 = vpop.permute.xlu1 %1943 }
0x1393   :  { %2455 = vmatmul.mubr.msk.bf16.vlgmr.msra.gmra.mrb[32].mxu0 %vm445_vm3, %v1970_v5  ;;  %1946 = vst.msk [vmem:[#allocation3 + $0x2] sm:$0x3] %vm61_vm1, %v1944_v7  ;;  %v819_v5 = vrot.slane %v812_v57, %v2698_v19  ;;  %v659_v7 = vrot.slane %v651_v2, %v2698_v19 }
0x1394   :  { %v2068_v1 = vld [vmem:[#allocation4] sm:$0x3] }
0x1396   :  { %v1939_v9 = vpop.permute.xlu1 %1938 }
0x1397   :  { %1941 = vst.msk [vmem:[#allocation4 + $0x2] sm:$0x3] %vm61_vm1, %v1939_v9 }
0x139a   :  { %v1969_v11 = vld [vmem:[#allocation3 + $0x2] sm:$0x3] }
0x139b   :  { %v1971_v53 = vpack.c.bf16 %v1969_v11, %v1969_v11  ;;  %v1244_v11 = vrot.slane %v1236_v8, %v2698_v19 }
0x139d   :  { %2463 = vmatmul.mubr.msk.bf16.vlgmr.msra.gmra.mrb[32].mxu1 %vm445_vm3, %v1971_v53  ;;  %v1035_v53 = vrot.slane %v1028_v4, %v2698_v19  ;;  %v1251_v10 = vrot.slane %v1244_v11, %v2698_v19 }
0x139e   :  { %v2130_v25 = vld [vmem:[#allocation4 + $0x2] sm:$0x3] }
0x1466   :  { %v2009_v12 = vpop.f32.mrb[32].mxu0 }
0x1467   :  { %v2060_v14 = vadd.f32 %v2059_v13, %v2009_v12  ;;  %v2456_v15 = vpop.f32.mrb[33].mxu0  ;;  %v1083_v12 = vpack.c.bf16 %v2885_v3, %v2885_v3  ;;  %v666_v13 = vrot.slane %v659_v7, %v2698_v19  ;;  %v882_v3 = vrot.slane %v875_v60, %v2698_v19 }
0x1468   :  { %v2012_v17 = vpop.f32.mrb[34].mxu0 }
0x1469   :  { %2591 = vtanh.f32 %v2060_v14  ;;  %v2457_v20 = vpop.f32.mrb[35].mxu0  ;;  %v2271_v26 = vmul.f32 -1.442695, %v2060_v14  ;;  %v1460_v14 = vrot.slane %v1452_v18, %v2698_v19  ;;  %v1091_v15 = vrot.slane %v1083_v12, %v2698_v19 }
0x146a   :  { %v1299_v17 = vpack.c.bf16 %v2921_v62, %v2921_v62 }
0x146b   :  { %v1467_v20 = vrot.slane %v1460_v14, %v2698_v19  ;;  %v1098_v62 = vrot.slane %v1091_v15, %v2698_v19 }
0x146c   :  { %v1307_v52 = vrot.slane %v1299_v17, %v2698_v19 }
0x1470   :  { %v2052_v6 = vpop.f32.mrb[32].mxu1 }
0x1471   :  { %v2122_v22 = vadd.f32 %v2121_v21, %v2052_v6  ;;  %v2464_v47 = vpop.f32.mrb[33].mxu1  ;;  %v1676_v6 = vrot.slane %v1668_v56, %v2698_v19  ;;  %v1884_v21 = vpack.c.bf16 %v3033_v54, %v3033_v54  ;;  %v1314_v54 = vrot.slane %v1307_v52, %v2698_v19 }
0x1472   :  { %v2055_v51 = vpop.f32.mrb[34].mxu1 }
0x1473   :  { %v2592_v23 = vpop.eup %2591  ;;  %2593 = vtanh.f32 %v2122_v22  ;;  %v2465_v24 = vpop.f32.mrb[35].mxu1  ;;  %v2273_v27 = vmul.f32 -1.442695, %v2122_v22  ;;  %v1515_v22 = vpack.c.bf16 %v2957_v59, %v2957_v59  ;;  %v1683_v47 = vrot.slane %v1676_v6, %v2698_v19 }
0x1474   :  { %2075 = vrot.lane.b32.xlu0 %v2592_v23, %s2616_s4  ;;  %2595 = vpow2.f32 %v2271_v26  ;;  %v1892_v23 = vrot.slane %v1884_v21, %v2698_v19  ;;  %v1731_v24 = vpack.c.bf16 %v2998_v55, %v2998_v55 }
0x1475   :  { %2597 = vpow2.f32 %v2273_v27  ;;  %v1523_v51 = vrot.slane %v1515_v22, %v2698_v19 }
0x1477   :  { %v1530_v59 = vrot.slane %v1523_v51, %v2698_v19 }
0x1478   :  { %2070 = vrot.lane.b32.xlu0 %v2068_v1, %s2614_s14  ;;  %v1899_v1 = vrot.slane %v1892_v23, %v2698_v19 }
0x147d   :  { %v2594_v58 = vpop.eup %2593 }
0x147e   :  { %2137 = vrot.lane.b32.xlu1 %v2594_v58, %s2616_s4  ;;  %v2596_v28 = vpop.eup %2595  ;;  %v1739_v58 = vrot.slane %v1731_v24, %v2698_v19 }
0x147f   :  { %v2064_v29 = vadd.f32 1.0, %v2596_v28  ;;  %v2598_v30 = vpop.eup %2597 }
0x1480   :  { %v2126_v31 = vadd.f32 1.0, %v2598_v30  ;;  %v1746_v26 = vrot.slane %v1739_v58, %v2698_v19 }
0x1481   :  { %2599 = vrcp.f32 %v2064_v29 }
0x1482   :  { %2132 = vrot.lane.b32.xlu1 %v2130_v25, %s2614_s14  ;;  %2601 = vrcp.f32 %v2126_v31  ;;  %v1947_v25 = vpack.c.bf16 %v3038_v61, %v3038_v61 }
0x1484   :  { %v1955_v55 = vrot.slane %v1947_v25, %v2698_v19 }
0x1486   :  { %v1962_v27 = vrot.slane %v1955_v55, %v2698_v19 }
0x148b   :  { %v3053_v32 = vpop.eup %2599 }
0x148c   :  { %v3057_v35 = vpop.eup %2601 }
0x14e6   :  { %v2076_v33 = vpop.permute.xlu0 %2075 }
0x14e7   :  { %v2078_v34 = vmul.f32 %v3053_v32, %v2076_v33 }
0x14e9   :  { %2080 = vrot.lane.b32.xlu0 %v2078_v34, %s2614_s14 }
0x14ea   :  { %v2071_v38 = vpop.permute.xlu0 %2070 }
0x14eb   :  { %v2073_v39 = vmul.f32 %v3053_v32, %v2071_v38 }
0x14f0   :  { %v2138_v36 = vpop.permute.xlu1 %2137 }
0x14f1   :  { %v2140_v37 = vmul.f32 %v3057_v35, %v2138_v36 }
0x14f3   :  { %2142 = vrot.lane.b32.xlu1 %v2140_v37, %s2614_s14 }
0x14f4   :  { %v2133_v42 = vpop.permute.xlu1 %2132 }
0x14f5   :  { %v2135_v44 = vmul.f32 %v3057_v35, %v2133_v42 }
0x155b   :  { %v2081_v40 = vpop.permute.xlu0 %2080 }
0x155c   :  { %v2083_v41 = vadd.f32 %v2081_v40, %v2073_v39 }
0x155e   :  { %2603 = vtanh.f32 %v2083_v41 }
0x1565   :  { %v2143_v45 = vpop.permute.xlu1 %2142 }
0x1566   :  { %v2145_v49 = vadd.f32 %v2143_v45, %v2135_v44 }
0x1568   :  { %v2604_v50 = vpop.eup %2603  ;;  %2605 = vtanh.f32 %v2145_v49 }
0x1569   :  { %2086 = vrot.lane.b32.xlu0 %v2604_v50, %s2616_s4 }
0x156d   :  { %602 = vrot.lane.b32.xlu0 %v601_v16, %s2614_s14 }
0x1571   :  { %820 = vrot.lane.b32.xlu0 %v819_v5, %s2614_s14 }
0x1572   :  { %v2606_v9 = vpop.eup %2605 }
0x1573   :  { %2148 = vrot.lane.b32.xlu1 %v2606_v9, %s2616_s4 }
0x1575   :  { %1036 = vrot.lane.b32.xlu0 %v1035_v53, %s2614_s14 }
0x1577   :  { %667 = vrot.lane.b32.xlu1 %v666_v13, %s2614_s14 }
0x1579   :  { %1252 = vrot.lane.b32.xlu0 %v1251_v10, %s2614_s14 }
0x157b   :  { %883 = vrot.lane.b32.xlu1 %v882_v3, %s2614_s14 }
0x157d   :  { %1468 = vrot.lane.b32.xlu0 %v1467_v20, %s2614_s14 }
0x157f   :  { %1099 = vrot.lane.b32.xlu1 %v1098_v62, %s2614_s14 }
0x1581   :  { %1684 = vrot.lane.b32.xlu0 %v1683_v47, %s2614_s14 }
0x1583   :  { %1315 = vrot.lane.b32.xlu1 %v1314_v54, %s2614_s14 }
0x1585   :  { %1900 = vrot.lane.b32.xlu0 %v1899_v1, %s2614_s14 }
0x1587   :  { %1531 = vrot.lane.b32.xlu1 %v1530_v59, %s2614_s14 }
0x1589   :  { %2091 = vrot.lane.b32.xlu0 %v2083_v41, %s2617_s21 }
0x158b   :  { %1747 = vrot.lane.b32.xlu1 %v1746_v26, %s2614_s14 }
0x158f   :  { %1963 = vrot.lane.b32.xlu1 %v1962_v27, %s2614_s14 }
0x1593   :  { %2153 = vrot.lane.b32.xlu1 %v2145_v49, %s2617_s21 }
0x15db   :  { %v2087_v28 = vpop.permute.xlu0 %2086 }
0x15dc   :  { %v2089_v29 = vmul.f32 %v3053_v32, %v2087_v28 }
0x15de   :  { %v2100_v61 = vpack.c.bf16 %v2089_v29, %v2089_v29  ;;  %2096 = vrot.lane.b32.xlu1 %v2089_v29, %s2614_s14 }
0x15df   :  { %v603_v30 = vpop.permute.xlu0 %602 }
0x15e0   :  { %v2108_v31 = vrot.slane %v2100_v61, %v2698_v19  ;;  %606 = vst.msk [vmem:[%s3221_s6] sm:$0x1] %vm605_vm4, %v603_v30 }
0x15e2   :  { %v2115_v33 = vrot.slane %v2108_v31, %v2698_v19 }
0x15e3   :  { %v821_v34 = vpop.permute.xlu0 %820 }
0x15e4   :  { %2236 = vst.msk [vmem:[%s3221_s6 + $0x1] sm:$0x1] %vm605_vm4, %v821_v34  ;;  %2116 = vrot.lane.b32.xlu0 %v2115_v33, %s2614_s14 }
0x15e5   :  { %v2149_v32 = vpop.permute.xlu1 %2148 }
0x15e6   :  { %v2151_v36 = vmul.f32 %v3057_v35, %v2149_v32 }
0x15e7   :  { %v1037_v37 = vpop.permute.xlu0 %1036 }
0x15e8   :  { %2242 = vst.msk [vmem:[%s3221_s6 + $0x2] sm:$0x1] %vm605_vm4, %v1037_v37  ;;  %v2162_v38 = vpack.c.bf16 %v2151_v36, %v2151_v36  ;;  %2158 = vrot.lane.b32.xlu0 %v2151_v36, %s2614_s14 }
0x15e9   :  { %v668_v39 = vpop.permute.xlu1 %667 }
0x15ea   :  { %v2170_v40 = vrot.slane %v2162_v38, %v2698_v19  ;;  %2232 = vst.msk [vmem:[%s3222_s7 + $0x7] sm:$0x1] %vm605_vm4, %v668_v39 }
0x15eb   :  { %v1253_v41 = vpop.permute.xlu0 %1252 }
0x15ec   :  { %2248 = vst.msk [vmem:[%s3221_s6 + $0x3] sm:$0x1] %vm605_vm4, %v1253_v41  ;;  %v2177_v35 = vrot.slane %v2170_v40, %v2698_v19 }
0x15ed   :  { %v884_v42 = vpop.permute.xlu1 %883 }
0x15ee   :  { %2238 = vst.msk [vmem:[%s3222_s7 + $0x6] sm:$0x1] %vm605_vm4, %v884_v42  ;;  %2178 = vrot.lane.b32.xlu1 %v2177_v35, %s2614_s14 }
0x15ef   :  { %v1469_v43 = vpop.permute.xlu0 %1468 }
0x15f0   :  { %2254 = vst.msk [vmem:[%s3221_s6 + $0x4] sm:$0x1] %vm605_vm4, %v1469_v43 }
0x15f1   :  { %v1100_v44 = vpop.permute.xlu1 %1099 }
0x15f2   :  { %2244 = vst.msk [vmem:[%s3222_s7 + $0x5] sm:$0x1] %vm605_vm4, %v1100_v44 }
0x15f3   :  { %v1685_v19 = vpop.permute.xlu0 %1684 }
0x15f4   :  { %2260 = vst.msk [vmem:[%s3221_s6 + $0x5] sm:$0x1] %vm605_vm4, %v1685_v19 }
0x15f5   :  { %v1316_v45 = vpop.permute.xlu1 %1315 }
0x15f6   :  { %2250 = vst.msk [vmem:[%s3222_s7 + $0x4] sm:$0x1] %vm605_vm4, %v1316_v45 }
0x15f7   :  { %v1901_v46 = vpop.permute.xlu0 %1900 }
0x15f8   :  { %2266 = vst.msk [vmem:[%s3221_s6 + $0x6] sm:$0x1] %vm605_vm4, %v1901_v46 }
0x15f9   :  { %v1532_v48 = vpop.permute.xlu1 %1531 }
0x15fa   :  { %2256 = vst.msk [vmem:[%s3222_s7 + $0x3] sm:$0x1] %vm605_vm4, %v1532_v48 }
0x15fb   :  { %v2092_v49 = vpop.permute.xlu0 %2091 }
0x15fc   :  { %2094 = vst.msk [vmem:[#allocation4] sm:$0x3] %vm61_vm1, %v2092_v49 }
0x15fd   :  { %v1748_v50 = vpop.permute.xlu1 %1747 }
0x15fe   :  { %2262 = vst.msk [vmem:[%s3222_s7 + $0x2] sm:$0x1] %vm605_vm4, %v1748_v50 }
0x1601   :  { %v1964_v57 = vpop.permute.xlu1 %1963 }
0x1602   :  { %2268 = vst.msk [vmem:[%s3222_s7 + $0x1] sm:$0x1] %vm605_vm4, %v1964_v57 }
0x1605   :  { %v2154_v63 = vpop.permute.xlu1 %2153 }
0x1606   :  { %2156 = vst.msk [vmem:[#allocation4 + $0x2] sm:$0x3] %vm61_vm1, %v2154_v63 }
0x1650   :  { %v2097_v16 = vpop.permute.xlu1 %2096 }
0x1651   :  { %2099 = vst.msk [vmem:[#allocation3] sm:$0x3] %vm61_vm1, %v2097_v16 }
0x1656   :  { %v2117_v2 = vpop.permute.xlu0 %2116 }
0x1657   :  { %2272 = vst.msk [vmem:[%s3221_s6 + $0x7] sm:$0x1] %vm605_vm4, %v2117_v2 }
0x165a   :  { %v2159_v4 = vpop.permute.xlu0 %2158 }
0x165b   :  { %2161 = vst.msk [vmem:[#allocation3 + $0x2] sm:$0x3] %vm61_vm1, %v2159_v4 }
0x1660   :  { %v2179_v8 = vpop.permute.xlu1 %2178 }
0x1661   :  { %2181 = vst.msk [vmem:[%s3222_s7] sm:$0x1] %vm605_vm4, %v2179_v8 }

// kernel: lstm_model_forward.4
= control target key start
LH: loop header
LB: loop body
LE: loop exit
PB: predicated region body
PF: predicated region fallthrough
CT: control target
= control target key end

     0   :  { %v135_v0 = vlaneseq  ;;  %v3382_v1 = vmov 0.0   ;;  %v3383_v3 = vmov 1966171168   ;;  %vm3384_vm0 = vmmov 0   ;;  %s3385_s26 = smov 32   ;;  %s4397_s5 = inlined_call_operand.vmem [shape: bf16[32,128], index: 5, kind: input, shape index: {}]   ;;  %s4398_s4 = inlined_call_operand.vmem [shape: bf16[32,128], index: 4, kind: input, shape index: {}]   ;;  %s4399_s1 = inlined_call_operand.vmem [shape: bf16[8,2,32], index: 1, kind: input, shape index: {}, may-alias: {1,3}]   ;;  %s4400_s0 = inlined_call_operand.vmem [shape: bf16[8,2,32], index: 0, kind: input, shape index: {}, may-alias: {0,2}]   ;;  %s4401_s7 = inlined_call_operand.vmem [shape: bf16[32,128], index: 7, kind: input, shape index: {}]   ;;  %s4402_s6 = inlined_call_operand.vmem [shape: bf16[32,128], index: 6, kind: input, shape index: {}]   ;;  %s4403_s3 = inlined_call_operand.vmem [shape: bf16[8,2,32], index: 3, kind: input, shape index: {}, may-alias: {1,3}]   ;;  %s4404_s2 = inlined_call_operand.vmem [shape: bf16[8,2,32], index: 2, kind: input, shape index: {}, may-alias: {0,2}]   ;;  %s4405_s9 = inlined_call_operand.vmem [shape: bf16[2,32,128], index: 9, kind: input, shape index: {}]   ;;  %s4406_s8 = inlined_call_operand.vmem [shape: f32[2,1,128], index: 8, kind: input, shape index: {}]   ;;  %s4407_s10 = inlined_call_operand.vmem [shape: bf16[2,8,32], index: 10, kind: output, shape index: {0}]   ;;  %s4408_s11 = inlined_call_operand.vmem [shape: bf16[2,8,32], index: 11, kind: output, shape index: {1}]  }
   0x1   :  { %3070 = vmatprep.subr.bf16.mxu0 %v3382_v1  ;;  %3078 = vmatprep.subr.bf16.mxu1 %v3382_v1  ;;  %v3238_v2 = vld [vmem:[%s4397_s5] sm:$0xff]   ;;  %v133_v4 = vunpack.c.l.s4 %v3383_v3  ;;  %v3240_v7 = vld [vmem:[%s4397_s5 + $0x8] sm:$0xff]   ;;  %vm91_vm1 = vcmask 254976   ;;  %vm189_vm2 = vcmask 261120   ;;  %vm925_vm3 = vcmask 253952  }
   0x2   :  { %v3239_v5 = vld [vmem:[%s4398_s4] sm:$0xff]   ;;  %3074 = vmatprep.mubr.msk.bf16.mxu0 %vm3384_vm0, %v3382_v1  ;;  %3082 = vmatprep.mubr.msk.bf16.mxu1 %vm3384_vm0, %v3382_v1  ;;  %v3462_v6 = vshrl.u32 %v135_v0, 7  ;;  %v3241_v9 = vld [vmem:[%s4398_s4 + $0x8] sm:$0xff]   ;;  %92 = vst.msk [vmem:[#allocation3] sm:$0x3] %vm91_vm1, %v3382_v1  ;;  %vm1018_vm6 = vcmask 257027  }
   0x3   :  { %3071 = vmatpush3.bf16.msra.mxu0 %v3238_v2  ;;  %v134_v8 = vunpack.c.0.s8 %v133_v4  ;;  %3079 = vmatpush3.bf16.msra.mxu1 %v3239_v5  ;;  %93 = vst.msk [vmem:[#allocation3 + $0x2] sm:$0x3] %vm91_vm1, %v3382_v1  ;;  %94 = vst.msk [vmem:[#allocation4] sm:$0x3] %vm91_vm1, %v3382_v1  ;;  %v108_v10 = vld [vmem:[%s4399_s1] sm:$0x1] }
   0x4   :  { %3072 = vmatprep.subr.bf16.mxu0 %v3382_v1  ;;  %95 = vst.msk [vmem:[#allocation4 + $0x2] sm:$0x3] %vm91_vm1, %v3382_v1  ;;  %3080 = vmatprep.subr.bf16.mxu1 %v3382_v1  ;;  %v109_v11 = vld [vmem:[%s4399_s1 + $0x1] sm:$0x1]  ;;  %v110_v12 = vld [vmem:[%s4399_s1 + $0x2] sm:$0x1] }
   0x5   :  { %v3490_v13 = vsub.s32 %v134_v8, %v3462_v6  ;;  %v111_v14 = vld [vmem:[%s4399_s1 + $0x3] sm:$0x1]  ;;  %v112_v15 = vld [vmem:[%s4399_s1 + $0x4] sm:$0x1]  ;;  %v113_v16 = vld [vmem:[%s4399_s1 + $0x5] sm:$0x1]  ;;  %v128_v17 = vcombine.low %v108_v10, %v109_v11 }
   0x6   :  { %v114_v18 = vld [vmem:[%s4399_s1 + $0x6] sm:$0x1]  ;;  %v115_v19 = vld [vmem:[%s4399_s1 + $0x7] sm:$0x1]  ;;  %v129_v20 = vcombine.low %v110_v12, %v111_v14  ;;  %v130_v21 = vcombine.low %v112_v15, %v113_v16  ;;  %v96_v22 = vld [vmem:[%s4400_s0] sm:$0x1] }
   0x7   :  { %3073 = vmatpush3.bf16.msra.mxu0 %v3240_v7  ;;  %3081 = vmatpush3.bf16.msra.mxu1 %v3241_v9  ;;  %v131_v23 = vcombine.low %v114_v18, %v115_v19  ;;  %v138_v24 = vrot.slane %v128_v17, %v3490_v13  ;;  %v97_v25 = vld [vmem:[%s4400_s0 + $0x1] sm:$0x1]  ;;  %v98_v26 = vld [vmem:[%s4400_s0 + $0x2] sm:$0x1]  ;;  %v99_v27 = vld [vmem:[%s4400_s0 + $0x3] sm:$0x1] }
   0x8   :  { %3086 = vmatprep.subr.bf16.mxu0 %v3382_v1  ;;  %3094 = vmatprep.subr.bf16.mxu1 %v3382_v1  ;;  %v145_v28 = vrot.slane %v129_v20, %v3490_v13  ;;  %v152_v29 = vrot.slane %v130_v21, %v3490_v13  ;;  %v100_v30 = vld [vmem:[%s4400_s0 + $0x4] sm:$0x1]  ;;  %v101_v31 = vld [vmem:[%s4400_s0 + $0x5] sm:$0x1]  ;;  %v102_v32 = vld [vmem:[%s4400_s0 + $0x6] sm:$0x1]  ;;  %v242_v33 = vcombine.low %v96_v22, %v97_v25 }
   0x9   :  { %v243_v34 = vcombine.low %v98_v26, %v99_v27  ;;  %v159_v35 = vrot.slane %v131_v23, %v3490_v13  ;;  %v103_v36 = vld [vmem:[%s4400_s0 + $0x7] sm:$0x1]  ;;  %v244_v37 = vcombine.low %v100_v30, %v101_v31  ;;  %v420_v49 = vld [vmem:[%s4403_s3] sm:$0x1]  ;;  %v421_v50 = vld [vmem:[%s4403_s3 + $0x1] sm:$0x1] }
   0xa   :  { %v160_v38 = vcombine.low %v138_v24, %v145_v28  ;;  %v245_v39 = vcombine.low %v102_v32, %v103_v36  ;;  %v252_v40 = vrot.slane %v242_v33, %v3490_v13  ;;  %v3242_v48 = vld [vmem:[%s4401_s7] sm:$0xff]   ;;  %v440_v56 = vcombine.low %v420_v49, %v421_v50  ;;  %v3244_v0 = vld [vmem:[%s4401_s7 + $0x8] sm:$0xff]  }
   0xb   :  { %v259_v41 = vrot.slane %v243_v34, %v3490_v13  ;;  %v161_v42 = vcombine.low %v152_v29, %v159_v35  ;;  %v266_v43 = vrot.slane %v244_v37, %v3490_v13  ;;  %v422_v53 = vld [vmem:[%s4403_s3 + $0x2] sm:$0x1]  ;;  %v423_v54 = vld [vmem:[%s4403_s3 + $0x3] sm:$0x1]  ;;  %v424_v55 = vld [vmem:[%s4403_s3 + $0x4] sm:$0x1] }
   0xc   :  { %v168_v44 = vrot.slane %v160_v38, %v3490_v13  ;;  %v273_v45 = vrot.slane %v245_v39, %v3490_v13  ;;  %v3243_v58 = vld [vmem:[%s4402_s6] sm:$0xff]   ;;  %v441_v62 = vcombine.low %v422_v53, %v423_v54  ;;  %v450_v4 = vrot.slane %v440_v56, %v3490_v13  ;;  %v3245_v26 = vld [vmem:[%s4402_s6 + $0x8] sm:$0xff]  }
   0xd   :  { %v274_v46 = vcombine.low %v252_v40, %v259_v41  ;;  %v175_v47 = vrot.slane %v161_v42, %v3490_v13  ;;  %v425_v59 = vld [vmem:[%s4403_s3 + $0x5] sm:$0x1]  ;;  %v426_v60 = vld [vmem:[%s4403_s3 + $0x6] sm:$0x1]  ;;  %v427_v61 = vld [vmem:[%s4403_s3 + $0x7] sm:$0x1] }
   0xe   :  { %v275_v51 = vcombine.low %v266_v43, %v273_v45  ;;  %v442_v2 = vcombine.low %v424_v55, %v425_v59  ;;  %v443_v3 = vcombine.low %v426_v60, %v427_v61  ;;  %v408_v5 = vld [vmem:[%s4404_s2] sm:$0x1]  ;;  %v409_v7 = vld [vmem:[%s4404_s2 + $0x1] sm:$0x1]  ;;  %v410_v8 = vld [vmem:[%s4404_s2 + $0x2] sm:$0x1]  ;;  %v457_v9 = vrot.slane %v441_v62, %v3490_v13 }
   0xf   :  { %v282_v52 = vrot.slane %v274_v46, %v3490_v13  ;;  %v176_v57 = vcombine.low %v168_v44, %v175_v47  ;;  %v411_v10 = vld [vmem:[%s4404_s2 + $0x3] sm:$0x1]  ;;  %v412_v11 = vld [vmem:[%s4404_s2 + $0x4] sm:$0x1]  ;;  %v413_v12 = vld [vmem:[%s4404_s2 + $0x5] sm:$0x1]  ;;  %v553_v14 = vcombine.low %v408_v5, %v409_v7 }
  0x10   :  { %v289_v63 = vrot.slane %v275_v51, %v3490_v13  ;;  %v464_v16 = vrot.slane %v442_v2, %v3490_v13  ;;  %v471_v17 = vrot.slane %v443_v3, %v3490_v13  ;;  %v414_v18 = vld [vmem:[%s4404_s2 + $0x6] sm:$0x1]  ;;  %v415_v19 = vld [vmem:[%s4404_s2 + $0x7] sm:$0x1]  ;;  %v472_v20 = vcombine.low %v450_v4, %v457_v9  ;;  %v852_v34 = vld [vmem:[#allocation4] sm:$0x3] }
  0x11   :  { %3075 = vmatmul.mubr.msk.bf16.vlgmr.msra.gmra.mrb[0].mxu0 %vm189_vm2, %v176_v57  ;;  %v554_v21 = vcombine.low %v410_v8, %v411_v10  ;;  %v555_v22 = vcombine.low %v412_v11, %v413_v12  ;;  %v556_v23 = vcombine.low %v414_v18, %v415_v19  ;;  %v563_v25 = vrot.slane %v553_v14, %v3490_v13  ;;  %v3627_v33 = vld [vmem:[%s4405_s9] sm:$0xff]   ;;  %v3638_v40 = vld [vmem:[%s4405_s9 + $0x8] sm:$0xff]   ;;  %v3645_v42 = vld [vmem:[%s4405_s9 + $0x10] sm:$0xff]   ;;  %s3388_s3 = smov 96  }
  0x12   :  { %v290_v15 = vcombine.low %v282_v52, %v289_v63  ;;  %3087 = vmatpush3.bf16.msra.mxu0 %v3242_v48  ;;  %3090 = vmatprep.mubr.msk.bf16.mxu0 %vm3384_vm0, %v3382_v1  ;;  %v473_v24 = vcombine.low %v464_v16, %v471_v17  ;;  %v480_v27 = vrot.slane %v472_v20, %v3490_v13  ;;  %v945_v38 = vld [vmem:[#allocation4 + $0x2] sm:$0x3]  ;;  %v729_v41 = vld [vmem:[#allocation3] sm:$0x3]  ;;  %v3655_v45 = vld [vmem:[%s4405_s9 + $0x18] sm:$0xff]   ;;  %vm1469_vm9 = vcmask 254977  }
  0x13   :  { %3088 = vmatprep.subr.bf16.mxu0 %v3382_v1  ;;  %v570_v28 = vrot.slane %v554_v21, %v3490_v13  ;;  %v577_v29 = vrot.slane %v555_v22, %v3490_v13  ;;  %v584_v31 = vrot.slane %v556_v23, %v3490_v13  ;;  %854 = vrot.lane.b32.xlu1 %v852_v34, %s3385_s26  ;;  %v730_v46 = vld [vmem:[#allocation3 + $0x2] sm:$0x3]  ;;  %v3386_v48 = vmov 1983009808   ;;  %v2941_v55 = vld [vmem:[%s4406_s8] ss:$0 sm:$0xff] }
  0x14   :  { %3083 = vmatmul.mubr.msk.bf16.vlgmr.msra.gmra.mrb[0].mxu1 %vm189_vm2, %v290_v15  ;;  %v487_v30 = vrot.slane %v473_v24, %v3490_v13  ;;  %v731_v44 = vpack.c.bf16 %v729_v41, %v729_v41  ;;  %v732_v47 = vpack.c.bf16 %v730_v46, %v730_v46  ;;  %v360_v49 = vunpack.c.l.s4 %v3386_v48  ;;  %v2953_v18 = vld [vmem:[%s4406_s8 + $0x1] ss:$0 sm:$0xff]  ;;  %s3387_s8 = smov 64  }
  0x15   :  { %3095 = vmatpush3.bf16.msra.mxu1 %v3243_v58  ;;  %3098 = vmatprep.mubr.msk.bf16.mxu1 %vm3384_vm0, %v3382_v1  ;;  %v585_v32 = vcombine.low %v563_v25, %v570_v28  ;;  %v586_v36 = vcombine.low %v577_v29, %v584_v31  ;;  %vm926_vm4 = vsmask.f32 256  ;;  %vm1019_vm7 = vsmask.f32 7950 }
  0x16   :  { %3096 = vmatprep.subr.bf16.mxu1 %v3382_v1  ;;  %3089 = vmatpush3.bf16.msra.mxu0 %v3244_v0  ;;  %v488_v35 = vcombine.low %v480_v27, %v487_v30  ;;  %v361_v51 = vunpack.c.0.s8 %v360_v49  ;;  %vm4081_vm5 = vmand %vm925_vm3, %vm926_vm4  ;;  %vm1470_vm10 = vsmask.f32 1280  ;;  %vm1560_vm12 = vcmask 256002  }
  0x17   :  { %3102 = vmatprep.subr.bf16.mxu0 %v3382_v1  ;;  %v593_v37 = vrot.slane %v585_v32, %v3490_v13  ;;  %v600_v39 = vrot.slane %v586_v36, %v3490_v13  ;;  %947 = vrot.lane.b32.xlu1 %v945_v38, %s3385_s26  ;;  %vm4096_vm8 = vmand %vm1018_vm6, %vm1019_vm7  ;;  %vm1561_vm13 = vsmask.f32 7946  ;;  %vm1831_vm15 = vsmask.f32 2304 }
  0x18   :  { %v364_v58 = vsub.s32 %v361_v51, %v3462_v6  ;;  %vm4110_vm11 = vmand %vm1469_vm9, %vm1470_vm10  ;;  %vm1289_vm7 = vsmask.f32 3328  ;;  %vm1199_vm10 = vsmask.f32 7938 }
  0x19   :  { %3097 = vmatpush3.bf16.msra.mxu1 %v3245_v26  ;;  %3091 = vmatmul.mubr.msk.bf16.vlgmr.msra.gmra.mrb[4].mxu0 %vm189_vm2, %v488_v35  ;;  %v601_v43 = vcombine.low %v593_v37, %v600_v39  ;;  %vm4126_vm14 = vmand %vm1560_vm12, %vm1561_vm13 }
  0x1a   :  { %3110 = vmatprep.subr.bf16.mxu1 %v3382_v1  ;;  %3103 = vmatpush3.bf16.msra.mxu0 %v3627_v33 }
  0x1b   :  { %3106 = vmatprep.mubr.msk.bf16.mxu0 %vm3384_vm0, %v3382_v1  ;;  %3104 = vmatprep.subr.bf16.mxu0 %v3382_v1 }
  0x1c   :  { %3099 = vmatmul.mubr.msk.bf16.vlgmr.msra.gmra.mrb[4].mxu1 %vm189_vm2, %v601_v43 }
  0x1d   :  { %3111 = vmatpush3.bf16.msra.mxu1 %v3645_v42  ;;  %3114 = vmatprep.mubr.msk.bf16.mxu1 %vm3384_vm0, %v3382_v1 }
  0x1e   :  { %3105 = vmatpush3.bf16.msra.mxu0 %v3638_v40  ;;  %3112 = vmatprep.subr.bf16.mxu1 %v3382_v1 }
  0x1f   :  { %3118 = vmatprep.subr.bf16.mxu0 %v3382_v1 }
  0x21   :  { %3107 = vmatmul.mubr.msk.bf16.vlgmr.msra.gmra.mrb[8].mxu0 %vm189_vm2, %v731_v44  ;;  %3113 = vmatpush3.bf16.msra.mxu1 %v3655_v45 }
  0x22   :  { %3119 = vmatpush3.bf16.msra.mxu0 %v3627_v33  ;;  %3122 = vmatprep.mubr.msk.bf16.mxu0 %vm3384_vm0, %v3382_v1 }
  0x23   :  { %3120 = vmatprep.subr.bf16.mxu0 %v3382_v1  ;;  %3126 = vmatprep.subr.bf16.mxu1 %v3382_v1 }
  0x24   :  { %3115 = vmatmul.mubr.msk.bf16.vlgmr.msra.gmra.mrb[8].mxu1 %vm189_vm2, %v732_v47 }
  0x25   :  { %3127 = vmatpush3.bf16.msra.mxu1 %v3645_v42  ;;  %3130 = vmatprep.mubr.msk.bf16.mxu1 %vm3384_vm0, %v3382_v1 }
  0x26   :  { %3121 = vmatpush3.bf16.msra.mxu0 %v3638_v40  ;;  %3128 = vmatprep.subr.bf16.mxu1 %v3382_v1 }
  0x27   :  { %3134 = vmatprep.subr.bf16.mxu0 %v3382_v1 }
  0x29   :  { %3129 = vmatpush3.bf16.msra.mxu1 %v3655_v45 }
  0x2a   :  { %3142 = vmatprep.subr.bf16.mxu1 %v3382_v1 }
  0xe4   :  { %v227_v50 = vpop.f32.mrb[0].mxu0 }
  0xe5   :  { %v3076_v52 = vpop.f32.mrb[1].mxu0 }
  0xe6   :  { %v230_v53 = vpop.f32.mrb[2].mxu0 }
  0xe7   :  { %v340_v54 = vpop.f32.mrb[0].mxu1  ;;  %v3077_v56 = vpop.f32.mrb[3].mxu0 }
  0xe8   :  { %v341_v57 = vadd.f32 %v340_v54, %v227_v50  ;;  %v3084_v59 = vpop.f32.mrb[1].mxu1 }
  0xe9   :  { %v343_v60 = vpop.f32.mrb[2].mxu1 }
  0xea   :  { %v354_v61 = vadd.f32 %v2941_v55, %v341_v57  ;;  %v344_v62 = vadd.f32 %v343_v60, %v230_v53  ;;  %v3085_v63 = vpop.f32.mrb[3].mxu1 }
  0xec   :  { %v358_v0 = vcombine.high %v354_v61, %v354_v61  ;;  %v365_v2 = vrot.slane %v354_v61, %v364_v58  ;;  %2942 = vst.sshfl [vmem:[#allocation2] sm:$0x3 pattern:$0x76325410] %v354_v61  ;;  %v355_v3 = vadd.f32 %v2941_v55, %v344_v62  ;;  %v538_v4 = vpop.f32.mrb[4].mxu0 }
  0xed   :  { %v3092_v10 = vpop.f32.mrb[5].mxu0 }
  0xee   :  { %v372_v5 = vrot.slane %v358_v0, %v364_v58  ;;  %v373_v7 = vcombine.high %v365_v2, %v365_v2  ;;  %2943 = vst.sshfl [vmem:[#allocation2 + $0x4] sm:$0x3 pattern:$0x76325410] %v358_v0  ;;  %v375_v8 = vcombine.high %v355_v3, %v355_v3  ;;  %v382_v9 = vrot.slane %v355_v3, %v364_v58  ;;  %v541_v11 = vpop.f32.mrb[6].mxu0 }
  0xef   :  { %2944 = vst.sshfl [vmem:[#allocation2 + $0x8] sm:$0x3 pattern:$0x76325410] %v355_v3  ;;  %v3093_v16 = vpop.f32.mrb[7].mxu0  ;;  %v651_v17 = vpop.f32.mrb[4].mxu1 }
  0xf0   :  { %v374_v12 = vcombine.high %v372_v5, %v372_v5  ;;  %401 = vst [vmem:[#allocation2 + $0x2] sm:$0x3] %v373_v7  ;;  %v389_v14 = vrot.slane %v375_v8, %v364_v58  ;;  %v390_v15 = vcombine.high %v382_v9, %v382_v9  ;;  %2945 = vst.sshfl [vmem:[#allocation2 + $0xc] sm:$0x3 pattern:$0x76325410] %v375_v8 }
  0xf1   :  { %v652_v20 = vadd.f32 %v651_v17, %v538_v4  ;;  %v3100_v21 = vpop.f32.mrb[5].mxu1  ;;  %v855_v4 = vpop.permute.xlu1 %854 }
  0xf2   :  { %403 = vst [vmem:[#allocation2 + $0x6] sm:$0x3] %v374_v12  ;;  %v391_v19 = vcombine.high %v389_v14, %v389_v14  ;;  %405 = vst [vmem:[#allocation2 + $0xa] sm:$0x3] %v390_v15  ;;  %v654_v22 = vpop.f32.mrb[6].mxu1 }
  0xf3   :  { %v666_v23 = vadd.f32 %v2953_v18, %v652_v20  ;;  %v655_v24 = vadd.f32 %v654_v22, %v541_v11  ;;  %v3101_v25 = vpop.f32.mrb[7].mxu1  ;;  %v843_v27 = vld [vmem:[#allocation2] sm:$0x3] }
  0xf4   :  { %407 = vst [vmem:[#allocation2 + $0xe] sm:$0x3] %v391_v19  ;;  %v782_v26 = vpop.f32.mrb[8].mxu0 }
  0xf5   :  { %v670_v28 = vcombine.high %v666_v23, %v666_v23  ;;  %v677_v29 = vrot.slane %v666_v23, %v364_v58  ;;  %2954 = vst.sshfl [vmem:[#allocation2 + $0x10] sm:$0x3 pattern:$0x76325410] %v666_v23  ;;  %v667_v30 = vadd.f32 %v2953_v18, %v655_v24  ;;  %v844_v31 = vadd.f32 %v843_v27, %v782_v26  ;;  %v3108_v32 = vpop.f32.mrb[9].mxu0  ;;  %v948_v9 = vpop.permute.xlu1 %947 }
  0xf6   :  { %v785_v34 = vpop.f32.mrb[10].mxu0 }
  0xf7   :  { %v684_v35 = vrot.slane %v670_v28, %v364_v58  ;;  %v685_v36 = vcombine.high %v677_v29, %v677_v29  ;;  %2955 = vst.sshfl [vmem:[#allocation2 + $0x14] sm:$0x3 pattern:$0x76325410] %v670_v28  ;;  %v687_v37 = vcombine.high %v667_v30, %v667_v30  ;;  %v694_v38 = vrot.slane %v667_v30, %v364_v58  ;;  %v3109_v39 = vpop.f32.mrb[11].mxu0  ;;  %v837_v41 = vpop.f32.mrb[8].mxu1 }
  0xf8   :  { %2956 = vst.sshfl [vmem:[#allocation2 + $0x18] sm:$0x3 pattern:$0x76325410] %v667_v30  ;;  %3250 = vtanh.f32 %v844_v31  ;;  %v3116_v47 = vpop.f32.mrb[9].mxu1 }
  0xf9   :  { %v686_v43 = vcombine.high %v684_v35, %v684_v35  ;;  %714 = vst [vmem:[#allocation2 + $0x12] sm:$0x3] %v685_v36  ;;  %v701_v44 = vrot.slane %v687_v37, %v364_v58  ;;  %v702_v46 = vcombine.high %v694_v38, %v694_v38  ;;  %2957 = vst.sshfl [vmem:[#allocation2 + $0x1c] sm:$0x3 pattern:$0x76325410] %v687_v37 }
  0xfa   :  { %v840_v48 = vpop.f32.mrb[10].mxu1  ;;  %v2964_v55 = vmul.f32 -1.442695, %v844_v31  ;;  %v1118_v29 = vld [vmem:[#allocation2 + $0x2] sm:$0x3] }
  0xfb   :  { %716 = vst [vmem:[#allocation2 + $0x16] sm:$0x3] %v686_v43  ;;  %v703_v49 = vcombine.high %v701_v44, %v701_v44  ;;  %718 = vst [vmem:[#allocation2 + $0x1a] sm:$0x3] %v702_v46  ;;  %v3117_v50 = vpop.f32.mrb[11].mxu1 }
  0xfd   :  { %720 = vst [vmem:[#allocation2 + $0x1e] sm:$0x3] %v703_v49 }
 0x100   :  { %v1208_v37 = vld [vmem:[#allocation2 + $0x1c] sm:$0x3] }
 0x102   :  { %v3251_v51 = vpop.eup %3250 }
 0x103   :  { %859 = vrot.lane.b32.xlu0 %v3251_v51, %s3387_s8 }
 0x104   :  { %v935_v52 = vld [vmem:[#allocation2 + $0x1e] sm:$0x3] }
 0x105   :  { %v936_v53 = vadd.f32 %v935_v52, %v837_v41 }
 0x107   :  { %3252 = vtanh.f32 %v936_v53  ;;  %v2966_v57 = vmul.f32 -1.442695, %v936_v53 }
 0x108   :  { %3254 = vpow2.f32 %v2964_v55 }
 0x109   :  { %3256 = vpow2.f32 %v2966_v57 }
 0x111   :  { %v3253_v54 = vpop.eup %3252 }
 0x112   :  { %952 = vrot.lane.b32.xlu0 %v3253_v54, %s3387_s8  ;;  %v3255_v56 = vpop.eup %3254 }
 0x113   :  { %v848_v58 = vadd.f32 1.0, %v3255_v56  ;;  %v3257_v59 = vpop.eup %3256 }
 0x114   :  { %v940_v63 = vadd.f32 1.0, %v3257_v59 }
 0x115   :  { %3258 = vrcp.f32 %v848_v58 }
 0x116   :  { %3260 = vrcp.f32 %v940_v63 }
 0x11f   :  { %v3259_v60 = vpop.eup %3258 }
 0x120   :  { %v3261_v0 = vpop.eup %3260  ;;  %v857_v5 = vmul.f32 %v3259_v60, %v855_v4 }
 0x121   :  { %v950_v11 = vmul.f32 %v3261_v0, %v948_v9 }
 0x175   :  { %v860_v61 = vpop.permute.xlu0 %859 }
 0x176   :  { %v862_v62 = vmul.f32 %v3259_v60, %v860_v61 }
 0x178   :  { %864 = vrot.lane.b32.xlu0 %v862_v62, %s3385_s26 }
 0x184   :  { %v953_v2 = vpop.permute.xlu0 %952 }
 0x185   :  { %v955_v3 = vmul.f32 %v3261_v0, %v953_v2 }
 0x187   :  { %957 = vrot.lane.b32.xlu1 %v955_v3, %s3385_s26 }
 0x1ea   :  { %v865_v7 = vpop.permute.xlu0 %864 }
 0x1eb   :  { %v867_v8 = vadd.f32 %v865_v7, %v857_v5 }
 0x1ed   :  { %3262 = vtanh.f32 %v867_v8 }
 0x1f7   :  { %v3263_v10 = vpop.eup %3262 }
 0x1f8   :  { %870 = vrot.lane.b32.xlu0 %v3263_v10, %s3387_s8 }
 0x1f9   :  { %v958_v12 = vpop.permute.xlu1 %957 }
 0x1fa   :  { %v960_v14 = vadd.f32 %v958_v12, %v950_v11 }
 0x1fc   :  { %3264 = vtanh.f32 %v960_v14 }
 0x206   :  { %v3265_v15 = vpop.eup %3264 }
 0x207   :  { %963 = vrot.lane.b32.xlu1 %v3265_v15, %s3387_s8 }
 0x26a   :  { %v871_v16 = vpop.permute.xlu0 %870 }
 0x26b   :  { %v3690_v17 = vmul.f32 %v3259_v60, %v871_v16 }
 0x26d   :  { %881 = vrot.lane.b32.xlu0 %v3690_v17, %s3385_s26 }
 0x271   :  { %875 = vrot.lane.b32.xlu0 %v867_v8, %s3388_s3 }
 0x279   :  { %v964_v18 = vpop.permute.xlu1 %963 }
 0x27a   :  { %v3695_v19 = vmul.f32 %v3261_v0, %v964_v18 }
 0x27c   :  { %973 = vrot.lane.b32.xlu1 %v3695_v19, %s3385_s26 }
 0x280   :  { %968 = vrot.lane.b32.xlu1 %v960_v14, %s3388_s3 }
 0x2df   :  { %v882_v20 = vpop.permute.xlu0 %881 }
 0x2e0   :  { %884 = vst.msk [vmem:[#allocation3] sm:$0x3] %vm91_vm1, %v882_v20 }
 0x2e3   :  { %v876_v21 = vpop.permute.xlu0 %875 }
 0x2e4   :  { %879 = vst.msk [vmem:[#allocation4] sm:$0x3] %vm91_vm1, %v876_v21 }
 0x2e7   :  { %v1027_v22 = vld [vmem:[#allocation3] sm:$0x3] }
 0x2e8   :  { %v1029_v23 = vpack.c.bf16 %v1027_v22, %v1027_v22 }
 0x2ea   :  { %3123 = vmatmul.mubr.msk.bf16.vlgmr.msra.gmra.mrb[12].mxu0 %vm189_vm2, %v1029_v23 }
 0x2eb   :  { %3135 = vmatpush3.bf16.msra.mxu0 %v3627_v33  ;;  %3138 = vmatprep.mubr.msk.bf16.mxu0 %vm3384_vm0, %v3382_v1  ;;  %v1127_v41 = vld [vmem:[#allocation4] sm:$0x3] }
 0x2ec   :  { %3136 = vmatprep.subr.bf16.mxu0 %v3382_v1 }
 0x2ee   :  { %v974_v24 = vpop.permute.xlu1 %973 }
 0x2ef   :  { %3137 = vmatpush3.bf16.msra.mxu0 %v3638_v40  ;;  %977 = vst.msk [vmem:[#allocation3 + $0x2] sm:$0x3] %vm91_vm1, %v974_v24  ;;  %v1388_v24 = vld [vmem:[#allocation2 + $0x4] sm:$0x3] }
 0x2f0   :  { %3150 = vmatprep.subr.bf16.mxu0 %v3382_v1 }
 0x2f2   :  { %v969_v25 = vpop.permute.xlu1 %968 }
 0x2f3   :  { %971 = vst.msk [vmem:[#allocation4 + $0x2] sm:$0x3] %vm91_vm1, %v969_v25 }
 0x2f6   :  { %v1028_v26 = vld [vmem:[#allocation3 + $0x2] sm:$0x3] }
 0x2f7   :  { %v1030_v27 = vpack.c.bf16 %v1028_v26, %v1028_v26 }
 0x2f9   :  { %3131 = vmatmul.mubr.msk.bf16.vlgmr.msra.gmra.mrb[12].mxu1 %vm189_vm2, %v1030_v27 }
 0x2fa   :  { %3143 = vmatpush3.bf16.msra.mxu1 %v3645_v42  ;;  %3146 = vmatprep.mubr.msk.bf16.mxu1 %vm3384_vm0, %v3382_v1  ;;  %v1217_v47 = vld [vmem:[#allocation4 + $0x2] sm:$0x3] }
 0x2fb   :  { %3144 = vmatprep.subr.bf16.mxu1 %v3382_v1 }
 0x2fe   :  { %3145 = vmatpush3.bf16.msra.mxu1 %v3655_v45 }
 0x2ff   :  { %3158 = vmatprep.subr.bf16.mxu1 %v3382_v1 }
 0x3bd   :  { %v1068_v28 = vpop.f32.mrb[12].mxu0 }
 0x3be   :  { %v1119_v30 = vadd.f32 %v1118_v29, %v1068_v28  ;;  %v3124_v31 = vpop.f32.mrb[13].mxu0 }
 0x3bf   :  { %v1071_v32 = vpop.f32.mrb[14].mxu0  ;;  %v1479_v31 = vld [vmem:[#allocation2 + $0x1a] sm:$0x3] }
 0x3c0   :  { %3266 = vtanh.f32 %v1119_v30  ;;  %v3125_v34 = vpop.f32.mrb[15].mxu0  ;;  %v2970_v48 = vmul.f32 -1.442695, %v1119_v30 }
 0x3ca   :  { %v3267_v35 = vpop.eup %3266 }
 0x3cb   :  { %1134 = vrot.lane.b32.xlu0 %v3267_v35, %s3387_s8 }
 0x3cc   :  { %v1111_v36 = vpop.f32.mrb[12].mxu1 }
 0x3cd   :  { %v1209_v38 = vadd.f32 %v1208_v37, %v1111_v36  ;;  %v3132_v39 = vpop.f32.mrb[13].mxu1 }
 0x3ce   :  { %v1114_v43 = vpop.f32.mrb[14].mxu1 }
 0x3cf   :  { %1129 = vrot.lane.b32.xlu0 %v1127_v41, %s3385_s26  ;;  %3268 = vtanh.f32 %v1209_v38  ;;  %v3133_v44 = vpop.f32.mrb[15].mxu1  ;;  %v2972_v50 = vmul.f32 -1.442695, %v1209_v38 }
 0x3d0   :  { %3270 = vpow2.f32 %v2970_v48 }
 0x3d1   :  { %3272 = vpow2.f32 %v2972_v50 }
 0x3d9   :  { %v3269_v46 = vpop.eup %3268 }
 0x3da   :  { %1224 = vrot.lane.b32.xlu1 %v3269_v46, %s3387_s8  ;;  %v3271_v49 = vpop.eup %3270 }
 0x3db   :  { %v1123_v51 = vadd.f32 1.0, %v3271_v49  ;;  %v3273_v52 = vpop.eup %3272 }
 0x3dc   :  { %v1213_v56 = vadd.f32 1.0, %v3273_v52 }
 0x3dd   :  { %3274 = vrcp.f32 %v1123_v51 }
 0x3de   :  { %1219 = vrot.lane.b32.xlu1 %v1217_v47, %s3385_s26  ;;  %3276 = vrcp.f32 %v1213_v56 }
 0x3e7   :  { %v3275_v53 = vpop.eup %3274 }
 0x3e8   :  { %v3277_v57 = vpop.eup %3276 }
 0x43d   :  { %v1135_v54 = vpop.permute.xlu0 %1134 }
 0x43e   :  { %v1137_v55 = vmul.f32 %v3275_v53, %v1135_v54 }
 0x440   :  { %1139 = vrot.lane.b32.xlu0 %v1137_v55, %s3385_s26 }
 0x441   :  { %v1130_v60 = vpop.permute.xlu0 %1129 }
 0x442   :  { %v1132_v61 = vmul.f32 %v3275_v53, %v1130_v60 }
 0x44c   :  { %v1225_v58 = vpop.permute.xlu1 %1224 }
 0x44d   :  { %v1227_v59 = vmul.f32 %v3277_v57, %v1225_v58 }
 0x44f   :  { %1229 = vrot.lane.b32.xlu1 %v1227_v59, %s3385_s26 }
 0x450   :  { %v1220_v0 = vpop.permute.xlu1 %1219 }
 0x451   :  { %v1222_v3 = vmul.f32 %v3277_v57, %v1220_v0 }
 0x4b2   :  { %v1140_v62 = vpop.permute.xlu0 %1139 }
 0x4b3   :  { %v1142_v63 = vadd.f32 %v1140_v62, %v1132_v61 }
 0x4b5   :  { %3278 = vtanh.f32 %v1142_v63 }
 0x4bf   :  { %v3279_v2 = vpop.eup %3278 }
 0x4c0   :  { %1145 = vrot.lane.b32.xlu0 %v3279_v2, %s3387_s8 }
 0x4c1   :  { %v1230_v4 = vpop.permute.xlu1 %1229 }
 0x4c2   :  { %v1232_v5 = vadd.f32 %v1230_v4, %v1222_v3 }
 0x4c4   :  { %3280 = vtanh.f32 %v1232_v5 }
 0x4ce   :  { %v3281_v7 = vpop.eup %3280 }
 0x4cf   :  { %1235 = vrot.lane.b32.xlu1 %v3281_v7, %s3387_s8 }
 0x532   :  { %v1146_v8 = vpop.permute.xlu0 %1145 }
 0x533   :  { %v3726_v9 = vmul.f32 %v3275_v53, %v1146_v8 }
 0x535   :  { %1155 = vrot.lane.b32.xlu0 %v3726_v9, %s3385_s26 }
 0x539   :  { %1150 = vrot.lane.b32.xlu0 %v1142_v63, %s3388_s3 }
 0x541   :  { %v1236_v10 = vpop.permute.xlu1 %1235 }
 0x542   :  { %v3731_v11 = vmul.f32 %v3277_v57, %v1236_v10 }
 0x544   :  { %1245 = vrot.lane.b32.xlu1 %v3731_v11, %s3385_s26 }
 0x548   :  { %1240 = vrot.lane.b32.xlu1 %v1232_v5, %s3388_s3 }
 0x5a7   :  { %v1156_v12 = vpop.permute.xlu0 %1155 }
 0x5a8   :  { %1158 = vst.msk [vmem:[#allocation3] sm:$0x3] %vm91_vm1, %v1156_v12 }
 0x5ab   :  { %v1151_v14 = vpop.permute.xlu0 %1150 }
 0x5ac   :  { %1153 = vst.msk [vmem:[#allocation4] sm:$0x3] %vm91_vm1, %v1151_v14 }
 0x5af   :  { %v1297_v15 = vld [vmem:[#allocation3] sm:$0x3] }
 0x5b0   :  { %v1299_v16 = vpack.c.bf16 %v1297_v15, %v1297_v15 }
 0x5b2   :  { %3139 = vmatmul.mubr.msk.bf16.vlgmr.msra.gmra.mrb[16].mxu0 %vm189_vm2, %v1299_v16 }
 0x5b3   :  { %3151 = vmatpush3.bf16.msra.mxu0 %v3627_v33  ;;  %3154 = vmatprep.mubr.msk.bf16.mxu0 %vm3384_vm0, %v3382_v1  ;;  %v1397_v35 = vld [vmem:[#allocation4] sm:$0x3] }
 0x5b4   :  { %3152 = vmatprep.subr.bf16.mxu0 %v3382_v1 }
 0x5b6   :  { %v1246_v18 = vpop.permute.xlu1 %1245 }
 0x5b7   :  { %3153 = vmatpush3.bf16.msra.mxu0 %v3638_v40  ;;  %1248 = vst.msk [vmem:[#allocation3 + $0x2] sm:$0x3] %vm91_vm1, %v1246_v18 }
 0x5b8   :  { %3166 = vmatprep.subr.bf16.mxu0 %v3382_v1 }
 0x5ba   :  { %v1241_v20 = vpop.permute.xlu1 %1240 }
 0x5bb   :  { %1243 = vst.msk [vmem:[#allocation4 + $0x2] sm:$0x3] %vm91_vm1, %v1241_v20 }
 0x5be   :  { %v1298_v21 = vld [vmem:[#allocation3 + $0x2] sm:$0x3] }
 0x5bf   :  { %v1300_v22 = vpack.c.bf16 %v1298_v21, %v1298_v21  ;;  %v1660_v21 = vld [vmem:[#allocation2 + $0x6] sm:$0x3] }
 0x5c1   :  { %3147 = vmatmul.mubr.msk.bf16.vlgmr.msra.gmra.mrb[16].mxu1 %vm189_vm2, %v1300_v22 }
 0x5c2   :  { %3159 = vmatpush3.bf16.msra.mxu1 %v3645_v42  ;;  %3162 = vmatprep.mubr.msk.bf16.mxu1 %vm3384_vm0, %v3382_v1  ;;  %v1488_v39 = vld [vmem:[#allocation4 + $0x2] sm:$0x3] }
 0x5c3   :  { %3160 = vmatprep.subr.bf16.mxu1 %v3382_v1 }
 0x5c6   :  { %3161 = vmatpush3.bf16.msra.mxu1 %v3655_v45 }
 0x5c7   :  { %3174 = vmatprep.subr.bf16.mxu1 %v3382_v1 }
 0x685   :  { %v1338_v23 = vpop.f32.mrb[16].mxu0 }
 0x686   :  { %v1389_v25 = vadd.f32 %v1388_v24, %v1338_v23  ;;  %v3140_v26 = vpop.f32.mrb[17].mxu0 }
 0x687   :  { %v1341_v27 = vpop.f32.mrb[18].mxu0 }
 0x688   :  { %3282 = vtanh.f32 %v1389_v25  ;;  %v3141_v28 = vpop.f32.mrb[19].mxu0  ;;  %v2976_v41 = vmul.f32 -1.442695, %v1389_v25 }
 0x689   :  { %v1750_v28 = vld [vmem:[#allocation2 + $0x18] sm:$0x3] }
 0x692   :  { %v3283_v29 = vpop.eup %3282 }
 0x693   :  { %1404 = vrot.lane.b32.xlu0 %v3283_v29, %s3387_s8 }
 0x694   :  { %v1381_v30 = vpop.f32.mrb[16].mxu1 }
 0x695   :  { %v1480_v32 = vadd.f32 %v1479_v31, %v1381_v30  ;;  %v3148_v34 = vpop.f32.mrb[17].mxu1 }
 0x696   :  { %v1384_v36 = vpop.f32.mrb[18].mxu1 }
 0x697   :  { %1399 = vrot.lane.b32.xlu0 %v1397_v35, %s3385_s26  ;;  %3284 = vtanh.f32 %v1480_v32  ;;  %v3149_v37 = vpop.f32.mrb[19].mxu1  ;;  %v2978_v44 = vmul.f32 -1.442695, %v1480_v32 }
 0x698   :  { %3286 = vpow2.f32 %v2976_v41 }
 0x699   :  { %3288 = vpow2.f32 %v2978_v44 }
 0x6a1   :  { %v3285_v38 = vpop.eup %3284 }
 0x6a2   :  { %1495 = vrot.lane.b32.xlu1 %v3285_v38, %s3387_s8  ;;  %v3287_v43 = vpop.eup %3286 }
 0x6a3   :  { %v1393_v46 = vadd.f32 1.0, %v3287_v43  ;;  %v3289_v47 = vpop.eup %3288 }
 0x6a4   :  { %v1484_v51 = vadd.f32 1.0, %v3289_v47 }
 0x6a5   :  { %3290 = vrcp.f32 %v1393_v46 }
 0x6a6   :  { %1490 = vrot.lane.b32.xlu1 %v1488_v39, %s3385_s26  ;;  %3292 = vrcp.f32 %v1484_v51 }
 0x6af   :  { %v3291_v48 = vpop.eup %3290 }
 0x6b0   :  { %v3293_v52 = vpop.eup %3292 }
 0x705   :  { %v1405_v49 = vpop.permute.xlu0 %1404 }
 0x706   :  { %v1407_v50 = vmul.f32 %v3291_v48, %v1405_v49 }
 0x708   :  { %1409 = vrot.lane.b32.xlu0 %v1407_v50, %s3385_s26 }
 0x709   :  { %v1400_v55 = vpop.permute.xlu0 %1399 }
 0x70a   :  { %v1402_v56 = vmul.f32 %v3291_v48, %v1400_v55 }
 0x714   :  { %v1496_v53 = vpop.permute.xlu1 %1495 }
 0x715   :  { %v1498_v54 = vmul.f32 %v3293_v52, %v1496_v53 }
 0x717   :  { %1500 = vrot.lane.b32.xlu1 %v1498_v54, %s3385_s26 }
 0x718   :  { %v1491_v59 = vpop.permute.xlu1 %1490 }
 0x719   :  { %v1493_v61 = vmul.f32 %v3293_v52, %v1491_v59 }
 0x77a   :  { %v1410_v57 = vpop.permute.xlu0 %1409 }
 0x77b   :  { %v1412_v58 = vadd.f32 %v1410_v57, %v1402_v56 }
 0x77d   :  { %3294 = vtanh.f32 %v1412_v58 }
 0x787   :  { %v3295_v60 = vpop.eup %3294 }
 0x788   :  { %1415 = vrot.lane.b32.xlu0 %v3295_v60, %s3387_s8 }
 0x789   :  { %v1501_v62 = vpop.permute.xlu1 %1500 }
 0x78a   :  { %v1503_v63 = vadd.f32 %v1501_v62, %v1493_v61 }
 0x78c   :  { %3296 = vtanh.f32 %v1503_v63 }
 0x796   :  { %v3297_v0 = vpop.eup %3296 }
 0x797   :  { %1506 = vrot.lane.b32.xlu1 %v3297_v0, %s3387_s8 }
 0x7fa   :  { %v1416_v2 = vpop.permute.xlu0 %1415 }
 0x7fb   :  { %v3762_v3 = vmul.f32 %v3291_v48, %v1416_v2 }
 0x7fd   :  { %1425 = vrot.lane.b32.xlu0 %v3762_v3, %s3385_s26 }
 0x801   :  { %1420 = vrot.lane.b32.xlu0 %v1412_v58, %s3388_s3 }
 0x809   :  { %v1507_v4 = vpop.permute.xlu1 %1506 }
 0x80a   :  { %v3767_v5 = vmul.f32 %v3293_v52, %v1507_v4 }
 0x80c   :  { %1516 = vrot.lane.b32.xlu1 %v3767_v5, %s3385_s26 }
 0x810   :  { %1511 = vrot.lane.b32.xlu1 %v1503_v63, %s3388_s3 }
 0x86f   :  { %v1426_v7 = vpop.permute.xlu0 %1425 }
 0x870   :  { %1428 = vst.msk [vmem:[#allocation3] sm:$0x3] %vm91_vm1, %v1426_v7 }
 0x873   :  { %v1421_v8 = vpop.permute.xlu0 %1420 }
 0x874   :  { %1423 = vst.msk [vmem:[#allocation4] sm:$0x3] %vm91_vm1, %v1421_v8 }
 0x877   :  { %v1569_v10 = vld [vmem:[#allocation3] sm:$0x3] }
 0x878   :  { %v1571_v12 = vpack.c.bf16 %v1569_v10, %v1569_v10 }
 0x87a   :  { %3155 = vmatmul.mubr.msk.bf16.vlgmr.msra.gmra.mrb[20].mxu0 %vm189_vm2, %v1571_v12 }
 0x87b   :  { %3167 = vmatpush3.bf16.msra.mxu0 %v3627_v33  ;;  %3170 = vmatprep.mubr.msk.bf16.mxu0 %vm3384_vm0, %v3382_v1  ;;  %v1669_v31 = vld [vmem:[#allocation4] sm:$0x3] }
 0x87c   :  { %3168 = vmatprep.subr.bf16.mxu0 %v3382_v1 }
 0x87e   :  { %v1517_v14 = vpop.permute.xlu1 %1516 }
 0x87f   :  { %3169 = vmatpush3.bf16.msra.mxu0 %v3638_v40  ;;  %1519 = vst.msk [vmem:[#allocation3 + $0x2] sm:$0x3] %vm91_vm1, %v1517_v14 }
 0x880   :  { %3182 = vmatprep.subr.bf16.mxu0 %v3382_v1 }
 0x882   :  { %v1512_v15 = vpop.permute.xlu1 %1511 }
 0x883   :  { %1514 = vst.msk [vmem:[#allocation4 + $0x2] sm:$0x3] %vm91_vm1, %v1512_v15 }
 0x886   :  { %v1570_v16 = vld [vmem:[#allocation3 + $0x2] sm:$0x3] }
 0x887   :  { %v1572_v18 = vpack.c.bf16 %v1570_v16, %v1570_v16 }
 0x889   :  { %3163 = vmatmul.mubr.msk.bf16.vlgmr.msra.gmra.mrb[20].mxu1 %vm189_vm2, %v1572_v18 }
 0x88a   :  { %3175 = vmatpush3.bf16.msra.mxu1 %v3645_v42  ;;  %3178 = vmatprep.mubr.msk.bf16.mxu1 %vm3384_vm0, %v3382_v1  ;;  %v1759_v36 = vld [vmem:[#allocation4 + $0x2] sm:$0x3] }
 0x88b   :  { %3176 = vmatprep.subr.bf16.mxu1 %v3382_v1 }
 0x88e   :  { %3177 = vmatpush3.bf16.msra.mxu1 %v3655_v45 }
 0x88f   :  { %3190 = vmatprep.subr.bf16.mxu1 %v3382_v1 }
 0x94d   :  { %v1610_v20 = vpop.f32.mrb[20].mxu0 }
 0x94e   :  { %v1661_v22 = vadd.f32 %v1660_v21, %v1610_v20  ;;  %v3156_v23 = vpop.f32.mrb[21].mxu0 }
 0x94f   :  { %v1613_v24 = vpop.f32.mrb[22].mxu0 }
 0x950   :  { %3298 = vtanh.f32 %v1661_v22  ;;  %v3157_v25 = vpop.f32.mrb[23].mxu0  ;;  %v2982_v37 = vmul.f32 -1.442695, %v1661_v22  ;;  %v2018_v24 = vld [vmem:[#allocation2 + $0x16] sm:$0x3] }
 0x95a   :  { %v3299_v26 = vpop.eup %3298 }
 0x95b   :  { %1676 = vrot.lane.b32.xlu0 %v3299_v26, %s3387_s8 }
 0x95c   :  { %v1653_v27 = vpop.f32.mrb[20].mxu1 }
 0x95d   :  { %v1751_v29 = vadd.f32 %v1750_v28, %v1653_v27  ;;  %v3164_v30 = vpop.f32.mrb[21].mxu1 }
 0x95e   :  { %v1656_v32 = vpop.f32.mrb[22].mxu1 }
 0x95f   :  { %1671 = vrot.lane.b32.xlu0 %v1669_v31, %s3385_s26  ;;  %3300 = vtanh.f32 %v1751_v29  ;;  %v3165_v34 = vpop.f32.mrb[23].mxu1  ;;  %v2984_v39 = vmul.f32 -1.442695, %v1751_v29 }
 0x960   :  { %3302 = vpow2.f32 %v2982_v37 }
 0x961   :  { %3304 = vpow2.f32 %v2984_v39 }
 0x969   :  { %v3301_v35 = vpop.eup %3300 }
 0x96a   :  { %1766 = vrot.lane.b32.xlu1 %v3301_v35, %s3387_s8  ;;  %v3303_v38 = vpop.eup %3302 }
 0x96b   :  { %v1665_v41 = vadd.f32 1.0, %v3303_v38  ;;  %v3305_v43 = vpop.eup %3304 }
 0x96c   :  { %v1755_v48 = vadd.f32 1.0, %v3305_v43 }
 0x96d   :  { %3306 = vrcp.f32 %v1665_v41 }
 0x96e   :  { %1761 = vrot.lane.b32.xlu1 %v1759_v36, %s3385_s26  ;;  %3308 = vrcp.f32 %v1755_v48 }
 0x977   :  { %v3307_v44 = vpop.eup %3306 }
 0x978   :  { %v3309_v49 = vpop.eup %3308 }
 0x9cd   :  { %v1677_v46 = vpop.permute.xlu0 %1676 }
 0x9ce   :  { %v1679_v47 = vmul.f32 %v3307_v44, %v1677_v46 }
 0x9d0   :  { %1681 = vrot.lane.b32.xlu0 %v1679_v47, %s3385_s26 }
 0x9d1   :  { %v1672_v52 = vpop.permute.xlu0 %1671 }
 0x9d2   :  { %v1674_v53 = vmul.f32 %v3307_v44, %v1672_v52 }
 0x9dc   :  { %v1767_v50 = vpop.permute.xlu1 %1766 }
 0x9dd   :  { %v1769_v51 = vmul.f32 %v3309_v49, %v1767_v50 }
 0x9df   :  { %1771 = vrot.lane.b32.xlu1 %v1769_v51, %s3385_s26 }
 0x9e0   :  { %v1762_v56 = vpop.permute.xlu1 %1761 }
 0x9e1   :  { %v1764_v58 = vmul.f32 %v3309_v49, %v1762_v56 }
 0xa42   :  { %v1682_v54 = vpop.permute.xlu0 %1681 }
 0xa43   :  { %v1684_v55 = vadd.f32 %v1682_v54, %v1674_v53 }
 0xa45   :  { %3310 = vtanh.f32 %v1684_v55 }
 0xa4f   :  { %v3311_v57 = vpop.eup %3310 }
 0xa50   :  { %1687 = vrot.lane.b32.xlu0 %v3311_v57, %s3387_s8 }
 0xa51   :  { %v1772_v59 = vpop.permute.xlu1 %1771 }
 0xa52   :  { %v1774_v60 = vadd.f32 %v1772_v59, %v1764_v58 }
 0xa54   :  { %3312 = vtanh.f32 %v1774_v60 }
 0xa5e   :  { %v3313_v61 = vpop.eup %3312 }
 0xa5f   :  { %1777 = vrot.lane.b32.xlu1 %v3313_v61, %s3387_s8 }
 0xac2   :  { %v1688_v62 = vpop.permute.xlu0 %1687 }
 0xac3   :  { %v3798_v63 = vmul.f32 %v3307_v44, %v1688_v62 }
 0xac5   :  { %1697 = vrot.lane.b32.xlu0 %v3798_v63, %s3385_s26 }
 0xac9   :  { %1692 = vrot.lane.b32.xlu0 %v1684_v55, %s3388_s3 }
 0xad1   :  { %v1778_v0 = vpop.permute.xlu1 %1777 }
 0xad2   :  { %v3803_v2 = vmul.f32 %v3309_v49, %v1778_v0 }
 0xad4   :  { %1787 = vrot.lane.b32.xlu1 %v3803_v2, %s3385_s26 }
 0xad8   :  { %1782 = vrot.lane.b32.xlu1 %v1774_v60, %s3388_s3 }
 0xb37   :  { %v1698_v4 = vpop.permute.xlu0 %1697 }
 0xb38   :  { %1700 = vst.msk [vmem:[#allocation3] sm:$0x3] %vm91_vm1, %v1698_v4 }
 0xb3b   :  { %v1693_v7 = vpop.permute.xlu0 %1692 }
 0xb3c   :  { %1695 = vst.msk [vmem:[#allocation4] sm:$0x3] %vm91_vm1, %v1693_v7  ;;  %v3850_v7 = vld [vmem:[%s4405_s9] sm:$0xff]  }
 0xb3f   :  { %v1839_v8 = vld [vmem:[#allocation3] sm:$0x3] }
 0xb40   :  { %v1841_v10 = vpack.c.bf16 %v1839_v8, %v1839_v8 }
 0xb42   :  { %3171 = vmatmul.mubr.msk.bf16.vlgmr.msra.gmra.mrb[24].mxu0 %vm189_vm2, %v1841_v10  ;;  %v3859_v10 = vld [vmem:[%s4405_s9 + $0x8] sm:$0xff]  }
 0xb43   :  { %3183 = vmatpush3.bf16.msra.mxu0 %v3627_v33  ;;  %3186 = vmatprep.mubr.msk.bf16.mxu0 %vm3384_vm0, %v3382_v1  ;;  %v1939_v27 = vld [vmem:[#allocation4] sm:$0x3] }
 0xb44   :  { %3184 = vmatprep.subr.bf16.mxu0 %v3382_v1 }
 0xb46   :  { %v1788_v12 = vpop.permute.xlu1 %1787 }
 0xb47   :  { %3185 = vmatpush3.bf16.msra.mxu0 %v3638_v40  ;;  %1790 = vst.msk [vmem:[#allocation3 + $0x2] sm:$0x3] %vm91_vm1, %v1788_v12  ;;  %v1930_v40 = vld [vmem:[#allocation2 + $0x8] sm:$0x3] }
 0xb48   :  { %3198 = vmatprep.subr.bf16.mxu0 %v3382_v1 }
 0xb4a   :  { %v1783_v14 = vpop.permute.xlu1 %1782 }
 0xb4b   :  { %1785 = vst.msk [vmem:[#allocation4 + $0x2] sm:$0x3] %vm91_vm1, %v1783_v14 }
 0xb4e   :  { %v1840_v15 = vld [vmem:[#allocation3 + $0x2] sm:$0x3] }
 0xb4f   :  { %v1842_v16 = vpack.c.bf16 %v1840_v15, %v1840_v15 }
 0xb51   :  { %3179 = vmatmul.mubr.msk.bf16.vlgmr.msra.gmra.mrb[24].mxu1 %vm189_vm2, %v1842_v16  ;;  %v3869_v16 = vld [vmem:[%s4405_s9 + $0x10] sm:$0xff]  }
 0xb52   :  { %3191 = vmatpush3.bf16.msra.mxu1 %v3645_v42  ;;  %3194 = vmatprep.mubr.msk.bf16.mxu1 %vm3384_vm0, %v3382_v1  ;;  %v2027_v30 = vld [vmem:[#allocation4 + $0x2] sm:$0x3] }
 0xb53   :  { %3192 = vmatprep.subr.bf16.mxu1 %v3382_v1 }
 0xb56   :  { %3193 = vmatpush3.bf16.msra.mxu1 %v3655_v45 }
 0xb57   :  { %3206 = vmatprep.subr.bf16.mxu1 %v3382_v1 }
 0xc15   :  { %v1880_v33 = vpop.f32.mrb[24].mxu0 }
 0xc16   :  { %v1931_v18 = vadd.f32 %v1930_v40, %v1880_v33  ;;  %v3172_v20 = vpop.f32.mrb[25].mxu0  ;;  %v3878_v33 = vld [vmem:[%s4405_s9 + $0x18] sm:$0xff]  }
 0xc17   :  { %v1883_v21 = vpop.f32.mrb[26].mxu0 }
 0xc18   :  { %3314 = vtanh.f32 %v1931_v18  ;;  %v3173_v22 = vpop.f32.mrb[27].mxu0  ;;  %v2988_v31 = vmul.f32 -1.442695, %v1931_v18  ;;  %v2196_v18 = vld [vmem:[#allocation2 + $0xa] sm:$0x3] }
 0xc22   :  { %v3315_v23 = vpop.eup %3314 }
 0xc23   :  { %1946 = vrot.lane.b32.xlu0 %v3315_v23, %s3387_s8 }
 0xc24   :  { %v1923_v42 = vpop.f32.mrb[24].mxu1 }
 0xc25   :  { %v2019_v25 = vadd.f32 %v2018_v24, %v1923_v42  ;;  %v3180_v26 = vpop.f32.mrb[25].mxu1 }
 0xc26   :  { %v1926_v28 = vpop.f32.mrb[26].mxu1 }
 0xc27   :  { %1941 = vrot.lane.b32.xlu0 %v1939_v27, %s3385_s26  ;;  %3316 = vtanh.f32 %v2019_v25  ;;  %v3181_v45 = vpop.f32.mrb[27].mxu1  ;;  %v2990_v34 = vmul.f32 -1.442695, %v2019_v25  ;;  %v2284_v25 = vld [vmem:[#allocation2 + $0x14] sm:$0x3] }
 0xc28   :  { %3318 = vpow2.f32 %v2988_v31 }
 0xc29   :  { %3320 = vpow2.f32 %v2990_v34 }
 0xc31   :  { %v3317_v29 = vpop.eup %3316 }
 0xc32   :  { %2034 = vrot.lane.b32.xlu1 %v3317_v29, %s3387_s8  ;;  %v3319_v32 = vpop.eup %3318 }
 0xc33   :  { %v1935_v35 = vadd.f32 1.0, %v3319_v32  ;;  %v3321_v36 = vpop.eup %3320 }
 0xc34   :  { %v2023_v41 = vadd.f32 1.0, %v3321_v36 }
 0xc35   :  { %3322 = vrcp.f32 %v1935_v35 }
 0xc36   :  { %2029 = vrot.lane.b32.xlu1 %v2027_v30, %s3385_s26  ;;  %3324 = vrcp.f32 %v2023_v41 }
 0xc3f   :  { %v3323_v37 = vpop.eup %3322 }
 0xc40   :  { %v3325_v43 = vpop.eup %3324 }
 0xc95   :  { %v1947_v38 = vpop.permute.xlu0 %1946 }
 0xc96   :  { %v1949_v39 = vmul.f32 %v3323_v37, %v1947_v38 }
 0xc98   :  { %1951 = vrot.lane.b32.xlu0 %v1949_v39, %s3385_s26 }
 0xc99   :  { %v1942_v47 = vpop.permute.xlu0 %1941 }
 0xc9a   :  { %v1944_v48 = vmul.f32 %v3323_v37, %v1942_v47 }
 0xca4   :  { %v2035_v44 = vpop.permute.xlu1 %2034 }
 0xca5   :  { %v2037_v46 = vmul.f32 %v3325_v43, %v2035_v44 }
 0xca7   :  { %2039 = vrot.lane.b32.xlu1 %v2037_v46, %s3385_s26 }
 0xca8   :  { %v2030_v51 = vpop.permute.xlu1 %2029 }
 0xca9   :  { %v2032_v53 = vmul.f32 %v3325_v43, %v2030_v51 }
 0xd0a   :  { %v1952_v49 = vpop.permute.xlu0 %1951 }
 0xd0b   :  { %v1954_v50 = vadd.f32 %v1952_v49, %v1944_v48 }
 0xd0d   :  { %3326 = vtanh.f32 %v1954_v50 }
 0xd17   :  { %v3327_v52 = vpop.eup %3326 }
 0xd18   :  { %1957 = vrot.lane.b32.xlu0 %v3327_v52, %s3387_s8 }
 0xd19   :  { %v2040_v54 = vpop.permute.xlu1 %2039 }
 0xd1a   :  { %v2042_v55 = vadd.f32 %v2040_v54, %v2032_v53 }
 0xd1c   :  { %3328 = vtanh.f32 %v2042_v55 }
 0xd26   :  { %v3329_v56 = vpop.eup %3328 }
 0xd27   :  { %2045 = vrot.lane.b32.xlu1 %v3329_v56, %s3387_s8 }
 0xd8a   :  { %v1958_v57 = vpop.permute.xlu0 %1957 }
 0xd8b   :  { %v3834_v58 = vmul.f32 %v3323_v37, %v1958_v57 }
 0xd8d   :  { %1967 = vrot.lane.b32.xlu0 %v3834_v58, %s3385_s26 }
 0xd91   :  { %1962 = vrot.lane.b32.xlu0 %v1954_v50, %s3388_s3 }
 0xd99   :  { %v2046_v59 = vpop.permute.xlu1 %2045 }
 0xd9a   :  { %v3839_v60 = vmul.f32 %v3325_v43, %v2046_v59 }
 0xd9c   :  { %2055 = vrot.lane.b32.xlu1 %v3839_v60, %s3385_s26 }
 0xda0   :  { %2050 = vrot.lane.b32.xlu1 %v2042_v55, %s3388_s3 }
 0xdff   :  { %v1968_v61 = vpop.permute.xlu0 %1967 }
 0xe00   :  { %1970 = vst.msk [vmem:[#allocation3] sm:$0x3] %vm91_vm1, %v1968_v61 }
 0xe03   :  { %v1963_v62 = vpop.permute.xlu0 %1962 }
 0xe04   :  { %1965 = vst.msk [vmem:[#allocation4] sm:$0x3] %vm91_vm1, %v1963_v62 }
 0xe07   :  { %v2105_v0 = vld [vmem:[#allocation3] sm:$0x3] }
 0xe08   :  { %v2107_v4 = vpack.c.bf16 %v2105_v0, %v2105_v0 }
 0xe0a   :  { %3187 = vmatmul.mubr.msk.bf16.vlgmr.msra.gmra.mrb[28].mxu0 %vm189_vm2, %v2107_v4 }
 0xe0b   :  { %3199 = vmatpush3.bf16.msra.mxu0 %v3850_v7  ;;  %3202 = vmatprep.mubr.msk.bf16.mxu0 %vm3384_vm0, %v3382_v1  ;;  %v2205_v28 = vld [vmem:[#allocation4] sm:$0x3] }
 0xe0c   :  { %3200 = vmatprep.subr.bf16.mxu0 %v3382_v1 }
 0xe0e   :  { %v2056_v8 = vpop.permute.xlu1 %2055 }
 0xe0f   :  { %3201 = vmatpush3.bf16.msra.mxu0 %v3859_v10  ;;  %2058 = vst.msk [vmem:[#allocation3 + $0x2] sm:$0x3] %vm91_vm1, %v2056_v8 }
 0xe10   :  { %3214 = vmatprep.subr.bf16.mxu0 %v3382_v1 }
 0xe12   :  { %v2051_v12 = vpop.permute.xlu1 %2050 }
 0xe13   :  { %2053 = vst.msk [vmem:[#allocation4 + $0x2] sm:$0x3] %vm91_vm1, %v2051_v12 }
 0xe16   :  { %v2106_v14 = vld [vmem:[#allocation3 + $0x2] sm:$0x3] }
 0xe17   :  { %v2108_v15 = vpack.c.bf16 %v2106_v14, %v2106_v14 }
 0xe19   :  { %3195 = vmatmul.mubr.msk.bf16.vlgmr.msra.gmra.mrb[28].mxu1 %vm189_vm2, %v2108_v15 }
 0xe1a   :  { %3207 = vmatpush3.bf16.msra.mxu1 %v3869_v16  ;;  %3210 = vmatprep.mubr.msk.bf16.mxu1 %vm3384_vm0, %v3382_v1  ;;  %v2293_v31 = vld [vmem:[#allocation4 + $0x2] sm:$0x3] }
 0xe1b   :  { %3208 = vmatprep.subr.bf16.mxu1 %v3382_v1 }
 0xe1e   :  { %3209 = vmatpush3.bf16.msra.mxu1 %v3878_v33 }
 0xe1f   :  { %3222 = vmatprep.subr.bf16.mxu1 %v3382_v1 }
 0xedd   :  { %v2146_v40 = vpop.f32.mrb[28].mxu0 }
 0xede   :  { %v2197_v20 = vadd.f32 %v2196_v18, %v2146_v40  ;;  %v3188_v21 = vpop.f32.mrb[29].mxu0 }
 0xedf   :  { %v2149_v22 = vpop.f32.mrb[30].mxu0 }
 0xee0   :  { %3330 = vtanh.f32 %v2197_v20  ;;  %v3189_v23 = vpop.f32.mrb[31].mxu0  ;;  %v2994_v32 = vmul.f32 -1.442695, %v2197_v20 }
 0xeea   :  { %v3331_v42 = vpop.eup %3330 }
 0xeeb   :  { %2212 = vrot.lane.b32.xlu0 %v3331_v42, %s3387_s8 }
 0xeec   :  { %v2189_v24 = vpop.f32.mrb[28].mxu1 }
 0xeed   :  { %v2285_v26 = vadd.f32 %v2284_v25, %v2189_v24  ;;  %v3196_v27 = vpop.f32.mrb[29].mxu1 }
 0xeee   :  { %v2192_v45 = vpop.f32.mrb[30].mxu1 }
 0xeef   :  { %2207 = vrot.lane.b32.xlu0 %v2205_v28, %s3385_s26  ;;  %3332 = vtanh.f32 %v2285_v26  ;;  %v3197_v29 = vpop.f32.mrb[31].mxu1  ;;  %v2996_v35 = vmul.f32 -1.442695, %v2285_v26  ;;  %v2550_v26 = vld [vmem:[#allocation2 + $0x12] sm:$0x3] }
 0xef0   :  { %3334 = vpow2.f32 %v2994_v32 }
 0xef1   :  { %3336 = vpow2.f32 %v2996_v35 }
 0xef9   :  { %v3333_v30 = vpop.eup %3332 }
 0xefa   :  { %2300 = vrot.lane.b32.xlu1 %v3333_v30, %s3387_s8  ;;  %v3335_v34 = vpop.eup %3334 }
 0xefb   :  { %v2201_v36 = vadd.f32 1.0, %v3335_v34  ;;  %v3337_v37 = vpop.eup %3336 }
 0xefc   :  { %v2289_v43 = vadd.f32 1.0, %v3337_v37 }
 0xefd   :  { %3338 = vrcp.f32 %v2201_v36 }
 0xefe   :  { %2295 = vrot.lane.b32.xlu1 %v2293_v31, %s3385_s26  ;;  %3340 = vrcp.f32 %v2289_v43 }
 0xf07   :  { %v3339_v38 = vpop.eup %3338 }
 0xf08   :  { %v3341_v44 = vpop.eup %3340 }
 0xf5d   :  { %v2213_v39 = vpop.permute.xlu0 %2212 }
 0xf5e   :  { %v2215_v41 = vmul.f32 %v3339_v38, %v2213_v39 }
 0xf60   :  { %2217 = vrot.lane.b32.xlu0 %v2215_v41, %s3385_s26 }
 0xf61   :  { %v2208_v48 = vpop.permute.xlu0 %2207 }
 0xf62   :  { %v2210_v49 = vmul.f32 %v3339_v38, %v2208_v48 }
 0xf6c   :  { %v2301_v46 = vpop.permute.xlu1 %2300 }
 0xf6d   :  { %v2303_v47 = vmul.f32 %v3341_v44, %v2301_v46 }
 0xf6f   :  { %2305 = vrot.lane.b32.xlu1 %v2303_v47, %s3385_s26 }
 0xf70   :  { %v2296_v52 = vpop.permute.xlu1 %2295 }
 0xf71   :  { %v2298_v54 = vmul.f32 %v3341_v44, %v2296_v52 }
 0xfd2   :  { %v2218_v50 = vpop.permute.xlu0 %2217 }
 0xfd3   :  { %v2220_v51 = vadd.f32 %v2218_v50, %v2210_v49 }
 0xfd5   :  { %3342 = vtanh.f32 %v2220_v51 }
 0xfdf   :  { %v3343_v53 = vpop.eup %3342 }
 0xfe0   :  { %2223 = vrot.lane.b32.xlu0 %v3343_v53, %s3387_s8 }
 0xfe1   :  { %v2306_v55 = vpop.permute.xlu1 %2305 }
 0xfe2   :  { %v2308_v56 = vadd.f32 %v2306_v55, %v2298_v54 }
 0xfe4   :  { %3344 = vtanh.f32 %v2308_v56 }
 0xfee   :  { %v3345_v57 = vpop.eup %3344 }
 0xfef   :  { %2311 = vrot.lane.b32.xlu1 %v3345_v57, %s3387_s8 }
0x1052   :  { %v2224_v59 = vpop.permute.xlu0 %2223 }
0x1053   :  { %v3890_v61 = vmul.f32 %v3339_v38, %v2224_v59 }
0x1055   :  { %2233 = vrot.lane.b32.xlu0 %v3890_v61, %s3385_s26 }
0x1059   :  { %2228 = vrot.lane.b32.xlu0 %v2220_v51, %s3388_s3 }
0x1061   :  { %v2312_v62 = vpop.permute.xlu1 %2311 }
0x1062   :  { %v3895_v0 = vmul.f32 %v3341_v44, %v2312_v62 }
0x1064   :  { %2321 = vrot.lane.b32.xlu1 %v3895_v0, %s3385_s26 }
0x1068   :  { %2316 = vrot.lane.b32.xlu1 %v2308_v56, %s3388_s3 }
0x10c7   :  { %v2234_v4 = vpop.permute.xlu0 %2233 }
0x10c8   :  { %2236 = vst.msk [vmem:[#allocation3] sm:$0x3] %vm91_vm1, %v2234_v4 }
0x10cb   :  { %v2229_v8 = vpop.permute.xlu0 %2228 }
0x10cc   :  { %2231 = vst.msk [vmem:[#allocation4] sm:$0x3] %vm91_vm1, %v2229_v8 }
0x10cf   :  { %v2371_v12 = vld [vmem:[#allocation3] sm:$0x3] }
0x10d0   :  { %v2373_v14 = vpack.c.bf16 %v2371_v12, %v2371_v12 }
0x10d2   :  { %3203 = vmatmul.mubr.msk.bf16.vlgmr.msra.gmra.mrb[32].mxu0 %vm189_vm2, %v2373_v14 }
0x10d3   :  { %3215 = vmatpush3.bf16.msra.mxu0 %v3850_v7  ;;  %3218 = vmatprep.mubr.msk.bf16.mxu0 %vm3384_vm0, %v3382_v1  ;;  %v2471_v28 = vld [vmem:[#allocation4] sm:$0x3] }
0x10d4   :  { %3216 = vmatprep.subr.bf16.mxu0 %v3382_v1 }
0x10d6   :  { %v2322_v15 = vpop.permute.xlu1 %2321 }
0x10d7   :  { %3217 = vmatpush3.bf16.msra.mxu0 %v3859_v10  ;;  %2324 = vst.msk [vmem:[#allocation3 + $0x2] sm:$0x3] %vm91_vm1, %v2322_v15  ;;  %v2462_v10 = vld [vmem:[#allocation2 + $0xc] sm:$0x3] }
0x10da   :  { %v2317_v40 = vpop.permute.xlu1 %2316 }
0x10db   :  { %2319 = vst.msk [vmem:[#allocation4 + $0x2] sm:$0x3] %vm91_vm1, %v2317_v40 }
0x10de   :  { %v2372_v18 = vld [vmem:[#allocation3 + $0x2] sm:$0x3] }
0x10df   :  { %v2374_v20 = vpack.c.bf16 %v2372_v18, %v2372_v18 }
0x10e1   :  { %3211 = vmatmul.mubr.msk.bf16.vlgmr.msra.gmra.mrb[32].mxu1 %vm189_vm2, %v2374_v20 }
0x10e2   :  { %3223 = vmatpush3.bf16.msra.mxu1 %v3869_v16  ;;  %3226 = vmatprep.mubr.msk.bf16.mxu1 %vm3384_vm0, %v3382_v1  ;;  %v2559_v29 = vld [vmem:[#allocation4 + $0x2] sm:$0x3]  ;;  %vm4144_vm0 = vmand %vm1560_vm12, %vm1831_vm15 }
0x10e3   :  { %3224 = vmatprep.subr.bf16.mxu1 %v3382_v1 }
0x10e6   :  { %3225 = vmatpush3.bf16.msra.mxu1 %v3878_v33 }
0x11a5   :  { %v2412_v7 = vpop.f32.mrb[32].mxu0 }
0x11a6   :  { %v2463_v21 = vadd.f32 %v2462_v10, %v2412_v7  ;;  %v3204_v22 = vpop.f32.mrb[33].mxu0  ;;  %v2728_v10 = vld [vmem:[#allocation2 + $0xe] sm:$0x3] }
0x11a7   :  { %v2415_v23 = vpop.f32.mrb[34].mxu0 }
0x11a8   :  { %3346 = vtanh.f32 %v2463_v21  ;;  %v3205_v42 = vpop.f32.mrb[35].mxu0  ;;  %v3000_v30 = vmul.f32 -1.442695, %v2463_v21 }
0x11b2   :  { %v3347_v24 = vpop.eup %3346 }
0x11b3   :  { %2478 = vrot.lane.b32.xlu0 %v3347_v24, %s3387_s8 }
0x11b4   :  { %v2455_v25 = vpop.f32.mrb[32].mxu1 }
0x11b5   :  { %v2551_v16 = vadd.f32 %v2550_v26, %v2455_v25  ;;  %v3212_v27 = vpop.f32.mrb[33].mxu1  ;;  %v2815_v26 = vld [vmem:[#allocation2 + $0x10] sm:$0x3] }
0x11b6   :  { %v2458_v45 = vpop.f32.mrb[34].mxu1 }
0x11b7   :  { %2473 = vrot.lane.b32.xlu0 %v2471_v28, %s3385_s26  ;;  %3348 = vtanh.f32 %v2551_v16  ;;  %v3213_v1 = vpop.f32.mrb[35].mxu1  ;;  %v3002_v32 = vmul.f32 -1.442695, %v2551_v16 }
0x11b8   :  { %3350 = vpow2.f32 %v3000_v30 }
0x11b9   :  { %3352 = vpow2.f32 %v3002_v32 }
0x11c1   :  { %v3349_v33 = vpop.eup %3348 }
0x11c2   :  { %2566 = vrot.lane.b32.xlu1 %v3349_v33, %s3387_s8  ;;  %v3351_v31 = vpop.eup %3350 }
0x11c3   :  { %v2467_v34 = vadd.f32 1.0, %v3351_v31  ;;  %v3353_v35 = vpop.eup %3352 }
0x11c4   :  { %v2555_v39 = vadd.f32 1.0, %v3353_v35 }
0x11c5   :  { %3354 = vrcp.f32 %v2467_v34 }
0x11c6   :  { %2561 = vrot.lane.b32.xlu1 %v2559_v29, %s3385_s26  ;;  %3356 = vrcp.f32 %v2555_v39 }
0x11cf   :  { %v3355_v36 = vpop.eup %3354 }
0x11d0   :  { %v3357_v41 = vpop.eup %3356 }
0x1225   :  { %v2479_v37 = vpop.permute.xlu0 %2478 }
0x1226   :  { %v2481_v38 = vmul.f32 %v3355_v36, %v2479_v37 }
0x1228   :  { %2483 = vrot.lane.b32.xlu0 %v2481_v38, %s3385_s26 }
0x1229   :  { %v2474_v46 = vpop.permute.xlu0 %2473 }
0x122a   :  { %v2476_v47 = vmul.f32 %v3355_v36, %v2474_v46 }
0x1234   :  { %v2567_v43 = vpop.permute.xlu1 %2566 }
0x1235   :  { %v2569_v44 = vmul.f32 %v3357_v41, %v2567_v43 }
0x1237   :  { %2571 = vrot.lane.b32.xlu1 %v2569_v44, %s3385_s26 }
0x1238   :  { %v2562_v50 = vpop.permute.xlu1 %2561 }
0x1239   :  { %v2564_v52 = vmul.f32 %v3357_v41, %v2562_v50 }
0x129a   :  { %v2484_v48 = vpop.permute.xlu0 %2483 }
0x129b   :  { %v2486_v49 = vadd.f32 %v2484_v48, %v2476_v47  ;;  %v885_v48 = vpack.c.bf16 %v3690_v17, %v3690_v17 }
0x129d   :  { %3358 = vtanh.f32 %v2486_v49 }
0x12a7   :  { %v3359_v51 = vpop.eup %3358 }
0x12a8   :  { %2489 = vrot.lane.b32.xlu0 %v3359_v51, %s3387_s8  ;;  %v893_v51 = vrot.slane %v885_v48, %v3490_v13 }
0x12a9   :  { %v2572_v53 = vpop.permute.xlu1 %2571 }
0x12aa   :  { %v2574_v54 = vadd.f32 %v2572_v53, %v2564_v52  ;;  %v978_v52 = vpack.c.bf16 %v3695_v19, %v3695_v19  ;;  %v3389_v53 = vmov 286326784  }
0x12ac   :  { %3360 = vtanh.f32 %v2574_v54 }
0x12b6   :  { %v3361_v55 = vpop.eup %3360 }
0x12b7   :  { %2577 = vrot.lane.b32.xlu1 %v3361_v55, %s3387_s8  ;;  %v900_v55 = vrot.slane %v893_v51, %v3490_v13 }
0x131a   :  { %v2490_v56 = vpop.permute.xlu0 %2489 }
0x131b   :  { %v3924_v57 = vmul.f32 %v3355_v36, %v2490_v56  ;;  %v986_v56 = vrot.slane %v978_v52, %v3490_v13 }
0x131d   :  { %2499 = vrot.lane.b32.xlu0 %v3924_v57, %s3385_s26 }
0x1321   :  { %2494 = vrot.lane.b32.xlu0 %v2486_v49, %s3388_s3 }
0x1329   :  { %v2578_v59 = vpop.permute.xlu1 %2577 }
0x132a   :  { %v3929_v62 = vmul.f32 %v3357_v41, %v2578_v59  ;;  %v1429_v59 = vpack.c.bf16 %v3762_v3, %v3762_v3 }
0x132c   :  { %2587 = vrot.lane.b32.xlu1 %v3929_v62, %s3385_s26 }
0x1330   :  { %2582 = vrot.lane.b32.xlu1 %v2574_v54, %s3388_s3  ;;  %v906_v54 = vunpack.c.l.s4 %v3389_v53 }
0x1332   :  { %v907_v17 = vunpack.c.0.s8 %v906_v54 }
0x1334   :  { %v3970_v19 = vsub.s32 %v907_v17, %v3462_v6 }
0x138f   :  { %v2500_v4 = vpop.permute.xlu0 %2499 }
0x1390   :  { %2502 = vst.msk [vmem:[#allocation3] sm:$0x3] %vm91_vm1, %v2500_v4  ;;  %v1520_v4 = vpack.c.bf16 %v3767_v5, %v3767_v5  ;;  %v1971_v5 = vpack.c.bf16 %v3834_v58, %v3834_v58 }
0x1393   :  { %v2495_v8 = vpop.permute.xlu0 %2494 }
0x1394   :  { %2497 = vst.msk [vmem:[#allocation4] sm:$0x3] %vm91_vm1, %v2495_v8  ;;  %v993_v8 = vrot.slane %v986_v56, %v3490_v13 }
0x1397   :  { %v2637_v12 = vld [vmem:[#allocation3] sm:$0x3] }
0x1398   :  { %v2639_v14 = vpack.c.bf16 %v2637_v12, %v2637_v12  ;;  %v1437_v12 = vrot.slane %v1429_v59, %v3490_v13 }
0x139a   :  { %3219 = vmatmul.mubr.msk.bf16.vlgmr.msra.gmra.mrb[36].mxu0 %vm189_vm2, %v2639_v14 }
0x139b   :  { %v2737_v28 = vld [vmem:[#allocation4] sm:$0x3] }
0x139e   :  { %v2588_v15 = vpop.permute.xlu1 %2587 }
0x139f   :  { %2590 = vst.msk [vmem:[#allocation3 + $0x2] sm:$0x3] %vm91_vm1, %v2588_v15  ;;  %v2965_v15 = vpack.i.b16 %v900_v55, %v900_v55 }
0x13a2   :  { %v2583_v40 = vpop.permute.xlu1 %2582 }
0x13a3   :  { %2585 = vst.msk [vmem:[#allocation4 + $0x2] sm:$0x3] %vm91_vm1, %v2583_v40 }
0x13a6   :  { %v2638_v18 = vld [vmem:[#allocation3 + $0x2] sm:$0x3] }
0x13a7   :  { %v2640_v20 = vpack.c.bf16 %v2638_v18, %v2638_v18  ;;  %v1528_v18 = vrot.slane %v1520_v4, %v3490_v13 }
0x13a9   :  { %3227 = vmatmul.mubr.msk.bf16.vlgmr.msra.gmra.mrb[36].mxu1 %vm189_vm2, %v2640_v20  ;;  %v1444_v20 = vrot.slane %v1437_v12, %v3490_v13  ;;  %v1535_v6 = vrot.slane %v1528_v18, %v3490_v13  ;;  %vm1741_vm2 = vsmask.f32 7942 }
0x13aa   :  { %v2824_v29 = vld [vmem:[#allocation4 + $0x2] sm:$0x3]  ;;  %vm4166_vm4 = vmand %vm1469_vm9, %vm1741_vm2 }
0x13ab   :  { %v2977_v58 = vpack.i.b16 %v1444_v20, %v1444_v20  ;;  %vm4188_vm9 = vmand %vm1018_vm6, %vm1289_vm7 }
0x13ac   :  { %vm4212_vm6 = vmand %vm925_vm3, %vm1199_vm10 }
0x146d   :  { %v2678_v7 = vpop.f32.mrb[36].mxu0 }
0x146e   :  { %v2729_v21 = vadd.f32 %v2728_v10, %v2678_v7  ;;  %v3220_v22 = vpop.f32.mrb[37].mxu0  ;;  %v911_v10 = vrot.slane %v2965_v15, %v3970_v19  ;;  %v1791_v15 = vpack.c.bf16 %v3803_v2, %v3803_v2  ;;  %v2237_v2 = vpack.c.bf16 %v3890_v61, %v3890_v61 }
0x146f   :  { %v2681_v23 = vpop.f32.mrb[38].mxu0  ;;  %v2325_v61 = vpack.c.bf16 %v3895_v0, %v3895_v0 }
0x1470   :  { %3362 = vtanh.f32 %v2729_v21  ;;  %v3221_v42 = vpop.f32.mrb[39].mxu0  ;;  %v3006_v30 = vmul.f32 -1.442695, %v2729_v21  ;;  %v2967_v21 = vpack.i.b16 %v993_v8, %v993_v8  ;;  %v1979_v23 = vrot.slane %v1971_v5, %v3490_v13 }
0x1471   :  { %v2059_v42 = vpack.c.bf16 %v3839_v60, %v3839_v60 }
0x147a   :  { %v3363_v24 = vpop.eup %3362 }
0x147b   :  { %2744 = vrot.lane.b32.xlu0 %v3363_v24, %s3387_s8  ;;  %v1004_v24 = vrot.slane %v2967_v21, %v3970_v19 }
0x147c   :  { %v2721_v25 = vpop.f32.mrb[36].mxu1 }
0x147d   :  { %v2816_v16 = vadd.f32 %v2815_v26, %v2721_v25  ;;  %v3228_v27 = vpop.f32.mrb[37].mxu1  ;;  %v2979_v25 = vpack.i.b16 %v1535_v6, %v1535_v6  ;;  %v902_v26 = vunpack.i.h.s16 %v900_v55 }
0x147e   :  { %v2724_v45 = vpop.f32.mrb[38].mxu1  ;;  %v2067_v27 = vrot.slane %v2059_v42, %v3490_v13 }
0x147f   :  { %2739 = vrot.lane.b32.xlu0 %v2737_v28, %s3385_s26  ;;  %3364 = vtanh.f32 %v2816_v16  ;;  %v3229_v1 = vpop.f32.mrb[39].mxu1  ;;  %v3008_v32 = vmul.f32 -1.442695, %v2816_v16  ;;  %v1986_v16 = vrot.slane %v1979_v23, %v3490_v13  ;;  %v2503_v28 = vpack.c.bf16 %v3924_v57, %v3924_v57 }
0x1480   :  { %3366 = vpow2.f32 %v3006_v30  ;;  %v1455_v45 = vrot.slane %v2977_v58, %v3970_v19  ;;  %v1546_v60 = vrot.slane %v2979_v25, %v3970_v19  ;;  %v904_v1 = vpack.i.b16 %v902_v26, %v902_v26 }
0x1481   :  { %3368 = vpow2.f32 %v3008_v32  ;;  %v2074_v30 = vrot.slane %v2067_v27, %v3490_v13  ;;  %v2591_v32 = vpack.c.bf16 %v3929_v62, %v3929_v62  ;;  %v1159_v57 = vpack.c.bf16 %v3726_v9, %v3726_v9 }
0x1482   :  { %v1249_v9 = vpack.c.bf16 %v3731_v11, %v3731_v11  ;;  %v1701_v11 = vpack.c.bf16 %v3798_v63, %v3798_v63  ;;  %v1988_v17 = vunpack.i.h.s16 %v1986_v16 }
0x1483   :  { %v1167_v62 = vrot.slane %v1159_v57, %v3490_v13 }
0x1484   :  { %v1257_v55 = vrot.slane %v1249_v9, %v3490_v13  ;;  %v1990_v63 = vpack.i.b16 %v1988_v17, %v1988_v17 }
0x1485   :  { %v1174_v54 = vrot.slane %v1167_v62, %v3490_v13 }
0x1486   :  { %v1264_v12 = vrot.slane %v1257_v55, %v3490_v13  ;;  %v2004_v23 = vrot.slane %v1990_v63, %v3970_v19  ;;  %v1021_v63 = vld [vmem:[%s4408_s11] sm:$0x8] }
0x1488   :  { %v2973_v21 = vpack.i.b16 %v1264_v12, %v1264_v12  ;;  %v1266_v0 = vunpack.i.h.s16 %v1264_v12 }
0x1489   :  { %v3365_v33 = vpop.eup %3364 }
0x148a   :  { %2831 = vrot.lane.b32.xlu1 %v3365_v33, %s3387_s8  ;;  %v3367_v31 = vpop.eup %3366  ;;  %v995_v33 = vunpack.i.h.s16 %v993_v8  ;;  %v1275_v26 = vrot.slane %v2973_v21, %v3970_v19  ;;  %v1472_v21 = vld [vmem:[%s4407_s10] sm:$0x2] }
0x148b   :  { %v2733_v34 = vadd.f32 1.0, %v3367_v31  ;;  %v3369_v35 = vpop.eup %3368  ;;  %v2511_v31 = vrot.slane %v2503_v28, %v3490_v13 }
0x148c   :  { %v2820_v39 = vadd.f32 1.0, %v3369_v35  ;;  %v918_v35 = vrot.slane %v904_v1, %v3970_v19 }
0x148d   :  { %3370 = vrcp.f32 %v2733_v34 }
0x148e   :  { %2826 = vrot.lane.b32.xlu1 %v2824_v29, %s3385_s26  ;;  %3372 = vrcp.f32 %v2820_v39  ;;  %v2989_v29 = vpack.i.b16 %v1986_v16, %v1986_v16  ;;  %v2991_v39 = vpack.i.b16 %v2074_v30, %v2074_v30  ;;  %v2245_v16 = vrot.slane %v2237_v2, %v3490_v13 }
0x1490   :  { %v2085_v53 = vrot.slane %v2991_v39, %v3970_v19 }
0x1497   :  { %v3944_v36 = vpop.eup %3370 }
0x1498   :  { %v3948_v41 = vpop.eup %3372 }
0x14ed   :  { %v2745_v37 = vpop.permute.xlu0 %2744 }
0x14ee   :  { %v2747_v38 = vmul.f32 %v3944_v36, %v2745_v37  ;;  %v997_v37 = vpack.i.b16 %v995_v33, %v995_v33  ;;  %v2252_v33 = vrot.slane %v2245_v16, %v3490_v13 }
0x14f0   :  { %2749 = vrot.lane.b32.xlu0 %v2747_v38, %s3385_s26  ;;  %v1446_v38 = vunpack.i.h.s16 %v1444_v20  ;;  %v2971_v20 = vpack.i.b16 %v1174_v54, %v1174_v54 }
0x14f1   :  { %v2740_v46 = vpop.permute.xlu0 %2739 }
0x14f2   :  { %v2742_v47 = vmul.f32 %v3944_v36, %v2740_v46  ;;  %v1997_v46 = vrot.slane %v2989_v29, %v3970_v19  ;;  %v1448_v48 = vpack.i.b16 %v1446_v38, %v1446_v38  ;;  %v1185_v42 = vrot.slane %v2971_v20, %v3970_v19 }
0x14f3   :  { %v2333_v29 = vrot.slane %v2325_v61, %v3490_v13 }
0x14f4   :  { %v1462_v56 = vrot.slane %v1448_v48, %v3970_v19 }
0x14f5   :  { %v2340_v57 = vrot.slane %v2333_v29, %v3490_v13 }
0x14fc   :  { %v2832_v43 = vpop.permute.xlu1 %2831 }
0x14fd   :  { %v2834_v44 = vmul.f32 %v3948_v41, %v2832_v43  ;;  %v2518_v43 = vrot.slane %v2511_v31, %v3490_v13 }
0x14ff   :  { %2836 = vrot.lane.b32.xlu1 %v2834_v44, %s3385_s26  ;;  %v2599_v44 = vrot.slane %v2591_v32, %v3490_v13  ;;  %v3001_v51 = vpack.i.b16 %v2518_v43, %v2518_v43 }
0x1500   :  { %v2827_v14 = vpop.permute.xlu1 %2826 }
0x1501   :  { %v2829_v3 = vmul.f32 %v3948_v41, %v2827_v14  ;;  %v2606_v52 = vrot.slane %v2599_v44, %v3490_v13  ;;  %v2529_v8 = vrot.slane %v3001_v51, %v3970_v19  ;;  %v1709_v14 = vrot.slane %v1701_v11, %v3490_v13 }
0x1502   :  { %v2254_v51 = vunpack.i.h.s16 %v2252_v33 }
0x1503   :  { %v3003_v4 = vpack.i.b16 %v2606_v52, %v2606_v52  ;;  %v1716_v5 = vrot.slane %v1709_v14, %v3490_v13  ;;  %v2608_v28 = vunpack.i.h.s16 %v2606_v52 }
0x1505   :  { %v1718_v39 = vunpack.i.h.s16 %v1716_v5 }
0x1507   :  { %v1720_v62 = vpack.i.b16 %v1718_v39, %v1718_v39 }
0x1509   :  { %v1734_v52 = vrot.slane %v1720_v62, %v3970_v19  ;;  %v2543_v62 = vld [vmem:[%s4407_s10] sm:$0x8] }
0x1562   :  { %v2750_v49 = vpop.permute.xlu0 %2749 }
0x1563   :  { %v3955_v50 = vadd.f32 %v2750_v49, %v2742_v47  ;;  %v1011_v47 = vrot.slane %v997_v37, %v3970_v19  ;;  %v1537_v49 = vunpack.i.h.s16 %v1535_v6  ;;  %v2520_v6 = vunpack.i.h.s16 %v2518_v43 }
0x1564   :  { %v2997_v43 = vpack.i.b16 %v2340_v57, %v2340_v57 }
0x1565   :  { %3374 = vtanh.f32 %v3955_v50  ;;  %v1539_v59 = vpack.i.b16 %v1537_v49, %v1537_v49  ;;  %v2522_v27 = vpack.i.b16 %v2520_v6, %v2520_v6 }
0x1566   :  { %v2351_v48 = vrot.slane %v2997_v43, %v3970_v19 }
0x1567   :  { %v1553_v18 = vrot.slane %v1539_v59, %v3970_v19  ;;  %v2536_v31 = vrot.slane %v2522_v27, %v3970_v19 }
0x156f   :  { %v3375_v40 = vpop.eup %3374 }
0x1570   :  { %2755 = vrot.lane.b32.xlu0 %v3375_v40, %s3387_s8  ;;  %v2076_v40 = vunpack.i.h.s16 %v2074_v30  ;;  %v2610_v30 = vpack.i.b16 %v2608_v28, %v2608_v28  ;;  %v931_v28 = vld [vmem:[%s4407_s10 + $0x4] sm:$0x1] }
0x1571   :  { %v2837_v7 = vpop.permute.xlu1 %2836 }
0x1572   :  { %v3979_v22 = vadd.f32 %v2837_v7, %v2829_v3  ;;  %v2617_v3 = vrot.slane %v3003_v4, %v3970_v19  ;;  %v1799_v7 = vrot.slane %v1791_v15, %v3490_v13 }
0x1574   :  { %919 = vrot.lane.b32.xlu0 %v911_v10, %s3385_s26  ;;  %3376 = vtanh.f32 %v3979_v22  ;;  %v2078_v10 = vpack.i.b16 %v2076_v40, %v2076_v40  ;;  %v1806_v58 = vrot.slane %v1799_v7, %v3490_v13 }
0x1576   :  { %v2092_v25 = vrot.slane %v2078_v10, %v3970_v19  ;;  %v1808_v9 = vunpack.i.h.s16 %v1806_v58 }
0x1578   :  { %1012 = vrot.lane.b32.xlu0 %v1004_v24, %s3385_s26  ;;  %v2983_v24 = vpack.i.b16 %v1716_v5, %v1716_v5  ;;  %v1810_v49 = vpack.i.b16 %v1808_v9, %v1808_v9 }
0x157a   :  { %v1727_v1 = vrot.slane %v2983_v24, %v3970_v19  ;;  %v1824_v55 = vrot.slane %v1810_v49, %v3970_v19 }
0x157c   :  { %1463 = vrot.lane.b32.xlu0 %v1455_v45, %s3385_s26  ;;  %v1176_v45 = vunpack.i.h.s16 %v1174_v54  ;;  %v2342_v54 = vunpack.i.h.s16 %v2340_v57 }
0x157e   :  { %v3377_v34 = vpop.eup %3376  ;;  %v1178_v32 = vpack.i.b16 %v1176_v45, %v1176_v45  ;;  %v2344_v11 = vpack.i.b16 %v2342_v54, %v2342_v54  ;;  %v1566_v54 = vld [vmem:[%s4408_s11 + $0x4] sm:$0x4] }
0x157f   :  { %2842 = vrot.lane.b32.xlu1 %v3377_v34, %s3387_s8  ;;  %v2995_v34 = vpack.i.b16 %v2252_v33, %v2252_v33 }
0x1580   :  { %1554 = vrot.lane.b32.xlu0 %v1546_v60, %s3385_s26  ;;  %v2985_v60 = vpack.i.b16 %v1806_v58, %v1806_v58  ;;  %v1192_v38 = vrot.slane %v1178_v32, %v3970_v19  ;;  %v2358_v59 = vrot.slane %v2344_v11, %v3970_v19 }
0x1581   :  { %v2263_v44 = vrot.slane %v2995_v34, %v3970_v19  ;;  %v2099_v34 = vld [vmem:[%s4408_s11] sm:$0x2] }
0x1582   :  { %v1817_v37 = vrot.slane %v2985_v60, %v3970_v19 }
0x1583   :  { %921 = vrot.lane.b32.xlu1 %v918_v35, %s3385_s26  ;;  %v2624_v35 = vrot.slane %v2610_v30, %v3970_v19 }
0x1584   :  { %2005 = vrot.lane.b32.xlu0 %v1997_v46, %s3385_s26  ;;  %v1268_v46 = vpack.i.b16 %v1266_v0, %v1266_v0  ;;  %v1024_v0 = vld [vmem:[%s4408_s11 + $0x4] sm:$0x8] }
0x1587   :  { %1014 = vrot.lane.b32.xlu1 %v1011_v47, %s3385_s26  ;;  %v1282_v47 = vrot.slane %v1268_v46, %v3970_v19 }
0x1588   :  { %2093 = vrot.lane.b32.xlu0 %v2085_v53, %s3385_s26  ;;  %v2256_v53 = vpack.i.b16 %v2254_v51, %v2254_v51 }
0x158b   :  { %1465 = vrot.lane.b32.xlu1 %v1462_v56, %s3385_s26  ;;  %v2270_v56 = vrot.slane %v2256_v53, %v3970_v19 }
0x158c   :  { %2537 = vrot.lane.b32.xlu0 %v2529_v8, %s3385_s26  ;;  %v928_v8 = vld [vmem:[%s4407_s10] sm:$0x1] }
0x158f   :  { %1556 = vrot.lane.b32.xlu1 %v1553_v18, %s3385_s26 }
0x1590   :  { %2625 = vrot.lane.b32.xlu0 %v2617_v3, %s3385_s26 }
0x1593   :  { %2007 = vrot.lane.b32.xlu1 %v2004_v23, %s3385_s26 }
0x1594   :  { %1193 = vrot.lane.b32.xlu0 %v1185_v42, %s3385_s26 }
0x1597   :  { %2095 = vrot.lane.b32.xlu1 %v2092_v25, %s3385_s26  ;;  %v1563_v25 = vld [vmem:[%s4408_s11] sm:$0x4] }
0x1598   :  { %1283 = vrot.lane.b32.xlu0 %v1275_v26, %s3385_s26 }
0x159b   :  { %2539 = vrot.lane.b32.xlu1 %v2536_v31, %s3385_s26 }
0x159c   :  { %1735 = vrot.lane.b32.xlu0 %v1727_v1, %s3385_s26 }
0x159f   :  { %2627 = vrot.lane.b32.xlu1 %v2624_v35, %s3385_s26 }
0x15a0   :  { %1825 = vrot.lane.b32.xlu0 %v1817_v37, %s3385_s26 }
0x15a3   :  { %1195 = vrot.lane.b32.xlu1 %v1192_v38, %s3385_s26 }
0x15a4   :  { %2271 = vrot.lane.b32.xlu0 %v2263_v44, %s3385_s26 }
0x15a7   :  { %1285 = vrot.lane.b32.xlu1 %v1282_v47, %s3385_s26 }
0x15a8   :  { %2359 = vrot.lane.b32.xlu0 %v2351_v48, %s3385_s26 }
0x15ab   :  { %1737 = vrot.lane.b32.xlu1 %v1734_v52, %s3385_s26 }
0x15ac   :  { %2760 = vrot.lane.b32.xlu0 %v3955_v50, %s3388_s3 }
0x15af   :  { %1827 = vrot.lane.b32.xlu1 %v1824_v55, %s3385_s26 }
0x15b3   :  { %2273 = vrot.lane.b32.xlu1 %v2270_v56, %s3385_s26 }
0x15b7   :  { %2361 = vrot.lane.b32.xlu1 %v2358_v59, %s3385_s26 }
0x15e2   :  { %v2756_v17 = vpop.permute.xlu0 %2755 }
0x15e3   :  { %v2758_v50 = vmul.f32 %v3944_v36, %v2756_v17 }
0x15e5   :  { %v2769_v12 = vpack.c.bf16 %v2758_v50, %v2758_v50  ;;  %2765 = vrot.lane.b32.xlu1 %v2758_v50, %s3385_s26  ;;  %v2014_v50 = vld [vmem:[%s4407_s10 + $0x4] sm:$0x4] }
0x15e6   :  { %v920_v14 = vpop.permute.xlu0 %919 }
0x15e7   :  { %v2777_v15 = vrot.slane %v2769_v12, %v3490_v13  ;;  %v929_v36 = vsel %vm4081_vm5, %v920_v14, %v928_v8 }
0x15e8   :  { %930 = vst [vmem:[%s4407_s10] sm:$0x1] %v929_v36  ;;  %v2102_v36 = vld [vmem:[%s4408_s11 + $0x4] sm:$0x2] }
0x15e9   :  { %v2784_v18 = vrot.slane %v2777_v15, %v3490_v13 }
0x15ea   :  { %v1013_v3 = vpop.permute.xlu0 %1012 }
0x15eb   :  { %v2786_v20 = vunpack.i.h.s16 %v2784_v18  ;;  %v3007_v5 = vpack.i.b16 %v2784_v18, %v2784_v18  ;;  %v1022_v7 = vsel %vm4096_vm8, %v1013_v3, %v1021_v63 }
0x15ec   :  { %1023 = vst [vmem:[%s4408_s11] sm:$0x8] %v1022_v7  ;;  %v2546_v7 = vld [vmem:[%s4407_s10 + $0x4] sm:$0x8] }
0x15ed   :  { %v2788_v2 = vpack.i.b16 %v2786_v20, %v2786_v20  ;;  %v2795_v6 = vrot.slane %v3007_v5, %v3970_v19 }
0x15ee   :  { %v1464_v23 = vpop.permute.xlu0 %1463 }
0x15ef   :  { %v1473_v42 = vsel %vm4110_vm11, %v1464_v23, %v1472_v21  ;;  %2803 = vrot.lane.b32.xlu0 %v2795_v6, %s3385_s26  ;;  %v2802_v24 = vrot.slane %v2788_v2, %v3970_v19 }
0x15f0   :  { %1474 = vst [vmem:[%s4407_s10] sm:$0x2] %v1473_v42 }
0x15f1   :  { %2805 = vrot.lane.b32.xlu1 %v2802_v24, %s3385_s26  ;;  %v2843_v26 = vpop.permute.xlu1 %2842  ;;  %v2634_v24 = vld [vmem:[%s4408_s11 + $0x4] sm:$0x1] }
0x15f2   :  { %v1555_v16 = vpop.permute.xlu0 %1554  ;;  %v2845_v61 = vmul.f32 %v3948_v41, %v2843_v26  ;;  %v2011_v41 = vld [vmem:[%s4407_s10] sm:$0x4] }
0x15f3   :  { %v1564_v27 = vsel %vm4126_vm14, %v1555_v16, %v1563_v25  ;;  %v1291_v18 = vld [vmem:[%s4408_s11] sm:$0x8] }
0x15f4   :  { %1565 = vst [vmem:[%s4408_s11] sm:$0x4] %v1564_v27  ;;  %v2856_v60 = vpack.c.bf16 %v2845_v61, %v2845_v61 }
0x15f5   :  { %v922_v1 = vpop.permute.xlu1 %921 }
0x15f6   :  { %v2006_v33 = vpop.permute.xlu0 %2005  ;;  %v2864_v29 = vrot.slane %v2856_v60, %v3490_v13  ;;  %v932_v30 = vsel %vm4081_vm5, %v922_v1, %v931_v28 }
0x15f7   :  { %v2012_v31 = vsel %vm4144_vm0, %v2006_v33, %v2011_v41  ;;  %933 = vst [vmem:[%s4407_s10 + $0x4] sm:$0x1] %v932_v30  ;;  %v1743_v2 = vld [vmem:[%s4407_s10] sm:$0x2] }
0x15f8   :  { %2013 = vst [vmem:[%s4407_s10] sm:$0x4] %v2012_v31  ;;  %v2871_v57 = vrot.slane %v2864_v29, %v3490_v13  ;;  %v1475_v13 = vld [vmem:[%s4407_s10 + $0x4] sm:$0x2] }
0x15f9   :  { %v1015_v35 = vpop.permute.xlu1 %1014 }
0x15fa   :  { %v2094_v37 = vpop.permute.xlu0 %2093  ;;  %v2873_v38 = vunpack.i.h.s16 %v2871_v57  ;;  %v3009_v39 = vpack.i.b16 %v2871_v57, %v2871_v57  ;;  %v1025_v43 = vsel %vm4096_vm8, %v1015_v35, %v1024_v0 }
0x15fb   :  { %v2100_v44 = vsel %vm4166_vm4, %v2094_v37, %v2099_v34  ;;  %1026 = vst [vmem:[%s4408_s11 + $0x4] sm:$0x8] %v1025_v43  ;;  %v1833_v26 = vld [vmem:[%s4408_s11] sm:$0x4] }
0x15fc   :  { %2101 = vst [vmem:[%s4408_s11] sm:$0x2] %v2100_v44  ;;  %v2875_v9 = vpack.i.b16 %v2873_v38, %v2873_v38  ;;  %v2882_v47 = vrot.slane %v3009_v39, %v3970_v19 }
0x15fd   :  { %v1466_v48 = vpop.permute.xlu1 %1465 }
0x15fe   :  { %v2538_v49 = vpop.permute.xlu0 %2537  ;;  %v1476_v51 = vsel %vm4110_vm11, %v1466_v48, %v1475_v13  ;;  %2890 = vrot.lane.b32.xlu0 %v2882_v47, %s3385_s26  ;;  %v2889_v52 = vrot.slane %v2875_v9, %v3970_v19  ;;  %v2631_v19 = vld [vmem:[%s4408_s11] sm:$0x1]  ;;  %v1204_v28 = vld [vmem:[%s4407_s10 + $0x4] sm:$0x1] }
0x15ff   :  { %v2544_v53 = vsel %vm4188_vm9, %v2538_v49, %v2543_v62  ;;  %1477 = vst [vmem:[%s4407_s10 + $0x4] sm:$0x2] %v1476_v51  ;;  %v2277_v60 = vld [vmem:[%s4407_s10] sm:$0x4] }
0x1600   :  { %2545 = vst [vmem:[%s4407_s10] sm:$0x8] %v2544_v53  ;;  %2892 = vrot.lane.b32.xlu1 %v2889_v52, %s3385_s26 }
0x1601   :  { %v1557_v11 = vpop.permute.xlu1 %1556 }
0x1602   :  { %v2626_v56 = vpop.permute.xlu0 %2625  ;;  %v1567_v59 = vsel %vm4126_vm14, %v1557_v11, %v1566_v54  ;;  %2847 = vrot.lane.b32.xlu0 %v3979_v22, %s3388_s3  ;;  %v1201_v22 = vld [vmem:[%s4407_s10] sm:$0x1]  ;;  %v1294_v30 = vld [vmem:[%s4408_s11 + $0x4] sm:$0x8] }
0x1603   :  { %v2632_v17 = vsel %vm4212_vm6, %v2626_v56, %v2631_v19  ;;  %1568 = vst [vmem:[%s4408_s11 + $0x4] sm:$0x4] %v1567_v59  ;;  %v2365_v0 = vld [vmem:[%s4408_s11] sm:$0x2] }
0x1604   :  { %2633 = vst [vmem:[%s4408_s11] sm:$0x1] %v2632_v17  ;;  %2852 = vrot.lane.b32.xlu1 %v2845_v61, %s3385_s26 }
0x1605   :  { %v2008_v8 = vpop.permute.xlu1 %2007 }
0x1606   :  { %v1194_v12 = vpop.permute.xlu0 %1193  ;;  %v2015_v14 = vsel %vm4144_vm0, %v2008_v8, %v2014_v50  ;;  %v1746_v37 = vld [vmem:[%s4407_s10 + $0x4] sm:$0x2] }
0x1607   :  { %v1202_v15 = vsel %vm4212_vm6, %v1194_v12, %v1201_v22  ;;  %2016 = vst [vmem:[%s4407_s10 + $0x4] sm:$0x4] %v2015_v14  ;;  %v2809_v58 = vld [vmem:[%s4407_s10] sm:$0x8] }
0x1608   :  { %1203 = vst [vmem:[%s4407_s10] sm:$0x1] %v1202_v15 }
0x1609   :  { %v2096_v63 = vpop.permute.xlu1 %2095 }
0x160a   :  { %v1284_v3 = vpop.permute.xlu0 %1283  ;;  %v2103_v20 = vsel %vm4166_vm4, %v2096_v63, %v2102_v36  ;;  %v1836_v44 = vld [vmem:[%s4408_s11 + $0x4] sm:$0x4] }
0x160b   :  { %v1292_v5 = vsel %vm4188_vm9, %v1284_v3, %v1291_v18  ;;  %2104 = vst [vmem:[%s4408_s11 + $0x4] sm:$0x2] %v2103_v20  ;;  %v2896_v55 = vld [vmem:[%s4408_s11] sm:$0x1] }
0x160c   :  { %1293 = vst [vmem:[%s4408_s11] sm:$0x8] %v1292_v5 }
0x160d   :  { %v2540_v21 = vpop.permute.xlu1 %2539 }
0x160e   :  { %v1736_v6 = vpop.permute.xlu0 %1735  ;;  %v2547_v23 = vsel %vm4188_vm9, %v2540_v21, %v2546_v7  ;;  %v2280_v32 = vld [vmem:[%s4407_s10 + $0x4] sm:$0x4] }
0x160f   :  { %v1744_v42 = vsel %vm4166_vm4, %v1736_v6, %v1743_v2  ;;  %2548 = vst [vmem:[%s4407_s10 + $0x4] sm:$0x8] %v2547_v23 }
0x1610   :  { %1745 = vst [vmem:[%s4407_s10] sm:$0x2] %v1744_v42 }
0x1611   :  { %v2628_v25 = vpop.permute.xlu1 %2627 }
0x1612   :  { %v1826_v16 = vpop.permute.xlu0 %1825  ;;  %v2635_v61 = vsel %vm4212_vm6, %v2628_v25, %v2634_v24  ;;  %v2368_v45 = vld [vmem:[%s4408_s11 + $0x4] sm:$0x2] }
0x1613   :  { %v1834_v27 = vsel %vm4144_vm0, %v1826_v16, %v1833_v26  ;;  %2636 = vst [vmem:[%s4408_s11 + $0x4] sm:$0x1] %v2635_v61 }
0x1614   :  { %1835 = vst [vmem:[%s4408_s11] sm:$0x4] %v1834_v27 }
0x1615   :  { %v1196_v41 = vpop.permute.xlu1 %1195 }
0x1616   :  { %v2272_v1 = vpop.permute.xlu0 %2271  ;;  %v1205_v33 = vsel %vm4212_vm6, %v1196_v41, %v1204_v28  ;;  %v2812_v10 = vld [vmem:[%s4407_s10 + $0x4] sm:$0x8] }
0x1617   :  { %v2278_v29 = vsel %vm4126_vm14, %v2272_v1, %v2277_v60  ;;  %1206 = vst [vmem:[%s4407_s10 + $0x4] sm:$0x1] %v1205_v33 }
0x1618   :  { %2279 = vst [vmem:[%s4407_s10] sm:$0x4] %v2278_v29 }
0x1619   :  { %v1286_v31 = vpop.permute.xlu1 %1285 }
0x161a   :  { %v2360_v34 = vpop.permute.xlu0 %2359  ;;  %v1295_v57 = vsel %vm4188_vm9, %v1286_v31, %v1294_v30  ;;  %v2899_v40 = vld [vmem:[%s4408_s11 + $0x4] sm:$0x1] }
0x161b   :  { %v2366_v35 = vsel %vm4110_vm11, %v2360_v34, %v2365_v0  ;;  %1296 = vst [vmem:[%s4408_s11 + $0x4] sm:$0x8] %v1295_v57 }
0x161c   :  { %2367 = vst [vmem:[%s4408_s11] sm:$0x2] %v2366_v35 }
0x161d   :  { %v1738_v38 = vpop.permute.xlu1 %1737 }
0x161e   :  { %v2761_v39 = vpop.permute.xlu0 %2760  ;;  %v1747_v43 = vsel %vm4166_vm4, %v1738_v38, %v1746_v37 }
0x161f   :  { %2763 = vst.msk [vmem:[#allocation4] sm:$0x3] %vm91_vm1, %v2761_v39  ;;  %1748 = vst [vmem:[%s4407_s10 + $0x4] sm:$0x2] %v1747_v43 }
0x1621   :  { %v1828_v13 = vpop.permute.xlu1 %1827 }
0x1622   :  { %v1837_v46 = vsel %vm4144_vm0, %v1828_v13, %v1836_v44 }
0x1623   :  { %1838 = vst [vmem:[%s4408_s11 + $0x4] sm:$0x4] %v1837_v46 }
0x1625   :  { %v2274_v62 = vpop.permute.xlu1 %2273 }
0x1626   :  { %v2281_v9 = vsel %vm4126_vm14, %v2274_v62, %v2280_v32 }
0x1627   :  { %2282 = vst [vmem:[%s4407_s10 + $0x4] sm:$0x4] %v2281_v9 }
0x1629   :  { %v2362_v47 = vpop.permute.xlu1 %2361 }
0x162a   :  { %v2369_v48 = vsel %vm4110_vm11, %v2362_v47, %v2368_v45 }
0x162b   :  { %2370 = vst [vmem:[%s4408_s11 + $0x4] sm:$0x2] %v2369_v48 }
0x1657   :  { %v2766_v49 = vpop.permute.xlu1 %2765 }
0x1658   :  { %2768 = vst.msk [vmem:[#allocation3] sm:$0x3] %vm91_vm1, %v2766_v49 }
0x1661   :  { %v2804_v51 = vpop.permute.xlu0 %2803 }
0x1662   :  { %v2810_v52 = vsel %vm4096_vm8, %v2804_v51, %v2809_v58 }
0x1663   :  { %2811 = vst [vmem:[%s4407_s10] sm:$0x8] %v2810_v52  ;;  %v2806_v53 = vpop.permute.xlu1 %2805 }
0x1664   :  { %v2813_v54 = vsel %vm4096_vm8, %v2806_v53, %v2812_v10 }
0x1665   :  { %2814 = vst [vmem:[%s4407_s10 + $0x4] sm:$0x8] %v2813_v54 }
0x1670   :  { %v2891_v19 = vpop.permute.xlu0 %2890 }
0x1671   :  { %v2897_v11 = vsel %vm4081_vm5, %v2891_v19, %v2896_v55 }
0x1672   :  { %2898 = vst [vmem:[%s4408_s11] sm:$0x1] %v2897_v11  ;;  %v2893_v56 = vpop.permute.xlu1 %2892 }
0x1673   :  { %v2900_v59 = vsel %vm4081_vm5, %v2893_v56, %v2899_v40 }
0x1674   :  { %2901 = vst [vmem:[%s4408_s11 + $0x4] sm:$0x1] %v2900_v59  ;;  %v2848_v17 = vpop.permute.xlu0 %2847 }
0x1675   :  { %2850 = vst.msk [vmem:[#allocation4 + $0x2] sm:$0x3] %vm91_vm1, %v2848_v17 }
0x1676   :  { %v2853_v50 = vpop.permute.xlu1 %2852 }
0x1677   :  { %2855 = vst.msk [vmem:[#allocation3 + $0x2] sm:$0x3] %vm91_vm1, %v2853_v50 }

</bundles_post_ra>
